<compile_context>
chip_gen: v6e
topology: v6e:2x2x1
jax: 0.10.0
libtpu: 0.0.40
codegen_flags: <defaults>
</compile_context>

<pallas_src>
import math
import functools
import numpy as np
import jax
import jax.numpy as jnp
from jax.experimental import pallas as pl
from jax.experimental.pallas import tpu as pltpu


# --------------------------------------------------------------------------
# Config (consistent with Transformer_multitasks.__init__)
# --------------------------------------------------------------------------
class Cfg:
    gpu = 0
    cap_len = 8          # maxlen
    beam_size = 3
    dec_in = 50          # vocab size
    e_model = 32
    d_model = 32
    n_heads = 4
    d_ff = 64
    e_layers = 1
    d_layers = 1
    dropout = 0.1        # eval mode -> identity
    brain_roi = 14
    enc_in = 8
    supercategories = 5
    labels = 10


SCALE_RANGES = ([0, 3, 4], [1, 5, 6, 7, 8, 9], [2] + list(range(10, 24)))
INTER_RANGE = [0, 1, 2]
NEG = -1e30   # stand-in for float('-inf'); keeps masked softmax finite


# --------------------------------------------------------------------------
# Row packer: concatenates many small param / constant matrices into one
# lane-aligned 2-D slab, recording (row_offset, rows, cols) per entry.
# --------------------------------------------------------------------------
class _RowPacker:
    def __init__(self, width):
        self.width = width
        self.chunks = []
        self.layout = {}
        self.n = 0

    def add(self, name, arr):
        arr = np.asarray(arr, np.float32)
        if arr.ndim == 1:
            arr = arr[None, :]
        r, c = arr.shape
        assert c <= self.width, (name, c, self.width)
        pad = (-self.n) % 8
        if pad:
            self.chunks.append(np.zeros((pad, self.width), np.float32))
            self.n += pad
        buf = np.zeros((r, self.width), np.float32)
        buf[:, :c] = arr
        self.layout[name] = (self.n, r, c)
        self.chunks.append(buf)
        self.n += r

    def finish(self):
        pad = (-self.n) % 8
        if pad:
            self.chunks.append(np.zeros((pad, self.width), np.float32))
            self.n += pad
        return np.concatenate(self.chunks, axis=0), self.layout


def _pe(max_len, dim):
    pos = np.arange(max_len, dtype=np.float32)[:, None]
    div = np.exp(np.arange(0, dim, 2, dtype=np.float32) * (-math.log(10000.0) / dim))
    pe = np.zeros((max_len, dim), np.float32)
    pe[:, 0::2] = np.sin(pos * div)
    pe[:, 1::2] = np.cos(pos * div)
    return pe


def _group_feat_sizes(cfg):
    group_in = [cfg.enc_in * 5, cfg.enc_in * 9, cfg.enc_in * 7, cfg.enc_in * 2,
                cfg.enc_in * 2, cfg.enc_in, cfg.enc_in * 2]
    return group_in + [cfg.enc_in] * cfg.brain_roi          # 21 segments


# --------------------------------------------------------------------------
# The fused kernel: fMRI embed -> encoder -> heads -> decoder -> vocab logits
# --------------------------------------------------------------------------
def _fused_kernel(xf_ref, toks_ref, sab_ref, segm_ref, cst_ref, p32_ref, pw_ref,
                  hout_ref, logits_ref, *, lay, dims):
    (B, S, E, H, T, V, F, e_layers, d_layers) = dims
    n_groups = len(SCALE_RANGES)
    NBS = B * S
    NBT = B * T
    Dh = E // H
    scale = 1.0 / math.sqrt(Dh)
    f32 = jnp.float32

    def dot(a, b):
        return jnp.dot(a, b, preferred_element_type=f32)

    def dot_nt(a, b):     # contract last dim of both (q @ k^T without transpose)
        return jax.lax.dot_general(a, b, (((1,), (1,)), ((), ())),
                                   preferred_element_type=f32)

    def c(name):
        o, r, w_ = lay["cst"][name]
        return cst_ref[o:o + r, 0:w_]

    def p(name):
        o, r, w_ = lay["p32"][name]
        return p32_ref[o:o + r, 0:w_]

    def w(name):
        o, r, w_ = lay["pw"][name]
        return pw_ref[o:o + r, 0:w_]

    def ln(v, g, b):
        mu = jnp.mean(v, axis=-1, keepdims=True)
        var = jnp.mean(jnp.square(v - mu), axis=-1, keepdims=True)
        return (v - mu) * jax.lax.rsqrt(var + 1e-5) * g + b

    def softmax(s):
        s = s - jnp.max(s, axis=-1, keepdims=True)
        e = jnp.exp(s)
        return e / jnp.sum(e, axis=-1, keepdims=True)    # exact division

    def mha(xq, wq, bq, wk, bk, wv, bv, wo, bo, bias, hmask):
        q = dot(xq, wq) + bq
        k = dot(xq, wk) + bk
        v = dot(xq, wv) + bv
        o = jnp.zeros_like(q)
        for h in range(H):
            hm = hmask[h:h + 1, :]
            pr = softmax(dot_nt(q * hm, k) * scale + bias)
            o = o + dot(pr, v * hm)
        return dot(o, wo) + bo

    # =============== Stage 1: fMRI + mt embeddings -> encoder input ===============
    xf = xf_ref[...]                                          # (B, 336)
    xexp = dot(c("r2b"), xf) * segm_ref[...]                  # (NBS, 336)
    fmri = dot(xexp, p("fmri_w")) + p("fmri_brow")            # (NBS, E)
    emb = ln(fmri, p("fmri_g48"), p("fmri_b48"))              # zero on mt rows

    embed_tab = p("embed")                                    # (V, E)
    vlane48 = jax.lax.broadcasted_iota(jnp.int32, (NBS, V), 1).astype(f32)
    mt_emb = dot((vlane48 == toks_ref[0:NBS, 0:1]).astype(f32), embed_tab)

    x = (emb + mt_emb) * (2.0 * math.sqrt(E)) + p("a_row") * p("pe_enc")

    # =============== Stage 2: encoder layers ===============
    hm96 = c("hm96")
    hm32 = c("hm32")
    rowlane = c("rowlane")
    intersel = c("intersel")
    for l in range(e_layers):
        pre = f"e{l}_"
        # intra-scale attention: projections shared across the 3 groups
        q96 = dot(x, w(pre + "wq_cat")) + w(pre + "bq_cat")
        k96 = dot(x, w(pre + "wk_cat")) + w(pre + "bk_cat")
        v96 = dot(x, w(pre + "wv_cat")) + w(pre + "bv_cat")
        o96 = jnp.zeros((NBS, n_groups * E), f32)
        for g in range(n_groups):
            bias_g = c(f"bias_g{g}")
            for h in range(H):
                i = g * H + h
                hm = hm96[i:i + 1, :]
                pr = softmax(dot_nt(q96 * hm, k96) * scale + bias_g)
                o96 = o96 + dot(pr, v96 * hm)
        z = dot(o96 * rowlane, p(pre + "wo_stack")) + p(pre + "bo_rows")

        # inter-scale attention over the (already updated) rows 0..2 per batch
        oi = mha(z, p(pre + "iwq"), p(pre + "ibq"), p(pre + "iwk"), p(pre + "ibk"),
                 p(pre + "iwv"), p(pre + "ibv"), p(pre + "iwo"), p(pre + "ibo"),
                 c("bias_inter"), hm32)
        z = intersel * oi + (1.0 - intersel) * z

        # PyTorch MultiScaleAttention mutates its input in place, so
        # `x + attn_output` equals 2 * attn_output (eval mode).
        h1 = ln(2.0 * z, p(pre + "ln1g"), p(pre + "ln1b"))
        hid = jnp.maximum(dot(h1, w(pre + "fw1")) + w(pre + "fb1"), 0.0)
        ff = dot(hid, p(pre + "fw2")) + p(pre + "fb2")
        x = ln(h1 + ff, p(pre + "ln2g"), p(pre + "ln2b"))

    # =============== Stage 3: token pooling + fused Cate/Name heads ===============
    token = dot(c("tokenM"), x)                               # (B, E)
    hh = jnp.maximum(dot(token, w("head_w1")) + w("head_b1"), 0.0)
    hout_ref[...] = dot(hh, p("head_w2")) + p("head_b2")      # (B, E) lane-padded

    # =============== Stage 4: decoder layers + vocabulary logits ===============
    vlane16 = jax.lax.broadcasted_iota(jnp.int32, (NBT, V), 1).astype(f32)
    dec = dot((vlane16 == toks_ref[NBS:NBS + NBT, 0:1]).astype(f32), embed_tab)
    y = dec * math.sqrt(E) + p("b_row") * p("pe_dec")
    sab = sab_ref[...]
    for l in range(d_layers):
        pre = f"d{l}_"
        sa = mha(y, p(pre + "wq"), p(pre + "bq"), p(pre + "wk"), p(pre + "bk"),
                 p(pre + "wv"), p(pre + "bv"), p(pre + "wo"), p(pre + "bo"),
                 sab, hm32)
        y1 = ln(y + sa, p(pre + "ln1g"), p(pre + "ln1b"))
        # Lk = 1 cross-attention: softmax over a single key == 1, so the result
        # collapses to out_proj(v_proj(memory)) broadcast over T per batch.
        cab = dot(dot(token, p(pre + "cwv")) + p(pre + "cbv"),
                  p(pre + "cwo")) + p(pre + "cbo")            # (B, E)
        y2 = ln(y1 + dot(c("bsel"), cab), p(pre + "ln2g"), p(pre + "ln2b"))
        hid = jnp.maximum(dot(y2, w(pre + "fw1")) + w(pre + "fb1"), 0.0)
        ff = dot(hid, p(pre + "fw2")) + p(pre + "fb2")
        y = ln(y2 + ff, p(pre + "ln3g"), p(pre + "ln3b"))

    logits_ref[...] = dot(y, w("smw")) + w("smb")


def _fspec(shape):
    zeros = (0,) * len(shape)
    return pl.BlockSpec(tuple(shape), lambda i, z=zeros: z)


def cogformer_forward_call(xf, toks, bias_sa, consts, params, *, cfg, layout, batch):
    B = batch
    S = 3 + 7 + cfg.brain_roi
    T = cfg.cap_len
    E = cfg.e_model
    NBT = B * T
    dims = (B, S, E, cfg.n_heads, T, cfg.dec_in, cfg.d_ff, cfg.e_layers, cfg.d_layers)
    kernel = functools.partial(_fused_kernel, lay=layout, dims=dims)
    ops = (xf, toks, bias_sa, consts["segmask"], consts["cst"],
           params["p32"], params["pw"])
    cost = pl.CostEstimate(
        flops=int(2.0e7),
        transcendentals=int(5.0e4),
        bytes_accessed=int(sum(a.size for a in ops) * 4 + (B * E + NBT * cfg.dec_in) * 4))
    return pl.pallas_call(
        kernel,
        out_shape=(jax.ShapeDtypeStruct((B, E), jnp.float32),
                   jax.ShapeDtypeStruct((NBT, cfg.dec_in), jnp.float32)),
        grid=(1,),
        in_specs=[_fspec(op.shape) for op in ops],
        out_specs=(_fspec((B, E)), _fspec((NBT, cfg.dec_in))),
        compiler_params=pltpu.CompilerParams(dimension_semantics=("arbitrary",)),
        cost_estimate=cost,
    )(*ops)


# --------------------------------------------------------------------------
# Trace-time constants (masks / selection matrices) — pure numpy, packed
# --------------------------------------------------------------------------
def build_consts(cfg, B):
    E, H = cfg.e_model, cfg.n_heads
    S = 3 + 7 + cfg.brain_roi
    T = cfg.cap_len
    n_groups = len(SCALE_RANGES)
    NBS, NBT = B * S, B * T
    Dh = E // H

    gid = np.full(S, -1, np.int64)
    for gi, idx in enumerate(SCALE_RANGES):
        gid[np.array(idx)] = gi

    row_b = np.repeat(np.arange(B), S)
    row_p = np.tile(np.arange(S), B)
    same_b = row_b[:, None] == row_b[None, :]

    cst = _RowPacker(128)
    for g in range(n_groups):
        ing = gid[row_p] == g
        allowed = same_b & ing[:, None] & ing[None, :]
        cst.add(f"bias_g{g}", np.where(allowed, 0.0, NEG).astype(np.float32))
    inter = np.isin(row_p, np.array(INTER_RANGE))
    cst.add("bias_inter",
            np.where(same_b & inter[:, None] & inter[None, :], 0.0, NEG).astype(np.float32))

    hm96 = np.zeros((n_groups * H, n_groups * E), np.float32)
    for g in range(n_groups):
        for h in range(H):
            hm96[g * H + h, g * E + h * Dh: g * E + (h + 1) * Dh] = 1.0
    cst.add("hm96", hm96)
    hm32 = np.zeros((H, E), np.float32)
    for h in range(H):
        hm32[h, h * Dh:(h + 1) * Dh] = 1.0
    cst.add("hm32", hm32)

    rowlane = np.zeros((NBS, n_groups * E), np.float32)
    for r in range(NBS):
        g = gid[row_p[r]]
        rowlane[r, g * E:(g + 1) * E] = 1.0
    cst.add("rowlane", rowlane)

    r2b = np.zeros((NBS, B), np.float32)
    r2b[np.arange(NBS), row_b] = 1.0
    cst.add("r2b", r2b)

    cst.add("intersel", inter.astype(np.float32)[:, None])

    tokenM = np.zeros((B, NBS), np.float32)
    for b in range(B):
        tokenM[b, b * S: b * S + 3] = 1.0 / 3.0
    cst.add("tokenM", tokenM)

    bsel = np.zeros((NBT, B), np.float32)
    bsel[np.arange(NBT), np.repeat(np.arange(B), T)] = 1.0
    cst.add("bsel", bsel)

    cst_arr, cst_lay = cst.finish()

    # fMRI segment mask: which flattened grouped-feature columns feed each row
    seg_in = _group_feat_sizes(cfg)
    Din = int(sum(seg_in))
    offs = np.cumsum([0] + seg_in)
    segmask = np.zeros((NBS, Din), np.float32)
    for r in range(NBS):
        pos = row_p[r]
        if pos >= 3:
            s = pos - 3
            segmask[r, offs[s]:offs[s + 1]] = 1.0

    consts = dict(cst=jnp.asarray(cst_arr), segmask=jnp.asarray(segmask))
    return consts, dict(cst=cst_lay)


# --------------------------------------------------------------------------
# Parameter construction (packed into two lane-aligned slabs)
# --------------------------------------------------------------------------
def make_params(cfg, key, batch):
    ks = iter(jax.random.split(key, 512))

    def nk():
        return next(ks)

    def lin(fi, fo):
        bound = 1.0 / math.sqrt(fi)
        w_ = np.asarray(jax.random.uniform(nk(), (fi, fo), jnp.float32, -bound, bound))
        b_ = np.asarray(jax.random.uniform(nk(), (fo,), jnp.float32, -bound, bound))
        return w_, b_

    E, F = cfg.e_model, cfg.d_ff
    B = batch
    S = 3 + 7 + cfg.brain_roi
    n_groups = len(SCALE_RANGES)
    gid = np.full(S, -1, np.int64)
    for gi, idx in enumerate(SCALE_RANGES):
        gid[np.array(idx)] = gi

    p32 = _RowPacker(E)       # width 32 slab
    pw = _RowPacker(128)      # width 128 slab

    # ---- fMRI embedding: 7 group linears + 14 ROI linears stacked row-wise ----
    seg_in = _group_feat_sizes(cfg)
    n_seg = len(seg_in)
    Din = int(sum(seg_in))
    Wf = np.zeros((Din, E), np.float32)
    seg_bias = np.zeros((n_seg, E), np.float32)
    off = 0
    for si, fi in enumerate(seg_in):
        w_, b_ = lin(fi, E)
        Wf[off:off + fi, :] = w_
        seg_bias[si] = b_
        off += fi
    p32.add("fmri_w", Wf)

    brow = np.zeros((B * S, E), np.float32)
    g48 = np.zeros((B * S, E), np.float32)
    b48 = np.zeros((B * S, E), np.float32)
    ln_g = np.ones((E,), np.float32)     # FMRIEmbedding LayerNorm defaults
    ln_b = np.zeros((E,), np.float32)
    for r in range(B * S):
        pos = r % S
        if pos >= 3:
            brow[r] = seg_bias[pos - 3]
            g48[r] = ln_g
            b48[r] = ln_b
    p32.add("fmri_brow", brow)
    p32.add("fmri_g48", g48)
    p32.add("fmri_b48", b48)

    # positional encodings (constants) and the scalar params a_fmri / b (zeros)
    p32.add("pe_enc", np.tile(_pe(S, E), (B, 1)))
    p32.add("pe_dec", np.tile(_pe(cfg.cap_len, E)[:cfg.cap_len], (B, 1)))
    p32.add("a_row", np.zeros((1, E), np.float32))   # nn.Parameter(torch.zeros(1))
    p32.add("b_row", np.zeros((1, E), np.float32))   # nn.Parameter(torch.zeros(1))
    p32.add("embed", np.asarray(jax.random.normal(nk(), (cfg.dec_in, E), jnp.float32)))

    # ---- encoder layers ----
    for l in range(cfg.e_layers):
        pre = f"e{l}_"
        wq_cat = np.zeros((E, n_groups * E), np.float32)
        wk_cat = np.zeros((E, n_groups * E), np.float32)
        wv_cat = np.zeros((E, n_groups * E), np.float32)
        bq_cat = np.zeros((1, n_groups * E), np.float32)
        bk_cat = np.zeros((1, n_groups * E), np.float32)
        bv_cat = np.zeros((1, n_groups * E), np.float32)
        wo_stack = np.zeros((n_groups * E, E), np.float32)
        bo_g = np.zeros((n_groups, E), np.float32)
        for g in range(n_groups):
            wq, bq = lin(E, E)
            wk, bk = lin(E, E)
            wv, bv = lin(E, E)
            wo, bo = lin(E, E)
            sl = slice(g * E, (g + 1) * E)
            wq_cat[:, sl] = wq
            wk_cat[:, sl] = wk
            wv_cat[:, sl] = wv
            bq_cat[0, sl] = bq
            bk_cat[0, sl] = bk
            bv_cat[0, sl] = bv
            wo_stack[sl, :] = wo
            bo_g[g] = bo
        pw.add(pre + "wq_cat", wq_cat)
        pw.add(pre + "bq_cat", bq_cat)
        pw.add(pre + "wk_cat", wk_cat)
        pw.add(pre + "bk_cat", bk_cat)
        pw.add(pre + "wv_cat", wv_cat)
        pw.add(pre + "bv_cat", bv_cat)
        p32.add(pre + "wo_stack", wo_stack)
        bo_rows = np.zeros((B * S, E), np.float32)
        for r in range(B * S):
            bo_rows[r] = bo_g[gid[r % S]]
        p32.add(pre + "bo_rows", bo_rows)
        # inter-scale attention (the 4th nn.MultiheadAttention)
        for nm in ("iwq", "iwk", "iwv", "iwo"):
            w_, b_ = lin(E, E)
            p32.add(pre + nm, w_)
            p32.add(pre + "ib" + nm[-1], b_[None, :])
        fw1, fb1 = lin(E, F)
        fw2, fb2 = lin(F, E)
        pw.add(pre + "fw1", fw1)
        pw.add(pre + "fb1", fb1[None, :])
        p32.add(pre + "fw2", fw2)
        p32.add(pre + "fb2", fb2[None, :])
        p32.add(pre + "ln1g", np.ones((1, E), np.float32))
        p32.add(pre + "ln1b", np.zeros((1, E), np.float32))
        p32.add(pre + "ln2g", np.ones((1, E), np.float32))
        p32.add(pre + "ln2b", np.zeros((1, E), np.float32))

    # ---- decoder layers ----
    for l in range(cfg.d_layers):
        pre = f"d{l}_"
        for nm in ("wq", "wk", "wv", "wo"):
            w_, b_ = lin(E, E)
            p32.add(pre + nm, w_)
            p32.add(pre + "b" + nm[-1], b_[None, :])
        for nm in ("cwv", "cwo"):
            w_, b_ = lin(E, E)
            p32.add(pre + nm, w_)
            p32.add(pre + "cb" + nm[-1], b_[None, :])
        fw1, fb1 = lin(E, F)
        fw2, fb2 = lin(F, E)
        pw.add(pre + "fw1", fw1)
        pw.add(pre + "fb1", fb1[None, :])
        p32.add(pre + "fw2", fw2)
        p32.add(pre + "fb2", fb2[None, :])
        for nm in ("ln1", "ln2", "ln3"):
            p32.add(pre + nm + "g", np.ones((1, E), np.float32))
            p32.add(pre + nm + "b", np.zeros((1, E), np.float32))

    # ---- fused Cate + Name heads ----
    cw1, cb1 = lin(E, 2 * E)
    cw2, cb2 = lin(2 * E, cfg.supercategories)
    nw1, nb1 = lin(E, 2 * E)
    nw2, nb2 = lin(2 * E, cfg.labels)
    n_out = cfg.supercategories + cfg.labels
    assert n_out <= E
    hw1 = np.concatenate([cw1, nw1], axis=1)                  # (E, 4E) = (32,128)
    hb1 = np.concatenate([cb1, nb1])[None, :]
    hw2 = np.zeros((4 * E, E), np.float32)
    hw2[:2 * E, :cfg.supercategories] = cw2
    hw2[2 * E:, cfg.supercategories:n_out] = nw2
    hb2 = np.zeros((1, E), np.float32)
    hb2[0, :cfg.supercategories] = cb2
    hb2[0, cfg.supercategories:n_out] = nb2
    pw.add("head_w1", hw1)
    pw.add("head_b1", hb1)
    p32.add("head_w2", hw2)
    p32.add("head_b2", hb2)

    # ---- vocabulary projection (ones / zeros as in __init__) ----
    pw.add("smw", np.ones((cfg.d_model, cfg.dec_in), np.float32))
    pw.add("smb", np.zeros((1, cfg.dec_in), np.float32))

    p32_arr, p32_lay = p32.finish()
    pw_arr, pw_lay = pw.finish()
    params = dict(p32=jnp.asarray(p32_arr), pw=jnp.asarray(pw_arr))
    layout = dict(p32=p32_lay, pw=pw_lay)
    return params, layout


# --------------------------------------------------------------------------
# Model glue: everything outside the single kernel is tiny XLA / loss work
# --------------------------------------------------------------------------
def forward(params, consts, src, mt, cate, name, cap_input, cap_output,
            tgt_mask, tgt_padding_mask, *, cfg, layout):
    B = src.shape[0]
    T = cap_input.shape[1]
    S = 3 + 7 + cfg.brain_roi
    n_sup = cfg.supercategories

    # grouped fMRI features, exactly as the reference encode() builds them
    dorsal = src[:, :5, :].reshape(B, -1)
    ventral = src[:, 5:, :].reshape(B, -1)
    visual = src[:, np.array([5, 0, 6, 1, 7, 2, 8]), :].reshape(B, -1)
    faces = src[:, np.array([9, 10]), :].reshape(B, -1)
    words = src[:, np.array([11, 12]), :].reshape(B, -1)
    places = src[:, 3, :].reshape(B, -1)
    bodies = src[:, np.array([4, 13]), :].reshape(B, -1)
    rois = src.reshape(B, -1)
    xf = jnp.concatenate(
        [dorsal, ventral, visual, faces, words, places, bodies, rois], axis=1)

    # token-id columns for the in-kernel one-hot embedding lookups
    tok48 = jnp.concatenate(
        [mt.astype(jnp.float32), jnp.full((B, S - 3), -1.0, jnp.float32)],
        axis=1).reshape(B * S, 1)
    cap16 = cap_input.astype(jnp.float32).reshape(B * T, 1)
    toks = jnp.concatenate([tok48, cap16], axis=0)

    # decoder self-attention additive bias (causal + key padding + batch block)
    pad_bias = jnp.where(tgt_padding_mask[:, None, :], NEG, 0.0)     # (B,1,T)
    blockvals = tgt_mask[None, :, :] + pad_bias                      # (B,T,T)
    eye = (np.arange(B)[:, None, None, None]
           == np.arange(B)[None, None, :, None])                     # (B,1,B,1)
    bias_sa = jnp.where(jnp.asarray(eye), blockvals[:, :, None, :],
                        NEG).reshape(B * T, B * T)

    hout, logits = cogformer_forward_call(xf, toks, bias_sa, consts, params,
                                          cfg=cfg, layout=layout, batch=B)
    feature = hout[:, :n_sup]
    name_logits = hout[:, n_sup:n_sup + cfg.labels]

    # ---- category head ----
    pre_cate_label = jax.nn.softmax(feature, axis=1)
    acc_cate = jnp.mean((jnp.argmax(pre_cate_label, axis=1) == cate)
                        .astype(jnp.float32))
    loss_cate = jnp.mean(jax.nn.logsumexp(feature, axis=1)
                         - jnp.take_along_axis(feature, cate[:, None], axis=1)[:, 0])

    # ---- semantic (name) head: numerically-stable BCE on logits + MSE ----
    pre_name_label = jax.nn.sigmoid(name_logits)
    bce = jnp.mean(jax.nn.softplus(name_logits) - name * name_logits)
    mse = jnp.mean(jnp.square(pre_name_label - name))
    loss_name = bce + mse

    # ---- captioning loss ----
    tgt_flat = cap_output.reshape(-1)
    ce = (jax.nn.logsumexp(logits, axis=1)
          - jnp.take_along_axis(logits, tgt_flat[:, None], axis=1)[:, 0])
    weights = jnp.logical_not(tgt_padding_mask).reshape(-1).astype(jnp.float32)
    loss_cap = jnp.sum(ce * weights) / B

    return pre_cate_label, acc_cate, loss_cate, pre_name_label, loss_name, loss_cap


# --------------------------------------------------------------------------
# mAP metric — host-side NumPy, exactly as in the reference (not a kernel)
# --------------------------------------------------------------------------
# TODO(synk): mAP (argsort / cumsum ranking) stays host-side like the reference.
def voc_ap(rec, prec, true_num):
    mrec = np.concatenate(([0.0], rec, [1.0]))
    mpre = np.concatenate(([0.0], prec, [0.0]))
    for i in range(mpre.size - 1, 0, -1):
        mpre[i - 1] = np.maximum(mpre[i - 1], mpre[i])
    i = np.where(mrec[1:] != mrec[:-1])[0]
    return np.sum((mrec[i + 1] - mrec[i]) * mpre[i + 1])


def compute_mAP(predict, target):
    class_num = target.shape[1]
    seg = np.concatenate((predict, target), axis=1)
    gt_label = seg[:, class_num:].astype(np.int32)
    sample_num = len(gt_label)
    tp = np.zeros(sample_num)
    fp = np.zeros(sample_num)
    aps = []
    for class_id in range(class_num):
        confidence = seg[:, class_id]
        sorted_ind = np.argsort(-confidence)
        sorted_label = [gt_label[x][class_id] for x in sorted_ind]
        for i in range(sample_num):
            tp[i] = sorted_label[i] > 0
            fp[i] = sorted_label[i] <= 0
        true_num = sum(tp)
        fp = np.cumsum(fp)
        tp = np.cumsum(tp)
        rec = tp / 1000000 if true_num == 0 else tp / float(true_num)
        prec = tp / np.maximum(tp + fp, np.finfo(np.float64).eps)
        aps += [voc_ap(rec, prec, true_num)]
    return float(np.mean(aps))


# --------------------------------------------------------------------------
if __name__ == "__main__":
    cfg = Cfg()
    B = 2
    root = jax.random.PRNGKey(0)
    pkey, dkey = jax.random.split(root)
    params, p_layout = make_params(cfg, pkey, B)
    consts, c_layout = build_consts(cfg, B)
    layout = {**p_layout, **c_layout}

    k1, k2, k3, k4 = jax.random.split(dkey, 4)
    src = jax.random.normal(k1, (B, cfg.brain_roi, cfg.enc_in), jnp.float32)
    mt = jax.random.randint(k2, (B, 3), 1, cfg.dec_in).astype(jnp.int32)
    cate_lbl = jax.random.randint(k3, (B,), 0, cfg.supercategories).astype(jnp.int32)
    name_lbl = (jax.random.uniform(k4, (B, cfg.labels)) > 0.5).astype(jnp.float32)
    cap_input = jnp.array([[1, 5, 7, 9, 3, 2, 0, 0],
                           [1, 4, 6, 8, 2, 0, 0, 0]], dtype=jnp.int32)
    cap_output = jnp.array([[5, 7, 9, 3, 2, 2, 0, 0],
                            [4, 6, 8, 2, 2, 0, 0, 0]], dtype=jnp.int32)
    T = cfg.cap_len
    # masks exactly as Transformer_multitasks.create_mask builds them
    tgt_mask = jnp.where(jnp.triu(jnp.ones((T, T), jnp.float32), k=1) == 1.0,
                         NEG, 0.0)
    tgt_padding_mask = (cap_input == 0)

    fwd = jax.jit(functools.partial(forward, cfg=cfg, layout=layout))
    outs = fwd(params, consts, src, mt, cate_lbl, name_lbl, cap_input, cap_output,
               tgt_mask, tgt_padding_mask)
    outs = jax.block_until_ready(outs)
    (pre_cate_label, acc_cate, loss_cate,
     pre_name_label, loss_name, loss_cap) = outs

    # mAP metric is host-side NumPy in the reference module as well
    map_value = compute_mAP(np.asarray(pre_name_label), np.asarray(name_lbl))

    for v in (acc_cate, loss_cate, loss_name, loss_cap):
        assert np.isfinite(np.asarray(v)).all(), "non-finite scalar output"
    assert np.isfinite(np.asarray(pre_cate_label)).all()
    assert np.isfinite(np.asarray(pre_name_label)).all()
    assert np.isfinite(map_value)
    print("KERNEL_OK")
</pallas_src>

<mosaic_0001>
module attributes {stable_mosaic.version = 11 : i64} {
  func.func @_fused_kernel(%arg0: i32, %arg1: memref<2x336xf32, #tpu.memory_space<vmem>>, %arg2: memref<64x1xf32, #tpu.memory_space<vmem>>, %arg3: memref<16x16xf32, #tpu.memory_space<vmem>>, %arg4: memref<48x336xf32, #tpu.memory_space<vmem>>, %arg5: memref<384x128xf32, #tpu.memory_space<vmem>>, %arg6: memref<1520x32xf32, #tpu.memory_space<vmem>>, %arg7: memref<280x128xf32, #tpu.memory_space<vmem>>, %arg8: memref<2x32xf32, #tpu.memory_space<vmem>>, %arg9: memref<16x50xf32, #tpu.memory_space<vmem>>) attributes {dimension_semantics = [#tpu.dimension_semantics<arbitrary>], iteration_bounds = array<i64: 1>, scalar_prefetch = 0 : i64, scratch_operands = 0 : i64, tpu.core_type = #tpu.core_type<tc>, window_params = [{pipeline_mode = #tpu.pipeline_mode<synchronous>, transform_indices = @transform_0, window_bounds = array<i64: 2, 336>}, {pipeline_mode = #tpu.pipeline_mode<synchronous>, transform_indices = @transform_1, window_bounds = array<i64: 64, 1>}, {pipeline_mode = #tpu.pipeline_mode<synchronous>, transform_indices = @transform_2, window_bounds = array<i64: 16, 16>}, {pipeline_mode = #tpu.pipeline_mode<synchronous>, transform_indices = @transform_3, window_bounds = array<i64: 48, 336>}, {pipeline_mode = #tpu.pipeline_mode<synchronous>, transform_indices = @transform_4, window_bounds = array<i64: 384, 128>}, {pipeline_mode = #tpu.pipeline_mode<synchronous>, transform_indices = @transform_5, window_bounds = array<i64: 1520, 32>}, {pipeline_mode = #tpu.pipeline_mode<synchronous>, transform_indices = @transform_6, window_bounds = array<i64: 280, 128>}, {pipeline_mode = #tpu.pipeline_mode<synchronous>, transform_indices = @transform_7, window_bounds = array<i64: 2, 32>}, {pipeline_mode = #tpu.pipeline_mode<synchronous>, transform_indices = @transform_8, window_bounds = array<i64: 16, 50>}]} {
    %c0 = arith.constant 0 : index
    %c0_0 = arith.constant 0 : index
    %0 = vector.load %arg1[%c0, %c0_0] : memref<2x336xf32, #tpu.memory_space<vmem>>, vector<2x336xf32>
    %c264 = arith.constant 264 : index
    %c0_1 = arith.constant 0 : index
    %1 = vector.load %arg5[%c264, %c0_1] : memref<384x128xf32, #tpu.memory_space<vmem>>, vector<48x2xf32>
    %cst = arith.constant dense<0.000000e+00> : vector<48x336xf32>
    %2 = tpu.matmul %1, %0, %cst {dimension_numbers = #tpu.dot_dimension_numbers<[1], [0], [0], [1], [0, 0, 1, 1], [], []>} : vector<48x2xf32>, vector<2x336xf32>, vector<48x336xf32> -> vector<48x336xf32>
    %c0_2 = arith.constant 0 : index
    %c0_3 = arith.constant 0 : index
    %3 = vector.load %arg4[%c0_2, %c0_3] : memref<48x336xf32, #tpu.memory_space<vmem>>, vector<48x336xf32>
    %4 = arith.mulf %2, %3 : vector<48x336xf32>
    %c0_4 = arith.constant 0 : index
    %c0_5 = arith.constant 0 : index
    %5 = vector.load %arg6[%c0_4, %c0_5] : memref<1520x32xf32, #tpu.memory_space<vmem>>, vector<336x32xf32>
    %cst_6 = arith.constant dense<0.000000e+00> : vector<48x32xf32>
    %6 = tpu.matmul %4, %5, %cst_6 {dimension_numbers = #tpu.dot_dimension_numbers<[1], [0], [0], [1], [0, 0, 1, 1], [], []>} : vector<48x336xf32>, vector<336x32xf32>, vector<48x32xf32> -> vector<48x32xf32>
    %c336 = arith.constant 336 : index
    %c0_7 = arith.constant 0 : index
    %7 = vector.load %arg6[%c336, %c0_7] : memref<1520x32xf32, #tpu.memory_space<vmem>>, vector<48x32xf32>
    %8 = arith.addf %6, %7 : vector<48x32xf32>
    %c384 = arith.constant 384 : index
    %c0_8 = arith.constant 0 : index
    %9 = vector.load %arg6[%c384, %c0_8] : memref<1520x32xf32, #tpu.memory_space<vmem>>, vector<48x32xf32>
    %c432 = arith.constant 432 : index
    %c0_9 = arith.constant 0 : index
    %10 = vector.load %arg6[%c432, %c0_9] : memref<1520x32xf32, #tpu.memory_space<vmem>>, vector<48x32xf32>
    %cst_10 = arith.constant dense<0.000000e+00> : vector<48xf32>
    %11 = vector.multi_reduction <add>, %8, %cst_10 [1] : vector<48x32xf32> to vector<48xf32>
    %12 = vector.shape_cast %11 : vector<48xf32> to vector<48x1xf32>
    %cst_11 = arith.constant 3.200000e+01 : f32
    %13 = vector.broadcast %cst_11 : f32 to vector<48x1xf32>
    %14 = arith.divf %12, %13 : vector<48x1xf32>
    %15 = vector.broadcast %14 : vector<48x1xf32> to vector<48x32xf32>
    %16 = arith.subf %8, %15 : vector<48x32xf32>
    %17 = arith.mulf %16, %16 : vector<48x32xf32>
    %cst_12 = arith.constant dense<0.000000e+00> : vector<48xf32>
    %18 = vector.multi_reduction <add>, %17, %cst_12 [1] : vector<48x32xf32> to vector<48xf32>
    %19 = vector.shape_cast %18 : vector<48xf32> to vector<48x1xf32>
    %cst_13 = arith.constant 3.200000e+01 : f32
    %20 = vector.broadcast %cst_13 : f32 to vector<48x1xf32>
    %21 = arith.divf %19, %20 : vector<48x1xf32>
    %22 = vector.broadcast %14 : vector<48x1xf32> to vector<48x32xf32>
    %23 = arith.subf %8, %22 : vector<48x32xf32>
    %cst_14 = arith.constant 9.99999974E-6 : f32
    %24 = vector.broadcast %cst_14 : f32 to vector<48x1xf32>
    %25 = arith.addf %21, %24 : vector<48x1xf32>
    %26 = math.rsqrt %25 : vector<48x1xf32>
    %27 = vector.broadcast %26 : vector<48x1xf32> to vector<48x32xf32>
    %28 = arith.mulf %23, %27 : vector<48x32xf32>
    %29 = arith.mulf %28, %9 : vector<48x32xf32>
    %30 = arith.addf %29, %10 : vector<48x32xf32>
    %c560 = arith.constant 560 : index
    %c0_15 = arith.constant 0 : index
    %31 = vector.load %arg6[%c560, %c0_15] : memref<1520x32xf32, #tpu.memory_space<vmem>>, vector<50x32xf32>
    %32 = tpu.iota {dimensions = array<i32: 1>} : vector<48x50xi32>
    %33 = arith.sitofp %32 : vector<48x50xi32> to vector<48x50xf32>
    %c0_16 = arith.constant 0 : index
    %c0_17 = arith.constant 0 : index
    %34 = vector.load %arg2[%c0_16, %c0_17] : memref<64x1xf32, #tpu.memory_space<vmem>>, vector<48x1xf32>
    %35 = vector.broadcast %34 : vector<48x1xf32> to vector<48x50xf32>
    %36 = arith.cmpf oeq, %33, %35 : vector<48x50xf32>
    %37 = arith.extui %36 : vector<48x50xi1> to vector<48x50xi32>
    %38 = arith.sitofp %37 : vector<48x50xi32> to vector<48x50xf32>
    %cst_18 = arith.constant dense<0.000000e+00> : vector<48x32xf32>
    %39 = tpu.matmul %38, %31, %cst_18 {dimension_numbers = #tpu.dot_dimension_numbers<[1], [0], [0], [1], [0, 0, 1, 1], [], []>} : vector<48x50xf32>, vector<50x32xf32>, vector<48x32xf32> -> vector<48x32xf32>
    %40 = arith.addf %30, %39 : vector<48x32xf32>
    %cst_19 = arith.constant 11.3137083 : f32
    %41 = vector.broadcast %cst_19 : f32 to vector<48x32xf32>
    %42 = arith.mulf %40, %41 : vector<48x32xf32>
    %c544 = arith.constant 544 : index
    %c0_20 = arith.constant 0 : index
    %43 = vector.load %arg6[%c544, %c0_20] : memref<1520x32xf32, #tpu.memory_space<vmem>>, vector<1x32xf32>
    %c480 = arith.constant 480 : index
    %c0_21 = arith.constant 0 : index
    %44 = vector.load %arg6[%c480, %c0_21] : memref<1520x32xf32, #tpu.memory_space<vmem>>, vector<48x32xf32>
    %45 = vector.broadcast %43 : vector<1x32xf32> to vector<48x32xf32>
    %46 = arith.mulf %45, %44 : vector<48x32xf32>
    %47 = arith.addf %42, %46 : vector<48x32xf32>
    %c192 = arith.constant 192 : index
    %c0_22 = arith.constant 0 : index
    %48 = vector.load %arg5[%c192, %c0_22] : memref<384x128xf32, #tpu.memory_space<vmem>>, vector<12x96xf32>
    %c208 = arith.constant 208 : index
    %c0_23 = arith.constant 0 : index
    %49 = vector.load %arg5[%c208, %c0_23] : memref<384x128xf32, #tpu.memory_space<vmem>>, vector<4x32xf32>
    %c216 = arith.constant 216 : index
    %c0_24 = arith.constant 0 : index
    %50 = vector.load %arg5[%c216, %c0_24] : memref<384x128xf32, #tpu.memory_space<vmem>>, vector<48x96xf32>
    %c312 = arith.constant 312 : index
    %c0_25 = arith.constant 0 : index
    %51 = vector.load %arg5[%c312, %c0_25] : memref<384x128xf32, #tpu.memory_space<vmem>>, vector<48x1xf32>
    %c0_26 = arith.constant 0 : index
    %c0_27 = arith.constant 0 : index
    %52 = vector.load %arg7[%c0_26, %c0_27] : memref<280x128xf32, #tpu.memory_space<vmem>>, vector<32x96xf32>
    %cst_28 = arith.constant dense<0.000000e+00> : vector<48x96xf32>
    %53 = tpu.matmul %47, %52, %cst_28 {dimension_numbers = #tpu.dot_dimension_numbers<[1], [0], [0], [1], [0, 0, 1, 1], [], []>} : vector<48x32xf32>, vector<32x96xf32>, vector<48x96xf32> -> vector<48x96xf32>
    %c32 = arith.constant 32 : index
    %c0_29 = arith.constant 0 : index
    %54 = vector.load %arg7[%c32, %c0_29] : memref<280x128xf32, #tpu.memory_space<vmem>>, vector<1x96xf32>
    %55 = vector.broadcast %54 : vector<1x96xf32> to vector<48x96xf32>
    %56 = arith.addf %53, %55 : vector<48x96xf32>
    %c40 = arith.constant 40 : index
    %c0_30 = arith.constant 0 : index
    %57 = vector.load %arg7[%c40, %c0_30] : memref<280x128xf32, #tpu.memory_space<vmem>>, vector<32x96xf32>
    %cst_31 = arith.constant dense<0.000000e+00> : vector<48x96xf32>
    %58 = tpu.matmul %47, %57, %cst_31 {dimension_numbers = #tpu.dot_dimension_numbers<[1], [0], [0], [1], [0, 0, 1, 1], [], []>} : vector<48x32xf32>, vector<32x96xf32>, vector<48x96xf32> -> vector<48x96xf32>
    %c72 = arith.constant 72 : index
    %c0_32 = arith.constant 0 : index
    %59 = vector.load %arg7[%c72, %c0_32] : memref<280x128xf32, #tpu.memory_space<vmem>>, vector<1x96xf32>
    %60 = vector.broadcast %59 : vector<1x96xf32> to vector<48x96xf32>
    %61 = arith.addf %58, %60 : vector<48x96xf32>
    %c80 = arith.constant 80 : index
    %c0_33 = arith.constant 0 : index
    %62 = vector.load %arg7[%c80, %c0_33] : memref<280x128xf32, #tpu.memory_space<vmem>>, vector<32x96xf32>
    %cst_34 = arith.constant dense<0.000000e+00> : vector<48x96xf32>
    %63 = tpu.matmul %47, %62, %cst_34 {dimension_numbers = #tpu.dot_dimension_numbers<[1], [0], [0], [1], [0, 0, 1, 1], [], []>} : vector<48x32xf32>, vector<32x96xf32>, vector<48x96xf32> -> vector<48x96xf32>
    %c112 = arith.constant 112 : index
    %c0_35 = arith.constant 0 : index
    %64 = vector.load %arg7[%c112, %c0_35] : memref<280x128xf32, #tpu.memory_space<vmem>>, vector<1x96xf32>
    %65 = vector.broadcast %64 : vector<1x96xf32> to vector<48x96xf32>
    %66 = arith.addf %63, %65 : vector<48x96xf32>
    %cst_36 = arith.constant 0.000000e+00 : f32
    %67 = vector.broadcast %cst_36 : f32 to vector<48x96xf32>
    %c0_37 = arith.constant 0 : index
    %c0_38 = arith.constant 0 : index
    %68 = vector.load %arg5[%c0_37, %c0_38] : memref<384x128xf32, #tpu.memory_space<vmem>>, vector<48x48xf32>
    %69 = vector.extract_strided_slice %48 {offsets = [0, 0], sizes = [1, 96], strides = [1, 1]} : vector<12x96xf32> to vector<1x96xf32>
    %70 = vector.broadcast %69 : vector<1x96xf32> to vector<48x96xf32>
    %71 = arith.mulf %56, %70 : vector<48x96xf32>
    %cst_39 = arith.constant dense<0.000000e+00> : vector<48x48xf32>
    %72 = tpu.matmul %71, %61, %cst_39 {dimension_numbers = #tpu.dot_dimension_numbers<[1], [1], [0], [0], [0, 0, 1, 0], [], []>} : vector<48x96xf32>, vector<48x96xf32>, vector<48x48xf32> -> vector<48x48xf32>
    %cst_40 = arith.constant 0.353553385 : f32
    %73 = vector.broadcast %cst_40 : f32 to vector<48x48xf32>
    %74 = arith.mulf %72, %73 : vector<48x48xf32>
    %75 = arith.addf %74, %68 : vector<48x48xf32>
    %cst_41 = arith.constant dense<0xFF800000> : vector<48xf32>
    %76 = vector.multi_reduction <maximumf>, %75, %cst_41 [1] : vector<48x48xf32> to vector<48xf32>
    %77 = vector.shape_cast %76 : vector<48xf32> to vector<48x1xf32>
    %78 = vector.broadcast %77 : vector<48x1xf32> to vector<48x48xf32>
    %79 = arith.subf %75, %78 : vector<48x48xf32>
    %80 = math.exp %79 : vector<48x48xf32>
    %cst_42 = arith.constant dense<0.000000e+00> : vector<48xf32>
    %81 = vector.multi_reduction <add>, %80, %cst_42 [1] : vector<48x48xf32> to vector<48xf32>
    %82 = vector.shape_cast %81 : vector<48xf32> to vector<48x1xf32>
    %83 = vector.broadcast %82 : vector<48x1xf32> to vector<48x48xf32>
    %84 = arith.divf %80, %83 : vector<48x48xf32>
    %85 = vector.broadcast %69 : vector<1x96xf32> to vector<48x96xf32>
    %86 = arith.mulf %66, %85 : vector<48x96xf32>
    %cst_43 = arith.constant dense<0.000000e+00> : vector<48x96xf32>
    %87 = tpu.matmul %84, %86, %cst_43 {dimension_numbers = #tpu.dot_dimension_numbers<[1], [0], [0], [1], [0, 0, 1, 1], [], []>} : vector<48x48xf32>, vector<48x96xf32>, vector<48x96xf32> -> vector<48x96xf32>
    %88 = arith.addf %67, %87 : vector<48x96xf32>
    %89 = vector.extract_strided_slice %48 {offsets = [1, 0], sizes = [1, 96], strides = [1, 1]} : vector<12x96xf32> to vector<1x96xf32>
    %90 = vector.broadcast %89 : vector<1x96xf32> to vector<48x96xf32>
    %91 = arith.mulf %56, %90 : vector<48x96xf32>
    %cst_44 = arith.constant dense<0.000000e+00> : vector<48x48xf32>
    %92 = tpu.matmul %91, %61, %cst_44 {dimension_numbers = #tpu.dot_dimension_numbers<[1], [1], [0], [0], [0, 0, 1, 0], [], []>} : vector<48x96xf32>, vector<48x96xf32>, vector<48x48xf32> -> vector<48x48xf32>
    %cst_45 = arith.constant 0.353553385 : f32
    %93 = vector.broadcast %cst_45 : f32 to vector<48x48xf32>
    %94 = arith.mulf %92, %93 : vector<48x48xf32>
    %95 = arith.addf %94, %68 : vector<48x48xf32>
    %cst_46 = arith.constant dense<0xFF800000> : vector<48xf32>
    %96 = vector.multi_reduction <maximumf>, %95, %cst_46 [1] : vector<48x48xf32> to vector<48xf32>
    %97 = vector.shape_cast %96 : vector<48xf32> to vector<48x1xf32>
    %98 = vector.broadcast %97 : vector<48x1xf32> to vector<48x48xf32>
    %99 = arith.subf %95, %98 : vector<48x48xf32>
    %100 = math.exp %99 : vector<48x48xf32>
    %cst_47 = arith.constant dense<0.000000e+00> : vector<48xf32>
    %101 = vector.multi_reduction <add>, %100, %cst_47 [1] : vector<48x48xf32> to vector<48xf32>
    %102 = vector.shape_cast %101 : vector<48xf32> to vector<48x1xf32>
    %103 = vector.broadcast %102 : vector<48x1xf32> to vector<48x48xf32>
    %104 = arith.divf %100, %103 : vector<48x48xf32>
    %105 = vector.broadcast %89 : vector<1x96xf32> to vector<48x96xf32>
    %106 = arith.mulf %66, %105 : vector<48x96xf32>
    %cst_48 = arith.constant dense<0.000000e+00> : vector<48x96xf32>
    %107 = tpu.matmul %104, %106, %cst_48 {dimension_numbers = #tpu.dot_dimension_numbers<[1], [0], [0], [1], [0, 0, 1, 1], [], []>} : vector<48x48xf32>, vector<48x96xf32>, vector<48x96xf32> -> vector<48x96xf32>
    %108 = arith.addf %88, %107 : vector<48x96xf32>
    %109 = vector.extract_strided_slice %48 {offsets = [2, 0], sizes = [1, 96], strides = [1, 1]} : vector<12x96xf32> to vector<1x96xf32>
    %110 = vector.broadcast %109 : vector<1x96xf32> to vector<48x96xf32>
    %111 = arith.mulf %56, %110 : vector<48x96xf32>
    %cst_49 = arith.constant dense<0.000000e+00> : vector<48x48xf32>
    %112 = tpu.matmul %111, %61, %cst_49 {dimension_numbers = #tpu.dot_dimension_numbers<[1], [1], [0], [0], [0, 0, 1, 0], [], []>} : vector<48x96xf32>, vector<48x96xf32>, vector<48x48xf32> -> vector<48x48xf32>
    %cst_50 = arith.constant 0.353553385 : f32
    %113 = vector.broadcast %cst_50 : f32 to vector<48x48xf32>
    %114 = arith.mulf %112, %113 : vector<48x48xf32>
    %115 = arith.addf %114, %68 : vector<48x48xf32>
    %cst_51 = arith.constant dense<0xFF800000> : vector<48xf32>
    %116 = vector.multi_reduction <maximumf>, %115, %cst_51 [1] : vector<48x48xf32> to vector<48xf32>
    %117 = vector.shape_cast %116 : vector<48xf32> to vector<48x1xf32>
    %118 = vector.broadcast %117 : vector<48x1xf32> to vector<48x48xf32>
    %119 = arith.subf %115, %118 : vector<48x48xf32>
    %120 = math.exp %119 : vector<48x48xf32>
    %cst_52 = arith.constant dense<0.000000e+00> : vector<48xf32>
    %121 = vector.multi_reduction <add>, %120, %cst_52 [1] : vector<48x48xf32> to vector<48xf32>
    %122 = vector.shape_cast %121 : vector<48xf32> to vector<48x1xf32>
    %123 = vector.broadcast %122 : vector<48x1xf32> to vector<48x48xf32>
    %124 = arith.divf %120, %123 : vector<48x48xf32>
    %125 = vector.broadcast %109 : vector<1x96xf32> to vector<48x96xf32>
    %126 = arith.mulf %66, %125 : vector<48x96xf32>
    %cst_53 = arith.constant dense<0.000000e+00> : vector<48x96xf32>
    %127 = tpu.matmul %124, %126, %cst_53 {dimension_numbers = #tpu.dot_dimension_numbers<[1], [0], [0], [1], [0, 0, 1, 1], [], []>} : vector<48x48xf32>, vector<48x96xf32>, vector<48x96xf32> -> vector<48x96xf32>
    %128 = arith.addf %108, %127 : vector<48x96xf32>
    %129 = vector.extract_strided_slice %48 {offsets = [3, 0], sizes = [1, 96], strides = [1, 1]} : vector<12x96xf32> to vector<1x96xf32>
    %130 = vector.broadcast %129 : vector<1x96xf32> to vector<48x96xf32>
    %131 = arith.mulf %56, %130 : vector<48x96xf32>
    %cst_54 = arith.constant dense<0.000000e+00> : vector<48x48xf32>
    %132 = tpu.matmul %131, %61, %cst_54 {dimension_numbers = #tpu.dot_dimension_numbers<[1], [1], [0], [0], [0, 0, 1, 0], [], []>} : vector<48x96xf32>, vector<48x96xf32>, vector<48x48xf32> -> vector<48x48xf32>
    %cst_55 = arith.constant 0.353553385 : f32
    %133 = vector.broadcast %cst_55 : f32 to vector<48x48xf32>
    %134 = arith.mulf %132, %133 : vector<48x48xf32>
    %135 = arith.addf %134, %68 : vector<48x48xf32>
    %cst_56 = arith.constant dense<0xFF800000> : vector<48xf32>
    %136 = vector.multi_reduction <maximumf>, %135, %cst_56 [1] : vector<48x48xf32> to vector<48xf32>
    %137 = vector.shape_cast %136 : vector<48xf32> to vector<48x1xf32>
    %138 = vector.broadcast %137 : vector<48x1xf32> to vector<48x48xf32>
    %139 = arith.subf %135, %138 : vector<48x48xf32>
    %140 = math.exp %139 : vector<48x48xf32>
    %cst_57 = arith.constant dense<0.000000e+00> : vector<48xf32>
    %141 = vector.multi_reduction <add>, %140, %cst_57 [1] : vector<48x48xf32> to vector<48xf32>
    %142 = vector.shape_cast %141 : vector<48xf32> to vector<48x1xf32>
    %143 = vector.broadcast %142 : vector<48x1xf32> to vector<48x48xf32>
    %144 = arith.divf %140, %143 : vector<48x48xf32>
    %145 = vector.broadcast %129 : vector<1x96xf32> to vector<48x96xf32>
    %146 = arith.mulf %66, %145 : vector<48x96xf32>
    %cst_58 = arith.constant dense<0.000000e+00> : vector<48x96xf32>
    %147 = tpu.matmul %144, %146, %cst_58 {dimension_numbers = #tpu.dot_dimension_numbers<[1], [0], [0], [1], [0, 0, 1, 1], [], []>} : vector<48x48xf32>, vector<48x96xf32>, vector<48x96xf32> -> vector<48x96xf32>
    %148 = arith.addf %128, %147 : vector<48x96xf32>
    %c48 = arith.constant 48 : index
    %c0_59 = arith.constant 0 : index
    %149 = vector.load %arg5[%c48, %c0_59] : memref<384x128xf32, #tpu.memory_space<vmem>>, vector<48x48xf32>
    %150 = vector.extract_strided_slice %48 {offsets = [4, 0], sizes = [1, 96], strides = [1, 1]} : vector<12x96xf32> to vector<1x96xf32>
    %151 = vector.broadcast %150 : vector<1x96xf32> to vector<48x96xf32>
    %152 = arith.mulf %56, %151 : vector<48x96xf32>
    %cst_60 = arith.constant dense<0.000000e+00> : vector<48x48xf32>
    %153 = tpu.matmul %152, %61, %cst_60 {dimension_numbers = #tpu.dot_dimension_numbers<[1], [1], [0], [0], [0, 0, 1, 0], [], []>} : vector<48x96xf32>, vector<48x96xf32>, vector<48x48xf32> -> vector<48x48xf32>
    %cst_61 = arith.constant 0.353553385 : f32
    %154 = vector.broadcast %cst_61 : f32 to vector<48x48xf32>
    %155 = arith.mulf %153, %154 : vector<48x48xf32>
    %156 = arith.addf %155, %149 : vector<48x48xf32>
    %cst_62 = arith.constant dense<0xFF800000> : vector<48xf32>
    %157 = vector.multi_reduction <maximumf>, %156, %cst_62 [1] : vector<48x48xf32> to vector<48xf32>
    %158 = vector.shape_cast %157 : vector<48xf32> to vector<48x1xf32>
    %159 = vector.broadcast %158 : vector<48x1xf32> to vector<48x48xf32>
    %160 = arith.subf %156, %159 : vector<48x48xf32>
    %161 = math.exp %160 : vector<48x48xf32>
    %cst_63 = arith.constant dense<0.000000e+00> : vector<48xf32>
    %162 = vector.multi_reduction <add>, %161, %cst_63 [1] : vector<48x48xf32> to vector<48xf32>
    %163 = vector.shape_cast %162 : vector<48xf32> to vector<48x1xf32>
    %164 = vector.broadcast %163 : vector<48x1xf32> to vector<48x48xf32>
    %165 = arith.divf %161, %164 : vector<48x48xf32>
    %166 = vector.broadcast %150 : vector<1x96xf32> to vector<48x96xf32>
    %167 = arith.mulf %66, %166 : vector<48x96xf32>
    %cst_64 = arith.constant dense<0.000000e+00> : vector<48x96xf32>
    %168 = tpu.matmul %165, %167, %cst_64 {dimension_numbers = #tpu.dot_dimension_numbers<[1], [0], [0], [1], [0, 0, 1, 1], [], []>} : vector<48x48xf32>, vector<48x96xf32>, vector<48x96xf32> -> vector<48x96xf32>
    %169 = arith.addf %148, %168 : vector<48x96xf32>
    %170 = vector.extract_strided_slice %48 {offsets = [5, 0], sizes = [1, 96], strides = [1, 1]} : vector<12x96xf32> to vector<1x96xf32>
    %171 = vector.broadcast %170 : vector<1x96xf32> to vector<48x96xf32>
    %172 = arith.mulf %56, %171 : vector<48x96xf32>
    %cst_65 = arith.constant dense<0.000000e+00> : vector<48x48xf32>
    %173 = tpu.matmul %172, %61, %cst_65 {dimension_numbers = #tpu.dot_dimension_numbers<[1], [1], [0], [0], [0, 0, 1, 0], [], []>} : vector<48x96xf32>, vector<48x96xf32>, vector<48x48xf32> -> vector<48x48xf32>
    %cst_66 = arith.constant 0.353553385 : f32
    %174 = vector.broadcast %cst_66 : f32 to vector<48x48xf32>
    %175 = arith.mulf %173, %174 : vector<48x48xf32>
    %176 = arith.addf %175, %149 : vector<48x48xf32>
    %cst_67 = arith.constant dense<0xFF800000> : vector<48xf32>
    %177 = vector.multi_reduction <maximumf>, %176, %cst_67 [1] : vector<48x48xf32> to vector<48xf32>
    %178 = vector.shape_cast %177 : vector<48xf32> to vector<48x1xf32>
    %179 = vector.broadcast %178 : vector<48x1xf32> to vector<48x48xf32>
    %180 = arith.subf %176, %179 : vector<48x48xf32>
    %181 = math.exp %180 : vector<48x48xf32>
    %cst_68 = arith.constant dense<0.000000e+00> : vector<48xf32>
    %182 = vector.multi_reduction <add>, %181, %cst_68 [1] : vector<48x48xf32> to vector<48xf32>
    %183 = vector.shape_cast %182 : vector<48xf32> to vector<48x1xf32>
    %184 = vector.broadcast %183 : vector<48x1xf32> to vector<48x48xf32>
    %185 = arith.divf %181, %184 : vector<48x48xf32>
    %186 = vector.broadcast %170 : vector<1x96xf32> to vector<48x96xf32>
    %187 = arith.mulf %66, %186 : vector<48x96xf32>
    %cst_69 = arith.constant dense<0.000000e+00> : vector<48x96xf32>
    %188 = tpu.matmul %185, %187, %cst_69 {dimension_numbers = #tpu.dot_dimension_numbers<[1], [0], [0], [1], [0, 0, 1, 1], [], []>} : vector<48x48xf32>, vector<48x96xf32>, vector<48x96xf32> -> vector<48x96xf32>
    %189 = arith.addf %169, %188 : vector<48x96xf32>
    %190 = vector.extract_strided_slice %48 {offsets = [6, 0], sizes = [1, 96], strides = [1, 1]} : vector<12x96xf32> to vector<1x96xf32>
    %191 = vector.broadcast %190 : vector<1x96xf32> to vector<48x96xf32>
    %192 = arith.mulf %56, %191 : vector<48x96xf32>
    %cst_70 = arith.constant dense<0.000000e+00> : vector<48x48xf32>
    %193 = tpu.matmul %192, %61, %cst_70 {dimension_numbers = #tpu.dot_dimension_numbers<[1], [1], [0], [0], [0, 0, 1, 0], [], []>} : vector<48x96xf32>, vector<48x96xf32>, vector<48x48xf32> -> vector<48x48xf32>
    %cst_71 = arith.constant 0.353553385 : f32
    %194 = vector.broadcast %cst_71 : f32 to vector<48x48xf32>
    %195 = arith.mulf %193, %194 : vector<48x48xf32>
    %196 = arith.addf %195, %149 : vector<48x48xf32>
    %cst_72 = arith.constant dense<0xFF800000> : vector<48xf32>
    %197 = vector.multi_reduction <maximumf>, %196, %cst_72 [1] : vector<48x48xf32> to vector<48xf32>
    %198 = vector.shape_cast %197 : vector<48xf32> to vector<48x1xf32>
    %199 = vector.broadcast %198 : vector<48x1xf32> to vector<48x48xf32>
    %200 = arith.subf %196, %199 : vector<48x48xf32>
    %201 = math.exp %200 : vector<48x48xf32>
    %cst_73 = arith.constant dense<0.000000e+00> : vector<48xf32>
    %202 = vector.multi_reduction <add>, %201, %cst_73 [1] : vector<48x48xf32> to vector<48xf32>
    %203 = vector.shape_cast %202 : vector<48xf32> to vector<48x1xf32>
    %204 = vector.broadcast %203 : vector<48x1xf32> to vector<48x48xf32>
    %205 = arith.divf %201, %204 : vector<48x48xf32>
    %206 = vector.broadcast %190 : vector<1x96xf32> to vector<48x96xf32>
    %207 = arith.mulf %66, %206 : vector<48x96xf32>
    %cst_74 = arith.constant dense<0.000000e+00> : vector<48x96xf32>
    %208 = tpu.matmul %205, %207, %cst_74 {dimension_numbers = #tpu.dot_dimension_numbers<[1], [0], [0], [1], [0, 0, 1, 1], [], []>} : vector<48x48xf32>, vector<48x96xf32>, vector<48x96xf32> -> vector<48x96xf32>
    %209 = arith.addf %189, %208 : vector<48x96xf32>
    %210 = vector.extract_strided_slice %48 {offsets = [7, 0], sizes = [1, 96], strides = [1, 1]} : vector<12x96xf32> to vector<1x96xf32>
    %211 = vector.broadcast %210 : vector<1x96xf32> to vector<48x96xf32>
    %212 = arith.mulf %56, %211 : vector<48x96xf32>
    %cst_75 = arith.constant dense<0.000000e+00> : vector<48x48xf32>
    %213 = tpu.matmul %212, %61, %cst_75 {dimension_numbers = #tpu.dot_dimension_numbers<[1], [1], [0], [0], [0, 0, 1, 0], [], []>} : vector<48x96xf32>, vector<48x96xf32>, vector<48x48xf32> -> vector<48x48xf32>
    %cst_76 = arith.constant 0.353553385 : f32
    %214 = vector.broadcast %cst_76 : f32 to vector<48x48xf32>
    %215 = arith.mulf %213, %214 : vector<48x48xf32>
    %216 = arith.addf %215, %149 : vector<48x48xf32>
    %cst_77 = arith.constant dense<0xFF800000> : vector<48xf32>
    %217 = vector.multi_reduction <maximumf>, %216, %cst_77 [1] : vector<48x48xf32> to vector<48xf32>
    %218 = vector.shape_cast %217 : vector<48xf32> to vector<48x1xf32>
    %219 = vector.broadcast %218 : vector<48x1xf32> to vector<48x48xf32>
    %220 = arith.subf %216, %219 : vector<48x48xf32>
    %221 = math.exp %220 : vector<48x48xf32>
    %cst_78 = arith.constant dense<0.000000e+00> : vector<48xf32>
    %222 = vector.multi_reduction <add>, %221, %cst_78 [1] : vector<48x48xf32> to vector<48xf32>
    %223 = vector.shape_cast %222 : vector<48xf32> to vector<48x1xf32>
    %224 = vector.broadcast %223 : vector<48x1xf32> to vector<48x48xf32>
    %225 = arith.divf %221, %224 : vector<48x48xf32>
    %226 = vector.broadcast %210 : vector<1x96xf32> to vector<48x96xf32>
    %227 = arith.mulf %66, %226 : vector<48x96xf32>
    %cst_79 = arith.constant dense<0.000000e+00> : vector<48x96xf32>
    %228 = tpu.matmul %225, %227, %cst_79 {dimension_numbers = #tpu.dot_dimension_numbers<[1], [0], [0], [1], [0, 0, 1, 1], [], []>} : vector<48x48xf32>, vector<48x96xf32>, vector<48x96xf32> -> vector<48x96xf32>
    %229 = arith.addf %209, %228 : vector<48x96xf32>
    %c96 = arith.constant 96 : index
    %c0_80 = arith.constant 0 : index
    %230 = vector.load %arg5[%c96, %c0_80] : memref<384x128xf32, #tpu.memory_space<vmem>>, vector<48x48xf32>
    %231 = vector.extract_strided_slice %48 {offsets = [8, 0], sizes = [1, 96], strides = [1, 1]} : vector<12x96xf32> to vector<1x96xf32>
    %232 = vector.broadcast %231 : vector<1x96xf32> to vector<48x96xf32>
    %233 = arith.mulf %56, %232 : vector<48x96xf32>
    %cst_81 = arith.constant dense<0.000000e+00> : vector<48x48xf32>
    %234 = tpu.matmul %233, %61, %cst_81 {dimension_numbers = #tpu.dot_dimension_numbers<[1], [1], [0], [0], [0, 0, 1, 0], [], []>} : vector<48x96xf32>, vector<48x96xf32>, vector<48x48xf32> -> vector<48x48xf32>
    %cst_82 = arith.constant 0.353553385 : f32
    %235 = vector.broadcast %cst_82 : f32 to vector<48x48xf32>
    %236 = arith.mulf %234, %235 : vector<48x48xf32>
    %237 = arith.addf %236, %230 : vector<48x48xf32>
    %cst_83 = arith.constant dense<0xFF800000> : vector<48xf32>
    %238 = vector.multi_reduction <maximumf>, %237, %cst_83 [1] : vector<48x48xf32> to vector<48xf32>
    %239 = vector.shape_cast %238 : vector<48xf32> to vector<48x1xf32>
    %240 = vector.broadcast %239 : vector<48x1xf32> to vector<48x48xf32>
    %241 = arith.subf %237, %240 : vector<48x48xf32>
    %242 = math.exp %241 : vector<48x48xf32>
    %cst_84 = arith.constant dense<0.000000e+00> : vector<48xf32>
    %243 = vector.multi_reduction <add>, %242, %cst_84 [1] : vector<48x48xf32> to vector<48xf32>
    %244 = vector.shape_cast %243 : vector<48xf32> to vector<48x1xf32>
    %245 = vector.broadcast %244 : vector<48x1xf32> to vector<48x48xf32>
    %246 = arith.divf %242, %245 : vector<48x48xf32>
    %247 = vector.broadcast %231 : vector<1x96xf32> to vector<48x96xf32>
    %248 = arith.mulf %66, %247 : vector<48x96xf32>
    %cst_85 = arith.constant dense<0.000000e+00> : vector<48x96xf32>
    %249 = tpu.matmul %246, %248, %cst_85 {dimension_numbers = #tpu.dot_dimension_numbers<[1], [0], [0], [1], [0, 0, 1, 1], [], []>} : vector<48x48xf32>, vector<48x96xf32>, vector<48x96xf32> -> vector<48x96xf32>
    %250 = arith.addf %229, %249 : vector<48x96xf32>
    %251 = vector.extract_strided_slice %48 {offsets = [9, 0], sizes = [1, 96], strides = [1, 1]} : vector<12x96xf32> to vector<1x96xf32>
    %252 = vector.broadcast %251 : vector<1x96xf32> to vector<48x96xf32>
    %253 = arith.mulf %56, %252 : vector<48x96xf32>
    %cst_86 = arith.constant dense<0.000000e+00> : vector<48x48xf32>
    %254 = tpu.matmul %253, %61, %cst_86 {dimension_numbers = #tpu.dot_dimension_numbers<[1], [1], [0], [0], [0, 0, 1, 0], [], []>} : vector<48x96xf32>, vector<48x96xf32>, vector<48x48xf32> -> vector<48x48xf32>
    %cst_87 = arith.constant 0.353553385 : f32
    %255 = vector.broadcast %cst_87 : f32 to vector<48x48xf32>
    %256 = arith.mulf %254, %255 : vector<48x48xf32>
    %257 = arith.addf %256, %230 : vector<48x48xf32>
    %cst_88 = arith.constant dense<0xFF800000> : vector<48xf32>
    %258 = vector.multi_reduction <maximumf>, %257, %cst_88 [1] : vector<48x48xf32> to vector<48xf32>
    %259 = vector.shape_cast %258 : vector<48xf32> to vector<48x1xf32>
    %260 = vector.broadcast %259 : vector<48x1xf32> to vector<48x48xf32>
    %261 = arith.subf %257, %260 : vector<48x48xf32>
    %262 = math.exp %261 : vector<48x48xf32>
    %cst_89 = arith.constant dense<0.000000e+00> : vector<48xf32>
    %263 = vector.multi_reduction <add>, %262, %cst_89 [1] : vector<48x48xf32> to vector<48xf32>
    %264 = vector.shape_cast %263 : vector<48xf32> to vector<48x1xf32>
    %265 = vector.broadcast %264 : vector<48x1xf32> to vector<48x48xf32>
    %266 = arith.divf %262, %265 : vector<48x48xf32>
    %267 = vector.broadcast %251 : vector<1x96xf32> to vector<48x96xf32>
    %268 = arith.mulf %66, %267 : vector<48x96xf32>
    %cst_90 = arith.constant dense<0.000000e+00> : vector<48x96xf32>
    %269 = tpu.matmul %266, %268, %cst_90 {dimension_numbers = #tpu.dot_dimension_numbers<[1], [0], [0], [1], [0, 0, 1, 1], [], []>} : vector<48x48xf32>, vector<48x96xf32>, vector<48x96xf32> -> vector<48x96xf32>
    %270 = arith.addf %250, %269 : vector<48x96xf32>
    %271 = vector.extract_strided_slice %48 {offsets = [10, 0], sizes = [1, 96], strides = [1, 1]} : vector<12x96xf32> to vector<1x96xf32>
    %272 = vector.broadcast %271 : vector<1x96xf32> to vector<48x96xf32>
    %273 = arith.mulf %56, %272 : vector<48x96xf32>
    %cst_91 = arith.constant dense<0.000000e+00> : vector<48x48xf32>
    %274 = tpu.matmul %273, %61, %cst_91 {dimension_numbers = #tpu.dot_dimension_numbers<[1], [1], [0], [0], [0, 0, 1, 0], [], []>} : vector<48x96xf32>, vector<48x96xf32>, vector<48x48xf32> -> vector<48x48xf32>
    %cst_92 = arith.constant 0.353553385 : f32
    %275 = vector.broadcast %cst_92 : f32 to vector<48x48xf32>
    %276 = arith.mulf %274, %275 : vector<48x48xf32>
    %277 = arith.addf %276, %230 : vector<48x48xf32>
    %cst_93 = arith.constant dense<0xFF800000> : vector<48xf32>
    %278 = vector.multi_reduction <maximumf>, %277, %cst_93 [1] : vector<48x48xf32> to vector<48xf32>
    %279 = vector.shape_cast %278 : vector<48xf32> to vector<48x1xf32>
    %280 = vector.broadcast %279 : vector<48x1xf32> to vector<48x48xf32>
    %281 = arith.subf %277, %280 : vector<48x48xf32>
    %282 = math.exp %281 : vector<48x48xf32>
    %cst_94 = arith.constant dense<0.000000e+00> : vector<48xf32>
    %283 = vector.multi_reduction <add>, %282, %cst_94 [1] : vector<48x48xf32> to vector<48xf32>
    %284 = vector.shape_cast %283 : vector<48xf32> to vector<48x1xf32>
    %285 = vector.broadcast %284 : vector<48x1xf32> to vector<48x48xf32>
    %286 = arith.divf %282, %285 : vector<48x48xf32>
    %287 = vector.broadcast %271 : vector<1x96xf32> to vector<48x96xf32>
    %288 = arith.mulf %66, %287 : vector<48x96xf32>
    %cst_95 = arith.constant dense<0.000000e+00> : vector<48x96xf32>
    %289 = tpu.matmul %286, %288, %cst_95 {dimension_numbers = #tpu.dot_dimension_numbers<[1], [0], [0], [1], [0, 0, 1, 1], [], []>} : vector<48x48xf32>, vector<48x96xf32>, vector<48x96xf32> -> vector<48x96xf32>
    %290 = arith.addf %270, %289 : vector<48x96xf32>
    %291 = vector.extract_strided_slice %48 {offsets = [11, 0], sizes = [1, 96], strides = [1, 1]} : vector<12x96xf32> to vector<1x96xf32>
    %292 = vector.broadcast %291 : vector<1x96xf32> to vector<48x96xf32>
    %293 = arith.mulf %56, %292 : vector<48x96xf32>
    %cst_96 = arith.constant dense<0.000000e+00> : vector<48x48xf32>
    %294 = tpu.matmul %293, %61, %cst_96 {dimension_numbers = #tpu.dot_dimension_numbers<[1], [1], [0], [0], [0, 0, 1, 0], [], []>} : vector<48x96xf32>, vector<48x96xf32>, vector<48x48xf32> -> vector<48x48xf32>
    %cst_97 = arith.constant 0.353553385 : f32
    %295 = vector.broadcast %cst_97 : f32 to vector<48x48xf32>
    %296 = arith.mulf %294, %295 : vector<48x48xf32>
    %297 = arith.addf %296, %230 : vector<48x48xf32>
    %cst_98 = arith.constant dense<0xFF800000> : vector<48xf32>
    %298 = vector.multi_reduction <maximumf>, %297, %cst_98 [1] : vector<48x48xf32> to vector<48xf32>
    %299 = vector.shape_cast %298 : vector<48xf32> to vector<48x1xf32>
    %300 = vector.broadcast %299 : vector<48x1xf32> to vector<48x48xf32>
    %301 = arith.subf %297, %300 : vector<48x48xf32>
    %302 = math.exp %301 : vector<48x48xf32>
    %cst_99 = arith.constant dense<0.000000e+00> : vector<48xf32>
    %303 = vector.multi_reduction <add>, %302, %cst_99 [1] : vector<48x48xf32> to vector<48xf32>
    %304 = vector.shape_cast %303 : vector<48xf32> to vector<48x1xf32>
    %305 = vector.broadcast %304 : vector<48x1xf32> to vector<48x48xf32>
    %306 = arith.divf %302, %305 : vector<48x48xf32>
    %307 = vector.broadcast %291 : vector<1x96xf32> to vector<48x96xf32>
    %308 = arith.mulf %66, %307 : vector<48x96xf32>
    %cst_100 = arith.constant dense<0.000000e+00> : vector<48x96xf32>
    %309 = tpu.matmul %306, %308, %cst_100 {dimension_numbers = #tpu.dot_dimension_numbers<[1], [0], [0], [1], [0, 0, 1, 1], [], []>} : vector<48x48xf32>, vector<48x96xf32>, vector<48x96xf32> -> vector<48x96xf32>
    %310 = arith.addf %290, %309 : vector<48x96xf32>
    %311 = arith.mulf %310, %50 : vector<48x96xf32>
    %c616 = arith.constant 616 : index
    %c0_101 = arith.constant 0 : index
    %312 = vector.load %arg6[%c616, %c0_101] : memref<1520x32xf32, #tpu.memory_space<vmem>>, vector<96x32xf32>
    %cst_102 = arith.constant dense<0.000000e+00> : vector<48x32xf32>
    %313 = tpu.matmul %311, %312, %cst_102 {dimension_numbers = #tpu.dot_dimension_numbers<[1], [0], [0], [1], [0, 0, 1, 1], [], []>} : vector<48x96xf32>, vector<96x32xf32>, vector<48x32xf32> -> vector<48x32xf32>
    %c712 = arith.constant 712 : index
    %c0_103 = arith.constant 0 : index
    %314 = vector.load %arg6[%c712, %c0_103] : memref<1520x32xf32, #tpu.memory_space<vmem>>, vector<48x32xf32>
    %315 = arith.addf %313, %314 : vector<48x32xf32>
    %c760 = arith.constant 760 : index
    %c0_104 = arith.constant 0 : index
    %316 = vector.load %arg6[%c760, %c0_104] : memref<1520x32xf32, #tpu.memory_space<vmem>>, vector<32x32xf32>
    %c792 = arith.constant 792 : index
    %c0_105 = arith.constant 0 : index
    %317 = vector.load %arg6[%c792, %c0_105] : memref<1520x32xf32, #tpu.memory_space<vmem>>, vector<1x32xf32>
    %c800 = arith.constant 800 : index
    %c0_106 = arith.constant 0 : index
    %318 = vector.load %arg6[%c800, %c0_106] : memref<1520x32xf32, #tpu.memory_space<vmem>>, vector<32x32xf32>
    %c832 = arith.constant 832 : index
    %c0_107 = arith.constant 0 : index
    %319 = vector.load %arg6[%c832, %c0_107] : memref<1520x32xf32, #tpu.memory_space<vmem>>, vector<1x32xf32>
    %c840 = arith.constant 840 : index
    %c0_108 = arith.constant 0 : index
    %320 = vector.load %arg6[%c840, %c0_108] : memref<1520x32xf32, #tpu.memory_space<vmem>>, vector<32x32xf32>
    %c872 = arith.constant 872 : index
    %c0_109 = arith.constant 0 : index
    %321 = vector.load %arg6[%c872, %c0_109] : memref<1520x32xf32, #tpu.memory_space<vmem>>, vector<1x32xf32>
    %c880 = arith.constant 880 : index
    %c0_110 = arith.constant 0 : index
    %322 = vector.load %arg6[%c880, %c0_110] : memref<1520x32xf32, #tpu.memory_space<vmem>>, vector<32x32xf32>
    %c912 = arith.constant 912 : index
    %c0_111 = arith.constant 0 : index
    %323 = vector.load %arg6[%c912, %c0_111] : memref<1520x32xf32, #tpu.memory_space<vmem>>, vector<1x32xf32>
    %c144 = arith.constant 144 : index
    %c0_112 = arith.constant 0 : index
    %324 = vector.load %arg5[%c144, %c0_112] : memref<384x128xf32, #tpu.memory_space<vmem>>, vector<48x48xf32>
    %cst_113 = arith.constant dense<0.000000e+00> : vector<48x32xf32>
    %325 = tpu.matmul %315, %316, %cst_113 {dimension_numbers = #tpu.dot_dimension_numbers<[1], [0], [0], [1], [0, 0, 1, 1], [], []>} : vector<48x32xf32>, vector<32x32xf32>, vector<48x32xf32> -> vector<48x32xf32>
    %326 = vector.broadcast %317 : vector<1x32xf32> to vector<48x32xf32>
    %327 = arith.addf %325, %326 : vector<48x32xf32>
    %cst_114 = arith.constant dense<0.000000e+00> : vector<48x32xf32>
    %328 = tpu.matmul %315, %318, %cst_114 {dimension_numbers = #tpu.dot_dimension_numbers<[1], [0], [0], [1], [0, 0, 1, 1], [], []>} : vector<48x32xf32>, vector<32x32xf32>, vector<48x32xf32> -> vector<48x32xf32>
    %329 = vector.broadcast %319 : vector<1x32xf32> to vector<48x32xf32>
    %330 = arith.addf %328, %329 : vector<48x32xf32>
    %cst_115 = arith.constant dense<0.000000e+00> : vector<48x32xf32>
    %331 = tpu.matmul %315, %320, %cst_115 {dimension_numbers = #tpu.dot_dimension_numbers<[1], [0], [0], [1], [0, 0, 1, 1], [], []>} : vector<48x32xf32>, vector<32x32xf32>, vector<48x32xf32> -> vector<48x32xf32>
    %332 = vector.broadcast %321 : vector<1x32xf32> to vector<48x32xf32>
    %333 = arith.addf %331, %332 : vector<48x32xf32>
    %cst_116 = arith.constant 0.000000e+00 : f32
    %334 = vector.broadcast %cst_116 : f32 to vector<48x32xf32>
    %335 = vector.extract_strided_slice %49 {offsets = [0, 0], sizes = [1, 32], strides = [1, 1]} : vector<4x32xf32> to vector<1x32xf32>
    %336 = vector.broadcast %335 : vector<1x32xf32> to vector<48x32xf32>
    %337 = arith.mulf %327, %336 : vector<48x32xf32>
    %cst_117 = arith.constant dense<0.000000e+00> : vector<48x48xf32>
    %338 = tpu.matmul %337, %330, %cst_117 {dimension_numbers = #tpu.dot_dimension_numbers<[1], [1], [0], [0], [0, 0, 1, 0], [], []>} : vector<48x32xf32>, vector<48x32xf32>, vector<48x48xf32> -> vector<48x48xf32>
    %cst_118 = arith.constant 0.353553385 : f32
    %339 = vector.broadcast %cst_118 : f32 to vector<48x48xf32>
    %340 = arith.mulf %338, %339 : vector<48x48xf32>
    %341 = arith.addf %340, %324 : vector<48x48xf32>
    %cst_119 = arith.constant dense<0xFF800000> : vector<48xf32>
    %342 = vector.multi_reduction <maximumf>, %341, %cst_119 [1] : vector<48x48xf32> to vector<48xf32>
    %343 = vector.shape_cast %342 : vector<48xf32> to vector<48x1xf32>
    %344 = vector.broadcast %343 : vector<48x1xf32> to vector<48x48xf32>
    %345 = arith.subf %341, %344 : vector<48x48xf32>
    %346 = math.exp %345 : vector<48x48xf32>
    %cst_120 = arith.constant dense<0.000000e+00> : vector<48xf32>
    %347 = vector.multi_reduction <add>, %346, %cst_120 [1] : vector<48x48xf32> to vector<48xf32>
    %348 = vector.shape_cast %347 : vector<48xf32> to vector<48x1xf32>
    %349 = vector.broadcast %348 : vector<48x1xf32> to vector<48x48xf32>
    %350 = arith.divf %346, %349 : vector<48x48xf32>
    %351 = vector.broadcast %335 : vector<1x32xf32> to vector<48x32xf32>
    %352 = arith.mulf %333, %351 : vector<48x32xf32>
    %cst_121 = arith.constant dense<0.000000e+00> : vector<48x32xf32>
    %353 = tpu.matmul %350, %352, %cst_121 {dimension_numbers = #tpu.dot_dimension_numbers<[1], [0], [0], [1], [0, 0, 1, 1], [], []>} : vector<48x48xf32>, vector<48x32xf32>, vector<48x32xf32> -> vector<48x32xf32>
    %354 = arith.addf %334, %353 : vector<48x32xf32>
    %355 = vector.extract_strided_slice %49 {offsets = [1, 0], sizes = [1, 32], strides = [1, 1]} : vector<4x32xf32> to vector<1x32xf32>
    %356 = vector.broadcast %355 : vector<1x32xf32> to vector<48x32xf32>
    %357 = arith.mulf %327, %356 : vector<48x32xf32>
    %cst_122 = arith.constant dense<0.000000e+00> : vector<48x48xf32>
    %358 = tpu.matmul %357, %330, %cst_122 {dimension_numbers = #tpu.dot_dimension_numbers<[1], [1], [0], [0], [0, 0, 1, 0], [], []>} : vector<48x32xf32>, vector<48x32xf32>, vector<48x48xf32> -> vector<48x48xf32>
    %cst_123 = arith.constant 0.353553385 : f32
    %359 = vector.broadcast %cst_123 : f32 to vector<48x48xf32>
    %360 = arith.mulf %358, %359 : vector<48x48xf32>
    %361 = arith.addf %360, %324 : vector<48x48xf32>
    %cst_124 = arith.constant dense<0xFF800000> : vector<48xf32>
    %362 = vector.multi_reduction <maximumf>, %361, %cst_124 [1] : vector<48x48xf32> to vector<48xf32>
    %363 = vector.shape_cast %362 : vector<48xf32> to vector<48x1xf32>
    %364 = vector.broadcast %363 : vector<48x1xf32> to vector<48x48xf32>
    %365 = arith.subf %361, %364 : vector<48x48xf32>
    %366 = math.exp %365 : vector<48x48xf32>
    %cst_125 = arith.constant dense<0.000000e+00> : vector<48xf32>
    %367 = vector.multi_reduction <add>, %366, %cst_125 [1] : vector<48x48xf32> to vector<48xf32>
    %368 = vector.shape_cast %367 : vector<48xf32> to vector<48x1xf32>
    %369 = vector.broadcast %368 : vector<48x1xf32> to vector<48x48xf32>
    %370 = arith.divf %366, %369 : vector<48x48xf32>
    %371 = vector.broadcast %355 : vector<1x32xf32> to vector<48x32xf32>
    %372 = arith.mulf %333, %371 : vector<48x32xf32>
    %cst_126 = arith.constant dense<0.000000e+00> : vector<48x32xf32>
    %373 = tpu.matmul %370, %372, %cst_126 {dimension_numbers = #tpu.dot_dimension_numbers<[1], [0], [0], [1], [0, 0, 1, 1], [], []>} : vector<48x48xf32>, vector<48x32xf32>, vector<48x32xf32> -> vector<48x32xf32>
    %374 = arith.addf %354, %373 : vector<48x32xf32>
    %375 = vector.extract_strided_slice %49 {offsets = [2, 0], sizes = [1, 32], strides = [1, 1]} : vector<4x32xf32> to vector<1x32xf32>
    %376 = vector.broadcast %375 : vector<1x32xf32> to vector<48x32xf32>
    %377 = arith.mulf %327, %376 : vector<48x32xf32>
    %cst_127 = arith.constant dense<0.000000e+00> : vector<48x48xf32>
    %378 = tpu.matmul %377, %330, %cst_127 {dimension_numbers = #tpu.dot_dimension_numbers<[1], [1], [0], [0], [0, 0, 1, 0], [], []>} : vector<48x32xf32>, vector<48x32xf32>, vector<48x48xf32> -> vector<48x48xf32>
    %cst_128 = arith.constant 0.353553385 : f32
    %379 = vector.broadcast %cst_128 : f32 to vector<48x48xf32>
    %380 = arith.mulf %378, %379 : vector<48x48xf32>
    %381 = arith.addf %380, %324 : vector<48x48xf32>
    %cst_129 = arith.constant dense<0xFF800000> : vector<48xf32>
    %382 = vector.multi_reduction <maximumf>, %381, %cst_129 [1] : vector<48x48xf32> to vector<48xf32>
    %383 = vector.shape_cast %382 : vector<48xf32> to vector<48x1xf32>
    %384 = vector.broadcast %383 : vector<48x1xf32> to vector<48x48xf32>
    %385 = arith.subf %381, %384 : vector<48x48xf32>
    %386 = math.exp %385 : vector<48x48xf32>
    %cst_130 = arith.constant dense<0.000000e+00> : vector<48xf32>
    %387 = vector.multi_reduction <add>, %386, %cst_130 [1] : vector<48x48xf32> to vector<48xf32>
    %388 = vector.shape_cast %387 : vector<48xf32> to vector<48x1xf32>
    %389 = vector.broadcast %388 : vector<48x1xf32> to vector<48x48xf32>
    %390 = arith.divf %386, %389 : vector<48x48xf32>
    %391 = vector.broadcast %375 : vector<1x32xf32> to vector<48x32xf32>
    %392 = arith.mulf %333, %391 : vector<48x32xf32>
    %cst_131 = arith.constant dense<0.000000e+00> : vector<48x32xf32>
    %393 = tpu.matmul %390, %392, %cst_131 {dimension_numbers = #tpu.dot_dimension_numbers<[1], [0], [0], [1], [0, 0, 1, 1], [], []>} : vector<48x48xf32>, vector<48x32xf32>, vector<48x32xf32> -> vector<48x32xf32>
    %394 = arith.addf %374, %393 : vector<48x32xf32>
    %395 = vector.extract_strided_slice %49 {offsets = [3, 0], sizes = [1, 32], strides = [1, 1]} : vector<4x32xf32> to vector<1x32xf32>
    %396 = vector.broadcast %395 : vector<1x32xf32> to vector<48x32xf32>
    %397 = arith.mulf %327, %396 : vector<48x32xf32>
    %cst_132 = arith.constant dense<0.000000e+00> : vector<48x48xf32>
    %398 = tpu.matmul %397, %330, %cst_132 {dimension_numbers = #tpu.dot_dimension_numbers<[1], [1], [0], [0], [0, 0, 1, 0], [], []>} : vector<48x32xf32>, vector<48x32xf32>, vector<48x48xf32> -> vector<48x48xf32>
    %cst_133 = arith.constant 0.353553385 : f32
    %399 = vector.broadcast %cst_133 : f32 to vector<48x48xf32>
    %400 = arith.mulf %398, %399 : vector<48x48xf32>
    %401 = arith.addf %400, %324 : vector<48x48xf32>
    %cst_134 = arith.constant dense<0xFF800000> : vector<48xf32>
    %402 = vector.multi_reduction <maximumf>, %401, %cst_134 [1] : vector<48x48xf32> to vector<48xf32>
    %403 = vector.shape_cast %402 : vector<48xf32> to vector<48x1xf32>
    %404 = vector.broadcast %403 : vector<48x1xf32> to vector<48x48xf32>
    %405 = arith.subf %401, %404 : vector<48x48xf32>
    %406 = math.exp %405 : vector<48x48xf32>
    %cst_135 = arith.constant dense<0.000000e+00> : vector<48xf32>
    %407 = vector.multi_reduction <add>, %406, %cst_135 [1] : vector<48x48xf32> to vector<48xf32>
    %408 = vector.shape_cast %407 : vector<48xf32> to vector<48x1xf32>
    %409 = vector.broadcast %408 : vector<48x1xf32> to vector<48x48xf32>
    %410 = arith.divf %406, %409 : vector<48x48xf32>
    %411 = vector.broadcast %395 : vector<1x32xf32> to vector<48x32xf32>
    %412 = arith.mulf %333, %411 : vector<48x32xf32>
    %cst_136 = arith.constant dense<0.000000e+00> : vector<48x32xf32>
    %413 = tpu.matmul %410, %412, %cst_136 {dimension_numbers = #tpu.dot_dimension_numbers<[1], [0], [0], [1], [0, 0, 1, 1], [], []>} : vector<48x48xf32>, vector<48x32xf32>, vector<48x32xf32> -> vector<48x32xf32>
    %414 = arith.addf %394, %413 : vector<48x32xf32>
    %cst_137 = arith.constant dense<0.000000e+00> : vector<48x32xf32>
    %415 = tpu.matmul %414, %322, %cst_137 {dimension_numbers = #tpu.dot_dimension_numbers<[1], [0], [0], [1], [0, 0, 1, 1], [], []>} : vector<48x32xf32>, vector<32x32xf32>, vector<48x32xf32> -> vector<48x32xf32>
    %416 = vector.broadcast %323 : vector<1x32xf32> to vector<48x32xf32>
    %417 = arith.addf %415, %416 : vector<48x32xf32>
    %418 = vector.broadcast %51 : vector<48x1xf32> to vector<48x32xf32>
    %419 = arith.mulf %418, %417 : vector<48x32xf32>
    %cst_138 = arith.constant 1.000000e+00 : f32
    %420 = vector.broadcast %cst_138 : f32 to vector<48x1xf32>
    %421 = arith.subf %420, %51 : vector<48x1xf32>
    %422 = vector.broadcast %421 : vector<48x1xf32> to vector<48x32xf32>
    %423 = arith.mulf %422, %315 : vector<48x32xf32>
    %424 = arith.addf %419, %423 : vector<48x32xf32>
    %cst_139 = arith.constant 2.000000e+00 : f32
    %425 = vector.broadcast %cst_139 : f32 to vector<48x32xf32>
    %426 = arith.mulf %425, %424 : vector<48x32xf32>
    %c992 = arith.constant 992 : index
    %c0_140 = arith.constant 0 : index
    %427 = vector.load %arg6[%c992, %c0_140] : memref<1520x32xf32, #tpu.memory_space<vmem>>, vector<1x32xf32>
    %c1000 = arith.constant 1000 : index
    %c0_141 = arith.constant 0 : index
    %428 = vector.load %arg6[%c1000, %c0_141] : memref<1520x32xf32, #tpu.memory_space<vmem>>, vector<1x32xf32>
    %cst_142 = arith.constant dense<0.000000e+00> : vector<48xf32>
    %429 = vector.multi_reduction <add>, %426, %cst_142 [1] : vector<48x32xf32> to vector<48xf32>
    %430 = vector.shape_cast %429 : vector<48xf32> to vector<48x1xf32>
    %cst_143 = arith.constant 3.200000e+01 : f32
    %431 = vector.broadcast %cst_143 : f32 to vector<48x1xf32>
    %432 = arith.divf %430, %431 : vector<48x1xf32>
    %433 = vector.broadcast %432 : vector<48x1xf32> to vector<48x32xf32>
    %434 = arith.subf %426, %433 : vector<48x32xf32>
    %435 = arith.mulf %434, %434 : vector<48x32xf32>
    %cst_144 = arith.constant dense<0.000000e+00> : vector<48xf32>
    %436 = vector.multi_reduction <add>, %435, %cst_144 [1] : vector<48x32xf32> to vector<48xf32>
    %437 = vector.shape_cast %436 : vector<48xf32> to vector<48x1xf32>
    %cst_145 = arith.constant 3.200000e+01 : f32
    %438 = vector.broadcast %cst_145 : f32 to vector<48x1xf32>
    %439 = arith.divf %437, %438 : vector<48x1xf32>
    %440 = vector.broadcast %432 : vector<48x1xf32> to vector<48x32xf32>
    %441 = arith.subf %426, %440 : vector<48x32xf32>
    %cst_146 = arith.constant 9.99999974E-6 : f32
    %442 = vector.broadcast %cst_146 : f32 to vector<48x1xf32>
    %443 = arith.addf %439, %442 : vector<48x1xf32>
    %444 = math.rsqrt %443 : vector<48x1xf32>
    %445 = vector.broadcast %444 : vector<48x1xf32> to vector<48x32xf32>
    %446 = arith.mulf %441, %445 : vector<48x32xf32>
    %447 = vector.broadcast %427 : vector<1x32xf32> to vector<48x32xf32>
    %448 = arith.mulf %446, %447 : vector<48x32xf32>
    %449 = vector.broadcast %428 : vector<1x32xf32> to vector<48x32xf32>
    %450 = arith.addf %448, %449 : vector<48x32xf32>
    %c120 = arith.constant 120 : index
    %c0_147 = arith.constant 0 : index
    %451 = vector.load %arg7[%c120, %c0_147] : memref<280x128xf32, #tpu.memory_space<vmem>>, vector<32x64xf32>
    %cst_148 = arith.constant dense<0.000000e+00> : vector<48x64xf32>
    %452 = tpu.matmul %450, %451, %cst_148 {dimension_numbers = #tpu.dot_dimension_numbers<[1], [0], [0], [1], [0, 0, 1, 1], [], []>} : vector<48x32xf32>, vector<32x64xf32>, vector<48x64xf32> -> vector<48x64xf32>
    %c152 = arith.constant 152 : index
    %c0_149 = arith.constant 0 : index
    %453 = vector.load %arg7[%c152, %c0_149] : memref<280x128xf32, #tpu.memory_space<vmem>>, vector<1x64xf32>
    %454 = vector.broadcast %453 : vector<1x64xf32> to vector<48x64xf32>
    %455 = arith.addf %452, %454 : vector<48x64xf32>
    %cst_150 = arith.constant 0.000000e+00 : f32
    %456 = vector.broadcast %cst_150 : f32 to vector<48x64xf32>
    %457 = arith.maximumf %455, %456 : vector<48x64xf32>
    %c920 = arith.constant 920 : index
    %c0_151 = arith.constant 0 : index
    %458 = vector.load %arg6[%c920, %c0_151] : memref<1520x32xf32, #tpu.memory_space<vmem>>, vector<64x32xf32>
    %cst_152 = arith.constant dense<0.000000e+00> : vector<48x32xf32>
    %459 = tpu.matmul %457, %458, %cst_152 {dimension_numbers = #tpu.dot_dimension_numbers<[1], [0], [0], [1], [0, 0, 1, 1], [], []>} : vector<48x64xf32>, vector<64x32xf32>, vector<48x32xf32> -> vector<48x32xf32>
    %c984 = arith.constant 984 : index
    %c0_153 = arith.constant 0 : index
    %460 = vector.load %arg6[%c984, %c0_153] : memref<1520x32xf32, #tpu.memory_space<vmem>>, vector<1x32xf32>
    %461 = vector.broadcast %460 : vector<1x32xf32> to vector<48x32xf32>
    %462 = arith.addf %459, %461 : vector<48x32xf32>
    %463 = arith.addf %450, %462 : vector<48x32xf32>
    %c1008 = arith.constant 1008 : index
    %c0_154 = arith.constant 0 : index
    %464 = vector.load %arg6[%c1008, %c0_154] : memref<1520x32xf32, #tpu.memory_space<vmem>>, vector<1x32xf32>
    %c1016 = arith.constant 1016 : index
    %c0_155 = arith.constant 0 : index
    %465 = vector.load %arg6[%c1016, %c0_155] : memref<1520x32xf32, #tpu.memory_space<vmem>>, vector<1x32xf32>
    %cst_156 = arith.constant dense<0.000000e+00> : vector<48xf32>
    %466 = vector.multi_reduction <add>, %463, %cst_156 [1] : vector<48x32xf32> to vector<48xf32>
    %467 = vector.shape_cast %466 : vector<48xf32> to vector<48x1xf32>
    %cst_157 = arith.constant 3.200000e+01 : f32
    %468 = vector.broadcast %cst_157 : f32 to vector<48x1xf32>
    %469 = arith.divf %467, %468 : vector<48x1xf32>
    %470 = vector.broadcast %469 : vector<48x1xf32> to vector<48x32xf32>
    %471 = arith.subf %463, %470 : vector<48x32xf32>
    %472 = arith.mulf %471, %471 : vector<48x32xf32>
    %cst_158 = arith.constant dense<0.000000e+00> : vector<48xf32>
    %473 = vector.multi_reduction <add>, %472, %cst_158 [1] : vector<48x32xf32> to vector<48xf32>
    %474 = vector.shape_cast %473 : vector<48xf32> to vector<48x1xf32>
    %cst_159 = arith.constant 3.200000e+01 : f32
    %475 = vector.broadcast %cst_159 : f32 to vector<48x1xf32>
    %476 = arith.divf %474, %475 : vector<48x1xf32>
    %477 = vector.broadcast %469 : vector<48x1xf32> to vector<48x32xf32>
    %478 = arith.subf %463, %477 : vector<48x32xf32>
    %cst_160 = arith.constant 9.99999974E-6 : f32
    %479 = vector.broadcast %cst_160 : f32 to vector<48x1xf32>
    %480 = arith.addf %476, %479 : vector<48x1xf32>
    %481 = math.rsqrt %480 : vector<48x1xf32>
    %482 = vector.broadcast %481 : vector<48x1xf32> to vector<48x32xf32>
    %483 = arith.mulf %478, %482 : vector<48x32xf32>
    %484 = vector.broadcast %464 : vector<1x32xf32> to vector<48x32xf32>
    %485 = arith.mulf %483, %484 : vector<48x32xf32>
    %486 = vector.broadcast %465 : vector<1x32xf32> to vector<48x32xf32>
    %487 = arith.addf %485, %486 : vector<48x32xf32>
    %c360 = arith.constant 360 : index
    %c0_161 = arith.constant 0 : index
    %488 = vector.load %arg5[%c360, %c0_161] : memref<384x128xf32, #tpu.memory_space<vmem>>, vector<2x48xf32>
    %cst_162 = arith.constant dense<0.000000e+00> : vector<2x32xf32>
    %489 = tpu.matmul %488, %487, %cst_162 {dimension_numbers = #tpu.dot_dimension_numbers<[1], [0], [0], [1], [0, 0, 1, 1], [], []>} : vector<2x48xf32>, vector<48x32xf32>, vector<2x32xf32> -> vector<2x32xf32>
    %c200 = arith.constant 200 : index
    %c0_163 = arith.constant 0 : index
    %490 = vector.load %arg7[%c200, %c0_163] : memref<280x128xf32, #tpu.memory_space<vmem>>, vector<32x128xf32>
    %cst_164 = arith.constant dense<0.000000e+00> : vector<2x128xf32>
    %491 = tpu.matmul %489, %490, %cst_164 {dimension_numbers = #tpu.dot_dimension_numbers<[1], [0], [0], [1], [0, 0, 1, 1], [], []>} : vector<2x32xf32>, vector<32x128xf32>, vector<2x128xf32> -> vector<2x128xf32>
    %c232 = arith.constant 232 : index
    %c0_165 = arith.constant 0 : index
    %492 = vector.load %arg7[%c232, %c0_165] : memref<280x128xf32, #tpu.memory_space<vmem>>, vector<1x128xf32>
    %493 = vector.broadcast %492 : vector<1x128xf32> to vector<2x128xf32>
    %494 = arith.addf %491, %493 : vector<2x128xf32>
    %cst_166 = arith.constant 0.000000e+00 : f32
    %495 = vector.broadcast %cst_166 : f32 to vector<2x128xf32>
    %496 = arith.maximumf %494, %495 : vector<2x128xf32>
    %c1384 = arith.constant 1384 : index
    %c0_167 = arith.constant 0 : index
    %497 = vector.load %arg6[%c1384, %c0_167] : memref<1520x32xf32, #tpu.memory_space<vmem>>, vector<128x32xf32>
    %cst_168 = arith.constant dense<0.000000e+00> : vector<2x32xf32>
    %498 = tpu.matmul %496, %497, %cst_168 {dimension_numbers = #tpu.dot_dimension_numbers<[1], [0], [0], [1], [0, 0, 1, 1], [], []>} : vector<2x128xf32>, vector<128x32xf32>, vector<2x32xf32> -> vector<2x32xf32>
    %c1512 = arith.constant 1512 : index
    %c0_169 = arith.constant 0 : index
    %499 = vector.load %arg6[%c1512, %c0_169] : memref<1520x32xf32, #tpu.memory_space<vmem>>, vector<1x32xf32>
    %500 = vector.broadcast %499 : vector<1x32xf32> to vector<2x32xf32>
    %501 = arith.addf %498, %500 : vector<2x32xf32>
    %c0_170 = arith.constant 0 : index
    %c0_171 = arith.constant 0 : index
    %502 = vector.load %arg8[%c0_170, %c0_171] : memref<2x32xf32, #tpu.memory_space<vmem>>, vector<2x32xf32>
    tpu.vector_store %arg8[%c0_170, %c0_171], %501 {strides = array<i32>} : memref<2x32xf32, #tpu.memory_space<vmem>>, vector<2x32xf32>,
    %503 = tpu.iota {dimensions = array<i32: 1>} : vector<16x50xi32>
    %504 = arith.sitofp %503 : vector<16x50xi32> to vector<16x50xf32>
    %c48_172 = arith.constant 48 : index
    %c0_173 = arith.constant 0 : index
    %505 = vector.load %arg2[%c48_172, %c0_173] : memref<64x1xf32, #tpu.memory_space<vmem>>, vector<16x1xf32>
    %506 = vector.broadcast %505 : vector<16x1xf32> to vector<16x50xf32>
    %507 = arith.cmpf oeq, %504, %506 : vector<16x50xf32>
    %508 = arith.extui %507 : vector<16x50xi1> to vector<16x50xi32>
    %509 = arith.sitofp %508 : vector<16x50xi32> to vector<16x50xf32>
    %cst_174 = arith.constant dense<0.000000e+00> : vector<16x32xf32>
    %510 = tpu.matmul %509, %31, %cst_174 {dimension_numbers = #tpu.dot_dimension_numbers<[1], [0], [0], [1], [0, 0, 1, 1], [], []>} : vector<16x50xf32>, vector<50x32xf32>, vector<16x32xf32> -> vector<16x32xf32>
    %cst_175 = arith.constant 5.65685415 : f32
    %511 = vector.broadcast %cst_175 : f32 to vector<16x32xf32>
    %512 = arith.mulf %510, %511 : vector<16x32xf32>
    %c552 = arith.constant 552 : index
    %c0_176 = arith.constant 0 : index
    %513 = vector.load %arg6[%c552, %c0_176] : memref<1520x32xf32, #tpu.memory_space<vmem>>, vector<1x32xf32>
    %c528 = arith.constant 528 : index
    %c0_177 = arith.constant 0 : index
    %514 = vector.load %arg6[%c528, %c0_177] : memref<1520x32xf32, #tpu.memory_space<vmem>>, vector<16x32xf32>
    %515 = vector.broadcast %513 : vector<1x32xf32> to vector<16x32xf32>
    %516 = arith.mulf %515, %514 : vector<16x32xf32>
    %517 = arith.addf %512, %516 : vector<16x32xf32>
    %c0_178 = arith.constant 0 : index
    %c0_179 = arith.constant 0 : index
    %518 = vector.load %arg3[%c0_178, %c0_179] : memref<16x16xf32, #tpu.memory_space<vmem>>, vector<16x16xf32>
    %c1024 = arith.constant 1024 : index
    %c0_180 = arith.constant 0 : index
    %519 = vector.load %arg6[%c1024, %c0_180] : memref<1520x32xf32, #tpu.memory_space<vmem>>, vector<32x32xf32>
    %c1056 = arith.constant 1056 : index
    %c0_181 = arith.constant 0 : index
    %520 = vector.load %arg6[%c1056, %c0_181] : memref<1520x32xf32, #tpu.memory_space<vmem>>, vector<1x32xf32>
    %c1064 = arith.constant 1064 : index
    %c0_182 = arith.constant 0 : index
    %521 = vector.load %arg6[%c1064, %c0_182] : memref<1520x32xf32, #tpu.memory_space<vmem>>, vector<32x32xf32>
    %c1096 = arith.constant 1096 : index
    %c0_183 = arith.constant 0 : index
    %522 = vector.load %arg6[%c1096, %c0_183] : memref<1520x32xf32, #tpu.memory_space<vmem>>, vector<1x32xf32>
    %c1104 = arith.constant 1104 : index
    %c0_184 = arith.constant 0 : index
    %523 = vector.load %arg6[%c1104, %c0_184] : memref<1520x32xf32, #tpu.memory_space<vmem>>, vector<32x32xf32>
    %c1136 = arith.constant 1136 : index
    %c0_185 = arith.constant 0 : index
    %524 = vector.load %arg6[%c1136, %c0_185] : memref<1520x32xf32, #tpu.memory_space<vmem>>, vector<1x32xf32>
    %c1144 = arith.constant 1144 : index
    %c0_186 = arith.constant 0 : index
    %525 = vector.load %arg6[%c1144, %c0_186] : memref<1520x32xf32, #tpu.memory_space<vmem>>, vector<32x32xf32>
    %c1176 = arith.constant 1176 : index
    %c0_187 = arith.constant 0 : index
    %526 = vector.load %arg6[%c1176, %c0_187] : memref<1520x32xf32, #tpu.memory_space<vmem>>, vector<1x32xf32>
    %cst_188 = arith.constant dense<0.000000e+00> : vector<16x32xf32>
    %527 = tpu.matmul %517, %519, %cst_188 {dimension_numbers = #tpu.dot_dimension_numbers<[1], [0], [0], [1], [0, 0, 1, 1], [], []>} : vector<16x32xf32>, vector<32x32xf32>, vector<16x32xf32> -> vector<16x32xf32>
    %528 = vector.broadcast %520 : vector<1x32xf32> to vector<16x32xf32>
    %529 = arith.addf %527, %528 : vector<16x32xf32>
    %cst_189 = arith.constant dense<0.000000e+00> : vector<16x32xf32>
    %530 = tpu.matmul %517, %521, %cst_189 {dimension_numbers = #tpu.dot_dimension_numbers<[1], [0], [0], [1], [0, 0, 1, 1], [], []>} : vector<16x32xf32>, vector<32x32xf32>, vector<16x32xf32> -> vector<16x32xf32>
    %531 = vector.broadcast %522 : vector<1x32xf32> to vector<16x32xf32>
    %532 = arith.addf %530, %531 : vector<16x32xf32>
    %cst_190 = arith.constant dense<0.000000e+00> : vector<16x32xf32>
    %533 = tpu.matmul %517, %523, %cst_190 {dimension_numbers = #tpu.dot_dimension_numbers<[1], [0], [0], [1], [0, 0, 1, 1], [], []>} : vector<16x32xf32>, vector<32x32xf32>, vector<16x32xf32> -> vector<16x32xf32>
    %534 = vector.broadcast %524 : vector<1x32xf32> to vector<16x32xf32>
    %535 = arith.addf %533, %534 : vector<16x32xf32>
    %cst_191 = arith.constant 0.000000e+00 : f32
    %536 = vector.broadcast %cst_191 : f32 to vector<16x32xf32>
    %537 = vector.extract_strided_slice %49 {offsets = [0, 0], sizes = [1, 32], strides = [1, 1]} : vector<4x32xf32> to vector<1x32xf32>
    %538 = vector.broadcast %537 : vector<1x32xf32> to vector<16x32xf32>
    %539 = arith.mulf %529, %538 : vector<16x32xf32>
    %cst_192 = arith.constant dense<0.000000e+00> : vector<16x16xf32>
    %540 = tpu.matmul %539, %532, %cst_192 {dimension_numbers = #tpu.dot_dimension_numbers<[1], [1], [0], [0], [0, 0, 1, 0], [], []>} : vector<16x32xf32>, vector<16x32xf32>, vector<16x16xf32> -> vector<16x16xf32>
    %cst_193 = arith.constant 0.353553385 : f32
    %541 = vector.broadcast %cst_193 : f32 to vector<16x16xf32>
    %542 = arith.mulf %540, %541 : vector<16x16xf32>
    %543 = arith.addf %542, %518 : vector<16x16xf32>
    %cst_194 = arith.constant dense<0xFF800000> : vector<16xf32>
    %544 = vector.multi_reduction <maximumf>, %543, %cst_194 [1] : vector<16x16xf32> to vector<16xf32>
    %545 = vector.shape_cast %544 : vector<16xf32> to vector<16x1xf32>
    %546 = vector.broadcast %545 : vector<16x1xf32> to vector<16x16xf32>
    %547 = arith.subf %543, %546 : vector<16x16xf32>
    %548 = math.exp %547 : vector<16x16xf32>
    %cst_195 = arith.constant dense<0.000000e+00> : vector<16xf32>
    %549 = vector.multi_reduction <add>, %548, %cst_195 [1] : vector<16x16xf32> to vector<16xf32>
    %550 = vector.shape_cast %549 : vector<16xf32> to vector<16x1xf32>
    %551 = vector.broadcast %550 : vector<16x1xf32> to vector<16x16xf32>
    %552 = arith.divf %548, %551 : vector<16x16xf32>
    %553 = vector.broadcast %537 : vector<1x32xf32> to vector<16x32xf32>
    %554 = arith.mulf %535, %553 : vector<16x32xf32>
    %cst_196 = arith.constant dense<0.000000e+00> : vector<16x32xf32>
    %555 = tpu.matmul %552, %554, %cst_196 {dimension_numbers = #tpu.dot_dimension_numbers<[1], [0], [0], [1], [0, 0, 1, 1], [], []>} : vector<16x16xf32>, vector<16x32xf32>, vector<16x32xf32> -> vector<16x32xf32>
    %556 = arith.addf %536, %555 : vector<16x32xf32>
    %557 = vector.extract_strided_slice %49 {offsets = [1, 0], sizes = [1, 32], strides = [1, 1]} : vector<4x32xf32> to vector<1x32xf32>
    %558 = vector.broadcast %557 : vector<1x32xf32> to vector<16x32xf32>
    %559 = arith.mulf %529, %558 : vector<16x32xf32>
    %cst_197 = arith.constant dense<0.000000e+00> : vector<16x16xf32>
    %560 = tpu.matmul %559, %532, %cst_197 {dimension_numbers = #tpu.dot_dimension_numbers<[1], [1], [0], [0], [0, 0, 1, 0], [], []>} : vector<16x32xf32>, vector<16x32xf32>, vector<16x16xf32> -> vector<16x16xf32>
    %cst_198 = arith.constant 0.353553385 : f32
    %561 = vector.broadcast %cst_198 : f32 to vector<16x16xf32>
    %562 = arith.mulf %560, %561 : vector<16x16xf32>
    %563 = arith.addf %562, %518 : vector<16x16xf32>
    %cst_199 = arith.constant dense<0xFF800000> : vector<16xf32>
    %564 = vector.multi_reduction <maximumf>, %563, %cst_199 [1] : vector<16x16xf32> to vector<16xf32>
    %565 = vector.shape_cast %564 : vector<16xf32> to vector<16x1xf32>
    %566 = vector.broadcast %565 : vector<16x1xf32> to vector<16x16xf32>
    %567 = arith.subf %563, %566 : vector<16x16xf32>
    %568 = math.exp %567 : vector<16x16xf32>
    %cst_200 = arith.constant dense<0.000000e+00> : vector<16xf32>
    %569 = vector.multi_reduction <add>, %568, %cst_200 [1] : vector<16x16xf32> to vector<16xf32>
    %570 = vector.shape_cast %569 : vector<16xf32> to vector<16x1xf32>
    %571 = vector.broadcast %570 : vector<16x1xf32> to vector<16x16xf32>
    %572 = arith.divf %568, %571 : vector<16x16xf32>
    %573 = vector.broadcast %557 : vector<1x32xf32> to vector<16x32xf32>
    %574 = arith.mulf %535, %573 : vector<16x32xf32>
    %cst_201 = arith.constant dense<0.000000e+00> : vector<16x32xf32>
    %575 = tpu.matmul %572, %574, %cst_201 {dimension_numbers = #tpu.dot_dimension_numbers<[1], [0], [0], [1], [0, 0, 1, 1], [], []>} : vector<16x16xf32>, vector<16x32xf32>, vector<16x32xf32> -> vector<16x32xf32>
    %576 = arith.addf %556, %575 : vector<16x32xf32>
    %577 = vector.extract_strided_slice %49 {offsets = [2, 0], sizes = [1, 32], strides = [1, 1]} : vector<4x32xf32> to vector<1x32xf32>
    %578 = vector.broadcast %577 : vector<1x32xf32> to vector<16x32xf32>
    %579 = arith.mulf %529, %578 : vector<16x32xf32>
    %cst_202 = arith.constant dense<0.000000e+00> : vector<16x16xf32>
    %580 = tpu.matmul %579, %532, %cst_202 {dimension_numbers = #tpu.dot_dimension_numbers<[1], [1], [0], [0], [0, 0, 1, 0], [], []>} : vector<16x32xf32>, vector<16x32xf32>, vector<16x16xf32> -> vector<16x16xf32>
    %cst_203 = arith.constant 0.353553385 : f32
    %581 = vector.broadcast %cst_203 : f32 to vector<16x16xf32>
    %582 = arith.mulf %580, %581 : vector<16x16xf32>
    %583 = arith.addf %582, %518 : vector<16x16xf32>
    %cst_204 = arith.constant dense<0xFF800000> : vector<16xf32>
    %584 = vector.multi_reduction <maximumf>, %583, %cst_204 [1] : vector<16x16xf32> to vector<16xf32>
    %585 = vector.shape_cast %584 : vector<16xf32> to vector<16x1xf32>
    %586 = vector.broadcast %585 : vector<16x1xf32> to vector<16x16xf32>
    %587 = arith.subf %583, %586 : vector<16x16xf32>
    %588 = math.exp %587 : vector<16x16xf32>
    %cst_205 = arith.constant dense<0.000000e+00> : vector<16xf32>
    %589 = vector.multi_reduction <add>, %588, %cst_205 [1] : vector<16x16xf32> to vector<16xf32>
    %590 = vector.shape_cast %589 : vector<16xf32> to vector<16x1xf32>
    %591 = vector.broadcast %590 : vector<16x1xf32> to vector<16x16xf32>
    %592 = arith.divf %588, %591 : vector<16x16xf32>
    %593 = vector.broadcast %577 : vector<1x32xf32> to vector<16x32xf32>
    %594 = arith.mulf %535, %593 : vector<16x32xf32>
    %cst_206 = arith.constant dense<0.000000e+00> : vector<16x32xf32>
    %595 = tpu.matmul %592, %594, %cst_206 {dimension_numbers = #tpu.dot_dimension_numbers<[1], [0], [0], [1], [0, 0, 1, 1], [], []>} : vector<16x16xf32>, vector<16x32xf32>, vector<16x32xf32> -> vector<16x32xf32>
    %596 = arith.addf %576, %595 : vector<16x32xf32>
    %597 = vector.extract_strided_slice %49 {offsets = [3, 0], sizes = [1, 32], strides = [1, 1]} : vector<4x32xf32> to vector<1x32xf32>
    %598 = vector.broadcast %597 : vector<1x32xf32> to vector<16x32xf32>
    %599 = arith.mulf %529, %598 : vector<16x32xf32>
    %cst_207 = arith.constant dense<0.000000e+00> : vector<16x16xf32>
    %600 = tpu.matmul %599, %532, %cst_207 {dimension_numbers = #tpu.dot_dimension_numbers<[1], [1], [0], [0], [0, 0, 1, 0], [], []>} : vector<16x32xf32>, vector<16x32xf32>, vector<16x16xf32> -> vector<16x16xf32>
    %cst_208 = arith.constant 0.353553385 : f32
    %601 = vector.broadcast %cst_208 : f32 to vector<16x16xf32>
    %602 = arith.mulf %600, %601 : vector<16x16xf32>
    %603 = arith.addf %602, %518 : vector<16x16xf32>
    %cst_209 = arith.constant dense<0xFF800000> : vector<16xf32>
    %604 = vector.multi_reduction <maximumf>, %603, %cst_209 [1] : vector<16x16xf32> to vector<16xf32>
    %605 = vector.shape_cast %604 : vector<16xf32> to vector<16x1xf32>
    %606 = vector.broadcast %605 : vector<16x1xf32> to vector<16x16xf32>
    %607 = arith.subf %603, %606 : vector<16x16xf32>
    %608 = math.exp %607 : vector<16x16xf32>
    %cst_210 = arith.constant dense<0.000000e+00> : vector<16xf32>
    %609 = vector.multi_reduction <add>, %608, %cst_210 [1] : vector<16x16xf32> to vector<16xf32>
    %610 = vector.shape_cast %609 : vector<16xf32> to vector<16x1xf32>
    %611 = vector.broadcast %610 : vector<16x1xf32> to vector<16x16xf32>
    %612 = arith.divf %608, %611 : vector<16x16xf32>
    %613 = vector.broadcast %597 : vector<1x32xf32> to vector<16x32xf32>
    %614 = arith.mulf %535, %613 : vector<16x32xf32>
    %cst_211 = arith.constant dense<0.000000e+00> : vector<16x32xf32>
    %615 = tpu.matmul %612, %614, %cst_211 {dimension_numbers = #tpu.dot_dimension_numbers<[1], [0], [0], [1], [0, 0, 1, 1], [], []>} : vector<16x16xf32>, vector<16x32xf32>, vector<16x32xf32> -> vector<16x32xf32>
    %616 = arith.addf %596, %615 : vector<16x32xf32>
    %cst_212 = arith.constant dense<0.000000e+00> : vector<16x32xf32>
    %617 = tpu.matmul %616, %525, %cst_212 {dimension_numbers = #tpu.dot_dimension_numbers<[1], [0], [0], [1], [0, 0, 1, 1], [], []>} : vector<16x32xf32>, vector<32x32xf32>, vector<16x32xf32> -> vector<16x32xf32>
    %618 = vector.broadcast %526 : vector<1x32xf32> to vector<16x32xf32>
    %619 = arith.addf %617, %618 : vector<16x32xf32>
    %620 = arith.addf %517, %619 : vector<16x32xf32>
    %c1336 = arith.constant 1336 : index
    %c0_213 = arith.constant 0 : index
    %621 = vector.load %arg6[%c1336, %c0_213] : memref<1520x32xf32, #tpu.memory_space<vmem>>, vector<1x32xf32>
    %c1344 = arith.constant 1344 : index
    %c0_214 = arith.constant 0 : index
    %622 = vector.load %arg6[%c1344, %c0_214] : memref<1520x32xf32, #tpu.memory_space<vmem>>, vector<1x32xf32>
    %cst_215 = arith.constant dense<0.000000e+00> : vector<16xf32>
    %623 = vector.multi_reduction <add>, %620, %cst_215 [1] : vector<16x32xf32> to vector<16xf32>
    %624 = vector.shape_cast %623 : vector<16xf32> to vector<16x1xf32>
    %cst_216 = arith.constant 3.200000e+01 : f32
    %625 = vector.broadcast %cst_216 : f32 to vector<16x1xf32>
    %626 = arith.divf %624, %625 : vector<16x1xf32>
    %627 = vector.broadcast %626 : vector<16x1xf32> to vector<16x32xf32>
    %628 = arith.subf %620, %627 : vector<16x32xf32>
    %629 = arith.mulf %628, %628 : vector<16x32xf32>
    %cst_217 = arith.constant dense<0.000000e+00> : vector<16xf32>
    %630 = vector.multi_reduction <add>, %629, %cst_217 [1] : vector<16x32xf32> to vector<16xf32>
    %631 = vector.shape_cast %630 : vector<16xf32> to vector<16x1xf32>
    %cst_218 = arith.constant 3.200000e+01 : f32
    %632 = vector.broadcast %cst_218 : f32 to vector<16x1xf32>
    %633 = arith.divf %631, %632 : vector<16x1xf32>
    %634 = vector.broadcast %626 : vector<16x1xf32> to vector<16x32xf32>
    %635 = arith.subf %620, %634 : vector<16x32xf32>
    %cst_219 = arith.constant 9.99999974E-6 : f32
    %636 = vector.broadcast %cst_219 : f32 to vector<16x1xf32>
    %637 = arith.addf %633, %636 : vector<16x1xf32>
    %638 = math.rsqrt %637 : vector<16x1xf32>
    %639 = vector.broadcast %638 : vector<16x1xf32> to vector<16x32xf32>
    %640 = arith.mulf %635, %639 : vector<16x32xf32>
    %641 = vector.broadcast %621 : vector<1x32xf32> to vector<16x32xf32>
    %642 = arith.mulf %640, %641 : vector<16x32xf32>
    %643 = vector.broadcast %622 : vector<1x32xf32> to vector<16x32xf32>
    %644 = arith.addf %642, %643 : vector<16x32xf32>
    %c1184 = arith.constant 1184 : index
    %c0_220 = arith.constant 0 : index
    %645 = vector.load %arg6[%c1184, %c0_220] : memref<1520x32xf32, #tpu.memory_space<vmem>>, vector<32x32xf32>
    %cst_221 = arith.constant dense<0.000000e+00> : vector<2x32xf32>
    %646 = tpu.matmul %489, %645, %cst_221 {dimension_numbers = #tpu.dot_dimension_numbers<[1], [0], [0], [1], [0, 0, 1, 1], [], []>} : vector<2x32xf32>, vector<32x32xf32>, vector<2x32xf32> -> vector<2x32xf32>
    %c1216 = arith.constant 1216 : index
    %c0_222 = arith.constant 0 : index
    %647 = vector.load %arg6[%c1216, %c0_222] : memref<1520x32xf32, #tpu.memory_space<vmem>>, vector<1x32xf32>
    %648 = vector.broadcast %647 : vector<1x32xf32> to vector<2x32xf32>
    %649 = arith.addf %646, %648 : vector<2x32xf32>
    %c1224 = arith.constant 1224 : index
    %c0_223 = arith.constant 0 : index
    %650 = vector.load %arg6[%c1224, %c0_223] : memref<1520x32xf32, #tpu.memory_space<vmem>>, vector<32x32xf32>
    %cst_224 = arith.constant dense<0.000000e+00> : vector<2x32xf32>
    %651 = tpu.matmul %649, %650, %cst_224 {dimension_numbers = #tpu.dot_dimension_numbers<[1], [0], [0], [1], [0, 0, 1, 1], [], []>} : vector<2x32xf32>, vector<32x32xf32>, vector<2x32xf32> -> vector<2x32xf32>
    %c1256 = arith.constant 1256 : index
    %c0_225 = arith.constant 0 : index
    %652 = vector.load %arg6[%c1256, %c0_225] : memref<1520x32xf32, #tpu.memory_space<vmem>>, vector<1x32xf32>
    %653 = vector.broadcast %652 : vector<1x32xf32> to vector<2x32xf32>
    %654 = arith.addf %651, %653 : vector<2x32xf32>
    %c368 = arith.constant 368 : index
    %c0_226 = arith.constant 0 : index
    %655 = vector.load %arg5[%c368, %c0_226] : memref<384x128xf32, #tpu.memory_space<vmem>>, vector<16x2xf32>
    %cst_227 = arith.constant dense<0.000000e+00> : vector<16x32xf32>
    %656 = tpu.matmul %655, %654, %cst_227 {dimension_numbers = #tpu.dot_dimension_numbers<[1], [0], [0], [1], [0, 0, 1, 1], [], []>} : vector<16x2xf32>, vector<2x32xf32>, vector<16x32xf32> -> vector<16x32xf32>
    %657 = arith.addf %644, %656 : vector<16x32xf32>
    %c1352 = arith.constant 1352 : index
    %c0_228 = arith.constant 0 : index
    %658 = vector.load %arg6[%c1352, %c0_228] : memref<1520x32xf32, #tpu.memory_space<vmem>>, vector<1x32xf32>
    %c1360 = arith.constant 1360 : index
    %c0_229 = arith.constant 0 : index
    %659 = vector.load %arg6[%c1360, %c0_229] : memref<1520x32xf32, #tpu.memory_space<vmem>>, vector<1x32xf32>
    %cst_230 = arith.constant dense<0.000000e+00> : vector<16xf32>
    %660 = vector.multi_reduction <add>, %657, %cst_230 [1] : vector<16x32xf32> to vector<16xf32>
    %661 = vector.shape_cast %660 : vector<16xf32> to vector<16x1xf32>
    %cst_231 = arith.constant 3.200000e+01 : f32
    %662 = vector.broadcast %cst_231 : f32 to vector<16x1xf32>
    %663 = arith.divf %661, %662 : vector<16x1xf32>
    %664 = vector.broadcast %663 : vector<16x1xf32> to vector<16x32xf32>
    %665 = arith.subf %657, %664 : vector<16x32xf32>
    %666 = arith.mulf %665, %665 : vector<16x32xf32>
    %cst_232 = arith.constant dense<0.000000e+00> : vector<16xf32>
    %667 = vector.multi_reduction <add>, %666, %cst_232 [1] : vector<16x32xf32> to vector<16xf32>
    %668 = vector.shape_cast %667 : vector<16xf32> to vector<16x1xf32>
    %cst_233 = arith.constant 3.200000e+01 : f32
    %669 = vector.broadcast %cst_233 : f32 to vector<16x1xf32>
    %670 = arith.divf %668, %669 : vector<16x1xf32>
    %671 = vector.broadcast %663 : vector<16x1xf32> to vector<16x32xf32>
    %672 = arith.subf %657, %671 : vector<16x32xf32>
    %cst_234 = arith.constant 9.99999974E-6 : f32
    %673 = vector.broadcast %cst_234 : f32 to vector<16x1xf32>
    %674 = arith.addf %670, %673 : vector<16x1xf32>
    %675 = math.rsqrt %674 : vector<16x1xf32>
    %676 = vector.broadcast %675 : vector<16x1xf32> to vector<16x32xf32>
    %677 = arith.mulf %672, %676 : vector<16x32xf32>
    %678 = vector.broadcast %658 : vector<1x32xf32> to vector<16x32xf32>
    %679 = arith.mulf %677, %678 : vector<16x32xf32>
    %680 = vector.broadcast %659 : vector<1x32xf32> to vector<16x32xf32>
    %681 = arith.addf %679, %680 : vector<16x32xf32>
    %c160 = arith.constant 160 : index
    %c0_235 = arith.constant 0 : index
    %682 = vector.load %arg7[%c160, %c0_235] : memref<280x128xf32, #tpu.memory_space<vmem>>, vector<32x64xf32>
    %cst_236 = arith.constant dense<0.000000e+00> : vector<16x64xf32>
    %683 = tpu.matmul %681, %682, %cst_236 {dimension_numbers = #tpu.dot_dimension_numbers<[1], [0], [0], [1], [0, 0, 1, 1], [], []>} : vector<16x32xf32>, vector<32x64xf32>, vector<16x64xf32> -> vector<16x64xf32>
    %c192_237 = arith.constant 192 : index
    %c0_238 = arith.constant 0 : index
    %684 = vector.load %arg7[%c192_237, %c0_238] : memref<280x128xf32, #tpu.memory_space<vmem>>, vector<1x64xf32>
    %685 = vector.broadcast %684 : vector<1x64xf32> to vector<16x64xf32>
    %686 = arith.addf %683, %685 : vector<16x64xf32>
    %cst_239 = arith.constant 0.000000e+00 : f32
    %687 = vector.broadcast %cst_239 : f32 to vector<16x64xf32>
    %688 = arith.maximumf %686, %687 : vector<16x64xf32>
    %c1264 = arith.constant 1264 : index
    %c0_240 = arith.constant 0 : index
    %689 = vector.load %arg6[%c1264, %c0_240] : memref<1520x32xf32, #tpu.memory_space<vmem>>, vector<64x32xf32>
    %cst_241 = arith.constant dense<0.000000e+00> : vector<16x32xf32>
    %690 = tpu.matmul %688, %689, %cst_241 {dimension_numbers = #tpu.dot_dimension_numbers<[1], [0], [0], [1], [0, 0, 1, 1], [], []>} : vector<16x64xf32>, vector<64x32xf32>, vector<16x32xf32> -> vector<16x32xf32>
    %c1328 = arith.constant 1328 : index
    %c0_242 = arith.constant 0 : index
    %691 = vector.load %arg6[%c1328, %c0_242] : memref<1520x32xf32, #tpu.memory_space<vmem>>, vector<1x32xf32>
    %692 = vector.broadcast %691 : vector<1x32xf32> to vector<16x32xf32>
    %693 = arith.addf %690, %692 : vector<16x32xf32>
    %694 = arith.addf %681, %693 : vector<16x32xf32>
    %c1368 = arith.constant 1368 : index
    %c0_243 = arith.constant 0 : index
    %695 = vector.load %arg6[%c1368, %c0_243] : memref<1520x32xf32, #tpu.memory_space<vmem>>, vector<1x32xf32>
    %c1376 = arith.constant 1376 : index
    %c0_244 = arith.constant 0 : index
    %696 = vector.load %arg6[%c1376, %c0_244] : memref<1520x32xf32, #tpu.memory_space<vmem>>, vector<1x32xf32>
    %cst_245 = arith.constant dense<0.000000e+00> : vector<16xf32>
    %697 = vector.multi_reduction <add>, %694, %cst_245 [1] : vector<16x32xf32> to vector<16xf32>
    %698 = vector.shape_cast %697 : vector<16xf32> to vector<16x1xf32>
    %cst_246 = arith.constant 3.200000e+01 : f32
    %699 = vector.broadcast %cst_246 : f32 to vector<16x1xf32>
    %700 = arith.divf %698, %699 : vector<16x1xf32>
    %701 = vector.broadcast %700 : vector<16x1xf32> to vector<16x32xf32>
    %702 = arith.subf %694, %701 : vector<16x32xf32>
    %703 = arith.mulf %702, %702 : vector<16x32xf32>
    %cst_247 = arith.constant dense<0.000000e+00> : vector<16xf32>
    %704 = vector.multi_reduction <add>, %703, %cst_247 [1] : vector<16x32xf32> to vector<16xf32>
    %705 = vector.shape_cast %704 : vector<16xf32> to vector<16x1xf32>
    %cst_248 = arith.constant 3.200000e+01 : f32
    %706 = vector.broadcast %cst_248 : f32 to vector<16x1xf32>
    %707 = arith.divf %705, %706 : vector<16x1xf32>
    %708 = vector.broadcast %700 : vector<16x1xf32> to vector<16x32xf32>
    %709 = arith.subf %694, %708 : vector<16x32xf32>
    %cst_249 = arith.constant 9.99999974E-6 : f32
    %710 = vector.broadcast %cst_249 : f32 to vector<16x1xf32>
    %711 = arith.addf %707, %710 : vector<16x1xf32>
    %712 = math.rsqrt %711 : vector<16x1xf32>
    %713 = vector.broadcast %712 : vector<16x1xf32> to vector<16x32xf32>
    %714 = arith.mulf %709, %713 : vector<16x32xf32>
    %715 = vector.broadcast %695 : vector<1x32xf32> to vector<16x32xf32>
    %716 = arith.mulf %714, %715 : vector<16x32xf32>
    %717 = vector.broadcast %696 : vector<1x32xf32> to vector<16x32xf32>
    %718 = arith.addf %716, %717 : vector<16x32xf32>
    %c240 = arith.constant 240 : index
    %c0_250 = arith.constant 0 : index
    %719 = vector.load %arg7[%c240, %c0_250] : memref<280x128xf32, #tpu.memory_space<vmem>>, vector<32x50xf32>
    %cst_251 = arith.constant dense<0.000000e+00> : vector<16x50xf32>
    %720 = tpu.matmul %718, %719, %cst_251 {dimension_numbers = #tpu.dot_dimension_numbers<[1], [0], [0], [1], [0, 0, 1, 1], [], []>} : vector<16x32xf32>, vector<32x50xf32>, vector<16x50xf32> -> vector<16x50xf32>
    %c272 = arith.constant 272 : index
    %c0_252 = arith.constant 0 : index
    %721 = vector.load %arg7[%c272, %c0_252] : memref<280x128xf32, #tpu.memory_space<vmem>>, vector<1x50xf32>
    %722 = vector.broadcast %721 : vector<1x50xf32> to vector<16x50xf32>
    %723 = arith.addf %720, %722 : vector<16x50xf32>
    %c0_253 = arith.constant 0 : index
    %c0_254 = arith.constant 0 : index
    %724 = vector.load %arg9[%c0_253, %c0_254] : memref<16x50xf32, #tpu.memory_space<vmem>>, vector<16x50xf32>
    tpu.vector_store %arg9[%c0_253, %c0_254], %723 {strides = array<i32>} : memref<16x50xf32, #tpu.memory_space<vmem>>, vector<16x50xf32>,
    return
  }
  func.func @transform_0(%arg0: i32) -> (i32, i32) {
    %c0_i32 = arith.constant 0 : i32
    %c0_i32_0 = arith.constant 0 : i32
    %c0_i32_1 = arith.constant 0 : i32
    return %c0_i32, %c0_i32_0 : i32, i32
  }
  func.func @transform_1(%arg0: i32) -> (i32, i32) {
    %c0_i32 = arith.constant 0 : i32
    %c0_i32_0 = arith.constant 0 : i32
    %c0_i32_1 = arith.constant 0 : i32
    return %c0_i32, %c0_i32_0 : i32, i32
  }
  func.func @transform_2(%arg0: i32) -> (i32, i32) {
    %c0_i32 = arith.constant 0 : i32
    %c0_i32_0 = arith.constant 0 : i32
    %c0_i32_1 = arith.constant 0 : i32
    return %c0_i32, %c0_i32_0 : i32, i32
  }
  func.func @transform_3(%arg0: i32) -> (i32, i32) {
    %c0_i32 = arith.constant 0 : i32
    %c0_i32_0 = arith.constant 0 : i32
    %c0_i32_1 = arith.constant 0 : i32
    return %c0_i32, %c0_i32_0 : i32, i32
  }
  func.func @transform_4(%arg0: i32) -> (i32, i32) {
    %c0_i32 = arith.constant 0 : i32
    %c0_i32_0 = arith.constant 0 : i32
    %c0_i32_1 = arith.constant 0 : i32
    return %c0_i32, %c0_i32_0 : i32, i32
  }
  func.func @transform_5(%arg0: i32) -> (i32, i32) {
    %c0_i32 = arith.constant 0 : i32
    %c0_i32_0 = arith.constant 0 : i32
    %c0_i32_1 = arith.constant 0 : i32
    return %c0_i32, %c0_i32_0 : i32, i32
  }
  func.func @transform_6(%arg0: i32) -> (i32, i32) {
    %c0_i32 = arith.constant 0 : i32
    %c0_i32_0 = arith.constant 0 : i32
    %c0_i32_1 = arith.constant 0 : i32
    return %c0_i32, %c0_i32_0 : i32, i32
  }
  func.func @transform_7(%arg0: i32) -> (i32, i32) {
    %c0_i32 = arith.constant 0 : i32
    %c0_i32_0 = arith.constant 0 : i32
    %c0_i32_1 = arith.constant 0 : i32
    return %c0_i32, %c0_i32_0 : i32, i32
  }
  func.func @transform_8(%arg0: i32) -> (i32, i32) {
    %c0_i32 = arith.constant 0 : i32
    %c0_i32_0 = arith.constant 0 : i32
    %c0_i32_1 = arith.constant 0 : i32
    return %c0_i32, %c0_i32_0 : i32, i32
  }
}

</mosaic_0001>

<bundles_post_ra>
// kernel: forward.1
= control target key start
LH: loop header
LB: loop body
LE: loop exit
PB: predicated region body
PF: predicated region fallthrough
CT: control target
= control target key end

     0   :  { %v40_v0 = vlaneseq  ;;  %v12604_v1 = vmov 1983009808   ;;  %v16419_v3 = vmov 0.0   ;;  %vm52_vm0 = vcmask 15360   ;;  %s16410_s0 = inlined_call_operand.vmem [shape: f32[2,336], index: 0, kind: input, shape index: {}]   ;;  %s16411_s4 = inlined_call_operand.vmem [shape: f32[384,128], index: 4, kind: input, shape index: {}]   ;;  %s16412_s5 = inlined_call_operand.vmem [shape: f32[1520,32], index: 5, kind: input, shape index: {}]   ;;  %s16413_s1 = inlined_call_operand.vmem [shape: f32[64,1], index: 1, kind: input, shape index: {}]   ;;  %s16414_s3 = inlined_call_operand.vmem [shape: f32[48,336], index: 3, kind: input, shape index: {}]   ;;  %s16415_s6 = inlined_call_operand.vmem [shape: f32[280,128], index: 6, kind: input, shape index: {}]   ;;  %s16416_s7 = inlined_call_operand.vmem [shape: f32[2,32], index: 7, kind: output, shape index: {0}]   ;;  %s16417_s2 = inlined_call_operand.vmem [shape: f32[16,16], index: 2, kind: input, shape index: {}]   ;;  %s16418_s8 = inlined_call_operand.vmem [shape: f32[16,50], index: 8, kind: output, shape index: {1}]  }
   0x1   :  { %v38_v2 = vunpack.c.l.s4 %v12604_v1  ;;  %142 = vmatprep.mubr.f32.mxu0 %v16419_v3  ;;  %v29_v4 = vld [vmem:[%s16411_s4 + $0x108] sm:$0xff]  ;;  %v28_v5 = vld [vmem:[%s16410_s0] sm:$0x3f]  ;;  %vm71_vm1 = vcmask 1041408   ;;  %v30_v12 = vld [vmem:[%s16411_s4 + $0x110] sm:$0xff]  ;;  %v12606_v60 = vmov 0  }
   0x2   :  { %v12661_v6 = vshrl.u32 %v40_v0, 7  ;;  %10953 = vmatprep.mubr.msk.f32.mxu1 %vm52_vm0, %v29_v4  ;;  %v36_v8 = vcombine.high %v28_v5, %v28_v5  ;;  %v341_v14 = vld [vmem:[%s16412_s5 + $0xf8] sm:$0xff]  ;;  %v32_v17 = vld [vmem:[%s16411_s4 + $0x120] sm:$0xff]  ;;  %v340_v18 = vld [vmem:[%s16412_s5 + $0xf0] sm:$0xff]  ;;  %12130 = vset.pattern.permute.xlu0 %v12606_v60  ;;  %vm358_vm2 = vcmask 654336   ;;  %vm735_vm3 = vcmask 408576  }
   0x3   :  { %v39_v7 = vunpack.c.0.s8 %v38_v2  ;;  %v31_v15 = vld [vmem:[%s16411_s4 + $0x118] sm:$0xff]  ;;  %v33_v19 = vld [vmem:[%s16411_s4 + $0x128] sm:$0xff]  ;;  %v324_v20 = vld [vmem:[%s16412_s5 + $0x70] sm:$0xff]  ;;  %12131 = vset.pattern.permute.xlu1 %v12606_v60  ;;  %vm579_vm10 = vcmask 261120   ;;  %vm1248_vm11 = vcmask 785408   ;;  %vm1392_vm12 = vcmask 392192  }
   0x4   :  { %v325_v16 = vld [vmem:[%s16412_s5 + $0x78] sm:$0xff]  ;;  %v339_v21 = vld [vmem:[%s16412_s5 + $0xe8] sm:$0xff]  ;;  %v34_v23 = vld [vmem:[%s16411_s4 + $0x130] sm:$0xff]  ;;  %vm7406_vm13 = vcmask 523264   ;;  %vm12607_vm14 = vmmov 0  }
   0x5   :  { %v42_v9 = vsub.s32 %v39_v7, %v12661_v6  ;;  %v323_v22 = vld [vmem:[%s16412_s5 + $0x68] sm:$0xff]  ;;  %v338_v24 = vld [vmem:[%s16412_s5 + $0xe0] sm:$0xff]  ;;  %v337_v27 = vld [vmem:[%s16412_s5 + $0xd8] sm:$0xff] }
   0x6   :  { %v322_v25 = vld [vmem:[%s16412_s5 + $0x60] sm:$0xff]  ;;  %v351_v26 = vld [vmem:[%s16412_s5 + $0x148] sm:$0xff]  ;;  %v321_v28 = vld [vmem:[%s16412_s5 + $0x58] sm:$0xff] }
   0x7   :  { %v43_v10 = vrot.slane %v28_v5, %v42_v9  ;;  %v50_v11 = vrot.slane %v36_v8, %v42_v9  ;;  %v336_v29 = vld [vmem:[%s16412_s5 + $0xd0] sm:$0xff]  ;;  %v350_v31 = vld [vmem:[%s16412_s5 + $0x140] sm:$0xff]  ;;  %v335_v32 = vld [vmem:[%s16412_s5 + $0xc8] sm:$0xff] }
   0x8   :  { %v320_v30 = vld [vmem:[%s16412_s5 + $0x50] sm:$0xff]  ;;  %v319_v33 = vld [vmem:[%s16412_s5 + $0x48] sm:$0xff]  ;;  %v334_v34 = vld [vmem:[%s16412_s5 + $0xc0] sm:$0xff] }
   0x9   :  { %v51_v13 = vcombine.high %v43_v10, %v43_v10  ;;  %10951 = vmatprep.subr.msk.mxu1 %vm71_vm1, %v50_v11  ;;  %v318_v35 = vld [vmem:[%s16412_s5 + $0x40] sm:$0xff]  ;;  %v349_v36 = vld [vmem:[%s16412_s5 + $0x138] sm:$0xff]  ;;  %v332_v39 = vld [vmem:[%s16412_s5 + $0xb0] sm:$0xff] }
   0xa   :  { %10952 = vmatpush3.msk.msra.mxu1 %vm71_vm1, %v50_v11  ;;  %v333_v37 = vld [vmem:[%s16412_s5 + $0xb8] sm:$0xff]  ;;  %v316_v40 = vld [vmem:[%s16412_s5 + $0x30] sm:$0xff]  ;;  %v331_v42 = vld [vmem:[%s16412_s5 + $0xa8] sm:$0xff] }
   0xb   :  { %9776 = vmatprep.subr.msk.mxu0 %vm71_vm1, %v51_v13  ;;  %10954 = vmatmul.mubr.msk.f32.vlgmr.msra.gmra.mxu1 %vm52_vm0, %v30_v12  ;;  %v317_v38 = vld [vmem:[%s16412_s5 + $0x38] sm:$0xff]  ;;  %v348_v41 = vld [vmem:[%s16412_s5 + $0x130] sm:$0xff]  ;;  %v315_v43 = vld [vmem:[%s16412_s5 + $0x28] sm:$0xff] }
   0xc   :  { %9777 = vmatpush1.msk.msra.mxu0 %vm71_vm1, %v43_v10  ;;  %10956 = vmatprep.mubr.msk.f32.mxu1 %vm52_vm0, %v31_v15  ;;  %v330_v44 = vld [vmem:[%s16412_s5 + $0xa0] sm:$0xff]  ;;  %v347_v45 = vld [vmem:[%s16412_s5 + $0x128] sm:$0xff]  ;;  %v329_v47 = vld [vmem:[%s16412_s5 + $0x98] sm:$0xff] }
   0xd   :  { %9778 = vmatmul.mubr.msk.f32.vlgmr.msra.gmra.mxu0 %vm52_vm0, %v29_v4  ;;  %10247 = vmatprep.subr.mxu0 %v341_v14  ;;  %v314_v46 = vld [vmem:[%s16412_s5 + $0x20] sm:$0xff]  ;;  %v313_v48 = vld [vmem:[%s16412_s5 + $0x18] sm:$0xff]  ;;  %v328_v49 = vld [vmem:[%s16412_s5 + $0x90] sm:$0xff] }
   0xe   :  { %148 = vmatprep.mubr.f32.mxu0 %v16419_v3  ;;  %10248 = vmatpush3.msra.mxu0 %v325_v16  ;;  %v346_v50 = vld [vmem:[%s16412_s5 + $0x120] sm:$0xff]  ;;  %v312_v51 = vld [vmem:[%s16412_s5 + $0x10] sm:$0xff]  ;;  %v327_v52 = vld [vmem:[%s16412_s5 + $0x88] sm:$0xff] }
   0xf   :  { %10957 = vmatmul.mubr.msk.f32.gmra.mxu1 %vm52_vm0, %v32_v17  ;;  %10249 = vmatprep.subr.mxu0 %v340_v18  ;;  %v345_v53 = vld [vmem:[%s16412_s5 + $0x118] sm:$0xff]  ;;  %v311_v54 = vld [vmem:[%s16412_s5 + $0x8] sm:$0xff]  ;;  %v326_v55 = vld [vmem:[%s16412_s5 + $0x80] sm:$0xff] }
  0x10   :  { %10959 = vmatprep.mubr.msk.f32.mxu1 %vm52_vm0, %v33_v19  ;;  %10250 = vmatpush3.msra.mxu0 %v324_v20  ;;  %v344_v56 = vld [vmem:[%s16412_s5 + $0x110] sm:$0xff]  ;;  %v310_v57 = vld [vmem:[%s16412_s5] sm:$0xff]  ;;  %v343_v58 = vld [vmem:[%s16412_s5 + $0x108] sm:$0xff] }
  0x11   :  { %9779 = vmatmul.mubr.msk.f32.gmra.mxu0 %vm52_vm0, %v30_v12  ;;  %10251 = vmatprep.subr.mxu0 %v339_v21  ;;  %v342_v59 = vld [vmem:[%s16412_s5 + $0x100] sm:$0xff]  ;;  %v683_v62 = vld [vmem:[%s16413_s1 + $0x10] sm:$0xff]  ;;  %v682_v63 = vld [vmem:[%s16413_s1 + $0x8] sm:$0xff] }
  0x12   :  { %154 = vmatprep.mubr.f32.mxu0 %v16419_v3  ;;  %10252 = vmatpush3.msra.mxu0 %v323_v22  ;;  %v681_v61 = vld [vmem:[%s16413_s1] sm:$0xff]  ;;  %v684_v1 = vld [vmem:[%s16413_s1 + $0x18] sm:$0xff]  ;;  %v686_v4 = vld [vmem:[%s16413_s1 + $0x28] sm:$0xff] }
  0x13   :  { %10960 = vmatmul.mubr.msk.f32.gmra.mxu1 %vm52_vm0, %v34_v23  ;;  %10253 = vmatprep.subr.mxu0 %v338_v24  ;;  %v685_v2 = vld [vmem:[%s16413_s1 + $0x20] sm:$0xff]  ;;  %v279_v5 = vld [vmem:[%s16414_s3 + $0x28] sm:$0xff]  ;;  %v276_v8 = vld [vmem:[%s16414_s3 + $0x10] sm:$0xff] }
  0x14   :  { %10254 = vmatpush3.msra.mxu0 %v322_v25  ;;  %10962 = vmatprep.subr.mxu1 %v351_v26  ;;  %v275_v10 = vld [vmem:[%s16414_s3 + $0x8] sm:$0xff]  ;;  %v274_v13 = vld [vmem:[%s16414_s3] sm:$0xff]  ;;  %v277_v25 = vld [vmem:[%s16414_s3 + $0x18] sm:$0xff] }
  0x15   :  { %9780 = vmatmul.mubr.msk.f32.gmra.mxu0 %vm52_vm0, %v31_v15  ;;  %10255 = vmatprep.subr.mxu0 %v337_v27  ;;  %v285_v15 = vld [vmem:[%s16414_s3 + $0x58] sm:$0xff]  ;;  %v282_v18 = vld [vmem:[%s16414_s3 + $0x40] sm:$0xff]  ;;  %v291_v27 = vld [vmem:[%s16414_s3 + $0x88] sm:$0xff] }
  0x16   :  { %160 = vmatprep.mubr.f32.mxu0 %v16419_v3  ;;  %10256 = vmatpush3.msra.mxu0 %v321_v28  ;;  %v278_v22 = vld [vmem:[%s16414_s3 + $0x20] sm:$0xff] }
  0x17   :  { %10257 = vmatprep.subr.mxu0 %v336_v29  ;;  %10963 = vmatpush3.msra.mxu1 %v351_v26  ;;  %v677_v60 = vld [vmem:[%s16412_s5 + $0x260] sm:$0x3] }
  0x18   :  { %10258 = vmatpush3.msra.mxu0 %v320_v30  ;;  %10964 = vmatprep.subr.mxu1 %v350_v31  ;;  %v288_v30 = vld [vmem:[%s16414_s3 + $0x70] sm:$0xff] }
  0x19   :  { %9781 = vmatmul.mubr.msk.f32.gmra.mxu0 %vm52_vm0, %v32_v17  ;;  %10259 = vmatprep.subr.mxu0 %v335_v32 }
  0x1a   :  { %166 = vmatprep.mubr.f32.mxu0 %v16419_v3  ;;  %10260 = vmatpush3.msra.mxu0 %v319_v33 }
  0x1b   :  { %10261 = vmatprep.subr.mxu0 %v334_v34  ;;  %10965 = vmatpush3.msra.mxu1 %v350_v31  ;;  %v281_v34 = vld [vmem:[%s16414_s3 + $0x38] sm:$0xff] }
  0x1c   :  { %10262 = vmatpush3.msra.mxu0 %v318_v35  ;;  %10966 = vmatprep.subr.mxu1 %v349_v36 }
  0x1d   :  { %9782 = vmatmul.mubr.msk.f32.gmra.mxu0 %vm52_vm0, %v33_v19  ;;  %10263 = vmatprep.subr.mxu0 %v333_v37  ;;  %v280_v37 = vld [vmem:[%s16414_s3 + $0x30] sm:$0xff] }
  0x1e   :  { %172 = vmatprep.mubr.f32.mxu0 %v16419_v3  ;;  %10264 = vmatpush3.msra.mxu0 %v317_v38 }
  0x1f   :  { %10265 = vmatprep.subr.mxu0 %v332_v39  ;;  %10967 = vmatpush3.msra.mxu1 %v349_v36 }
  0x20   :  { %10266 = vmatpush3.msra.mxu0 %v316_v40  ;;  %10968 = vmatprep.subr.mxu1 %v348_v41 }
  0x21   :  { %9783 = vmatmul.mubr.msk.f32.gmra.mxu0 %vm52_vm0, %v34_v23  ;;  %10267 = vmatprep.subr.mxu0 %v331_v42 }
  0x22   :  { %10268 = vmatpush3.msra.mxu0 %v315_v43  ;;  %10969 = vmatpush3.msra.mxu1 %v348_v41  ;;  %v284_v43 = vld [vmem:[%s16414_s3 + $0x50] sm:$0xff] }
  0x23   :  { %10269 = vmatprep.subr.mxu0 %v330_v44  ;;  %10970 = vmatprep.subr.mxu1 %v347_v45  ;;  %v283_v44 = vld [vmem:[%s16414_s3 + $0x48] sm:$0xff] }
  0x24   :  { %10270 = vmatpush3.msra.mxu0 %v314_v46  ;;  %10971 = vmatpush3.msra.mxu1 %v347_v45 }
  0x25   :  { %10271 = vmatprep.subr.mxu0 %v329_v47  ;;  %10972 = vmatprep.subr.mxu1 %v346_v50 }
  0x26   :  { %10272 = vmatpush3.msra.mxu0 %v313_v48  ;;  %10973 = vmatpush3.msra.mxu1 %v346_v50  ;;  %v286_v50 = vld [vmem:[%s16414_s3 + $0x60] sm:$0xff] }
  0x27   :  { %10273 = vmatprep.subr.mxu0 %v328_v49  ;;  %10974 = vmatprep.subr.mxu1 %v345_v53  ;;  %v287_v49 = vld [vmem:[%s16414_s3 + $0x68] sm:$0xff] }
  0x28   :  { %10274 = vmatpush3.msra.mxu0 %v312_v51  ;;  %10975 = vmatpush3.msra.mxu1 %v345_v53 }
  0x29   :  { %10275 = vmatprep.subr.mxu0 %v327_v52  ;;  %10976 = vmatprep.subr.mxu1 %v344_v56 }
  0x2a   :  { %10276 = vmatpush3.msra.mxu0 %v311_v54  ;;  %10977 = vmatpush3.msra.mxu1 %v344_v56  ;;  %v289_v56 = vld [vmem:[%s16414_s3 + $0x78] sm:$0xff] }
  0x2b   :  { %10277 = vmatprep.subr.mxu0 %v326_v55  ;;  %10978 = vmatprep.subr.mxu1 %v343_v58  ;;  %v290_v55 = vld [vmem:[%s16414_s3 + $0x80] sm:$0xff] }
  0x2c   :  { %10278 = vmatpush3.msra.mxu0 %v310_v57  ;;  %10979 = vmatpush3.msra.mxu1 %v343_v58 }
  0x2d   :  { %10980 = vmatprep.subr.mxu1 %v342_v59  ;;  %689 = vperm.xlu0 %12130, %v681_v61   ;;  %v676_v61 = vld [vmem:[%s16412_s5 + $0x258] sm:$0xff] }
  0x2e   :  { %10981 = vmatpush3.msra.mxu1 %v342_v59  ;;  %699 = vperm.xlu1 %12131, %v683_v62   ;;  %v679_v62 = vand.u32 127, %v40_v0 }
  0x2f   :  { %10991 = vmatprep.subr.msk.mxu1 %vm71_vm1, %v677_v60 }
  0x31   :  { %694 = vperm.xlu0 %12130, %v682_v63  }
  0x32   :  { %704 = vperm.xlu1 %12131, %v684_v1   ;;  %v675_v1 = vld [vmem:[%s16412_s5 + $0x250] sm:$0xff] }
  0x35   :  { %709 = vperm.xlu0 %12130, %v685_v2   ;;  %v12916_v2 = vcvt.s32.f32 %v679_v62 }
  0x36   :  { %714 = vperm.xlu1 %12131, %v686_v4  }
  0x37   :  { %16476 = vst [vmem:[#allocation2_spill] sm:$0xff] %v12916_v2 }
  0xa8   :  { %v690_v63 = vpop.permute.xlu0 %689 }
  0xa9   :  { %v700_v4 = vpop.permute.xlu1 %699  ;;  %vm717_vm4 = vcmp.eq.f32.partialorder %v12916_v2, %v690_v63 }
  0xaa   :  { %v9797_v0 = vsel %vm717_vm4, 1.0, %v16419_v3  ;;  %vm719_vm6 = vcmp.eq.f32.partialorder %v12916_v2, %v700_v4  ;;  %vm7874_vm4 = vcmask 254976  }
  0xcb   :  { %v10955_v7 = vpop.f32.mrf.mxu1 }
  0xcc   :  { %v297_v11 = vmul.f32 %v10955_v7, %v279_v5  ;;  %v674_v5 = vld [vmem:[%s16412_s5 + $0x248] sm:$0xff]  ;;  %v673_v7 = vld [vmem:[%s16412_s5 + $0x240] sm:$0xff] }
  0xcd   :  { %v144_v9 = vpop.f32.mrf.mxu0  ;;  %v245_v12 = vpop.f32.mrf.mxu1 }
  0xce   :  { %v294_v14 = vmul.f32 %v276_v8, %v245_v12  ;;  %v292_v20 = vmul.f32 %v274_v13, %v144_v9  ;;  %v695_v8 = vpop.permute.xlu0 %694  ;;  %v672_v9 = vld [vmem:[%s16412_s5 + $0x238] sm:$0xff] }
  0xcf   :  { %v146_v16 = vpop.f32.mrf.mxu0  ;;  %v10958_v17 = vpop.f32.mrf.mxu1  ;;  %vm718_vm5 = vcmp.eq.f32.partialorder %v12916_v2, %v695_v8 }
  0xd0   :  { %v293_v19 = vmul.f32 %v275_v10, %v146_v16  ;;  %10982 = vmatprep.mubr.msk.f32.mxu1 %vm358_vm2, %v294_v14  ;;  %v303_v23 = vmul.f32 %v10958_v17, %v285_v15  ;;  %v705_v10 = vpop.permute.xlu1 %704  ;;  %v9798_v13 = vsel %vm718_vm5, 1.0, %v16419_v3  ;;  %v9799_v14 = vsel %vm719_vm6, 1.0, %v16419_v3 }
  0xd1   :  { %v150_v21 = vpop.f32.mrf.mxu0  ;;  %10983 = vmatmul.mubr.msk.f32.vlgmr.msra.gmra.mxu1 %vm358_vm2, %v297_v11  ;;  %v255_v24 = vpop.f32.mrf.mxu1  ;;  %v671_v11 = vld [vmem:[%s16412_s5 + $0x230] sm:$0xff]  ;;  %vm720_vm7 = vcmp.eq.f32.partialorder %v12916_v2, %v705_v10  ;;  %vm8346_vm5 = vcmask 130048  }
  0xd2   :  { %441 = vmatprep.mubr.f32.mxu0 %v293_v19  ;;  %v300_v26 = vmul.f32 %v282_v18, %v255_v24  ;;  %v295_v32 = vmul.f32 %v277_v25, %v150_v21  ;;  %10992 = vmatpush3.msk.msra.mxu1 %vm71_vm1, %v677_v60  ;;  %v710_v12 = vpop.permute.xlu0 %709  ;;  %v9800_v16 = vsel %vm720_vm7, 1.0, %v16419_v3 }
  0xd3   :  { %v152_v28 = vpop.f32.mrf.mxu0  ;;  %442 = vmatmul.mubr.f32.vlgmr.msra.gmra.mxu0 %v292_v20  ;;  %v10961_v29 = vpop.f32.mrf.mxu1  ;;  %10993 = vmatprep.subr.mxu1 %v676_v61  ;;  %vm721_vm8 = vcmp.eq.f32.partialorder %v12916_v2, %v710_v12 }
  0xd4   :  { %v296_v31 = vmul.f32 %v278_v22, %v152_v28  ;;  %10985 = vmatprep.mubr.msk.f32.mxu1 %vm358_vm2, %v300_v26  ;;  %v309_v35 = vmul.f32 %v10961_v29, %v291_v27  ;;  %10994 = vmatpush3.msra.mxu1 %v676_v61  ;;  %v715_v15 = vpop.permute.xlu1 %714  ;;  %v9801_v17 = vsel %vm721_vm8, 1.0, %v16419_v3  ;;  %v352_v22 = vld [vmem:[%s16412_s5 + $0x150] sm:$0xff]  ;;  %v353_v27 = vld [vmem:[%s16412_s5 + $0x158] sm:$0xff] }
  0xd5   :  { %v156_v33 = vpop.f32.mrf.mxu0  ;;  %10986 = vmatmul.mubr.msk.f32.gmra.mxu1 %vm358_vm2, %v303_v23  ;;  %v265_v36 = vpop.f32.mrf.mxu1  ;;  %10995 = vmatprep.subr.mxu1 %v675_v1  ;;  %vm722_vm9 = vcmp.eq.f32.partialorder %v12916_v2, %v715_v15 }
  0xd6   :  { %446 = vmatprep.mubr.f32.mxu0 %v296_v31  ;;  %v306_v38 = vmul.f32 %v288_v30, %v265_v36  ;;  %v298_v41 = vmul.f32 %v280_v37, %v156_v33  ;;  %10996 = vmatpush3.msra.mxu1 %v675_v1  ;;  %v9802_v18 = vsel %vm722_vm9, 1.0, %v16419_v3  ;;  %v354_v36 = vld [vmem:[%s16412_s5 + $0x160] sm:$0xff] }
  0xd7   :  { %v158_v39 = vpop.f32.mrf.mxu0  ;;  %447 = vmatmul.mubr.f32.gmra.mxu0 %v295_v32  ;;  %10997 = vmatprep.subr.mxu1 %v674_v5 }
  0xd8   :  { %v299_v40 = vmul.f32 %v281_v34, %v158_v39  ;;  %10988 = vmatprep.mubr.msk.f32.mxu1 %vm358_vm2, %v306_v38  ;;  %10998 = vmatpush3.msra.mxu1 %v674_v5 }
  0xd9   :  { %v162_v42 = vpop.f32.mrf.mxu0  ;;  %10989 = vmatmul.mubr.msk.f32.gmra.mxu1 %vm358_vm2, %v309_v35  ;;  %10999 = vmatprep.subr.mxu1 %v673_v7 }
  0xda   :  { %451 = vmatprep.mubr.f32.mxu0 %v299_v40  ;;  %v301_v47 = vmul.f32 %v283_v44, %v162_v42  ;;  %11005 = vmatprep.mubr.msk.f32.mxu1 %vm735_vm3, %v9797_v0 }
  0xdb   :  { %v164_v45 = vpop.f32.mrf.mxu0  ;;  %452 = vmatmul.mubr.f32.gmra.mxu0 %v298_v41  ;;  %11000 = vmatpush3.msra.mxu1 %v673_v7 }
  0xdc   :  { %v302_v46 = vmul.f32 %v284_v43, %v164_v45  ;;  %11001 = vmatprep.subr.mxu1 %v672_v9  ;;  %v355_v43 = vld [vmem:[%s16412_s5 + $0x168] sm:$0xff] }
  0xdd   :  { %v168_v48 = vpop.f32.mrf.mxu0  ;;  %11002 = vmatpush3.msra.mxu1 %v672_v9 }
  0xde   :  { %456 = vmatprep.mubr.f32.mxu0 %v302_v46  ;;  %v304_v53 = vmul.f32 %v286_v50, %v168_v48  ;;  %11003 = vmatprep.subr.mxu1 %v671_v11 }
  0xdf   :  { %v170_v51 = vpop.f32.mrf.mxu0  ;;  %457 = vmatmul.mubr.f32.gmra.mxu0 %v301_v47  ;;  %11004 = vmatpush3.msra.mxu1 %v671_v11 }
  0xe0   :  { %v305_v52 = vmul.f32 %v287_v49, %v170_v51  ;;  %11006 = vmatmul.mubr.msk.f32.vlgmr.msra.gmra.mxu1 %vm735_vm3, %v9798_v13 }
  0xe1   :  { %v174_v54 = vpop.f32.mrf.mxu0  ;;  %11008 = vmatprep.mubr.msk.f32.mxu1 %vm735_vm3, %v9799_v14 }
  0xe2   :  { %461 = vmatprep.mubr.f32.mxu0 %v305_v52  ;;  %v307_v59 = vmul.f32 %v289_v56, %v174_v54  ;;  %v356_v52 = vld [vmem:[%s16412_s5 + $0x170] sm:$0xff] }
  0xe3   :  { %v176_v57 = vpop.f32.mrf.mxu0  ;;  %462 = vmatmul.mubr.f32.gmra.mxu0 %v304_v53 }
  0xe4   :  { %v308_v58 = vmul.f32 %v290_v55, %v176_v57  ;;  %11009 = vmatmul.mubr.msk.f32.gmra.mxu1 %vm735_vm3, %v9800_v16 }
  0xe5   :  { %11011 = vmatprep.mubr.msk.f32.mxu1 %vm735_vm3, %v9801_v17 }
  0xe6   :  { %466 = vmatprep.mubr.f32.mxu0 %v308_v58 }
  0xe7   :  { %467 = vmatmul.mubr.f32.gmra.mxu0 %v307_v59  ;;  %v357_v59 = vld [vmem:[%s16412_s5 + $0x178] sm:$0xff] }
  0xe8   :  { %11012 = vmatmul.mubr.msk.f32.gmra.mxu1 %vm735_vm3, %v9802_v18 }
 0x191   :  { %v10984_v20 = vpop.f32.mrf.mxu1 }
 0x193   :  { %v10279_v19 = vpop.f32.mrf.mxu0  ;;  %v538_v25 = vpop.f32.mrf.mxu1 }
 0x195   :  { %v10280_v21 = vpop.f32.mrf.mxu0  ;;  %v10987_v32 = vpop.f32.mrf.mxu1 }
 0x196   :  { %v10281_v23 = vadd.f32 %v10280_v21, %v10279_v19 }
 0x197   :  { %v10282_v24 = vpop.f32.mrf.mxu0  ;;  %v548_v40 = vpop.f32.mrf.mxu1 }
 0x198   :  { %v444_v26 = vadd.f32 %v10281_v23, %v352_v22 }
 0x199   :  { %v10283_v28 = vpop.f32.mrf.mxu0  ;;  %v10990_v51 = vpop.f32.mrf.mxu1 }
 0x19a   :  { %v10284_v29 = vadd.f32 %v10283_v28, %v10282_v24  ;;  %v539_v30 = vadd.f32 %v538_v25, %v444_v26 }
 0x19b   :  { %v10285_v31 = vpop.f32.mrf.mxu0  ;;  %v558_v58 = vpop.f32.mrf.mxu1 }
 0x19c   :  { %v449_v33 = vadd.f32 %v10284_v29, %v353_v27  ;;  %v580_v34 = vsel %vm579_vm10, %v539_v30, 0.0 }
 0x19d   :  { %v10286_v35 = vpop.f32.mrf.mxu0  ;;  %581 = vadd.xlane.f32.xlu0 %v580_v34 }
 0x19e   :  { %v10287_v37 = vadd.f32 %v10286_v35, %v10285_v31  ;;  %v544_v38 = vadd.f32 %v10984_v20, %v449_v33 }
 0x19f   :  { %v10288_v39 = vpop.f32.mrf.mxu0 }
 0x1a0   :  { %v454_v41 = vadd.f32 %v10287_v37, %v354_v36  ;;  %v583_v42 = vsel %vm579_vm10, %v544_v38, 0.0  ;;  %v1027_v36 = vld [vmem:[%s16415_s6 + $0x40] sm:$0xff]  ;;  %v905_v37 = vld [vmem:[%s16415_s6 + $0x18] sm:$0xff] }
 0x1a1   :  { %v10289_v44 = vpop.f32.mrf.mxu0  ;;  %584 = vadd.xlane.f32.xlu1 %v583_v42  ;;  %11031 = vmatprep.subr.mxu0 %v1027_v36  ;;  %v902_v42 = vld [vmem:[%s16415_s6] sm:$0xff] }
 0x1a2   :  { %v549_v45 = vadd.f32 %v548_v40, %v454_v41  ;;  %v10290_v46 = vadd.f32 %v10289_v44, %v10288_v39  ;;  %11014 = vmatprep.subr.mxu1 %v905_v37  ;;  %v904_v39 = vld [vmem:[%s16415_s6 + $0x10] sm:$0xff]  ;;  %11032 = vmatpush3.msra.mxu0 %v1027_v36  ;;  %v903_v40 = vld [vmem:[%s16415_s6 + $0x8] sm:$0xff] }
 0x1a3   :  { %v10291_v47 = vpop.f32.mrf.mxu0  ;;  %11015 = vmatpush3.msra.mxu1 %v905_v37  ;;  %v1025_v41 = vld [vmem:[%s16415_s6 + $0x30] sm:$0xff]  ;;  %v13029_v44 = vld [vmem:[%s16415_s6 + $0x68] sm:$0xff] }
 0x1a4   :  { %v459_v48 = vadd.f32 %v10290_v46, %v355_v43  ;;  %v586_v49 = vsel %vm579_vm10, %v549_v45, 0.0  ;;  %11016 = vmatprep.subr.mxu1 %v904_v39  ;;  %v1024_v43 = vld [vmem:[%s16415_s6 + $0x28] sm:$0xff]  ;;  %v867_v36 = vld [vmem:[%s16412_s5 + $0x1f0] sm:$0xff] }
 0x1a5   :  { %v10292_v50 = vpop.f32.mrf.mxu0  ;;  %587 = vadd.xlane.f32.xlu0 %v586_v49  ;;  %11017 = vmatpush3.msra.mxu1 %v904_v39 }
 0x1a6   :  { %v10293_v53 = vadd.f32 %v10292_v50, %v10291_v47  ;;  %v554_v54 = vadd.f32 %v10987_v32, %v459_v48  ;;  %11018 = vmatprep.subr.mxu1 %v903_v40 }
 0x1a7   :  { %v10294_v55 = vpop.f32.mrf.mxu0  ;;  %11019 = vmatpush3.msra.mxu1 %v903_v40 }
 0x1a8   :  { %v464_v56 = vadd.f32 %v10293_v53, %v356_v52  ;;  %v589_v57 = vsel %vm579_vm10, %v554_v54, 0.0  ;;  %11020 = vmatprep.subr.mxu1 %v902_v42 }
 0x1a9   :  { %v10295_v60 = vpop.f32.mrf.mxu0  ;;  %590 = vadd.xlane.f32.xlu0 %v589_v57  ;;  %11021 = vmatpush3.msra.mxu1 %v902_v42 }
 0x1aa   :  { %v559_v61 = vadd.f32 %v558_v58, %v464_v56  ;;  %v10296_v62 = vadd.f32 %v10295_v60, %v10294_v55  ;;  %11048 = vmatprep.subr.mxu1 %v13029_v44  ;;  %v567_v60 = vld [vmem:[%s16412_s5 + $0x180] sm:$0xff] }
 0x1ac   :  { %v469_v63 = vadd.f32 %v10296_v62, %v357_v59  ;;  %v592_v1 = vsel %vm579_vm10, %v559_v61, 0.0 }
 0x1ad   :  { %593 = vadd.xlane.f32.xlu1 %v592_v1 }
 0x1ae   :  { %v564_v4 = vadd.f32 %v10990_v51, %v469_v63  ;;  %v11007_v63 = vpop.f32.mrf.mxu1 }
 0x1b0   :  { %v595_v5 = vsel %vm579_vm10, %v564_v4, 0.0 }
 0x1b1   :  { %596 = vadd.xlane.f32.xlu0 %v595_v5 }
 0x226   :  { %v582_v0 = vpop.xlane.xlu0 %581 }
 0x227   :  { %v599_v7 = vmul.f32 0.03125, %v582_v0 }
 0x229   :  { %v12972_v8 = vsub.f32 %v539_v30, %v599_v7 }
 0x22a   :  { %v585_v9 = vpop.xlane.xlu1 %584 }
 0x22b   :  { %v600_v10 = vmul.f32 0.03125, %v585_v9  ;;  %v611_v11 = vmul.f32 %v12972_v8, %v12972_v8  ;;  %v568_v9 = vld [vmem:[%s16412_s5 + $0x188] sm:$0xff] }
 0x22d   :  { %v12976_v12 = vsub.f32 %v544_v38, %v600_v10  ;;  %v617_v13 = vsel %vm579_vm10, %v611_v11, 0.0  ;;  %v1026_v38 = vld [vmem:[%s16415_s6 + $0x38] sm:$0xff]  ;;  %v13045_v10 = vld [vmem:[%s16412_s5 + $0x220] ss:$0 sm:$0xff] }
 0x22e   :  { %v588_v14 = vpop.xlane.xlu0 %587  ;;  %618 = vadd.xlane.f32.xlu1 %v617_v13  ;;  %11033 = vmatprep.subr.mxu0 %v1026_v38 }
 0x22f   :  { %v601_v15 = vmul.f32 0.03125, %v588_v14  ;;  %v612_v16 = vmul.f32 %v12976_v12, %v12976_v12  ;;  %11034 = vmatpush3.msra.mxu0 %v1026_v38 }
 0x230   :  { %11035 = vmatprep.subr.mxu0 %v1025_v41 }
 0x231   :  { %v12981_v17 = vsub.f32 %v549_v45, %v601_v15  ;;  %v620_v18 = vsel %vm579_vm10, %v612_v16, 0.0  ;;  %11036 = vmatpush3.msra.mxu0 %v1025_v41  ;;  %v823_v15 = vpop.f32.mrf.mxu1  ;;  %v574_v16 = vld [vmem:[%s16412_s5 + $0x1b8] sm:$0xff]  ;;  %v576_v41 = vld [vmem:[%s16412_s5 + $0x1c8] sm:$0xff] }
 0x232   :  { %v591_v19 = vpop.xlane.xlu0 %590  ;;  %621 = vadd.xlane.f32.xlu0 %v620_v18  ;;  %11037 = vmatprep.subr.mxu0 %v1024_v43 }
 0x233   :  { %v602_v20 = vmul.f32 0.03125, %v591_v19  ;;  %v613_v21 = vmul.f32 %v12981_v17, %v12981_v17  ;;  %11038 = vmatpush3.msra.mxu0 %v1024_v43 }
 0x235   :  { %v12986_v22 = vsub.f32 %v554_v54, %v602_v20  ;;  %v623_v23 = vsel %vm579_vm10, %v613_v21, 0.0 }
 0x236   :  { %624 = vadd.xlane.f32.xlu1 %v623_v23  ;;  %v594_v24 = vpop.xlane.xlu1 %593  ;;  %v866_v23 = vld [vmem:[%s16412_s5 + $0x1e8] sm:$0xff] }
 0x237   :  { %v603_v25 = vmul.f32 0.03125, %v594_v24  ;;  %v614_v26 = vmul.f32 %v12986_v22, %v12986_v22 }
 0x239   :  { %v12991_v27 = vsub.f32 %v559_v61, %v603_v25  ;;  %v626_v28 = vsel %vm579_vm10, %v614_v26, 0.0 }
 0x23a   :  { %627 = vadd.xlane.f32.xlu0 %v626_v28  ;;  %v597_v29 = vpop.xlane.xlu0 %596  ;;  %v11010_v28 = vpop.f32.mrf.mxu1 }
 0x23b   :  { %v604_v30 = vmul.f32 0.03125, %v597_v29  ;;  %v615_v31 = vmul.f32 %v12991_v27, %v12991_v27  ;;  %v575_v29 = vld [vmem:[%s16412_s5 + $0x1c0] sm:$0xff] }
 0x23c   :  { %v833_v40 = vpop.f32.mrf.mxu1 }
 0x23d   :  { %v12996_v32 = vsub.f32 %v564_v4, %v604_v30  ;;  %v629_v33 = vsel %vm579_vm10, %v615_v31, 0.0  ;;  %v573_v4 = vld [vmem:[%s16412_s5 + $0x1b0] sm:$0xff] }
 0x23e   :  { %630 = vadd.xlane.f32.xlu1 %v629_v33  ;;  %v876_v33 = vmul.f32 %v13045_v10, %v866_v23 }
 0x23f   :  { %v616_v34 = vmul.f32 %v12996_v32, %v12996_v32 }
 0x241   :  { %v632_v35 = vsel %vm579_vm10, %v616_v34, 0.0 }
 0x242   :  { %633 = vadd.xlane.f32.xlu0 %v632_v35 }
 0x2b7   :  { %v619_v45 = vpop.xlane.xlu1 %618 }
 0x2b8   :  { %v635_v46 = vmul.f32 0.03125, %v619_v45  ;;  %v877_v45 = vmul.f32 %v13045_v10, %v867_v36 }
 0x2ba   :  { %v641_v47 = vadd.f32 1e-05, %v635_v46 }
 0x2bb   :  { %v622_v48 = vpop.xlane.xlu0 %621 }
 0x2bc   :  { %12133 = vrsqrt.f32 %v641_v47  ;;  %v636_v49 = vmul.f32 0.03125, %v622_v48  ;;  %v868_v48 = vld [vmem:[%s16412_s5 + $0x1f8] sm:$0xff] }
 0x2be   :  { %v642_v50 = vadd.f32 1e-05, %v636_v49  ;;  %v571_v49 = vld [vmem:[%s16412_s5 + $0x1a0] sm:$0xff] }
 0x2bf   :  { %v625_v51 = vpop.xlane.xlu1 %624 }
 0x2c0   :  { %12135 = vrsqrt.f32 %v642_v50  ;;  %v637_v52 = vmul.f32 0.03125, %v625_v51 }
 0x2c2   :  { %v643_v53 = vadd.f32 1e-05, %v637_v52 }
 0x2c3   :  { %v628_v54 = vpop.xlane.xlu0 %627 }
 0x2c4   :  { %12137 = vrsqrt.f32 %v643_v53  ;;  %v638_v55 = vmul.f32 0.03125, %v628_v54  ;;  %v11013_v53 = vpop.f32.mrf.mxu1  ;;  %v577_v54 = vld [vmem:[%s16412_s5 + $0x1d0] sm:$0xff] }
 0x2c6   :  { %v644_v56 = vadd.f32 1e-05, %v638_v55 }
 0x2c7   :  { %v631_v57 = vpop.xlane.xlu1 %630 }
 0x2c8   :  { %12139 = vrsqrt.f32 %v644_v56  ;;  %v639_v58 = vmul.f32 0.03125, %v631_v57  ;;  %v878_v57 = vmul.f32 %v13045_v10, %v868_v48 }
 0x2c9   :  { %v12134_v59 = vpop.eup %12133 }
 0x2ca   :  { %v645_v61 = vadd.f32 1e-05, %v639_v58  ;;  %v653_v62 = vmul.f32 %v12134_v59, %v12972_v8  ;;  %v865_v8 = vld [vmem:[%s16412_s5 + $0x1e0] sm:$0xff]  ;;  %v1129_v59 = vld [vmem:[%s16415_s6 + $0x58] sm:$0xff] }
 0x2cb   :  { %v634_v1 = vpop.xlane.xlu0 %633  ;;  %v875_v20 = vmul.f32 %v13045_v10, %v865_v8 }
 0x2cc   :  { %12141 = vrsqrt.f32 %v645_v61  ;;  %v640_v5 = vmul.f32 0.03125, %v634_v1  ;;  %v659_v0 = vmul.f32 %v653_v62, %v567_v60  ;;  %v1128_v1 = vld [vmem:[%s16415_s6 + $0x50] sm:$0xff] }
 0x2cd   :  { %v12136_v7 = vpop.eup %12135 }
 0x2ce   :  { %v654_v11 = vmul.f32 %v12136_v7, %v12976_v12  ;;  %v646_v13 = vadd.f32 1e-05, %v640_v5  ;;  %v665_v14 = vadd.f32 %v659_v0, %v573_v4  ;;  %v569_v12 = vld [vmem:[%s16412_s5 + $0x190] sm:$0xff]  ;;  %v843_v4 = vpop.f32.mrf.mxu1  ;;  %v578_v5 = vld [vmem:[%s16412_s5 + $0x1d8] sm:$0xff] }
 0x2d0   :  { %v660_v18 = vmul.f32 %v654_v11, %v568_v9  ;;  %12143 = vrsqrt.f32 %v646_v13  ;;  %v852_v19 = vadd.f32 %v823_v15, %v665_v14 }
 0x2d1   :  { %v12138_v21 = vpop.eup %12137 }
 0x2d2   :  { %v666_v24 = vadd.f32 %v660_v18, %v574_v16  ;;  %v858_v25 = vmul.f32 11.313708, %v852_v19  ;;  %v655_v26 = vmul.f32 %v12138_v21, %v12981_v17  ;;  %v570_v17 = vld [vmem:[%s16412_s5 + $0x198] sm:$0xff]  ;;  %v13143_v21 = vsub.s32 2, %v12661_v6 }
 0x2d4   :  { %v13065_v30 = vadd.f32 %v875_v20, %v858_v25  ;;  %v853_v31 = vadd.f32 %v11007_v63, %v666_v24  ;;  %v661_v34 = vmul.f32 %v655_v26, %v569_v12  ;;  %v888_v20 = vld [vmem:[%s16411_s4 + $0xc8] sm:$0xf]  ;;  %16478 = vst [vmem:[#allocation4_spill] sm:$0xff] %v13143_v21  ;;  %v13152_v24 = vsub.s32 3, %v12661_v6 }
 0x2d5   :  { %v12140_v35 = vpop.eup %12139  ;;  %v13149_v12 = vrot.slane %v888_v20, %v13143_v21  ;;  %v2558_v25 = vsub.s32 4, %v12661_v6  ;;  %v2884_v26 = vsub.s32 5, %v12661_v6 }
 0x2d6   :  { %11022 = vmatprep.mubr.msk.f32.mxu1 %vm579_vm10, %v13065_v30  ;;  %11039 = vmatprep.mubr.msk.f32.mxu0 %vm579_vm10, %v13065_v30  ;;  %v859_v37 = vmul.f32 11.313708, %v853_v31  ;;  %v667_v38 = vadd.f32 %v661_v34, %v575_v29  ;;  %v656_v39 = vmul.f32 %v12140_v35, %v12986_v22  ;;  %v1130_v22 = vld [vmem:[%s16415_s6 + $0x60] sm:$0xff]  ;;  %16479 = vst [vmem:[#allocation5_spill] sm:$0xff] %v13152_v24  ;;  %v3210_v31 = vsub.s32 6, %v12661_v6 }
 0x2d7   :  { %v13162_v29 = vld [vmem:[%s16415_s6 + $0x20] ss:$0 sm:$0xff] }
 0x2d8   :  { %v882_v42 = vadd.f32 %v876_v33, %v859_v37  ;;  %v854_v43 = vadd.f32 %v833_v40, %v667_v38  ;;  %v662_v46 = vmul.f32 %v656_v39, %v570_v17  ;;  %v3536_v33 = vsub.s32 7, %v12661_v6 }
 0x2d9   :  { %v12142_v47 = vpop.eup %12141 }
 0x2da   :  { %11023 = vmatmul.mubr.msk.f32.vlgmr.msra.gmra.mxu1 %vm579_vm10, %v882_v42  ;;  %11040 = vmatmul.mubr.msk.f32.vlgmr.msra.gmra.mxu0 %vm579_vm10, %v882_v42  ;;  %v860_v50 = vmul.f32 11.313708, %v854_v43  ;;  %v668_v51 = vadd.f32 %v662_v46, %v576_v41  ;;  %v657_v52 = vmul.f32 %v12142_v47, %v12991_v27  ;;  %v869_v27 = vld [vmem:[%s16412_s5 + $0x200] sm:$0xff]  ;;  %v13197_v46 = vrot.slane %v888_v20, %v13152_v24 }
 0x2db   :  { %11049 = vmatpush3.msra.mxu1 %v13029_v44  ;;  %v572_v44 = vld [vmem:[%s16412_s5 + $0x1a8] sm:$0xff]  ;;  %v879_v9 = vmul.f32 %v13045_v10, %v869_v27 }
 0x2dc   :  { %v883_v55 = vadd.f32 %v877_v45, %v860_v50  ;;  %v855_v56 = vadd.f32 %v11010_v28, %v668_v51  ;;  %v663_v58 = vmul.f32 %v657_v52, %v571_v49  ;;  %11050 = vmatprep.subr.mxu1 %v1130_v22  ;;  %v887_v28 = vld [vmem:[%s16411_s4 + $0xc0] sm:$0xff] }
 0x2dd   :  { %v12144_v60 = vpop.eup %12143  ;;  %11051 = vmatpush3.msra.mxu1 %v1130_v22  ;;  %v13170_v35 = vrot.slane %v887_v28, %v13143_v21  ;;  %v13173_v36 = vrot.slane %v887_v28, %v13152_v24  ;;  %v13175_v17 = vrot.slane %v887_v28, %v2558_v25  ;;  %v13177_v37 = vrot.slane %v887_v28, %v2884_v26 }
 0x2de   :  { %11025 = vmatprep.mubr.msk.f32.mxu1 %vm579_vm10, %v883_v55  ;;  %11042 = vmatprep.mubr.msk.f32.mxu0 %vm579_vm10, %v883_v55  ;;  %v861_v61 = vmul.f32 11.313708, %v855_v56  ;;  %v669_v62 = vadd.f32 %v663_v58, %v577_v54  ;;  %v658_v63 = vmul.f32 %v12144_v60, %v12996_v32  ;;  %v870_v32 = vld [vmem:[%s16412_s5 + $0x208] sm:$0xff]  ;;  %v13188_v41 = vrot.slane %v887_v28, %v3210_v31 }
 0x2df   :  { %11052 = vmatprep.subr.mxu1 %v1129_v59  ;;  %v880_v16 = vmul.f32 %v13045_v10, %v870_v32  ;;  %v13137_v10 = vsub.s32 1, %v12661_v6  ;;  %v13191_v43 = vrot.slane %v887_v28, %v3536_v33  ;;  %v9818_v33 = vld [vmem:[%s16415_s6 + $0x48] ss:$0 sm:$0xff] }
 0x2e0   :  { %v884_v0 = vadd.f32 %v878_v57, %v861_v61  ;;  %v856_v7 = vadd.f32 %v843_v4, %v669_v62  ;;  %v664_v8 = vmul.f32 %v658_v63, %v572_v44  ;;  %11053 = vmatpush3.msra.mxu1 %v1129_v59 }
 0x2e1   :  { %11054 = vmatprep.subr.mxu1 %v1128_v1  ;;  %16477 = vst [vmem:[#allocation3_spill] sm:$0xff] %v13137_v10  ;;  %v13146_v23 = vrot.slane %v888_v20, %v13137_v10 }
 0x2e2   :  { %11026 = vmatmul.mubr.msk.f32.gmra.mxu1 %vm579_vm10, %v884_v0  ;;  %11043 = vmatmul.mubr.msk.f32.gmra.mxu0 %vm579_vm10, %v884_v0  ;;  %v862_v11 = vmul.f32 11.313708, %v856_v7  ;;  %v670_v13 = vadd.f32 %v664_v8, %v578_v5 }
 0x2e3   :  { %11055 = vmatpush3.msra.mxu1 %v1128_v1 }
 0x2e4   :  { %v885_v14 = vadd.f32 %v879_v9, %v862_v11  ;;  %v857_v15 = vadd.f32 %v11013_v53, %v670_v13 }
 0x2e6   :  { %11028 = vmatprep.mubr.msk.f32.mxu1 %vm579_vm10, %v885_v14  ;;  %11045 = vmatprep.mubr.msk.f32.mxu0 %vm579_vm10, %v885_v14  ;;  %v863_v18 = vmul.f32 11.313708, %v857_v15 }
 0x2e8   :  { %v886_v19 = vadd.f32 %v880_v16, %v863_v18 }
 0x2ea   :  { %11029 = vmatmul.mubr.msk.f32.gmra.mxu1 %vm579_vm10, %v886_v19  ;;  %11046 = vmatmul.mubr.msk.f32.gmra.mxu0 %vm579_vm10, %v886_v19 }
 0x2eb   :  { %11056 = vmatprep.mubr.msk.f32.mxu1 %vm579_vm10, %v13065_v30  ;;  %v13165_v30 = vsub.s32 0, %v12661_v6  ;;  %v13186_v6 = vrot.slane %v887_v28, %v13137_v10 }
 0x2ed   :  { %16480 = vst [vmem:[#allocation6_spill] sm:$0xff] %v13165_v30  ;;  %v13183_v40 = vrot.slane %v887_v28, %v13165_v30  ;;  %v13194_v45 = vrot.slane %v888_v20, %v13165_v30 }
 0x2ee   :  { %11057 = vmatmul.mubr.msk.f32.vlgmr.msra.gmra.mxu1 %vm579_vm10, %v882_v42 }
 0x2ef   :  { %11059 = vmatprep.mubr.msk.f32.mxu1 %vm579_vm10, %v883_v55 }
 0x2f2   :  { %11060 = vmatmul.mubr.msk.f32.gmra.mxu1 %vm579_vm10, %v884_v0 }
 0x2f3   :  { %11062 = vmatprep.mubr.msk.f32.mxu1 %vm579_vm10, %v885_v14 }
 0x2f6   :  { %11063 = vmatmul.mubr.msk.f32.gmra.mxu1 %vm579_vm10, %v886_v19 }
 0x39a   :  { %v11024_v34 = vpop.f32.mrf.mxu1  ;;  %v11041_v47 = vpop.f32.mrf.mxu0 }
 0x39b   :  { %v13180_v38 = vadd.f32 %v11024_v34, %v13162_v29 }
 0x39c   :  { %v995_v39 = vpop.f32.mrf.mxu1  ;;  %v1099_v44 = vpop.f32.mrf.mxu0 }
 0x39d   :  { %v996_v42 = vadd.f32 %v13162_v29, %v995_v39  ;;  %v13201_v48 = vmul.f32 %v13170_v35, %v13180_v38  ;;  %v13205_v49 = vmul.f32 %v13173_v36, %v13180_v38  ;;  %v13209_v22 = vmul.f32 %v13175_v17, %v13180_v38 }
 0x39e   :  { %v13213_v50 = vmul.f32 %v13177_v37, %v13180_v38  ;;  %v13234_v58 = vmul.f32 %v13188_v41, %v13180_v38  ;;  %v13243_v60 = vmul.f32 %v13191_v43, %v13180_v38  ;;  %v13250_v62 = vmul.f32 %v13194_v45, %v13180_v38 }
 0x39f   :  { %16481 = vst [vmem:[#allocation7_spill] sm:$0xff] %v13209_v22  ;;  %v1242_v51 = vmul.f32 %v13183_v40, %v996_v42  ;;  %v1469_v52 = vmul.f32 %v13186_v6, %v996_v42  ;;  %v13218_v53 = vmul.f32 %v13170_v35, %v996_v42  ;;  %v13221_v54 = vmul.f32 %v13173_v36, %v996_v42 }
 0x3a0   :  { %16482 = vst [vmem:[#allocation8_spill] sm:$0xff] %v13213_v50  ;;  %v13224_v55 = vmul.f32 %v13175_v17, %v996_v42  ;;  %v13227_v56 = vmul.f32 %v13177_v37, %v996_v42  ;;  %v13230_v57 = vmul.f32 %v13188_v41, %v996_v42  ;;  %16486 = vst [vmem:[#allocation12_spill] sm:$0xff] %v13234_v58 }
 0x3a1   :  { %11077 = vmatprep.mubr.msk.f32.mxu0 %vm1248_vm11, %v1242_v51  ;;  %11098 = vmatprep.mubr.msk.f32.mxu1 %vm1248_vm11, %v1469_v52  ;;  %v13239_v59 = vmul.f32 %v13191_v43, %v996_v42  ;;  %16488 = vst [vmem:[#allocation14_spill] sm:$0xff] %v13243_v60  ;;  %v13246_v27 = vmul.f32 %v13194_v45, %v996_v42  ;;  %16490 = vst [vmem:[#allocation16_spill] sm:$0xff] %v13250_v62 }
 0x3a2   :  { %16483 = vst [vmem:[#allocation9_spill] sm:$0xff] %v13224_v55  ;;  %16484 = vst [vmem:[#allocation10_spill] sm:$0xff] %v13227_v56  ;;  %v11027_v61 = vpop.f32.mrf.mxu1  ;;  %v13253_v63 = vmul.f32 %v13146_v23, %v996_v42  ;;  %v13257_v1 = vmul.f32 %v13146_v23, %v13180_v38  ;;  %v13260_v4 = vmul.f32 %v13149_v12, %v996_v42  ;;  %v11044_v9 = vpop.f32.mrf.mxu0 }
 0x3a3   :  { %16485 = vst [vmem:[#allocation11_spill] sm:$0xff] %v13230_v57  ;;  %16487 = vst [vmem:[#allocation13_spill] sm:$0xff] %v13239_v59  ;;  %v13263_v5 = vadd.f32 %v11027_v61, %v13162_v29  ;;  %v13267_v0 = vmul.f32 %v13149_v12, %v13180_v38  ;;  %v13270_v7 = vmul.f32 %v13197_v46, %v996_v42 }
 0x3a4   :  { %16489 = vst [vmem:[#allocation15_spill] sm:$0xff] %v13246_v27  ;;  %16491 = vst [vmem:[#allocation17_spill] sm:$0xff] %v13253_v63  ;;  %v1005_v8 = vpop.f32.mrf.mxu1  ;;  %v13274_v32 = vmul.f32 %v13197_v46, %v13180_v38  ;;  %v1109_v20 = vpop.f32.mrf.mxu0 }
 0x3a5   :  { %16492 = vst [vmem:[#allocation18_spill] sm:$0xff] %v13257_v1  ;;  %16493 = vst [vmem:[#allocation19_spill] sm:$0xff] %v13260_v4  ;;  %v13277_v11 = vadd.f32 %v13162_v29, %v1005_v8  ;;  %v13281_v13 = vmul.f32 %v13170_v35, %v13263_v5  ;;  %v13285_v14 = vmul.f32 %v13173_v36, %v13263_v5 }
 0x3a6   :  { %16494 = vst [vmem:[#allocation20_spill] sm:$0xff] %v13267_v0  ;;  %16495 = vst [vmem:[#allocation21_spill] sm:$0xff] %v13270_v7  ;;  %v13289_v15 = vmul.f32 %v13175_v17, %v13263_v5  ;;  %v13293_v16 = vmul.f32 %v13177_v37, %v13263_v5  ;;  %v13317_v31 = vmul.f32 %v13188_v41, %v13263_v5 }
 0x3a7   :  { %16496 = vst [vmem:[#allocation22_spill] sm:$0xff] %v13274_v32  ;;  %16497 = vst [vmem:[#allocation23_spill] sm:$0xff] %v13285_v14  ;;  %v13297_v18 = vmul.f32 %v13170_v35, %v13277_v11  ;;  %v13301_v19 = vmul.f32 %v13173_v36, %v13277_v11  ;;  %v13305_v25 = vmul.f32 %v13175_v17, %v13277_v11 }
 0x3a8   :  { %16498 = vst [vmem:[#allocation24_spill] sm:$0xff] %v13289_v15  ;;  %16499 = vst [vmem:[#allocation25_spill] sm:$0xff] %v13293_v16  ;;  %v13309_v26 = vmul.f32 %v13177_v37, %v13277_v11  ;;  %v13313_v28 = vmul.f32 %v13188_v41, %v13277_v11  ;;  %v13324_v34 = vmul.f32 %v13191_v43, %v13277_v11 }
 0x3a9   :  { %16500 = vst [vmem:[#allocation26_spill] sm:$0xff] %v13301_v19  ;;  %16501 = vst [vmem:[#allocation27_spill] sm:$0xff] %v13305_v25  ;;  %v13328_v39 = vmul.f32 %v13191_v43, %v13263_v5  ;;  %v13332_v42 = vmul.f32 %v13194_v45, %v13277_v11  ;;  %v13336_v51 = vmul.f32 %v13194_v45, %v13263_v5 }
 0x3aa   :  { %16502 = vst [vmem:[#allocation28_spill] sm:$0xff] %v13309_v26  ;;  %16503 = vst [vmem:[#allocation29_spill] sm:$0xff] %v13313_v28  ;;  %v11030_v52 = vpop.f32.mrf.mxu1  ;;  %v11047_v61 = vpop.f32.mrf.mxu0  ;;  %v13340_v8 = vmul.f32 %v13146_v23, %v13277_v11  ;;  %v13344_v3 = vmul.f32 %v13146_v23, %v13263_v5  ;;  %v13348_v2 = vmul.f32 %v13149_v12, %v13277_v11 }
 0x3ab   :  { %16504 = vst [vmem:[#allocation30_spill] sm:$0xff] %v13317_v31  ;;  %16505 = vst [vmem:[#allocation31_spill] sm:$0xff] %v13324_v34  ;;  %v13352_v24 = vmul.f32 %v13149_v12, %v13263_v5  ;;  %v13355_v21 = vadd.f32 %v11030_v52, %v13162_v29  ;;  %v13357_v10 = vadd.f32 %v11047_v61, %v9818_v33 }
 0x3ac   :  { %16506 = vst [vmem:[#allocation32_spill] sm:$0xff] %v13328_v39  ;;  %16507 = vst [vmem:[#allocation33_spill] sm:$0xff] %v13332_v42  ;;  %v13361_v30 = vmul.f32 %v13197_v46, %v13277_v11  ;;  %v13365_v32 = vmul.f32 %v13197_v46, %v13263_v5  ;;  %v13367_v7 = vadd.f32 %v11041_v47, %v9818_v33  ;;  %v1119_v0 = vpop.f32.mrf.mxu0 }
 0x3ad   :  { %16508 = vst [vmem:[#allocation34_spill] sm:$0xff] %v13336_v51  ;;  %16509 = vst [vmem:[#allocation35_spill] sm:$0xff] %v13340_v8  ;;  %v13372_v52 = vadd.f32 %v9818_v33, %v1099_v44  ;;  %v13377_v4 = vadd.f32 %v9818_v33, %v1119_v0  ;;  %11065 = vmatprep.subr.msk.mxu0 %vm1248_vm11, %v13357_v10  ;;  %11086 = vmatprep.subr.msk.mxu1 %vm1248_vm11, %v13357_v10 }
 0x3ae   :  { %16510 = vst [vmem:[#allocation36_spill] sm:$0xff] %v13344_v3  ;;  %16511 = vst [vmem:[#allocation37_spill] sm:$0xff] %v13348_v2  ;;  %v1015_v2 = vpop.f32.mrf.mxu1  ;;  %11066 = vmatpush3.xpose.msk.msra.mxu0 %vm1248_vm11, %v13357_v10  ;;  %11087 = vmatpush3.xpose.msk.msra.mxu1 %vm1248_vm11, %v13357_v10  ;;  %v13389_v44 = vmul.f32 %v13183_v40, %v13180_v38  ;;  %v13399_v0 = vadd.f32 %v11044_v9, %v9818_v33 }
 0x3af   :  { %16512 = vst [vmem:[#allocation38_spill] sm:$0xff] %v13352_v24  ;;  %16513 = vst [vmem:[#allocation39_spill] sm:$0xff] %v13361_v30  ;;  %v9825_v24 = vld [vmem:[%s16415_s6 + $0x70] ss:$0 sm:$0xff]  ;;  %v13375_v61 = vadd.f32 %v13162_v29, %v1015_v2  ;;  %v13393_v2 = vmul.f32 %v13170_v35, %v13355_v21  ;;  %v13397_v29 = vmul.f32 %v13173_v36, %v13355_v21  ;;  %11067 = vmatprep.subr.msk.mxu0 %vm1248_vm11, %v13377_v4 }
 0x3b0   :  { %16514 = vst [vmem:[#allocation40_spill] sm:$0xff] %v13365_v32  ;;  %v11058_v47 = vpop.f32.mrf.mxu1  ;;  %11088 = vmatprep.subr.msk.mxu1 %vm1248_vm11, %v13377_v4  ;;  %v13409_v30 = vmul.f32 %v13186_v6, %v13180_v38  ;;  %v13425_v1 = vmul.f32 %v13175_v17, %v13355_v21  ;;  %v13427_v63 = vadd.f32 %v9818_v33, %v1109_v20 }
 0x3b1   :  { %16515 = vst [vmem:[#allocation41_spill] sm:$0xff] %v13397_v29  ;;  %v13401_v32 = vadd.f32 %v11058_v47, %v9825_v24  ;;  %v13413_v8 = vmul.f32 %v13170_v35, %v13375_v61  ;;  %v13417_v9 = vmul.f32 %v13173_v36, %v13375_v61  ;;  %v13421_v47 = vmul.f32 %v13175_v17, %v13375_v61 }
 0x3b2   :  { %v1203_v3 = vpop.f32.mrf.mxu1  ;;  %16518 = vst [vmem:[#allocation44_spill] sm:$0xff] %v13425_v1  ;;  %v13433_v51 = vmul.f32 %v13183_v40, %v13263_v5  ;;  %11068 = vmatpush3.xpose.msk.msra.mxu0 %vm1248_vm11, %v13377_v4  ;;  %11089 = vmatpush3.xpose.msk.msra.mxu1 %vm1248_vm11, %v13377_v4  ;;  %v13463_v39 = vmul.f32 %v13183_v40, %v13277_v11 }
 0x3b3   :  { %16516 = vst [vmem:[#allocation42_spill] sm:$0xff] %v13417_v9  ;;  %16517 = vst [vmem:[#allocation43_spill] sm:$0xff] %v13421_v47  ;;  %v13429_v38 = vadd.f32 %v9825_v24, %v1203_v3  ;;  %v13437_v42 = vmul.f32 %v13173_v36, %v13401_v32  ;;  %v13445_v20 = vmul.f32 %v13170_v35, %v13401_v32  ;;  %11069 = vmatprep.subr.msk.mxu0 %vm1248_vm11, %v13399_v0 }
 0x3b4   :  { %v11061_v62 = vpop.f32.mrf.mxu1  ;;  %v13449_v3 = vmul.f32 %v13175_v17, %v13401_v32  ;;  %v13453_v33 = vmul.f32 %v13177_v37, %v13401_v32  ;;  %11090 = vmatprep.subr.msk.mxu1 %vm1248_vm11, %v13399_v0  ;;  %v13467_v34 = vmul.f32 %v13186_v6, %v13263_v5  ;;  %v13489_v5 = vmul.f32 %v13186_v6, %v13277_v11 }
 0x3b5   :  { %v13455_v27 = vadd.f32 %v11061_v62, %v9825_v24  ;;  %v13471_v59 = vmul.f32 %v13173_v36, %v13429_v38  ;;  %v13475_v62 = vmul.f32 %v13170_v35, %v13429_v38  ;;  %v13479_v31 = vmul.f32 %v13175_v17, %v13429_v38 }
 0x3b6   :  { %16519 = vst [vmem:[#allocation45_spill] sm:$0xff] %v13449_v3  ;;  %16520 = vst [vmem:[#allocation46_spill] sm:$0xff] %v13453_v33  ;;  %v1213_v60 = vpop.f32.mrf.mxu1  ;;  %v13483_v28 = vmul.f32 %v13177_v37, %v13429_v38  ;;  %v13493_v57 = vmul.f32 %v13183_v40, %v13375_v61  ;;  %11070 = vmatpush3.xpose.msk.msra.mxu0 %vm1248_vm11, %v13399_v0  ;;  %11091 = vmatpush3.xpose.msk.msra.mxu1 %vm1248_vm11, %v13399_v0 }
 0x3b7   :  { %16521 = vst [vmem:[#allocation47_spill] sm:$0xff] %v13479_v31  ;;  %v13485_v58 = vadd.f32 %v9825_v24, %v1213_v60  ;;  %v13497_v16 = vmul.f32 %v13173_v36, %v13455_v27  ;;  %v13505_v60 = vmul.f32 %v13170_v35, %v13455_v27  ;;  %v13509_v11 = vmul.f32 %v13175_v17, %v13455_v27 }
 0x3b8   :  { %16522 = vst [vmem:[#allocation48_spill] sm:$0xff] %v13483_v28  ;;  %v11064_v26 = vpop.f32.mrf.mxu1  ;;  %v13513_v50 = vmul.f32 %v13177_v37, %v13455_v27  ;;  %11071 = vmatprep.subr.msk.mxu0 %vm1248_vm11, %v13427_v63  ;;  %11092 = vmatprep.subr.msk.mxu1 %vm1248_vm11, %v13427_v63  ;;  %v13523_v28 = vmul.f32 %v13186_v6, %v13455_v27 }
 0x3b9   :  { %16523 = vst [vmem:[#allocation49_spill] sm:$0xff] %v13509_v11  ;;  %v13515_v56 = vadd.f32 %v11064_v26, %v9825_v24  ;;  %v13527_v33 = vmul.f32 %v13186_v6, %v13375_v61  ;;  %v13531_v47 = vmul.f32 %v13173_v36, %v13485_v58  ;;  %v13535_v26 = vmul.f32 %v13170_v35, %v13485_v58 }
 0x3ba   :  { %16524 = vst [vmem:[#allocation50_spill] sm:$0xff] %v13513_v50  ;;  %v1223_v1 = vpop.f32.mrf.mxu1  ;;  %v13539_v50 = vmul.f32 %v13175_v17, %v13485_v58  ;;  %v13543_v15 = vmul.f32 %v13177_v37, %v13485_v58  ;;  %v13555_v31 = vmul.f32 %v13183_v40, %v13455_v27  ;;  %11072 = vmatpush3.xpose.msk.msra.mxu0 %vm1248_vm11, %v13427_v63 }
 0x3bb   :  { %v13545_v25 = vadd.f32 %v9825_v24, %v1223_v1  ;;  %v13549_v22 = vmul.f32 %v13186_v6, %v13515_v56  ;;  %v1464_v55 = vmul.f32 %v13183_v40, %v13515_v56  ;;  %11093 = vmatpush3.xpose.msk.msra.mxu1 %vm1248_vm11, %v13427_v63  ;;  %v13563_v24 = vmul.f32 %v13173_v36, %v13515_v56 }
 0x3bc   :  { %16525 = vst [vmem:[#allocation51_spill] sm:$0xff] %v13539_v50  ;;  %16526 = vst [vmem:[#allocation52_spill] sm:$0xff] %v13543_v15  ;;  %v13567_v1 = vmul.f32 %v13175_v17, %v13515_v56  ;;  %v13571_v15 = vmul.f32 %v13177_v37, %v13515_v56  ;;  %11073 = vmatprep.subr.msk.mxu0 %vm1248_vm11, %v13367_v7  ;;  %11094 = vmatprep.subr.msk.mxu1 %vm1248_vm11, %v13367_v7 }
 0x3bd   :  { %v13579_v3 = vmul.f32 %v13186_v6, %v13545_v25  ;;  %v1463_v29 = vmul.f32 %v13183_v40, %v13545_v25  ;;  %v13585_v50 = vmul.f32 %v13173_v36, %v13545_v25  ;;  %v13593_v9 = vmul.f32 %v13175_v17, %v13545_v25 }
 0x3be   :  { %16527 = vst [vmem:[#allocation53_spill] sm:$0xff] %v13571_v15  ;;  %v13589_v15 = vmul.f32 %v13170_v35, %v13545_v25  ;;  %v13597_v11 = vmul.f32 %v13177_v37, %v13545_v25  ;;  %v13601_v14 = vmul.f32 %v13188_v41, %v13515_v56  ;;  %v13605_v36 = vmul.f32 %v13188_v41, %v13545_v25 }
 0x3bf   :  { %16528 = vst [vmem:[#allocation54_spill] sm:$0xff] %v13593_v9  ;;  %v13609_v19 = vmul.f32 %v13188_v41, %v13455_v27  ;;  %v13613_v17 = vmul.f32 %v13177_v37, %v13375_v61  ;;  %v13617_v9 = vmul.f32 %v13188_v41, %v13485_v58  ;;  %11074 = vmatpush3.xpose.msk.msra.mxu0 %vm1248_vm11, %v13367_v7 }
 0x3c0   :  { %16529 = vst [vmem:[#allocation55_spill] sm:$0xff] %v13601_v14  ;;  %16530 = vst [vmem:[#allocation56_spill] sm:$0xff] %v13605_v36  ;;  %11095 = vmatpush3.xpose.msk.msra.mxu1 %vm1248_vm11, %v13367_v7  ;;  %v13625_v36 = vmul.f32 %v13177_v37, %v13355_v21  ;;  %11075 = vmatprep.subr.msk.mxu0 %vm1248_vm11, %v13372_v52  ;;  %v13645_v37 = vmul.f32 %v13191_v43, %v13545_v25 }
 0x3c1   :  { %16531 = vst [vmem:[#allocation57_spill] sm:$0xff] %v13609_v19  ;;  %16532 = vst [vmem:[#allocation58_spill] sm:$0xff] %v13613_v17  ;;  %v13629_v19 = vmul.f32 %v13188_v41, %v13401_v32  ;;  %v13633_v17 = vmul.f32 %v13188_v41, %v13429_v38  ;;  %11096 = vmatprep.subr.msk.mxu1 %vm1248_vm11, %v13372_v52  ;;  %v13661_v14 = vmul.f32 %v13188_v41, %v13355_v21 }
 0x3c2   :  { %16533 = vst [vmem:[#allocation59_spill] sm:$0xff] %v13617_v9  ;;  %16534 = vst [vmem:[#allocation60_spill] sm:$0xff] %v13625_v36  ;;  %v13641_v9 = vmul.f32 %v13191_v43, %v13515_v56  ;;  %v13657_v36 = vmul.f32 %v13191_v43, %v13485_v58 }
 0x3c3   :  { %16535 = vst [vmem:[#allocation61_spill] sm:$0xff] %v13629_v19  ;;  %16536 = vst [vmem:[#allocation62_spill] sm:$0xff] %v13633_v17  ;;  %v13649_v19 = vmul.f32 %v13191_v43, %v13455_v27  ;;  %v13653_v17 = vmul.f32 %v13188_v41, %v13375_v61  ;;  %v13681_v41 = vmul.f32 %v13194_v45, %v13455_v27  ;;  %11076 = vmatpush3.xpose.msk.msra.mxu0 %vm1248_vm11, %v13372_v52 }
 0x3c4   :  { %16537 = vst [vmem:[#allocation63_spill] sm:$0xff] %v13641_v9  ;;  %16538 = vst [vmem:[#allocation64_spill] sm:$0xff] %v13645_v37  ;;  %v13665_v9 = vmul.f32 %v13191_v43, %v13401_v32  ;;  %v13669_v37 = vmul.f32 %v13191_v43, %v13429_v38  ;;  %11097 = vmatpush3.xpose.msk.msra.mxu1 %vm1248_vm11, %v13372_v52  ;;  %11107 = vmatprep.subr.mxu0 %v13549_v22 }
 0x3c5   :  { %16539 = vst [vmem:[#allocation65_spill] sm:$0xff] %v13649_v19  ;;  %16540 = vst [vmem:[#allocation66_spill] sm:$0xff] %v13653_v17  ;;  %v13673_v19 = vmul.f32 %v13194_v45, %v13515_v56  ;;  %v13677_v17 = vmul.f32 %v13194_v45, %v13545_v25  ;;  %11128 = vmatprep.subr.mxu1 %v1464_v55 }
 0x3c6   :  { %16541 = vst [vmem:[#allocation67_spill] sm:$0xff] %v13665_v9  ;;  %16542 = vst [vmem:[#allocation68_spill] sm:$0xff] %v13669_v37  ;;  %v13689_v37 = vmul.f32 %v13191_v43, %v13375_v61  ;;  %v13706_v9 = vmul.f32 %v13194_v45, %v13429_v38  ;;  %11078 = vmatmul.mubr.msk.f32.vlgmr.msra.gmra.mxu0 %vm1248_vm11, %v13389_v44  ;;  %v13758_v44 = vmul.f32 %v13149_v12, %v13455_v27 }
 0x3c7   :  { %16543 = vst [vmem:[#allocation69_spill] sm:$0xff] %v13673_v19  ;;  %16544 = vst [vmem:[#allocation70_spill] sm:$0xff] %v13677_v17  ;;  %v13693_v19 = vmul.f32 %v13194_v45, %v13485_v58  ;;  %v13697_v17 = vmul.f32 %v13191_v43, %v13355_v21  ;;  %v13718_v43 = vmul.f32 %v13146_v23, %v13455_v27  ;;  %11099 = vmatmul.mubr.msk.f32.vlgmr.msra.gmra.mxu1 %vm1248_vm11, %v13409_v30 }
 0x3c8   :  { %16545 = vst [vmem:[#allocation71_spill] sm:$0xff] %v13681_v41  ;;  %16546 = vst [vmem:[#allocation72_spill] sm:$0xff] %v13689_v37  ;;  %v13702_v41 = vmul.f32 %v13194_v45, %v13401_v32  ;;  %v13710_v37 = vmul.f32 %v13146_v23, %v13515_v56  ;;  %11080 = vmatprep.mubr.msk.f32.mxu0 %vm1248_vm11, %v13463_v39  ;;  %11101 = vmatprep.mubr.msk.f32.mxu1 %vm1248_vm11, %v13489_v5 }
 0x3c9   :  { %16547 = vst [vmem:[#allocation73_spill] sm:$0xff] %v13693_v19  ;;  %16548 = vst [vmem:[#allocation74_spill] sm:$0xff] %v13697_v17  ;;  %v13714_v19 = vmul.f32 %v13146_v23, %v13545_v25  ;;  %v13722_v17 = vmul.f32 %v13194_v45, %v13375_v61  ;;  %v13750_v30 = vmul.f32 %v13149_v12, %v13515_v56  ;;  %11108 = vmatpush3.msra.mxu0 %v13549_v22 }
 0x3ca   :  { %16549 = vst [vmem:[#allocation75_spill] sm:$0xff] %v13702_v41  ;;  %16551 = vst [vmem:[#allocation77_spill] sm:$0xff] %v13718_v43  ;;  %v13726_v41 = vmul.f32 %v13146_v23, %v13485_v58  ;;  %v13738_v43 = vmul.f32 %v13146_v23, %v13401_v32  ;;  %11129 = vmatpush3.msra.mxu1 %v1464_v55  ;;  %v13763_v39 = vmul.f32 %v13146_v23, %v13375_v61 }
 0x3cb   :  { %16550 = vst [vmem:[#allocation76_spill] sm:$0xff] %v13714_v19  ;;  %16552 = vst [vmem:[#allocation78_spill] sm:$0xff] %v13722_v17  ;;  %v13734_v19 = vmul.f32 %v13194_v45, %v13355_v21  ;;  %v13742_v17 = vmul.f32 %v13146_v23, %v13429_v38  ;;  %v13754_v45 = vmul.f32 %v13149_v12, %v13545_v25  ;;  %11109 = vmatprep.subr.mxu0 %v13579_v3 }
 0x3cc   :  { %16553 = vst [vmem:[#allocation79_spill] sm:$0xff] %v13738_v43  ;;  %16555 = vst [vmem:[#allocation81_spill] sm:$0xff] %v13750_v30  ;;  %v13767_v5 = vmul.f32 %v13149_v12, %v13485_v58  ;;  %v13771_v30 = vmul.f32 %v13146_v23, %v13355_v21  ;;  %11130 = vmatprep.subr.mxu1 %v1463_v29  ;;  %v13780_v22 = vmul.f32 %v13149_v12, %v13429_v38 }
 0x3cd   :  { %16554 = vst [vmem:[#allocation80_spill] sm:$0xff] %v13742_v17  ;;  %16556 = vst [vmem:[#allocation82_spill] sm:$0xff] %v13754_v45  ;;  %v13784_v55 = vmul.f32 %v13197_v46, %v13515_v56  ;;  %11110 = vmatpush3.msra.mxu0 %v13579_v3  ;;  %11131 = vmatpush3.msra.mxu1 %v1463_v29  ;;  %v13789_v23 = vmul.f32 %v13197_v46, %v13545_v25 }
 0x3ce   :  { %16557 = vst [vmem:[#allocation83_spill] sm:$0xff] %v13758_v44  ;;  %16558 = vst [vmem:[#allocation84_spill] sm:$0xff] %v13763_v39  ;;  %v13776_v44 = vmul.f32 %v13149_v12, %v13401_v32  ;;  %11081 = vmatmul.mubr.msk.f32.gmra.mxu0 %vm1248_vm11, %v13433_v51  ;;  %11102 = vmatmul.mubr.msk.f32.gmra.mxu1 %vm1248_vm11, %v13467_v34  ;;  %v13805_v29 = vmul.f32 %v13197_v46, %v13485_v58 }
 0x3cf   :  { %16559 = vst [vmem:[#allocation85_spill] sm:$0xff] %v13767_v5  ;;  %16560 = vst [vmem:[#allocation86_spill] sm:$0xff] %v13771_v30  ;;  %v13793_v30 = vmul.f32 %v13197_v46, %v13455_v27  ;;  %v13809_v25 = vmul.f32 %v13149_v12, %v13355_v21  ;;  %v13813_v27 = vmul.f32 %v13197_v46, %v13401_v32  ;;  %11111 = vmatprep.subr.mxu0 %v13523_v28 }
 0x3d0   :  { %16561 = vst [vmem:[#allocation87_spill] sm:$0xff] %v13776_v44  ;;  %16562 = vst [vmem:[#allocation88_spill] sm:$0xff] %v13780_v22  ;;  %v13797_v44 = vmul.f32 %v13149_v12, %v13375_v61  ;;  %11132 = vmatprep.subr.mxu1 %v13555_v31  ;;  %v13819_v51 = vmul.f32 %v13197_v46, %v13429_v38  ;;  %v13823_v34 = vmul.f32 %v13197_v46, %v13375_v61 }
 0x3d1   :  { %16563 = vst [vmem:[#allocation89_spill] sm:$0xff] %v13784_v55  ;;  %16564 = vst [vmem:[#allocation90_spill] sm:$0xff] %v13789_v23  ;;  %v13827_v12 = vmul.f32 %v13197_v46, %v13355_v21  ;;  %11083 = vmatprep.mubr.msk.f32.mxu0 %vm1248_vm11, %v13493_v57  ;;  %11104 = vmatprep.mubr.msk.f32.mxu1 %vm1248_vm11, %v13527_v33  ;;  %v1668_v3 = vmul.f32 %v13186_v6, %v13485_v58 }
 0x3d2   :  { %16565 = vst [vmem:[#allocation91_spill] sm:$0xff] %v13793_v30  ;;  %16566 = vst [vmem:[#allocation92_spill] sm:$0xff] %v13797_v44  ;;  %11112 = vmatpush3.msra.mxu0 %v13523_v28  ;;  %11133 = vmatpush3.msra.mxu1 %v13555_v31  ;;  %v1247_v46 = vmul.f32 %v13183_v40, %v13355_v21  ;;  %v1474_v57 = vmul.f32 %v13186_v6, %v13355_v21 }
 0x3d3   :  { %16567 = vst [vmem:[#allocation93_spill] sm:$0xff] %v13805_v29  ;;  %16568 = vst [vmem:[#allocation94_spill] sm:$0xff] %v13809_v25  ;;  %11113 = vmatprep.subr.mxu0 %v1668_v3  ;;  %v1667_v61 = vmul.f32 %v13186_v6, %v13401_v32  ;;  %v1666_v28 = vmul.f32 %v13186_v6, %v13429_v38  ;;  %v1459_v21 = vmul.f32 %v13183_v40, %v13429_v38 }
 0x3d4   :  { %16569 = vst [vmem:[#allocation95_spill] sm:$0xff] %v13813_v27  ;;  %16570 = vst [vmem:[#allocation96_spill] sm:$0xff] %v13819_v51  ;;  %v1461_v51 = vmul.f32 %v13183_v40, %v13485_v58  ;;  %11114 = vmatpush3.msra.mxu0 %v1668_v3  ;;  %v1460_v58 = vmul.f32 %v13183_v40, %v13401_v32  ;;  %11105 = vmatmul.mubr.msk.f32.gmra.mxu1 %vm1248_vm11, %v1474_v57  ;;  %v13863_v40 = vld [vmem:[%s16411_s4 + $0x8] sm:$0xff]  ;;  %v13876_v57 = vld [vmem:[%s16411_s4 + $0x18] sm:$0xff] }
 0x3d5   :  { %16571 = vst [vmem:[#allocation97_spill] sm:$0xff] %v13823_v34  ;;  %16572 = vst [vmem:[#allocation98_spill] sm:$0xff] %v13827_v12  ;;  %11084 = vmatmul.mubr.msk.f32.gmra.mxu0 %vm1248_vm11, %v1247_v46  ;;  %11115 = vmatprep.subr.mxu0 %v1667_v61  ;;  %v13855_v31 = vmul.f32 %v13170_v35, %v13515_v56  ;;  %v13868_v35 = vld [vmem:[%s16411_s4] sm:$0xff] }
 0x3d6   :  { %11134 = vmatprep.subr.mxu1 %v1461_v51  ;;  %11116 = vmatpush3.msra.mxu0 %v1667_v61 }
 0x3d7   :  { %11135 = vmatpush3.msra.mxu1 %v1461_v51  ;;  %11117 = vmatprep.subr.mxu0 %v1666_v28 }
 0x3d8   :  { %11136 = vmatprep.subr.mxu1 %v1460_v58  ;;  %11118 = vmatpush3.msra.mxu0 %v1666_v28 }
 0x3d9   :  { %11137 = vmatpush3.msra.mxu1 %v1460_v58  ;;  %11149 = vmatprep.subr.msk.mxu0 %vm1248_vm11, %v13357_v10 }
 0x3da   :  { %11138 = vmatprep.subr.mxu1 %v1459_v21 }
 0x3db   :  { %11139 = vmatpush3.msra.mxu1 %v1459_v21  ;;  %v13882_v21 = vld [vmem:[%s16411_s4 + $0x10] sm:$0xff] }
 0x3dc   :  { %11170 = vmatprep.subr.mxu1 %v13855_v31 }
 0x486   :  { %v11079_v45 = vpop.f32.mrf.mxu0 }
 0x487   :  { %v11100_v32 = vpop.f32.mrf.mxu1 }
 0x488   :  { %v1589_v6 = vmul.f32 0.35355338, %v11100_v32 }
 0x489   :  { %v1559_v38 = vpop.f32.mrf.mxu1 }
 0x48a   :  { %v1588_v56 = vmul.f32 0.35355338, %v1559_v38  ;;  %v1595_v33 = vadd.f32 %v1589_v6, %v13863_v40 }
 0x48c   :  { %v1603_v3 = vsel %vm1392_vm12, %v1595_v33, -inf  ;;  %v1594_v46 = vadd.f32 %v1588_v56, %v13868_v35 }
 0x48d   :  { %1604 = vmax.xlane.f32.xlu0 %v1603_v3 }
 0x48e   :  { %v11103_v51 = vpop.f32.mrf.mxu1  ;;  %v1600_v28 = vsel %vm1392_vm12, %v1594_v46, -inf }
 0x48f   :  { %v1591_v61 = vmul.f32 0.35355338, %v11103_v51  ;;  %1601 = vmax.xlane.f32.xlu1 %v1600_v28  ;;  %v13890_v51 = vld [vmem:[%s16411_s4 + $0x28] sm:$0xff] }
 0x490   :  { %v1569_v58 = vpop.f32.mrf.mxu1 }
 0x491   :  { %v1590_v32 = vmul.f32 0.35355338, %v1569_v58  ;;  %v1597_v6 = vadd.f32 %v1591_v61, %v13876_v57  ;;  %v13896_v61 = vld [vmem:[%s16411_s4 + $0x20] sm:$0xff] }
 0x493   :  { %v1609_v38 = vsel %vm1392_vm12, %v1597_v6, -inf  ;;  %v1596_v56 = vadd.f32 %v1590_v32, %v13882_v21 }
 0x494   :  { %v11106_v12 = vpop.f32.mrf.mxu1  ;;  %1610 = vmax.xlane.f32.xlu0 %v1609_v38 }
 0x495   :  { %v1593_v3 = vmul.f32 0.35355338, %v11106_v12  ;;  %v1606_v34 = vsel %vm1392_vm12, %v1596_v56, -inf }
 0x496   :  { %v1579_v27 = vpop.f32.mrf.mxu1  ;;  %1607 = vmax.xlane.f32.xlu1 %v1606_v34 }
 0x497   :  { %v1592_v58 = vmul.f32 0.35355338, %v1579_v27  ;;  %v1599_v28 = vadd.f32 %v1593_v3, %v13890_v51 }
 0x499   :  { %v1615_v32 = vsel %vm1392_vm12, %v1599_v28, -inf  ;;  %v1598_v38 = vadd.f32 %v1592_v58, %v13896_v61 }
 0x49a   :  { %1616 = vmax.xlane.f32.xlu0 %v1615_v32 }
 0x49b   :  { %v1612_v25 = vsel %vm1392_vm12, %v1598_v38, -inf }
 0x49c   :  { %1613 = vmax.xlane.f32.xlu1 %v1612_v25 }
 0x516   :  { %v1605_v12 = vpop.xlane.xlu0 %1604 }
 0x517   :  { %v1619_v29 = vsub.f32 %v1595_v33, %v1605_v12 }
 0x518   :  { %v1602_v44 = vpop.xlane.xlu1 %1601 }
 0x519   :  { %v1626_v34 = vmul.f32 1.442695, %v1619_v29  ;;  %v1618_v30 = vsub.f32 %v1594_v46, %v1602_v44  ;;  %v1351_v44 = vpop.f32.mrf.mxu0 }
 0x51b   :  { %12145 = vpow2.f32 %v1626_v34  ;;  %v1624_v23 = vmul.f32 1.442695, %v1618_v30 }
 0x51d   :  { %v1611_v55 = vpop.xlane.xlu0 %1610  ;;  %12147 = vpow2.f32 %v1624_v23 }
 0x51e   :  { %v1621_v22 = vsub.f32 %v1597_v6, %v1611_v55 }
 0x51f   :  { %v1608_v27 = vpop.xlane.xlu1 %1607 }
 0x520   :  { %v1630_v3 = vmul.f32 1.442695, %v1621_v22  ;;  %v1620_v5 = vsub.f32 %v1596_v56, %v1608_v27  ;;  %v11082_v22 = vpop.f32.mrf.mxu0 }
 0x521   :  { %v1383_v27 = vmul.f32 0.35355338, %v11082_v22 }
 0x522   :  { %12149 = vpow2.f32 %v1630_v3  ;;  %v1628_v39 = vmul.f32 1.442695, %v1620_v5  ;;  %v1361_v56 = vpop.f32.mrf.mxu0 }
 0x523   :  { %v1617_v58 = vpop.xlane.xlu0 %1616  ;;  %v13917_v22 = vadd.f32 %v1383_v27, %v13876_v57 }
 0x524   :  { %12151 = vpow2.f32 %v1628_v39  ;;  %v1623_v32 = vsub.f32 %v1599_v28, %v1617_v58  ;;  %v1381_v28 = vmul.f32 0.35355338, %v11079_v45  ;;  %v11085_v34 = vpop.f32.mrf.mxu0 }
 0x525   :  { %v1614_v25 = vpop.xlane.xlu1 %1613 }
 0x526   :  { %v1634_v17 = vmul.f32 1.442695, %v1623_v32  ;;  %v1622_v33 = vsub.f32 %v1598_v38, %v1614_v25  ;;  %v1380_v38 = vmul.f32 0.35355338, %v1351_v44  ;;  %v13908_v58 = vadd.f32 %v1381_v28, %v13863_v40  ;;  %v1371_v45 = vpop.f32.mrf.mxu0 }
 0x527   :  { %v1382_v25 = vmul.f32 0.35355338, %v1361_v56  ;;  %v1402_v28 = vsel %vm1392_vm12, %v13917_v22, -inf }
 0x528   :  { %12153 = vpow2.f32 %v1634_v17  ;;  %v1632_v29 = vmul.f32 1.442695, %v1622_v33  ;;  %v12146_v46 = vpop.eup %12145  ;;  %v1396_v44 = vsel %vm1392_vm12, %v13908_v58, -inf }
 0x529   :  { %v1639_v30 = vsel %vm1392_vm12, %v12146_v46, 0.0  ;;  %v13922_v56 = vadd.f32 %v1382_v25, %v13882_v21 }
 0x52a   :  { %12155 = vpow2.f32 %v1632_v29  ;;  %v12148_v55 = vpop.eup %12147  ;;  %1640 = vadd.xlane.f32.xlu0 %v1639_v30  ;;  %v13912_v29 = vadd.f32 %v1380_v38, %v13868_v35  ;;  %v1385_v30 = vmul.f32 0.35355338, %v11085_v34 }
 0x52b   :  { %v1636_v23 = vsel %vm1392_vm12, %v12148_v55, 0.0  ;;  %v1399_v38 = vsel %vm1392_vm12, %v13922_v56, -inf }
 0x52c   :  { %1637 = vadd.xlane.f32.xlu1 %v1636_v23  ;;  %v1384_v23 = vmul.f32 0.35355338, %v1371_v45 }
 0x52e   :  { %v13932_v34 = vadd.f32 %v1384_v23, %v13896_v61 }
 0x52f   :  { %v12150_v5 = vpop.eup %12149 }
 0x530   :  { %v1645_v39 = vsel %vm1392_vm12, %v12150_v5, 0.0 }
 0x531   :  { %v12152_v6 = vpop.eup %12151  ;;  %1646 = vadd.xlane.f32.xlu0 %v1645_v39  ;;  %v1393_v39 = vsel %vm1392_vm12, %v13912_v29, -inf }
 0x532   :  { %v1642_v17 = vsel %vm1392_vm12, %v12152_v6, 0.0 }
 0x533   :  { %1643 = vadd.xlane.f32.xlu1 %v1642_v17  ;;  %v13927_v17 = vadd.f32 %v1385_v30, %v13890_v51 }
 0x535   :  { %v12154_v12 = vpop.eup %12153  ;;  %v1408_v27 = vsel %vm1392_vm12, %v13927_v17, -inf }
 0x536   :  { %v1651_v3 = vsel %vm1392_vm12, %v12154_v12, 0.0 }
 0x537   :  { %v12156_v32 = vpop.eup %12155  ;;  %1652 = vadd.xlane.f32.xlu0 %v1651_v3  ;;  %v1405_v3 = vsel %vm1392_vm12, %v13932_v34, -inf }
 0x538   :  { %v1648_v33 = vsel %vm1392_vm12, %v12156_v32, 0.0 }
 0x539   :  { %1649 = vadd.xlane.f32.xlu1 %v1648_v33 }
 0x53b   :  { %1397 = vmax.xlane.f32.xlu0 %v1396_v44 }
 0x53d   :  { %1394 = vmax.xlane.f32.xlu1 %v1393_v39 }
 0x53f   :  { %1403 = vmax.xlane.f32.xlu0 %v1402_v28 }
 0x541   :  { %1400 = vmax.xlane.f32.xlu1 %v1399_v38 }
 0x543   :  { %1409 = vmax.xlane.f32.xlu0 %v1408_v27 }
 0x545   :  { %1406 = vmax.xlane.f32.xlu1 %v1405_v3 }
 0x5b3   :  { %v1641_v25 = vpop.xlane.xlu0 %1640 }
 0x5b4   :  { %12157 = vrcp.f32 %v1641_v25 }
 0x5b5   :  { %v1638_v33 = vpop.xlane.xlu1 %1637 }
 0x5b6   :  { %12159 = vrcp.f32 %v1638_v33 }
 0x5ba   :  { %v1647_v45 = vpop.xlane.xlu0 %1646 }
 0x5bb   :  { %12161 = vrcp.f32 %v1647_v45 }
 0x5bc   :  { %v1644_v30 = vpop.xlane.xlu1 %1643 }
 0x5bd   :  { %12163 = vrcp.f32 %v1644_v30 }
 0x5c0   :  { %v1653_v44 = vpop.xlane.xlu0 %1652 }
 0x5c1   :  { %12165 = vrcp.f32 %v1653_v44  ;;  %v12158_v39 = vpop.eup %12157 }
 0x5c2   :  { %v1650_v23 = vpop.xlane.xlu1 %1649  ;;  %v1657_v27 = vmul.f32 %v12158_v39, %v12146_v46 }
 0x5c3   :  { %12167 = vrcp.f32 %v1650_v23  ;;  %v12160_v28 = vpop.eup %12159 }
 0x5c4   :  { %v1655_v38 = vmul.f32 %v12160_v28, %v12148_v55 }
 0x5c6   :  { %11119 = vmatprep.mubr.msk.f32.mxu0 %vm1392_vm12, %v1655_v38 }
 0x5c7   :  { %11120 = vmatmul.mubr.msk.f32.vlgmr.msra.gmra.mxu0 %vm1392_vm12, %v1657_v27 }
 0x5c8   :  { %v12162_v43 = vpop.eup %12161  ;;  %11150 = vmatpush3.xpose.msk.msra.mxu0 %vm1248_vm11, %v13357_v10 }
 0x5c9   :  { %11151 = vmatprep.subr.msk.mxu0 %vm1248_vm11, %v13377_v4  ;;  %v1661_v33 = vmul.f32 %v12162_v43, %v12150_v5 }
 0x5ca   :  { %v12164_v3 = vpop.eup %12163 }
 0x5cb   :  { %v1659_v25 = vmul.f32 %v12164_v3, %v12152_v6 }
 0x5cc   :  { %11152 = vmatpush3.xpose.msk.msra.mxu0 %vm1248_vm11, %v13377_v4 }
 0x5cd   :  { %11122 = vmatprep.mubr.msk.f32.mxu0 %vm1392_vm12, %v1659_v25  ;;  %11153 = vmatprep.subr.msk.mxu0 %vm1248_vm11, %v13399_v0 }
 0x5ce   :  { %11123 = vmatmul.mubr.msk.f32.gmra.mxu0 %vm1392_vm12, %v1661_v33  ;;  %v12166_v55 = vpop.eup %12165 }
 0x5cf   :  { %v1665_v30 = vmul.f32 %v12166_v55, %v12154_v12 }
 0x5d0   :  { %v12168_v46 = vpop.eup %12167  ;;  %11154 = vmatpush3.xpose.msk.msra.mxu0 %vm1248_vm11, %v13399_v0 }
 0x5d1   :  { %v1663_v45 = vmul.f32 %v12168_v46, %v12156_v32  ;;  %11155 = vmatprep.subr.msk.mxu0 %vm1248_vm11, %v13427_v63 }
 0x5d3   :  { %11125 = vmatprep.mubr.msk.f32.mxu0 %vm1392_vm12, %v1663_v45 }
 0x5d4   :  { %11126 = vmatmul.mubr.msk.f32.gmra.mxu0 %vm1392_vm12, %v1665_v30 }
 0x5d5   :  { %11161 = vmatprep.mubr.msk.f32.mxu0 %vm1248_vm11, %v13218_v53  ;;  %11156 = vmatpush3.xpose.msk.msra.mxu0 %vm1248_vm11, %v13427_v63  ;;  %v1398_v53 = vpop.xlane.xlu0 %1397 }
 0x5d6   :  { %11157 = vmatprep.subr.msk.mxu0 %vm1248_vm11, %v13367_v7 }
 0x5d9   :  { %11158 = vmatpush3.xpose.msk.msra.mxu0 %vm1248_vm11, %v13367_v7 }
 0x5da   :  { %11159 = vmatprep.subr.msk.mxu0 %vm1248_vm11, %v13372_v52 }
 0x5dd   :  { %11160 = vmatpush3.xpose.msk.msra.mxu0 %vm1248_vm11, %v13372_v52 }
 0x5de   :  { %11212 = vmatprep.subr.mxu0 %v13563_v24 }
 0x5e0   :  { %11162 = vmatmul.mubr.msk.f32.vlgmr.msra.gmra.mxu0 %vm1248_vm11, %v13201_v48 }
 0x5e1   :  { %11164 = vmatprep.mubr.msk.f32.mxu0 %vm1248_vm11, %v13297_v18  ;;  %11213 = vmatpush3.msra.mxu0 %v13563_v24 }
 0x5e2   :  { %11214 = vmatprep.subr.mxu0 %v13585_v50 }
 0x5e3   :  { %11215 = vmatpush3.msra.mxu0 %v13585_v50 }
 0x5e4   :  { %11165 = vmatmul.mubr.msk.f32.gmra.mxu0 %vm1248_vm11, %v13281_v13  ;;  %11216 = vmatprep.subr.mxu0 %v13497_v16 }
 0x5e5   :  { %11167 = vmatprep.mubr.msk.f32.mxu0 %vm1248_vm11, %v13413_v8  ;;  %11217 = vmatpush3.msra.mxu0 %v13497_v16  ;;  %v1395_v16 = vpop.xlane.xlu1 %1394  ;;  %v1404_v8 = vpop.xlane.xlu0 %1403 }
 0x5e6   :  { %11218 = vmatprep.subr.mxu0 %v13531_v47  ;;  %v1414_v24 = vsub.f32 %v13917_v22, %v1404_v8 }
 0x5e7   :  { %11219 = vmatpush3.msra.mxu0 %v13531_v47 }
 0x5e8   :  { %11168 = vmatmul.mubr.msk.f32.gmra.mxu0 %vm1248_vm11, %v13393_v2  ;;  %11220 = vmatprep.subr.mxu0 %v13437_v42  ;;  %v1423_v44 = vmul.f32 1.442695, %v1414_v24 }
 0x5e9   :  { %11221 = vmatpush3.msra.mxu0 %v13437_v42  ;;  %v1412_v42 = vsub.f32 %v13908_v58, %v1398_v53  ;;  %v1401_v2 = vpop.xlane.xlu1 %1400  ;;  %v1410_v6 = vpop.xlane.xlu0 %1409 }
 0x5ea   :  { %11222 = vmatprep.subr.mxu0 %v13471_v59  ;;  %v1413_v5 = vsub.f32 %v13922_v56, %v1401_v2  ;;  %v1416_v58 = vsub.f32 %v13927_v17, %v1410_v6 }
 0x5eb   :  { %11223 = vmatpush3.msra.mxu0 %v13471_v59  ;;  %v1411_v59 = vsub.f32 %v13912_v29, %v1395_v16  ;;  %v1419_v43 = vmul.f32 1.442695, %v1412_v42 }
 0x5ec   :  { %11233 = vmatprep.subr.msk.mxu0 %vm1248_vm11, %v13357_v10  ;;  %v1421_v38 = vmul.f32 1.442695, %v1413_v5  ;;  %v1427_v25 = vmul.f32 1.442695, %v1416_v58 }
 0x5ed   :  { %v1417_v32 = vmul.f32 1.442695, %v1411_v59  ;;  %v1407_v23 = vpop.xlane.xlu1 %1406  ;;  %12169 = vpow2.f32 %v1419_v43 }
 0x5ee   :  { %v1415_v29 = vsub.f32 %v13932_v34, %v1407_v23 }
 0x5ef   :  { %12171 = vpow2.f32 %v1417_v32 }
 0x5f0   :  { %12173 = vpow2.f32 %v1423_v44  ;;  %v1425_v45 = vmul.f32 1.442695, %v1415_v29 }
 0x5f1   :  { %12175 = vpow2.f32 %v1421_v38 }
 0x5f2   :  { %12177 = vpow2.f32 %v1427_v25 }
 0x5f3   :  { %12179 = vpow2.f32 %v1425_v45 }
 0x5fa   :  { %v14021_v44 = vpop.eup %12169 }
 0x687   :  { %v13992_v48 = vpop.f32.mrf.mxu0 }
 0x689   :  { %v13994_v50 = vpop.f32.mrf.mxu0 }
 0x68e   :  { %v13996_v13 = vpop.f32.mrf.mxu0 }
 0x690   :  { %v13998_v18 = vpop.f32.mrf.mxu0 }
 0x694   :  { %v14001_v47 = vpop.f32.mrf.mxu0 }
 0x696   :  { %v14006_v12 = vpop.f32.mrf.mxu0 }
 0x6a0   :  { %v11163_v39 = vpop.f32.mrf.mxu0 }
 0x6a1   :  { %v2022_v28 = vmul.f32 0.35355338, %v11163_v39  ;;  %v14024_v39 = vpop.eup %12171 }
 0x6a2   :  { %v1992_v27 = vpop.f32.mrf.mxu0  ;;  %v14026_v58 = vpop.eup %12173 }
 0x6a3   :  { %v2021_v22 = vmul.f32 0.35355338, %v1992_v27  ;;  %v2028_v3 = vadd.f32 %v2022_v28, %v13863_v40  ;;  %v1432_v28 = vsel %vm1392_vm12, %v14021_v44, 0.0  ;;  %v14030_v38 = vpop.eup %12175  ;;  %v1429_v27 = vsel %vm1392_vm12, %v14024_v39, 0.0 }
 0x6a4   :  { %v11166_v56 = vpop.f32.mrf.mxu0  ;;  %v1438_v29 = vsel %vm1392_vm12, %v14026_v58, 0.0 }
 0x6a5   :  { %v2024_v33 = vmul.f32 0.35355338, %v11166_v56  ;;  %v2036_v55 = vsel %vm1392_vm12, %v2028_v3, -inf  ;;  %v2027_v46 = vadd.f32 %v2021_v22, %v13868_v35  ;;  %v14036_v22 = vpop.eup %12177  ;;  %v1435_v56 = vsel %vm1392_vm12, %v14030_v38, 0.0 }
 0x6a6   :  { %2037 = vmax.xlane.f32.xlu0 %v2036_v55  ;;  %v2002_v17 = vpop.f32.mrf.mxu0  ;;  %v14040_v25 = vpop.eup %12179 }
 0x6a7   :  { %v2023_v30 = vmul.f32 0.35355338, %v2002_v17  ;;  %v2033_v53 = vsel %vm1392_vm12, %v2027_v46, -inf  ;;  %v2030_v34 = vadd.f32 %v2024_v33, %v13876_v57  ;;  %v1444_v33 = vsel %vm1392_vm12, %v14036_v22, 0.0 }
 0x6a8   :  { %v11169_v16 = vpop.f32.mrf.mxu0  ;;  %2034 = vmax.xlane.f32.xlu1 %v2033_v53  ;;  %v1441_v55 = vsel %vm1392_vm12, %v14040_v25, 0.0 }
 0x6a9   :  { %v2026_v8 = vmul.f32 0.35355338, %v11169_v16  ;;  %v2042_v42 = vsel %vm1392_vm12, %v2030_v34, -inf  ;;  %v2029_v2 = vadd.f32 %v2023_v30, %v13882_v21 }
 0x6aa   :  { %2043 = vmax.xlane.f32.xlu0 %v2042_v42  ;;  %v2012_v59 = vpop.f32.mrf.mxu0 }
 0x6ab   :  { %v2025_v24 = vmul.f32 0.35355338, %v2012_v59  ;;  %v2039_v43 = vsel %vm1392_vm12, %v2029_v2, -inf  ;;  %v2032_v5 = vadd.f32 %v2026_v8, %v13890_v51 }
 0x6ac   :  { %2040 = vmax.xlane.f32.xlu1 %v2039_v43 }
 0x6ad   :  { %v2048_v6 = vsel %vm1392_vm12, %v2032_v5, -inf  ;;  %v2031_v32 = vadd.f32 %v2025_v24, %v13896_v61 }
 0x6ae   :  { %2049 = vmax.xlane.f32.xlu0 %v2048_v6 }
 0x6af   :  { %v2045_v23 = vsel %vm1392_vm12, %v2031_v32, -inf }
 0x6b0   :  { %2046 = vmax.xlane.f32.xlu1 %v2045_v23 }
 0x6b2   :  { %1433 = vadd.xlane.f32.xlu0 %v1432_v28 }
 0x6b4   :  { %1430 = vadd.xlane.f32.xlu1 %v1429_v27 }
 0x6b6   :  { %1439 = vadd.xlane.f32.xlu0 %v1438_v29 }
 0x6b8   :  { %1436 = vadd.xlane.f32.xlu1 %v1435_v56 }
 0x6ba   :  { %1445 = vadd.xlane.f32.xlu0 %v1444_v33 }
 0x6bc   :  { %1442 = vadd.xlane.f32.xlu1 %v1441_v55 }
 0x72f   :  { %v2038_v17 = vpop.xlane.xlu0 %2037 }
 0x730   :  { %v2052_v45 = vsub.f32 %v2028_v3, %v2038_v17 }
 0x731   :  { %v2035_v30 = vpop.xlane.xlu1 %2034 }
 0x732   :  { %v2059_v53 = vmul.f32 1.442695, %v2052_v45  ;;  %v2051_v16 = vsub.f32 %v2027_v46, %v2035_v30 }
 0x733   :  { %v2044_v8 = vpop.xlane.xlu0 %2043 }
 0x734   :  { %12181 = vpow2.f32 %v2059_v53  ;;  %v2057_v42 = vmul.f32 1.442695, %v2051_v16  ;;  %v2054_v59 = vsub.f32 %v2030_v34, %v2044_v8 }
 0x735   :  { %v2041_v24 = vpop.xlane.xlu1 %2040 }
 0x736   :  { %12183 = vpow2.f32 %v2057_v42  ;;  %v2063_v43 = vmul.f32 1.442695, %v2054_v59  ;;  %v2053_v6 = vsub.f32 %v2029_v2, %v2041_v24 }
 0x737   :  { %v2050_v23 = vpop.xlane.xlu0 %2049 }
 0x738   :  { %12185 = vpow2.f32 %v2063_v43  ;;  %v2061_v28 = vmul.f32 1.442695, %v2053_v6  ;;  %v2056_v27 = vsub.f32 %v2032_v5, %v2050_v23 }
 0x739   :  { %v2047_v29 = vpop.xlane.xlu1 %2046 }
 0x73a   :  { %12187 = vpow2.f32 %v2061_v28  ;;  %v2067_v56 = vmul.f32 1.442695, %v2056_v27  ;;  %v2055_v33 = vsub.f32 %v2031_v32, %v2047_v29 }
 0x73b   :  { %v1434_v3 = vpop.xlane.xlu0 %1433 }
 0x73c   :  { %12189 = vpow2.f32 %v2067_v56  ;;  %v2065_v55 = vmul.f32 1.442695, %v2055_v33 }
 0x73d   :  { %12191 = vrcp.f32 %v1434_v3  ;;  %v1431_v46 = vpop.xlane.xlu1 %1430 }
 0x73e   :  { %12193 = vpow2.f32 %v2065_v55 }
 0x73f   :  { %12195 = vrcp.f32 %v1431_v46  ;;  %v1440_v34 = vpop.xlane.xlu0 %1439 }
 0x740   :  { %12197 = vrcp.f32 %v1440_v34 }
 0x741   :  { %v14046_v17 = vpop.eup %12181  ;;  %v1437_v2 = vpop.xlane.xlu1 %1436 }
 0x742   :  { %12199 = vrcp.f32 %v1437_v2  ;;  %v2072_v5 = vsel %vm1392_vm12, %v14046_v17, 0.0 }
 0x743   :  { %v14050_v45 = vpop.eup %12183  ;;  %2073 = vadd.xlane.f32.xlu0 %v2072_v5  ;;  %v1446_v32 = vpop.xlane.xlu0 %1445 }
 0x744   :  { %v2069_v30 = vsel %vm1392_vm12, %v14050_v45, 0.0  ;;  %12201 = vrcp.f32 %v1446_v32 }
 0x745   :  { %v14054_v53 = vpop.eup %12185  ;;  %2070 = vadd.xlane.f32.xlu1 %v2069_v30  ;;  %v1443_v16 = vpop.xlane.xlu1 %1442 }
 0x746   :  { %12203 = vrcp.f32 %v1443_v16  ;;  %v2078_v8 = vsel %vm1392_vm12, %v14054_v53, 0.0 }
 0x747   :  { %v12188_v42 = vpop.eup %12187  ;;  %2079 = vadd.xlane.f32.xlu0 %v2078_v8 }
 0x748   :  { %v2075_v59 = vsel %vm1392_vm12, %v12188_v42, 0.0 }
 0x749   :  { %v14059_v24 = vpop.eup %12189  ;;  %2076 = vadd.xlane.f32.xlu1 %v2075_v59  ;;  %v16575_v59 = vld [vmem:[#allocation23_spill] sm:$0xff] }
 0x74a   :  { %v12192_v43 = vpop.eup %12191  ;;  %v2084_v6 = vsel %vm1392_vm12, %v14059_v24, 0.0 }
 0x74b   :  { %v12194_v23 = vpop.eup %12193  ;;  %2085 = vadd.xlane.f32.xlu0 %v2084_v6  ;;  %v1450_v33 = vmul.f32 %v12192_v43, %v14021_v44  ;;  %v16577_v43 = vld [vmem:[#allocation42_spill] sm:$0xff]  ;;  %v16579_v6 = vld [vmem:[#allocation41_spill] sm:$0xff] }
 0x74c   :  { %v12196_v28 = vpop.eup %12195  ;;  %v2081_v27 = vsel %vm1392_vm12, %v12194_v23, 0.0 }
 0x74d   :  { %2082 = vadd.xlane.f32.xlu1 %v2081_v27  ;;  %v1448_v29 = vmul.f32 %v12196_v28, %v14024_v39  ;;  %v12198_v56 = vpop.eup %12197 }
 0x74e   :  { %v1454_v34 = vmul.f32 %v12198_v56, %v14026_v58 }
 0x74f   :  { %v12200_v3 = vpop.eup %12199  ;;  %11140 = vmatprep.mubr.msk.f32.mxu1 %vm1392_vm12, %v1448_v29 }
 0x750   :  { %11141 = vmatmul.mubr.msk.f32.vlgmr.msra.gmra.mxu1 %vm1392_vm12, %v1450_v33  ;;  %v1452_v55 = vmul.f32 %v12200_v3, %v14030_v38 }
 0x751   :  { %11171 = vmatpush3.msra.mxu1 %v13855_v31  ;;  %v12202_v46 = vpop.eup %12201 }
 0x752   :  { %11172 = vmatprep.subr.mxu1 %v13589_v15  ;;  %11143 = vmatprep.mubr.msk.f32.mxu1 %vm1392_vm12, %v1452_v55  ;;  %v1458_v31 = vmul.f32 %v12202_v46, %v14036_v22 }
 0x753   :  { %v12204_v39 = vpop.eup %12203  ;;  %11173 = vmatpush3.msra.mxu1 %v13589_v15 }
 0x754   :  { %11174 = vmatprep.subr.mxu1 %v13505_v60  ;;  %11144 = vmatmul.mubr.msk.f32.gmra.mxu1 %vm1392_vm12, %v1454_v34  ;;  %v1456_v44 = vmul.f32 %v12204_v39, %v14040_v25 }
 0x755   :  { %11175 = vmatpush3.msra.mxu1 %v13505_v60 }
 0x756   :  { %11176 = vmatprep.subr.mxu1 %v13535_v26  ;;  %11146 = vmatprep.mubr.msk.f32.mxu1 %vm1392_vm12, %v1456_v44 }
 0x757   :  { %11177 = vmatpush3.msra.mxu1 %v13535_v26 }
 0x758   :  { %11178 = vmatprep.subr.mxu1 %v13445_v20  ;;  %11147 = vmatmul.mubr.msk.f32.gmra.mxu1 %vm1392_vm12, %v1458_v31 }
 0x759   :  { %11179 = vmatpush3.msra.mxu1 %v13445_v20 }
 0x75a   :  { %11180 = vmatprep.subr.mxu1 %v13475_v62 }
 0x75b   :  { %11181 = vmatpush3.msra.mxu1 %v13475_v62 }
 0x75c   :  { %11191 = vmatprep.subr.msk.mxu1 %vm1248_vm11, %v13357_v10 }
 0x7cc   :  { %v2074_v15 = vpop.xlane.xlu0 %2073 }
 0x7cd   :  { %12205 = vrcp.f32 %v2074_v15 }
 0x7ce   :  { %v2071_v60 = vpop.xlane.xlu1 %2070 }
 0x7cf   :  { %12207 = vrcp.f32 %v2071_v60 }
 0x7d0   :  { %v2080_v58 = vpop.xlane.xlu0 %2079 }
 0x7d1   :  { %12209 = vrcp.f32 %v2080_v58 }
 0x7d2   :  { %v2077_v26 = vpop.xlane.xlu1 %2076 }
 0x7d3   :  { %12211 = vrcp.f32 %v2077_v26 }
 0x7d4   :  { %v2086_v38 = vpop.xlane.xlu0 %2085 }
 0x7d5   :  { %12213 = vrcp.f32 %v2086_v38 }
 0x7d6   :  { %v2083_v22 = vpop.xlane.xlu1 %2082 }
 0x7d7   :  { %12215 = vrcp.f32 %v2083_v22 }
 0x7da   :  { %v12206_v20 = vpop.eup %12205 }
 0x7db   :  { %v2090_v62 = vmul.f32 %v12206_v20, %v14046_v17 }
 0x7dc   :  { %v12208_v25 = vpop.eup %12207 }
 0x7dd   :  { %v2088_v2 = vmul.f32 %v12208_v25, %v14050_v45 }
 0x7de   :  { %v12210_v5 = vpop.eup %12209 }
 0x7df   :  { %11182 = vmatprep.mubr.msk.f32.mxu1 %vm1392_vm12, %v2088_v2  ;;  %v2094_v16 = vmul.f32 %v12210_v5, %v14054_v53  ;;  %v16574_v53 = vld [vmem:[#allocation54_spill] sm:$0xff] }
 0x7e0   :  { %v12212_v32 = vpop.eup %12211  ;;  %11183 = vmatmul.mubr.msk.f32.vlgmr.msra.gmra.mxu1 %vm1392_vm12, %v2090_v62 }
 0x7e1   :  { %11192 = vmatpush3.xpose.msk.msra.mxu1 %vm1248_vm11, %v13357_v10  ;;  %v2092_v30 = vmul.f32 %v12212_v32, %v12188_v42 }
 0x7e2   :  { %11193 = vmatprep.subr.msk.mxu1 %vm1248_vm11, %v13377_v4  ;;  %v12214_v8 = vpop.eup %12213 }
 0x7e3   :  { %11185 = vmatprep.mubr.msk.f32.mxu1 %vm1392_vm12, %v2092_v30  ;;  %v2098_v42 = vmul.f32 %v12214_v8, %v14059_v24  ;;  %v16576_v24 = vld [vmem:[#allocation49_spill] sm:$0xff] }
 0x7e4   :  { %v12216_v45 = vpop.eup %12215  ;;  %11186 = vmatmul.mubr.msk.f32.gmra.mxu1 %vm1392_vm12, %v2094_v16 }
 0x7e5   :  { %11194 = vmatpush3.xpose.msk.msra.mxu1 %vm1248_vm11, %v13377_v4  ;;  %v2096_v17 = vmul.f32 %v12216_v45, %v12194_v23  ;;  %v16581_v23 = vld [vmem:[#allocation47_spill] sm:$0xff] }
 0x7e6   :  { %11195 = vmatprep.subr.msk.mxu1 %vm1248_vm11, %v13399_v0 }
 0x7e7   :  { %11188 = vmatprep.mubr.msk.f32.mxu1 %vm1392_vm12, %v2096_v17 }
 0x7e8   :  { %11189 = vmatmul.mubr.msk.f32.gmra.mxu1 %vm1392_vm12, %v2098_v42 }
 0x7e9   :  { %11196 = vmatpush3.xpose.msk.msra.mxu1 %vm1248_vm11, %v13399_v0  ;;  %11203 = vmatprep.mubr.msk.f32.mxu1 %vm1248_vm11, %v13221_v54  ;;  %v16573_v54 = vld [vmem:[#allocation26_spill] sm:$0xff] }
 0x7ea   :  { %11197 = vmatprep.subr.msk.mxu1 %vm1248_vm11, %v13427_v63 }
 0x7ed   :  { %11198 = vmatpush3.xpose.msk.msra.mxu1 %vm1248_vm11, %v13427_v63 }
 0x7ee   :  { %11199 = vmatprep.subr.msk.mxu1 %vm1248_vm11, %v13367_v7 }
 0x7f1   :  { %11200 = vmatpush3.xpose.msk.msra.mxu1 %vm1248_vm11, %v13367_v7 }
 0x7f2   :  { %11201 = vmatprep.subr.msk.mxu1 %vm1248_vm11, %v13372_v52 }
 0x7f5   :  { %11202 = vmatpush3.xpose.msk.msra.mxu1 %vm1248_vm11, %v13372_v52 }
 0x7f6   :  { %11254 = vmatprep.subr.mxu1 %v13567_v1 }
 0x7f8   :  { %11204 = vmatmul.mubr.msk.f32.vlgmr.msra.gmra.mxu1 %vm1248_vm11, %v13205_v49  ;;  %v16578_v49 = vld [vmem:[#allocation51_spill] sm:$0xff] }
 0x7f9   :  { %11206 = vmatprep.mubr.msk.f32.mxu1 %vm1248_vm11, %v16573_v54  ;;  %11255 = vmatpush3.msra.mxu1 %v13567_v1  ;;  %v16580_v1 = vld [vmem:[#allocation45_spill] sm:$0xff] }
 0x7fa   :  { %11256 = vmatprep.subr.mxu1 %v16574_v53 }
 0x7fb   :  { %11257 = vmatpush3.msra.mxu1 %v16574_v53 }
 0x7fc   :  { %11207 = vmatmul.mubr.msk.f32.gmra.mxu1 %vm1248_vm11, %v16575_v59  ;;  %11258 = vmatprep.subr.mxu1 %v16576_v24 }
 0x7fd   :  { %11209 = vmatprep.mubr.msk.f32.mxu1 %vm1248_vm11, %v16577_v43  ;;  %11259 = vmatpush3.msra.mxu1 %v16576_v24 }
 0x7fe   :  { %11260 = vmatprep.subr.mxu1 %v16578_v49 }
 0x7ff   :  { %11261 = vmatpush3.msra.mxu1 %v16578_v49 }
 0x800   :  { %11210 = vmatmul.mubr.msk.f32.gmra.mxu1 %vm1248_vm11, %v16579_v6  ;;  %11262 = vmatprep.subr.mxu1 %v16580_v1 }
 0x801   :  { %11263 = vmatpush3.msra.mxu1 %v16580_v1 }
 0x802   :  { %11264 = vmatprep.subr.mxu1 %v16581_v23 }
 0x803   :  { %11265 = vmatpush3.msra.mxu1 %v16581_v23 }
 0x804   :  { %11275 = vmatprep.subr.msk.mxu1 %vm1248_vm11, %v13357_v10 }
 0x810   :  { %v11142_v28 = vpop.f32.mrf.mxu1 }
 0x811   :  { %v1875_v55 = vadd.f32 %v11142_v28, %v13992_v48 }
 0x812   :  { %v14147_v27 = vpop.f32.mrf.mxu1 }
 0x814   :  { %v11145_v29 = vpop.f32.mrf.mxu1 }
 0x815   :  { %v1885_v44 = vadd.f32 %v11145_v29, %v13996_v13 }
 0x816   :  { %v14149_v56 = vpop.f32.mrf.mxu1 }
 0x818   :  { %v11148_v33 = vpop.f32.mrf.mxu1 }
 0x819   :  { %v1895_v58 = vadd.f32 %v11148_v33, %v14001_v47 }
 0x81a   :  { %v14151_v3 = vpop.f32.mrf.mxu1 }
 0x8a0   :  { %v11184_v46 = vpop.f32.mrf.mxu1 }
 0x8a1   :  { %v14154_v34 = vadd.f32 %v11184_v46, %v1875_v55 }
 0x8a2   :  { %v14156_v39 = vpop.f32.mrf.mxu1 }
 0x8a4   :  { %v11187_v31 = vpop.f32.mrf.mxu1 }
 0x8a5   :  { %v14159_v15 = vadd.f32 %v11187_v31, %v1885_v44 }
 0x8a6   :  { %v14161_v60 = vpop.f32.mrf.mxu1 }
 0x8a8   :  { %v11190_v26 = vpop.f32.mrf.mxu1 }
 0x8a9   :  { %v14164_v38 = vadd.f32 %v11190_v26, %v1895_v58 }
 0x8aa   :  { %v14166_v22 = vpop.f32.mrf.mxu1 }
 0x8b8   :  { %v11205_v48 = vpop.f32.mrf.mxu1 }
 0x8b9   :  { %v2348_v20 = vmul.f32 0.35355338, %v11205_v48 }
 0x8ba   :  { %v2318_v25 = vpop.f32.mrf.mxu1 }
 0x8bb   :  { %v2347_v2 = vmul.f32 0.35355338, %v2318_v25  ;;  %v2354_v62 = vadd.f32 %v2348_v20, %v13863_v40 }
 0x8bc   :  { %v11208_v5 = vpop.f32.mrf.mxu1 }
 0x8bd   :  { %v2350_v13 = vmul.f32 0.35355338, %v11208_v5  ;;  %v2362_v32 = vsel %vm1392_vm12, %v2354_v62, -inf  ;;  %v2353_v30 = vadd.f32 %v2347_v2, %v13868_v35 }
 0x8be   :  { %2363 = vmax.xlane.f32.xlu0 %v2362_v32  ;;  %v2328_v16 = vpop.f32.mrf.mxu1 }
 0x8bf   :  { %v2349_v47 = vmul.f32 0.35355338, %v2328_v16  ;;  %v2359_v8 = vsel %vm1392_vm12, %v2353_v30, -inf  ;;  %v2356_v45 = vadd.f32 %v2350_v13, %v13876_v57 }
 0x8c0   :  { %2360 = vmax.xlane.f32.xlu1 %v2359_v8  ;;  %v11211_v17 = vpop.f32.mrf.mxu1 }
 0x8c1   :  { %v2352_v42 = vmul.f32 0.35355338, %v11211_v17  ;;  %v2368_v54 = vsel %vm1392_vm12, %v2356_v45, -inf  ;;  %v2355_v40 = vadd.f32 %v2349_v47, %v13882_v21 }
 0x8c2   :  { %2369 = vmax.xlane.f32.xlu0 %v2368_v54  ;;  %v2338_v53 = vpop.f32.mrf.mxu1 }
 0x8c3   :  { %v2351_v59 = vmul.f32 0.35355338, %v2338_v53  ;;  %v2365_v24 = vsel %vm1392_vm12, %v2355_v40, -inf  ;;  %v2358_v35 = vadd.f32 %v2352_v42, %v13890_v51 }
 0x8c4   :  { %2366 = vmax.xlane.f32.xlu1 %v2365_v24 }
 0x8c5   :  { %v2374_v43 = vsel %vm1392_vm12, %v2358_v35, -inf  ;;  %v2357_v49 = vadd.f32 %v2351_v59, %v13896_v61 }
 0x8c6   :  { %2375 = vmax.xlane.f32.xlu0 %v2374_v43 }
 0x8c7   :  { %v2371_v57 = vsel %vm1392_vm12, %v2357_v49, -inf }
 0x8c8   :  { %2372 = vmax.xlane.f32.xlu1 %v2371_v57 }
 0x947   :  { %v2364_v6 = vpop.xlane.xlu0 %2363 }
 0x948   :  { %v2378_v1 = vsub.f32 %v2354_v62, %v2364_v6 }
 0x949   :  { %v2361_v23 = vpop.xlane.xlu1 %2360 }
 0x94a   :  { %v2385_v21 = vmul.f32 1.442695, %v2378_v1  ;;  %v2377_v28 = vsub.f32 %v2353_v30, %v2361_v23 }
 0x94b   :  { %v2370_v29 = vpop.xlane.xlu0 %2369 }
 0x94c   :  { %12217 = vpow2.f32 %v2385_v21  ;;  %v2383_v33 = vmul.f32 1.442695, %v2377_v28  ;;  %v2380_v55 = vsub.f32 %v2356_v45, %v2370_v29 }
 0x94d   :  { %v2367_v46 = vpop.xlane.xlu1 %2366 }
 0x94e   :  { %12219 = vpow2.f32 %v2383_v33  ;;  %v2389_v51 = vmul.f32 1.442695, %v2380_v55  ;;  %v2379_v44 = vsub.f32 %v2355_v40, %v2367_v46 }
 0x94f   :  { %v2376_v31 = vpop.xlane.xlu0 %2375 }
 0x950   :  { %12221 = vpow2.f32 %v2389_v51  ;;  %v2387_v61 = vmul.f32 1.442695, %v2379_v44  ;;  %v2382_v58 = vsub.f32 %v2358_v35, %v2376_v31  ;;  %v16582_v51 = vld [vmem:[#allocation9_spill] sm:$0xff]  ;;  %v16584_v31 = vld [vmem:[#allocation7_spill] sm:$0xff] }
 0x951   :  { %v2373_v26 = vpop.xlane.xlu1 %2372  ;;  %v16583_v44 = vld [vmem:[#allocation53_spill] sm:$0xff] }
 0x952   :  { %12223 = vpow2.f32 %v2387_v61  ;;  %v2393_v48 = vmul.f32 1.442695, %v2382_v58  ;;  %v2381_v20 = vsub.f32 %v2357_v49, %v2373_v26  ;;  %v16585_v61 = vld [vmem:[#allocation27_spill] sm:$0xff]  ;;  %v16586_v58 = vld [vmem:[#allocation24_spill] sm:$0xff]  ;;  %v16587_v26 = vld [vmem:[#allocation50_spill] sm:$0xff] }
 0x954   :  { %12225 = vpow2.f32 %v2393_v48  ;;  %v2391_v25 = vmul.f32 1.442695, %v2381_v20  ;;  %v16588_v48 = vld [vmem:[#allocation43_spill] sm:$0xff]  ;;  %v16589_v20 = vld [vmem:[#allocation52_spill] sm:$0xff] }
 0x956   :  { %12227 = vpow2.f32 %v2391_v25  ;;  %v16590_v25 = vld [vmem:[#allocation44_spill] sm:$0xff] }
 0x959   :  { %v12218_v2 = vpop.eup %12217 }
 0x95a   :  { %v2398_v62 = vsel %vm1392_vm12, %v12218_v2, 0.0 }
 0x95b   :  { %v12220_v5 = vpop.eup %12219  ;;  %2399 = vadd.xlane.f32.xlu0 %v2398_v62 }
 0x95c   :  { %v2395_v13 = vsel %vm1392_vm12, %v12220_v5, 0.0 }
 0x95d   :  { %v12222_v32 = vpop.eup %12221  ;;  %2396 = vadd.xlane.f32.xlu1 %v2395_v13 }
 0x95e   :  { %v2404_v30 = vsel %vm1392_vm12, %v12222_v32, 0.0 }
 0x95f   :  { %v12224_v16 = vpop.eup %12223  ;;  %2405 = vadd.xlane.f32.xlu0 %v2404_v30 }
 0x960   :  { %v2401_v47 = vsel %vm1392_vm12, %v12224_v16, 0.0 }
 0x961   :  { %v12226_v8 = vpop.eup %12225  ;;  %2402 = vadd.xlane.f32.xlu1 %v2401_v47 }
 0x962   :  { %v2410_v45 = vsel %vm1392_vm12, %v12226_v8, 0.0 }
 0x963   :  { %v12228_v17 = vpop.eup %12227  ;;  %2411 = vadd.xlane.f32.xlu0 %v2410_v45 }
 0x964   :  { %v2407_v42 = vsel %vm1392_vm12, %v12228_v17, 0.0 }
 0x965   :  { %2408 = vadd.xlane.f32.xlu1 %v2407_v42 }
 0x9e4   :  { %v2400_v54 = vpop.xlane.xlu0 %2399 }
 0x9e5   :  { %12229 = vrcp.f32 %v2400_v54 }
 0x9e6   :  { %v2397_v40 = vpop.xlane.xlu1 %2396 }
 0x9e7   :  { %12231 = vrcp.f32 %v2397_v40 }
 0x9e8   :  { %v2406_v53 = vpop.xlane.xlu0 %2405 }
 0x9e9   :  { %12233 = vrcp.f32 %v2406_v53 }
 0x9ea   :  { %v2403_v59 = vpop.xlane.xlu1 %2402 }
 0x9eb   :  { %12235 = vrcp.f32 %v2403_v59  ;;  %v14269_v59 = vld [vmem:[%s16411_s4 + $0x48] sm:$0xff] }
 0x9ec   :  { %v2412_v24 = vpop.xlane.xlu0 %2411 }
 0x9ed   :  { %12237 = vrcp.f32 %v2412_v24 }
 0x9ee   :  { %v2409_v35 = vpop.xlane.xlu1 %2408 }
 0x9ef   :  { %12239 = vrcp.f32 %v2409_v35 }
 0x9f2   :  { %v12230_v43 = vpop.eup %12229 }
 0x9f3   :  { %v2416_v6 = vmul.f32 %v12230_v43, %v12218_v2  ;;  %v16591_v2 = vld [vmem:[#allocation46_spill] sm:$0xff] }
 0x9f4   :  { %v12232_v49 = vpop.eup %12231 }
 0x9f5   :  { %v2414_v57 = vmul.f32 %v12232_v49, %v12220_v5 }
 0x9f6   :  { %v12234_v1 = vpop.eup %12233 }
 0x9f7   :  { %11224 = vmatprep.mubr.msk.f32.mxu0 %vm1392_vm12, %v2414_v57  ;;  %v2420_v28 = vmul.f32 %v12234_v1, %v12222_v32  ;;  %v14276_v57 = vld [vmem:[%s16411_s4 + $0x40] sm:$0xff] }
 0x9f8   :  { %v12236_v23 = vpop.eup %12235  ;;  %11225 = vmatmul.mubr.msk.f32.vlgmr.msra.gmra.mxu0 %vm1392_vm12, %v2416_v6 }
 0x9f9   :  { %11234 = vmatpush3.xpose.msk.msra.mxu0 %vm1248_vm11, %v13357_v10  ;;  %v2418_v21 = vmul.f32 %v12236_v23, %v12224_v16 }
 0x9fa   :  { %11235 = vmatprep.subr.msk.mxu0 %vm1248_vm11, %v13377_v4  ;;  %v12238_v29 = vpop.eup %12237 }
 0x9fb   :  { %11227 = vmatprep.mubr.msk.f32.mxu0 %vm1392_vm12, %v2418_v21  ;;  %v2424_v46 = vmul.f32 %v12238_v29, %v12226_v8 }
 0x9fc   :  { %v12240_v33 = vpop.eup %12239  ;;  %11228 = vmatmul.mubr.msk.f32.gmra.mxu0 %vm1392_vm12, %v2420_v28  ;;  %v14283_v28 = vld [vmem:[%s16411_s4 + $0x58] sm:$0xff] }
 0x9fd   :  { %11236 = vmatpush3.xpose.msk.msra.mxu0 %vm1248_vm11, %v13377_v4  ;;  %v2422_v55 = vmul.f32 %v12240_v33, %v12228_v17 }
 0x9fe   :  { %11237 = vmatprep.subr.msk.mxu0 %vm1248_vm11, %v13399_v0 }
 0x9ff   :  { %11230 = vmatprep.mubr.msk.f32.mxu0 %vm1392_vm12, %v2422_v55 }
 0xa00   :  { %11231 = vmatmul.mubr.msk.f32.gmra.mxu0 %vm1392_vm12, %v2424_v46 }
 0xa01   :  { %11238 = vmatpush3.xpose.msk.msra.mxu0 %vm1248_vm11, %v13399_v0  ;;  %11245 = vmatprep.mubr.msk.f32.mxu0 %vm1248_vm11, %v16582_v51  ;;  %v14290_v51 = vld [vmem:[%s16411_s4 + $0x50] sm:$0xff] }
 0xa02   :  { %11239 = vmatprep.subr.msk.mxu0 %vm1248_vm11, %v13427_v63 }
 0xa05   :  { %11240 = vmatpush3.xpose.msk.msra.mxu0 %vm1248_vm11, %v13427_v63 }
 0xa06   :  { %11241 = vmatprep.subr.msk.mxu0 %vm1248_vm11, %v13367_v7 }
 0xa09   :  { %11242 = vmatpush3.xpose.msk.msra.mxu0 %vm1248_vm11, %v13367_v7 }
 0xa0a   :  { %11243 = vmatprep.subr.msk.mxu0 %vm1248_vm11, %v13372_v52 }
 0xa0d   :  { %11244 = vmatpush3.xpose.msk.msra.mxu0 %vm1248_vm11, %v13372_v52 }
 0xa0e   :  { %11296 = vmatprep.subr.mxu0 %v16583_v44 }
 0xa10   :  { %11246 = vmatmul.mubr.msk.f32.vlgmr.msra.gmra.mxu0 %vm1248_vm11, %v16584_v31 }
 0xa11   :  { %11248 = vmatprep.mubr.msk.f32.mxu0 %vm1248_vm11, %v16585_v61  ;;  %11297 = vmatpush3.msra.mxu0 %v16583_v44 }
 0xa12   :  { %11298 = vmatprep.subr.mxu0 %v13597_v11 }
 0xa13   :  { %11299 = vmatpush3.msra.mxu0 %v13597_v11  ;;  %v16592_v11 = vld [vmem:[#allocation48_spill] sm:$0xff] }
 0xa14   :  { %11249 = vmatmul.mubr.msk.f32.gmra.mxu0 %vm1248_vm11, %v16586_v58  ;;  %11300 = vmatprep.subr.mxu0 %v16587_v26 }
 0xa15   :  { %11251 = vmatprep.mubr.msk.f32.mxu0 %vm1248_vm11, %v16588_v48  ;;  %11301 = vmatpush3.msra.mxu0 %v16587_v26 }
 0xa16   :  { %11302 = vmatprep.subr.mxu0 %v16589_v20 }
 0xa17   :  { %11303 = vmatpush3.msra.mxu0 %v16589_v20 }
 0xa18   :  { %11252 = vmatmul.mubr.msk.f32.gmra.mxu0 %vm1248_vm11, %v16590_v25  ;;  %11304 = vmatprep.subr.mxu0 %v16591_v2 }
 0xa19   :  { %11305 = vmatpush3.msra.mxu0 %v16591_v2 }
 0xa1a   :  { %11306 = vmatprep.subr.mxu0 %v16592_v11 }
 0xa1b   :  { %11307 = vmatpush3.msra.mxu0 %v16592_v11 }
 0xa1c   :  { %11317 = vmatprep.subr.msk.mxu0 %vm1248_vm11, %v13357_v10 }
 0xab8   :  { %v11226_v62 = vpop.f32.mrf.mxu0 }
 0xab9   :  { %v14241_v5 = vadd.f32 %v11226_v62, %v14154_v34  ;;  %v14258_v34 = vld [vmem:[%s16411_s4 + $0x38] sm:$0xff] }
 0xaba   :  { %v14243_v13 = vpop.f32.mrf.mxu0 }
 0xabc   :  { %v11229_v32 = vpop.f32.mrf.mxu0 }
 0xabd   :  { %v14246_v30 = vadd.f32 %v11229_v32, %v14159_v15  ;;  %v14263_v15 = vld [vmem:[%s16411_s4 + $0x30] sm:$0xff] }
 0xabe   :  { %v14248_v16 = vpop.f32.mrf.mxu0 }
 0xac0   :  { %v11232_v47 = vpop.f32.mrf.mxu0 }
 0xac1   :  { %v14251_v8 = vadd.f32 %v11232_v47, %v14164_v38 }
 0xac2   :  { %v14253_v45 = vpop.f32.mrf.mxu0 }
 0xad0   :  { %v11247_v17 = vpop.f32.mrf.mxu0 }
 0xad1   :  { %v2680_v42 = vmul.f32 0.35355338, %v11247_v17 }
 0xad2   :  { %v2650_v54 = vpop.f32.mrf.mxu0 }
 0xad3   :  { %v2679_v40 = vmul.f32 0.35355338, %v2650_v54  ;;  %v2686_v53 = vadd.f32 %v2680_v42, %v14258_v34 }
 0xad4   :  { %v11250_v38 = vpop.f32.mrf.mxu0 }
 0xad5   :  { %v2682_v24 = vmul.f32 0.35355338, %v11250_v38  ;;  %v2694_v35 = vsel %vm1392_vm12, %v2686_v53, -inf  ;;  %v2685_v43 = vadd.f32 %v2679_v40, %v14263_v15 }
 0xad6   :  { %2695 = vmax.xlane.f32.xlu0 %v2694_v35  ;;  %v2660_v49 = vpop.f32.mrf.mxu0 }
 0xad7   :  { %v2681_v6 = vmul.f32 0.35355338, %v2660_v49  ;;  %v2691_v1 = vsel %vm1392_vm12, %v2685_v43, -inf  ;;  %v2688_v23 = vadd.f32 %v2682_v24, %v14269_v59 }
 0xad8   :  { %2692 = vmax.xlane.f32.xlu1 %v2691_v1  ;;  %v11253_v21 = vpop.f32.mrf.mxu0 }
 0xad9   :  { %v2684_v29 = vmul.f32 0.35355338, %v11253_v21  ;;  %v2700_v33 = vsel %vm1392_vm12, %v2688_v23, -inf  ;;  %v2687_v55 = vadd.f32 %v2681_v6, %v14276_v57 }
 0xada   :  { %2701 = vmax.xlane.f32.xlu0 %v2700_v33  ;;  %v2670_v46 = vpop.f32.mrf.mxu0 }
 0xadb   :  { %v2683_v44 = vmul.f32 0.35355338, %v2670_v46  ;;  %v2697_v31 = vsel %vm1392_vm12, %v2687_v55, -inf  ;;  %v2690_v61 = vadd.f32 %v2684_v29, %v14283_v28 }
 0xadc   :  { %2698 = vmax.xlane.f32.xlu1 %v2697_v31 }
 0xadd   :  { %v2706_v58 = vsel %vm1392_vm12, %v2690_v61, -inf  ;;  %v2689_v26 = vadd.f32 %v2683_v44, %v14290_v51 }
 0xade   :  { %2707 = vmax.xlane.f32.xlu0 %v2706_v58 }
 0xadf   :  { %v2703_v48 = vsel %vm1392_vm12, %v2689_v26, -inf }
 0xae0   :  { %2704 = vmax.xlane.f32.xlu1 %v2703_v48 }
 0xb5f   :  { %v2696_v20 = vpop.xlane.xlu0 %2695 }
 0xb60   :  { %v2710_v25 = vsub.f32 %v2686_v53, %v2696_v20 }
 0xb61   :  { %v2693_v2 = vpop.xlane.xlu1 %2692 }
 0xb62   :  { %v2717_v11 = vmul.f32 1.442695, %v2710_v25  ;;  %v2709_v62 = vsub.f32 %v2685_v43, %v2693_v2 }
 0xb63   :  { %v2702_v32 = vpop.xlane.xlu0 %2701 }
 0xb64   :  { %12241 = vpow2.f32 %v2717_v11  ;;  %v2715_v47 = vmul.f32 1.442695, %v2709_v62  ;;  %v2712_v17 = vsub.f32 %v2688_v23, %v2702_v32 }
 0xb65   :  { %v2699_v42 = vpop.xlane.xlu1 %2698 }
 0xb66   :  { %12243 = vpow2.f32 %v2715_v47  ;;  %v2721_v54 = vmul.f32 1.442695, %v2712_v17  ;;  %v2711_v40 = vsub.f32 %v2687_v55, %v2699_v42 }
 0xb67   :  { %v2708_v38 = vpop.xlane.xlu0 %2707 }
 0xb68   :  { %12245 = vpow2.f32 %v2721_v54  ;;  %v2719_v24 = vmul.f32 1.442695, %v2711_v40  ;;  %v2714_v35 = vsub.f32 %v2690_v61, %v2708_v38 }
 0xb69   :  { %v2705_v49 = vpop.xlane.xlu1 %2704 }
 0xb6a   :  { %12247 = vpow2.f32 %v2719_v24  ;;  %v2725_v6 = vmul.f32 1.442695, %v2714_v35  ;;  %v2713_v1 = vsub.f32 %v2689_v26, %v2705_v49 }
 0xb6c   :  { %12249 = vpow2.f32 %v2725_v6  ;;  %v2723_v53 = vmul.f32 1.442695, %v2713_v1 }
 0xb6e   :  { %12251 = vpow2.f32 %v2723_v53  ;;  %v16593_v53 = vld [vmem:[#allocation10_spill] sm:$0xff] }
 0xb71   :  { %v12242_v43 = vpop.eup %12241 }
 0xb72   :  { %v2730_v21 = vsel %vm1392_vm12, %v12242_v43, 0.0 }
 0xb73   :  { %v12244_v29 = vpop.eup %12243  ;;  %2731 = vadd.xlane.f32.xlu0 %v2730_v21  ;;  %v16595_v21 = vld [vmem:[#allocation8_spill] sm:$0xff] }
 0xb74   :  { %v2727_v23 = vsel %vm1392_vm12, %v12244_v29, 0.0 }
 0xb75   :  { %v12246_v33 = vpop.eup %12245  ;;  %2728 = vadd.xlane.f32.xlu1 %v2727_v23  ;;  %v16597_v23 = vld [vmem:[#allocation56_spill] sm:$0xff] }
 0xb76   :  { %v2736_v55 = vsel %vm1392_vm12, %v12246_v33, 0.0 }
 0xb77   :  { %v12248_v46 = vpop.eup %12247  ;;  %2737 = vadd.xlane.f32.xlu0 %v2736_v55  ;;  %v16599_v55 = vld [vmem:[#allocation57_spill] sm:$0xff] }
 0xb78   :  { %v2733_v44 = vsel %vm1392_vm12, %v12248_v46, 0.0 }
 0xb79   :  { %v12250_v31 = vpop.eup %12249  ;;  %2734 = vadd.xlane.f32.xlu1 %v2733_v44  ;;  %v16601_v44 = vld [vmem:[#allocation59_spill] sm:$0xff] }
 0xb7a   :  { %v2742_v61 = vsel %vm1392_vm12, %v12250_v31, 0.0 }
 0xb7b   :  { %v12252_v58 = vpop.eup %12251  ;;  %2743 = vadd.xlane.f32.xlu0 %v2742_v61  ;;  %v16603_v61 = vld [vmem:[#allocation61_spill] sm:$0xff] }
 0xb7c   :  { %v2739_v26 = vsel %vm1392_vm12, %v12252_v58, 0.0 }
 0xb7d   :  { %2740 = vadd.xlane.f32.xlu1 %v2739_v26 }
 0xbfc   :  { %v2732_v48 = vpop.xlane.xlu0 %2731 }
 0xbfd   :  { %12253 = vrcp.f32 %v2732_v48 }
 0xbfe   :  { %v2729_v20 = vpop.xlane.xlu1 %2728 }
 0xbff   :  { %12255 = vrcp.f32 %v2729_v20 }
 0xc00   :  { %v2738_v25 = vpop.xlane.xlu0 %2737 }
 0xc01   :  { %12257 = vrcp.f32 %v2738_v25 }
 0xc02   :  { %v2735_v2 = vpop.xlane.xlu1 %2734 }
 0xc03   :  { %12259 = vrcp.f32 %v2735_v2 }
 0xc04   :  { %v2744_v11 = vpop.xlane.xlu0 %2743 }
 0xc05   :  { %12261 = vrcp.f32 %v2744_v11 }
 0xc06   :  { %v2741_v62 = vpop.xlane.xlu1 %2740 }
 0xc07   :  { %12263 = vrcp.f32 %v2741_v62 }
 0xc0a   :  { %v12254_v32 = vpop.eup %12253 }
 0xc0b   :  { %v2748_v42 = vmul.f32 %v12254_v32, %v12242_v43  ;;  %v16594_v43 = vld [vmem:[#allocation55_spill] sm:$0xff] }
 0xc0c   :  { %v12256_v47 = vpop.eup %12255 }
 0xc0d   :  { %v2746_v17 = vmul.f32 %v12256_v47, %v12244_v29  ;;  %v16596_v29 = vld [vmem:[#allocation28_spill] sm:$0xff] }
 0xc0e   :  { %v12258_v54 = vpop.eup %12257 }
 0xc0f   :  { %11266 = vmatprep.mubr.msk.f32.mxu1 %vm1392_vm12, %v2746_v17  ;;  %v2752_v24 = vmul.f32 %v12258_v54, %v12246_v33  ;;  %v16598_v33 = vld [vmem:[#allocation25_spill] sm:$0xff] }
 0xc10   :  { %v12260_v40 = vpop.eup %12259  ;;  %11267 = vmatmul.mubr.msk.f32.vlgmr.msra.gmra.mxu1 %vm1392_vm12, %v2748_v42 }
 0xc11   :  { %11276 = vmatpush3.xpose.msk.msra.mxu1 %vm1248_vm11, %v13357_v10  ;;  %v2750_v38 = vmul.f32 %v12260_v40, %v12248_v46  ;;  %v16600_v46 = vld [vmem:[#allocation58_spill] sm:$0xff] }
 0xc12   :  { %11277 = vmatprep.subr.msk.mxu1 %vm1248_vm11, %v13377_v4  ;;  %v12262_v35 = vpop.eup %12261 }
 0xc13   :  { %11269 = vmatprep.mubr.msk.f32.mxu1 %vm1392_vm12, %v2750_v38  ;;  %v2756_v1 = vmul.f32 %v12262_v35, %v12250_v31  ;;  %v16602_v31 = vld [vmem:[#allocation60_spill] sm:$0xff] }
 0xc14   :  { %v12264_v49 = vpop.eup %12263  ;;  %11270 = vmatmul.mubr.msk.f32.gmra.mxu1 %vm1392_vm12, %v2752_v24 }
 0xc15   :  { %11278 = vmatpush3.xpose.msk.msra.mxu1 %vm1248_vm11, %v13377_v4  ;;  %v2754_v6 = vmul.f32 %v12264_v49, %v12252_v58  ;;  %v16604_v58 = vld [vmem:[#allocation62_spill] sm:$0xff] }
 0xc16   :  { %11279 = vmatprep.subr.msk.mxu1 %vm1248_vm11, %v13399_v0 }
 0xc17   :  { %11272 = vmatprep.mubr.msk.f32.mxu1 %vm1392_vm12, %v2754_v6 }
 0xc18   :  { %11273 = vmatmul.mubr.msk.f32.gmra.mxu1 %vm1392_vm12, %v2756_v1 }
 0xc19   :  { %11280 = vmatpush3.xpose.msk.msra.mxu1 %vm1248_vm11, %v13399_v0  ;;  %11287 = vmatprep.mubr.msk.f32.mxu1 %vm1248_vm11, %v16593_v53 }
 0xc1a   :  { %11281 = vmatprep.subr.msk.mxu1 %vm1248_vm11, %v13427_v63 }
 0xc1d   :  { %11282 = vmatpush3.xpose.msk.msra.mxu1 %vm1248_vm11, %v13427_v63 }
 0xc1e   :  { %11283 = vmatprep.subr.msk.mxu1 %vm1248_vm11, %v13367_v7 }
 0xc21   :  { %11284 = vmatpush3.xpose.msk.msra.mxu1 %vm1248_vm11, %v13367_v7 }
 0xc22   :  { %11285 = vmatprep.subr.msk.mxu1 %vm1248_vm11, %v13372_v52 }
 0xc25   :  { %11286 = vmatpush3.xpose.msk.msra.mxu1 %vm1248_vm11, %v13372_v52 }
 0xc26   :  { %11338 = vmatprep.subr.mxu1 %v16594_v43 }
 0xc28   :  { %11288 = vmatmul.mubr.msk.f32.vlgmr.msra.gmra.mxu1 %vm1248_vm11, %v16595_v21 }
 0xc29   :  { %11290 = vmatprep.mubr.msk.f32.mxu1 %vm1248_vm11, %v16596_v29  ;;  %11339 = vmatpush3.msra.mxu1 %v16594_v43 }
 0xc2a   :  { %11340 = vmatprep.subr.mxu1 %v16597_v23 }
 0xc2b   :  { %11341 = vmatpush3.msra.mxu1 %v16597_v23 }
 0xc2c   :  { %11291 = vmatmul.mubr.msk.f32.gmra.mxu1 %vm1248_vm11, %v16598_v33  ;;  %11342 = vmatprep.subr.mxu1 %v16599_v55 }
 0xc2d   :  { %11293 = vmatprep.mubr.msk.f32.mxu1 %vm1248_vm11, %v16600_v46  ;;  %11343 = vmatpush3.msra.mxu1 %v16599_v55 }
 0xc2e   :  { %11344 = vmatprep.subr.mxu1 %v16601_v44 }
 0xc2f   :  { %11345 = vmatpush3.msra.mxu1 %v16601_v44 }
 0xc30   :  { %11294 = vmatmul.mubr.msk.f32.gmra.mxu1 %vm1248_vm11, %v16602_v31  ;;  %11346 = vmatprep.subr.mxu1 %v16603_v61 }
 0xc31   :  { %11347 = vmatpush3.msra.mxu1 %v16603_v61 }
 0xc32   :  { %11348 = vmatprep.subr.mxu1 %v16604_v58 }
 0xc33   :  { %11349 = vmatpush3.msra.mxu1 %v16604_v58 }
 0xc34   :  { %11359 = vmatprep.subr.msk.mxu1 %vm1248_vm11, %v13357_v10 }
 0xcd0   :  { %v11268_v26 = vpop.f32.mrf.mxu1 }
 0xcd1   :  { %v14358_v48 = vadd.f32 %v11268_v26, %v14241_v5 }
 0xcd2   :  { %v14360_v20 = vpop.f32.mrf.mxu1 }
 0xcd4   :  { %v11271_v25 = vpop.f32.mrf.mxu1 }
 0xcd5   :  { %v14363_v2 = vadd.f32 %v11271_v25, %v14246_v30 }
 0xcd6   :  { %v14365_v11 = vpop.f32.mrf.mxu1 }
 0xcd8   :  { %v11274_v62 = vpop.f32.mrf.mxu1 }
 0xcd9   :  { %v14368_v32 = vadd.f32 %v11274_v62, %v14251_v8 }
 0xcda   :  { %v14370_v47 = vpop.f32.mrf.mxu1 }
 0xce8   :  { %v11289_v17 = vpop.f32.mrf.mxu1 }
 0xce9   :  { %v3006_v42 = vmul.f32 0.35355338, %v11289_v17 }
 0xcea   :  { %v2976_v54 = vpop.f32.mrf.mxu1 }
 0xceb   :  { %v3005_v40 = vmul.f32 0.35355338, %v2976_v54  ;;  %v3012_v5 = vadd.f32 %v3006_v42, %v14258_v34 }
 0xcec   :  { %v11292_v38 = vpop.f32.mrf.mxu1 }
 0xced   :  { %v3008_v24 = vmul.f32 0.35355338, %v11292_v38  ;;  %v3020_v35 = vsel %vm1392_vm12, %v3012_v5, -inf  ;;  %v3011_v30 = vadd.f32 %v3005_v40, %v14263_v15 }
 0xcee   :  { %3021 = vmax.xlane.f32.xlu0 %v3020_v35  ;;  %v2986_v49 = vpop.f32.mrf.mxu1 }
 0xcef   :  { %v3007_v6 = vmul.f32 0.35355338, %v2986_v49  ;;  %v3017_v8 = vsel %vm1392_vm12, %v3011_v30, -inf  ;;  %v3014_v1 = vadd.f32 %v3008_v24, %v14269_v59 }
 0xcf0   :  { %3018 = vmax.xlane.f32.xlu1 %v3017_v8  ;;  %v11295_v53 = vpop.f32.mrf.mxu1 }
 0xcf1   :  { %v3010_v43 = vmul.f32 0.35355338, %v11295_v53  ;;  %v3026_v21 = vsel %vm1392_vm12, %v3014_v1, -inf  ;;  %v3013_v29 = vadd.f32 %v3007_v6, %v14276_v57 }
 0xcf2   :  { %3027 = vmax.xlane.f32.xlu0 %v3026_v21  ;;  %v2996_v23 = vpop.f32.mrf.mxu1 }
 0xcf3   :  { %v3009_v33 = vmul.f32 0.35355338, %v2996_v23  ;;  %v3023_v55 = vsel %vm1392_vm12, %v3013_v29, -inf  ;;  %v3016_v46 = vadd.f32 %v3010_v43, %v14283_v28 }
 0xcf4   :  { %3024 = vmax.xlane.f32.xlu1 %v3023_v55 }
 0xcf5   :  { %v3032_v44 = vsel %vm1392_vm12, %v3016_v46, -inf  ;;  %v3015_v31 = vadd.f32 %v3009_v33, %v14290_v51 }
 0xcf6   :  { %3033 = vmax.xlane.f32.xlu0 %v3032_v44 }
 0xcf7   :  { %v3029_v61 = vsel %vm1392_vm12, %v3015_v31, -inf }
 0xcf8   :  { %3030 = vmax.xlane.f32.xlu1 %v3029_v61 }
 0xd77   :  { %v3022_v58 = vpop.xlane.xlu0 %3021 }
 0xd78   :  { %v3036_v26 = vsub.f32 %v3012_v5, %v3022_v58 }
 0xd79   :  { %v3019_v25 = vpop.xlane.xlu1 %3018 }
 0xd7a   :  { %v3043_v62 = vmul.f32 1.442695, %v3036_v26  ;;  %v3035_v17 = vsub.f32 %v3011_v30, %v3019_v25 }
 0xd7b   :  { %v3028_v42 = vpop.xlane.xlu0 %3027 }
 0xd7c   :  { %12265 = vpow2.f32 %v3043_v62  ;;  %v3041_v54 = vmul.f32 1.442695, %v3035_v17  ;;  %v3038_v40 = vsub.f32 %v3014_v1, %v3028_v42 }
 0xd7d   :  { %v3025_v38 = vpop.xlane.xlu1 %3024 }
 0xd7e   :  { %12267 = vpow2.f32 %v3041_v54  ;;  %v3047_v24 = vmul.f32 1.442695, %v3038_v40  ;;  %v3037_v35 = vsub.f32 %v3013_v29, %v3025_v38 }
 0xd7f   :  { %v3034_v49 = vpop.xlane.xlu0 %3033 }
 0xd80   :  { %12269 = vpow2.f32 %v3047_v24  ;;  %v3045_v6 = vmul.f32 1.442695, %v3037_v35  ;;  %v3040_v8 = vsub.f32 %v3016_v46, %v3034_v49 }
 0xd81   :  { %v3031_v53 = vpop.xlane.xlu1 %3030 }
 0xd82   :  { %12271 = vpow2.f32 %v3045_v6  ;;  %v3051_v43 = vmul.f32 1.442695, %v3040_v8  ;;  %v3039_v21 = vsub.f32 %v3015_v31, %v3031_v53 }
 0xd84   :  { %12273 = vpow2.f32 %v3051_v43  ;;  %v3049_v5 = vmul.f32 1.442695, %v3039_v21 }
 0xd86   :  { %12275 = vpow2.f32 %v3049_v5 }
 0xd89   :  { %v12266_v30 = vpop.eup %12265 }
 0xd8a   :  { %v3056_v23 = vsel %vm1392_vm12, %v12266_v30, 0.0 }
 0xd8b   :  { %v12268_v33 = vpop.eup %12267  ;;  %3057 = vadd.xlane.f32.xlu0 %v3056_v23 }
 0xd8c   :  { %v3053_v1 = vsel %vm1392_vm12, %v12268_v33, 0.0 }
 0xd8d   :  { %v12270_v55 = vpop.eup %12269  ;;  %3054 = vadd.xlane.f32.xlu1 %v3053_v1  ;;  %v16606_v1 = vld [vmem:[#allocation63_spill] sm:$0xff] }
 0xd8e   :  { %v3062_v29 = vsel %vm1392_vm12, %v12270_v55, 0.0 }
 0xd8f   :  { %v12272_v44 = vpop.eup %12271  ;;  %3063 = vadd.xlane.f32.xlu0 %v3062_v29  ;;  %v16608_v29 = vld [vmem:[#allocation29_spill] sm:$0xff] }
 0xd90   :  { %v3059_v46 = vsel %vm1392_vm12, %v12272_v44, 0.0 }
 0xd91   :  { %v12274_v61 = vpop.eup %12273  ;;  %3060 = vadd.xlane.f32.xlu1 %v3059_v46  ;;  %v16610_v46 = vld [vmem:[#allocation30_spill] sm:$0xff] }
 0xd92   :  { %v3068_v31 = vsel %vm1392_vm12, %v12274_v61, 0.0 }
 0xd93   :  { %v12276_v58 = vpop.eup %12275  ;;  %3069 = vadd.xlane.f32.xlu0 %v3068_v31  ;;  %v16612_v31 = vld [vmem:[#allocation66_spill] sm:$0xff] }
 0xd94   :  { %v3065_v26 = vsel %vm1392_vm12, %v12276_v58, 0.0 }
 0xd95   :  { %3066 = vadd.xlane.f32.xlu1 %v3065_v26  ;;  %v16614_v26 = vld [vmem:[#allocation68_spill] sm:$0xff] }
 0xe14   :  { %v3058_v25 = vpop.xlane.xlu0 %3057 }
 0xe15   :  { %12277 = vrcp.f32 %v3058_v25 }
 0xe16   :  { %v3055_v62 = vpop.xlane.xlu1 %3054 }
 0xe17   :  { %12279 = vrcp.f32 %v3055_v62 }
 0xe18   :  { %v3064_v17 = vpop.xlane.xlu0 %3063 }
 0xe19   :  { %12281 = vrcp.f32 %v3064_v17 }
 0xe1a   :  { %v3061_v42 = vpop.xlane.xlu1 %3060 }
 0xe1b   :  { %12283 = vrcp.f32 %v3061_v42 }
 0xe1c   :  { %v3070_v54 = vpop.xlane.xlu0 %3069 }
 0xe1d   :  { %12285 = vrcp.f32 %v3070_v54 }
 0xe1e   :  { %v3067_v40 = vpop.xlane.xlu1 %3066 }
 0xe1f   :  { %12287 = vrcp.f32 %v3067_v40 }
 0xe22   :  { %v12278_v38 = vpop.eup %12277 }
 0xe23   :  { %v3074_v49 = vmul.f32 %v12278_v38, %v12266_v30 }
 0xe24   :  { %v12280_v24 = vpop.eup %12279 }
 0xe25   :  { %v3072_v35 = vmul.f32 %v12280_v24, %v12268_v33  ;;  %v16605_v33 = vld [vmem:[#allocation11_spill] sm:$0xff] }
 0xe26   :  { %v12282_v6 = vpop.eup %12281 }
 0xe27   :  { %11308 = vmatprep.mubr.msk.f32.mxu0 %vm1392_vm12, %v3072_v35  ;;  %v3078_v43 = vmul.f32 %v12282_v6, %v12270_v55  ;;  %v16607_v55 = vld [vmem:[#allocation12_spill] sm:$0xff] }
 0xe28   :  { %v12284_v8 = vpop.eup %12283  ;;  %11309 = vmatmul.mubr.msk.f32.vlgmr.msra.gmra.mxu0 %vm1392_vm12, %v3074_v49 }
 0xe29   :  { %11318 = vmatpush3.xpose.msk.msra.mxu0 %vm1248_vm11, %v13357_v10  ;;  %v3076_v53 = vmul.f32 %v12284_v8, %v12272_v44  ;;  %v16609_v44 = vld [vmem:[#allocation64_spill] sm:$0xff] }
 0xe2a   :  { %11319 = vmatprep.subr.msk.mxu0 %vm1248_vm11, %v13377_v4  ;;  %v12286_v21 = vpop.eup %12285 }
 0xe2b   :  { %11311 = vmatprep.mubr.msk.f32.mxu0 %vm1392_vm12, %v3076_v53  ;;  %v3082_v23 = vmul.f32 %v12286_v21, %v12274_v61  ;;  %v16611_v61 = vld [vmem:[#allocation65_spill] sm:$0xff] }
 0xe2c   :  { %v12288_v5 = vpop.eup %12287  ;;  %11312 = vmatmul.mubr.msk.f32.gmra.mxu0 %vm1392_vm12, %v3078_v43 }
 0xe2d   :  { %11320 = vmatpush3.xpose.msk.msra.mxu0 %vm1248_vm11, %v13377_v4  ;;  %v3080_v30 = vmul.f32 %v12288_v5, %v12276_v58  ;;  %v16613_v58 = vld [vmem:[#allocation67_spill] sm:$0xff] }
 0xe2e   :  { %11321 = vmatprep.subr.msk.mxu0 %vm1248_vm11, %v13399_v0 }
 0xe2f   :  { %11314 = vmatprep.mubr.msk.f32.mxu0 %vm1392_vm12, %v3080_v30 }
 0xe30   :  { %11315 = vmatmul.mubr.msk.f32.gmra.mxu0 %vm1392_vm12, %v3082_v23 }
 0xe31   :  { %11322 = vmatpush3.xpose.msk.msra.mxu0 %vm1248_vm11, %v13399_v0  ;;  %11329 = vmatprep.mubr.msk.f32.mxu0 %vm1248_vm11, %v16605_v33 }
 0xe32   :  { %11323 = vmatprep.subr.msk.mxu0 %vm1248_vm11, %v13427_v63 }
 0xe35   :  { %11324 = vmatpush3.xpose.msk.msra.mxu0 %vm1248_vm11, %v13427_v63 }
 0xe36   :  { %11325 = vmatprep.subr.msk.mxu0 %vm1248_vm11, %v13367_v7 }
 0xe39   :  { %11326 = vmatpush3.xpose.msk.msra.mxu0 %vm1248_vm11, %v13367_v7 }
 0xe3a   :  { %11327 = vmatprep.subr.msk.mxu0 %vm1248_vm11, %v13372_v52 }
 0xe3d   :  { %11328 = vmatpush3.xpose.msk.msra.mxu0 %vm1248_vm11, %v13372_v52 }
 0xe3e   :  { %11380 = vmatprep.subr.mxu0 %v16606_v1 }
 0xe40   :  { %11330 = vmatmul.mubr.msk.f32.vlgmr.msra.gmra.mxu0 %vm1248_vm11, %v16607_v55 }
 0xe41   :  { %11332 = vmatprep.mubr.msk.f32.mxu0 %vm1248_vm11, %v16608_v29  ;;  %11381 = vmatpush3.msra.mxu0 %v16606_v1 }
 0xe42   :  { %11382 = vmatprep.subr.mxu0 %v16609_v44 }
 0xe43   :  { %11383 = vmatpush3.msra.mxu0 %v16609_v44 }
 0xe44   :  { %11333 = vmatmul.mubr.msk.f32.gmra.mxu0 %vm1248_vm11, %v16610_v46  ;;  %11384 = vmatprep.subr.mxu0 %v16611_v61 }
 0xe45   :  { %11335 = vmatprep.mubr.msk.f32.mxu0 %vm1248_vm11, %v16612_v31  ;;  %11385 = vmatpush3.msra.mxu0 %v16611_v61 }
 0xe46   :  { %11386 = vmatprep.subr.mxu0 %v13657_v36 }
 0xe47   :  { %11387 = vmatpush3.msra.mxu0 %v13657_v36 }
 0xe48   :  { %11336 = vmatmul.mubr.msk.f32.gmra.mxu0 %vm1248_vm11, %v13661_v14  ;;  %11388 = vmatprep.subr.mxu0 %v16613_v58 }
 0xe49   :  { %11389 = vmatpush3.msra.mxu0 %v16613_v58 }
 0xe4a   :  { %11390 = vmatprep.subr.mxu0 %v16614_v26 }
 0xe4b   :  { %11391 = vmatpush3.msra.mxu0 %v16614_v26 }
 0xe4c   :  { %11401 = vmatprep.subr.msk.mxu0 %vm1248_vm11, %v13357_v10 }
 0xee8   :  { %v11310_v25 = vpop.f32.mrf.mxu0 }
 0xee9   :  { %v14445_v62 = vadd.f32 %v11310_v25, %v14358_v48 }
 0xeea   :  { %v14447_v17 = vpop.f32.mrf.mxu0 }
 0xeec   :  { %v11313_v36 = vpop.f32.mrf.mxu0 }
 0xeed   :  { %v14450_v14 = vadd.f32 %v11313_v36, %v14363_v2 }
 0xeee   :  { %v14452_v42 = vpop.f32.mrf.mxu0 }
 0xef0   :  { %v11316_v54 = vpop.f32.mrf.mxu0 }
 0xef1   :  { %v14455_v40 = vadd.f32 %v11316_v54, %v14368_v32 }
 0xef2   :  { %v14457_v38 = vpop.f32.mrf.mxu0 }
 0xf00   :  { %v11331_v24 = vpop.f32.mrf.mxu0 }
 0xf01   :  { %v3332_v35 = vmul.f32 0.35355338, %v11331_v24 }
 0xf02   :  { %v3302_v49 = vpop.f32.mrf.mxu0 }
 0xf03   :  { %v3331_v6 = vmul.f32 0.35355338, %v3302_v49  ;;  %v3338_v48 = vadd.f32 %v3332_v35, %v14258_v34 }
 0xf04   :  { %v11334_v8 = vpop.f32.mrf.mxu0 }
 0xf05   :  { %v3334_v53 = vmul.f32 0.35355338, %v11334_v8  ;;  %v3346_v43 = vsel %vm1392_vm12, %v3338_v48, -inf  ;;  %v3337_v2 = vadd.f32 %v3331_v6, %v14263_v15 }
 0xf06   :  { %3347 = vmax.xlane.f32.xlu0 %v3346_v43  ;;  %v3312_v21 = vpop.f32.mrf.mxu0 }
 0xf07   :  { %v3333_v5 = vmul.f32 0.35355338, %v3312_v21  ;;  %v3343_v32 = vsel %vm1392_vm12, %v3337_v2, -inf  ;;  %v3340_v30 = vadd.f32 %v3334_v53, %v14269_v59 }
 0xf08   :  { %3344 = vmax.xlane.f32.xlu1 %v3343_v32  ;;  %v11337_v23 = vpop.f32.mrf.mxu0 }
 0xf09   :  { %v3336_v33 = vmul.f32 0.35355338, %v11337_v23  ;;  %v3352_v1 = vsel %vm1392_vm12, %v3340_v30, -inf  ;;  %v3339_v55 = vadd.f32 %v3333_v5, %v14276_v57 }
 0xf0a   :  { %3353 = vmax.xlane.f32.xlu0 %v3352_v1  ;;  %v3322_v29 = vpop.f32.mrf.mxu0 }
 0xf0b   :  { %v3335_v44 = vmul.f32 0.35355338, %v3322_v29  ;;  %v3349_v46 = vsel %vm1392_vm12, %v3339_v55, -inf  ;;  %v3342_v61 = vadd.f32 %v3336_v33, %v14283_v28 }
 0xf0c   :  { %3350 = vmax.xlane.f32.xlu1 %v3349_v46 }
 0xf0d   :  { %v3358_v31 = vsel %vm1392_vm12, %v3342_v61, -inf  ;;  %v3341_v58 = vadd.f32 %v3335_v44, %v14290_v51 }
 0xf0e   :  { %3359 = vmax.xlane.f32.xlu0 %v3358_v31 }
 0xf0f   :  { %v3355_v26 = vsel %vm1392_vm12, %v3341_v58, -inf }
 0xf10   :  { %3356 = vmax.xlane.f32.xlu1 %v3355_v26 }
 0xf8f   :  { %v3348_v25 = vpop.xlane.xlu0 %3347 }
 0xf90   :  { %v3362_v36 = vsub.f32 %v3338_v48, %v3348_v25 }
 0xf91   :  { %v3345_v54 = vpop.xlane.xlu1 %3344 }
 0xf92   :  { %v3369_v24 = vmul.f32 1.442695, %v3362_v36  ;;  %v3361_v35 = vsub.f32 %v3337_v2, %v3345_v54 }
 0xf93   :  { %v3354_v49 = vpop.xlane.xlu0 %3353 }
 0xf94   :  { %12289 = vpow2.f32 %v3369_v24  ;;  %v3367_v6 = vmul.f32 1.442695, %v3361_v35  ;;  %v3364_v8 = vsub.f32 %v3340_v30, %v3354_v49 }
 0xf95   :  { %v3351_v53 = vpop.xlane.xlu1 %3350 }
 0xf96   :  { %12291 = vpow2.f32 %v3367_v6  ;;  %v3373_v43 = vmul.f32 1.442695, %v3364_v8  ;;  %v3363_v21 = vsub.f32 %v3339_v55, %v3351_v53 }
 0xf97   :  { %v3360_v5 = vpop.xlane.xlu0 %3359 }
 0xf98   :  { %12293 = vpow2.f32 %v3373_v43  ;;  %v3371_v32 = vmul.f32 1.442695, %v3363_v21  ;;  %v3366_v23 = vsub.f32 %v3342_v61, %v3360_v5 }
 0xf99   :  { %v3357_v33 = vpop.xlane.xlu1 %3356 }
 0xf9a   :  { %12295 = vpow2.f32 %v3371_v32  ;;  %v3377_v1 = vmul.f32 1.442695, %v3366_v23  ;;  %v3365_v29 = vsub.f32 %v3341_v58, %v3357_v33 }
 0xf9c   :  { %12297 = vpow2.f32 %v3377_v1  ;;  %v3375_v48 = vmul.f32 1.442695, %v3365_v29 }
 0xf9e   :  { %12299 = vpow2.f32 %v3375_v48 }
 0xfa1   :  { %v12290_v2 = vpop.eup %12289 }
 0xfa2   :  { %v3382_v44 = vsel %vm1392_vm12, %v12290_v2, 0.0 }
 0xfa3   :  { %v12292_v46 = vpop.eup %12291  ;;  %3383 = vadd.xlane.f32.xlu0 %v3382_v44 }
 0xfa4   :  { %v3379_v30 = vsel %vm1392_vm12, %v12292_v46, 0.0 }
 0xfa5   :  { %v12294_v31 = vpop.eup %12293  ;;  %3380 = vadd.xlane.f32.xlu1 %v3379_v30  ;;  %v16615_v30 = vld [vmem:[#allocation13_spill] sm:$0xff] }
 0xfa6   :  { %v3388_v55 = vsel %vm1392_vm12, %v12294_v31, 0.0 }
 0xfa7   :  { %v12296_v26 = vpop.eup %12295  ;;  %3389 = vadd.xlane.f32.xlu0 %v3388_v55  ;;  %v16617_v55 = vld [vmem:[#allocation14_spill] sm:$0xff] }
 0xfa8   :  { %v3385_v61 = vsel %vm1392_vm12, %v12296_v26, 0.0 }
 0xfa9   :  { %v12298_v25 = vpop.eup %12297  ;;  %3386 = vadd.xlane.f32.xlu1 %v3385_v61  ;;  %v16619_v61 = vld [vmem:[#allocation70_spill] sm:$0xff] }
 0xfaa   :  { %v3394_v58 = vsel %vm1392_vm12, %v12298_v25, 0.0 }
 0xfab   :  { %v12300_v36 = vpop.eup %12299  ;;  %3395 = vadd.xlane.f32.xlu0 %v3394_v58  ;;  %v16621_v58 = vld [vmem:[#allocation71_spill] sm:$0xff] }
 0xfac   :  { %v3391_v54 = vsel %vm1392_vm12, %v12300_v36, 0.0 }
 0xfad   :  { %3392 = vadd.xlane.f32.xlu1 %v3391_v54  ;;  %v16623_v54 = vld [vmem:[#allocation73_spill] sm:$0xff] }
0x102c   :  { %v3384_v24 = vpop.xlane.xlu0 %3383 }
0x102d   :  { %12301 = vrcp.f32 %v3384_v24  ;;  %v16624_v24 = vld [vmem:[#allocation74_spill] sm:$0xff] }
0x102e   :  { %v3381_v35 = vpop.xlane.xlu1 %3380 }
0x102f   :  { %12303 = vrcp.f32 %v3381_v35  ;;  %v16625_v35 = vld [vmem:[#allocation75_spill] sm:$0xff] }
0x1030   :  { %v3390_v49 = vpop.xlane.xlu0 %3389 }
0x1031   :  { %12305 = vrcp.f32 %v3390_v49  ;;  %v1870_v49 = vadd.f32 %v14147_v27, %v13994_v50 }
0x1032   :  { %v3387_v6 = vpop.xlane.xlu1 %3386 }
0x1033   :  { %12307 = vrcp.f32 %v3387_v6  ;;  %v2218_v6 = vadd.f32 %v14156_v39, %v1870_v49 }
0x1034   :  { %v3396_v8 = vpop.xlane.xlu0 %3395 }
0x1035   :  { %12309 = vrcp.f32 %v3396_v8  ;;  %v1880_v8 = vadd.f32 %v14149_v56, %v13998_v18 }
0x1036   :  { %v3393_v53 = vpop.xlane.xlu1 %3392 }
0x1037   :  { %12311 = vrcp.f32 %v3393_v53  ;;  %v2544_v53 = vadd.f32 %v14243_v13, %v2218_v6 }
0x103a   :  { %v12302_v43 = vpop.eup %12301 }
0x103b   :  { %v3400_v32 = vmul.f32 %v12302_v43, %v12290_v2  ;;  %v2220_v43 = vadd.f32 %v14161_v60, %v1880_v8 }
0x103c   :  { %v12304_v21 = vpop.eup %12303 }
0x103d   :  { %v3398_v5 = vmul.f32 %v12304_v21, %v12292_v46  ;;  %v2876_v21 = vadd.f32 %v14360_v20, %v2544_v53 }
0x103e   :  { %v12306_v23 = vpop.eup %12305 }
0x103f   :  { %11350 = vmatprep.mubr.msk.f32.mxu1 %vm1392_vm12, %v3398_v5  ;;  %v3404_v29 = vmul.f32 %v12306_v23, %v12294_v31  ;;  %v16616_v31 = vld [vmem:[#allocation69_spill] sm:$0xff]  ;;  %v3202_v23 = vadd.f32 %v14447_v17, %v2876_v21 }
0x1040   :  { %v12308_v33 = vpop.eup %12307  ;;  %11351 = vmatmul.mubr.msk.f32.vlgmr.msra.gmra.mxu1 %vm1392_vm12, %v3400_v32  ;;  %v2546_v32 = vadd.f32 %v14248_v16, %v2220_v43 }
0x1041   :  { %11360 = vmatpush3.xpose.msk.msra.mxu1 %vm1248_vm11, %v13357_v10  ;;  %v3402_v1 = vmul.f32 %v12308_v33, %v12296_v26  ;;  %v16618_v26 = vld [vmem:[#allocation31_spill] sm:$0xff] }
0x1042   :  { %11361 = vmatprep.subr.msk.mxu1 %vm1248_vm11, %v13377_v4  ;;  %v12310_v48 = vpop.eup %12309  ;;  %v2878_v56 = vadd.f32 %v14365_v11, %v2546_v32 }
0x1043   :  { %11353 = vmatprep.mubr.msk.f32.mxu1 %vm1392_vm12, %v3402_v1  ;;  %v3408_v46 = vmul.f32 %v12310_v48, %v12298_v25  ;;  %v16620_v25 = vld [vmem:[#allocation32_spill] sm:$0xff] }
0x1044   :  { %v12312_v44 = vpop.eup %12311  ;;  %11354 = vmatmul.mubr.msk.f32.gmra.mxu1 %vm1392_vm12, %v3404_v29  ;;  %v3204_v20 = vadd.f32 %v14452_v42, %v2878_v56 }
0x1045   :  { %11362 = vmatpush3.xpose.msk.msra.mxu1 %vm1248_vm11, %v13377_v4  ;;  %v3406_v2 = vmul.f32 %v12312_v44, %v12300_v36  ;;  %v16622_v36 = vld [vmem:[#allocation72_spill] sm:$0xff] }
0x1046   :  { %11363 = vmatprep.subr.msk.mxu1 %vm1248_vm11, %v13399_v0 }
0x1047   :  { %11356 = vmatprep.mubr.msk.f32.mxu1 %vm1392_vm12, %v3406_v2 }
0x1048   :  { %11357 = vmatmul.mubr.msk.f32.gmra.mxu1 %vm1392_vm12, %v3408_v46 }
0x1049   :  { %11364 = vmatpush3.xpose.msk.msra.mxu1 %vm1248_vm11, %v13399_v0  ;;  %11371 = vmatprep.mubr.msk.f32.mxu1 %vm1248_vm11, %v16615_v30 }
0x104a   :  { %11365 = vmatprep.subr.msk.mxu1 %vm1248_vm11, %v13427_v63 }
0x104d   :  { %11366 = vmatpush3.xpose.msk.msra.mxu1 %vm1248_vm11, %v13427_v63 }
0x104e   :  { %11367 = vmatprep.subr.msk.mxu1 %vm1248_vm11, %v13367_v7 }
0x1051   :  { %11368 = vmatpush3.xpose.msk.msra.mxu1 %vm1248_vm11, %v13367_v7 }
0x1052   :  { %11369 = vmatprep.subr.msk.mxu1 %vm1248_vm11, %v13372_v52 }
0x1055   :  { %11370 = vmatpush3.xpose.msk.msra.mxu1 %vm1248_vm11, %v13372_v52 }
0x1056   :  { %11422 = vmatprep.subr.mxu1 %v16616_v31 }
0x1058   :  { %11372 = vmatmul.mubr.msk.f32.vlgmr.msra.gmra.mxu1 %vm1248_vm11, %v16617_v55 }
0x1059   :  { %11374 = vmatprep.mubr.msk.f32.mxu1 %vm1248_vm11, %v16618_v26  ;;  %11423 = vmatpush3.msra.mxu1 %v16616_v31 }
0x105a   :  { %11424 = vmatprep.subr.mxu1 %v16619_v61 }
0x105b   :  { %11425 = vmatpush3.msra.mxu1 %v16619_v61 }
0x105c   :  { %11375 = vmatmul.mubr.msk.f32.gmra.mxu1 %vm1248_vm11, %v16620_v25  ;;  %11426 = vmatprep.subr.mxu1 %v16621_v58 }
0x105d   :  { %11377 = vmatprep.mubr.msk.f32.mxu1 %vm1248_vm11, %v16622_v36  ;;  %11427 = vmatpush3.msra.mxu1 %v16621_v58 }
0x105e   :  { %11428 = vmatprep.subr.mxu1 %v16623_v54 }
0x105f   :  { %11429 = vmatpush3.msra.mxu1 %v16623_v54 }
0x1060   :  { %11378 = vmatmul.mubr.msk.f32.gmra.mxu1 %vm1248_vm11, %v16624_v24  ;;  %11430 = vmatprep.subr.mxu1 %v16625_v35 }
0x1061   :  { %11431 = vmatpush3.msra.mxu1 %v16625_v35 }
0x1062   :  { %11432 = vmatprep.subr.mxu1 %v13706_v9 }
0x1063   :  { %11433 = vmatpush3.msra.mxu1 %v13706_v9  ;;  %v1890_v9 = vadd.f32 %v14151_v3, %v14006_v12 }
0x1064   :  { %11443 = vmatprep.subr.msk.mxu1 %vm1248_vm11, %v13357_v10 }
0x1065   :  { %v2222_v18 = vadd.f32 %v14166_v22, %v1890_v9 }
0x1067   :  { %v2548_v13 = vadd.f32 %v14253_v45, %v2222_v18 }
0x1069   :  { %v2880_v16 = vadd.f32 %v14370_v47, %v2548_v13 }
0x106b   :  { %v3206_v22 = vadd.f32 %v14457_v38, %v2880_v16 }
0x1100   :  { %v11352_v5 = vpop.f32.mrf.mxu1 }
0x1101   :  { %v14544_v50 = vadd.f32 %v11352_v5, %v14445_v62 }
0x1102   :  { %v3499_v27 = vpop.f32.mrf.mxu1 }
0x1103   :  { %v14548_v39 = vadd.f32 %v3499_v27, %v3202_v23 }
0x1104   :  { %v11355_v60 = vpop.f32.mrf.mxu1 }
0x1105   :  { %v14553_v12 = vadd.f32 %v11355_v60, %v14450_v14 }
0x1106   :  { %v3509_v3 = vpop.f32.mrf.mxu1 }
0x1107   :  { %v14556_v62 = vadd.f32 %v3509_v3, %v3204_v20 }
0x1108   :  { %v11358_v17 = vpop.f32.mrf.mxu1 }
0x1109   :  { %v14560_v11 = vadd.f32 %v11358_v17, %v14455_v40 }
0x110a   :  { %v3519_v33 = vpop.f32.mrf.mxu1 }
0x110b   :  { %v14562_v1 = vadd.f32 %v3519_v33, %v3206_v22 }
0x1118   :  { %v11373_v45 = vpop.f32.mrf.mxu1 }
0x1119   :  { %v3658_v29 = vmul.f32 0.35355338, %v11373_v45 }
0x111a   :  { %v3628_v42 = vpop.f32.mrf.mxu1 }
0x111b   :  { %v3664_v14 = vadd.f32 %v3658_v29, %v14258_v34  ;;  %v3657_v48 = vmul.f32 0.35355338, %v3628_v42 }
0x111c   :  { %v11376_v44 = vpop.f32.mrf.mxu1 }
0x111d   :  { %v3663_v47 = vadd.f32 %v3657_v48, %v14263_v15  ;;  %v3660_v2 = vmul.f32 0.35355338, %v11376_v44  ;;  %v3672_v46 = vsel %vm1392_vm12, %v3664_v14, -inf }
0x111e   :  { %3673 = vmax.xlane.f32.xlu0 %v3672_v46  ;;  %v3638_v38 = vpop.f32.mrf.mxu1 }
0x111f   :  { %v3666_v40 = vadd.f32 %v3660_v2, %v14269_v59  ;;  %v3659_v30 = vmul.f32 0.35355338, %v3638_v38  ;;  %v3669_v31 = vsel %vm1392_vm12, %v3663_v47, -inf }
0x1120   :  { %3670 = vmax.xlane.f32.xlu1 %v3669_v31  ;;  %v11379_v55 = vpop.f32.mrf.mxu1 }
0x1121   :  { %v3665_v26 = vadd.f32 %v3659_v30, %v14276_v57  ;;  %v3662_v61 = vmul.f32 0.35355338, %v11379_v55  ;;  %v3678_v34 = vsel %vm1392_vm12, %v3666_v40, -inf }
0x1122   :  { %3679 = vmax.xlane.f32.xlu0 %v3678_v34  ;;  %v3648_v25 = vpop.f32.mrf.mxu1 }
0x1123   :  { %v3668_v15 = vadd.f32 %v3662_v61, %v14283_v28  ;;  %v3661_v58 = vmul.f32 0.35355338, %v3648_v25  ;;  %v3675_v36 = vsel %vm1392_vm12, %v3665_v26, -inf }
0x1124   :  { %3676 = vmax.xlane.f32.xlu1 %v3675_v36 }
0x1125   :  { %v3667_v59 = vadd.f32 %v3661_v58, %v14290_v51  ;;  %v3684_v54 = vsel %vm1392_vm12, %v3668_v15, -inf }
0x1126   :  { %3685 = vmax.xlane.f32.xlu0 %v3684_v54 }
0x1127   :  { %v3681_v24 = vsel %vm1392_vm12, %v3667_v59, -inf }
0x1128   :  { %3682 = vmax.xlane.f32.xlu1 %v3681_v24  ;;  %v16626_v24 = vld [vmem:[#allocation15_spill] sm:$0xff] }
0x11a7   :  { %v3674_v57 = vpop.xlane.xlu0 %3673 }
0x11a8   :  { %v3688_v35 = vsub.f32 %v3664_v14, %v3674_v57  ;;  %v16627_v57 = vld [vmem:[#allocation16_spill] sm:$0xff] }
0x11a9   :  { %v3671_v49 = vpop.xlane.xlu1 %3670 }
0x11aa   :  { %v3695_v6 = vmul.f32 1.442695, %v3688_v35  ;;  %v3687_v8 = vsub.f32 %v3663_v47, %v3671_v49  ;;  %v16628_v35 = vld [vmem:[#allocation33_spill] sm:$0xff]  ;;  %v16629_v49 = vld [vmem:[#allocation76_spill] sm:$0xff] }
0x11ab   :  { %v3680_v53 = vpop.xlane.xlu0 %3679 }
0x11ac   :  { %12313 = vpow2.f32 %v3695_v6  ;;  %v3693_v28 = vmul.f32 1.442695, %v3687_v8  ;;  %v3690_v43 = vsub.f32 %v3666_v40, %v3680_v53  ;;  %v16630_v6 = vld [vmem:[#allocation34_spill] sm:$0xff]  ;;  %v16631_v8 = vld [vmem:[#allocation77_spill] sm:$0xff] }
0x11ad   :  { %v3677_v21 = vpop.xlane.xlu1 %3676  ;;  %v16632_v53 = vld [vmem:[#allocation78_spill] sm:$0xff] }
0x11ae   :  { %12315 = vpow2.f32 %v3693_v28  ;;  %v3699_v5 = vmul.f32 1.442695, %v3690_v43  ;;  %v3689_v9 = vsub.f32 %v3665_v26, %v3677_v21  ;;  %v16634_v28 = vld [vmem:[#allocation80_spill] sm:$0xff] }
0x11af   :  { %v3686_v51 = vpop.xlane.xlu0 %3685 }
0x11b0   :  { %12317 = vpow2.f32 %v3699_v5  ;;  %v3697_v32 = vmul.f32 1.442695, %v3689_v9  ;;  %v3692_v23 = vsub.f32 %v3668_v15, %v3686_v51 }
0x11b1   :  { %v3683_v27 = vpop.xlane.xlu1 %3682 }
0x11b2   :  { %12319 = vpow2.f32 %v3697_v32  ;;  %v3703_v18 = vmul.f32 1.442695, %v3692_v23  ;;  %v3691_v56 = vsub.f32 %v3667_v59, %v3683_v27 }
0x11b4   :  { %12321 = vpow2.f32 %v3703_v18  ;;  %v3701_v60 = vmul.f32 1.442695, %v3691_v56 }
0x11b6   :  { %12323 = vpow2.f32 %v3701_v60 }
0x11b9   :  { %v12314_v13 = vpop.eup %12313 }
0x11ba   :  { %v3708_v20 = vsel %vm1392_vm12, %v12314_v13, 0.0 }
0x11bb   :  { %v12316_v3 = vpop.eup %12315  ;;  %3709 = vadd.xlane.f32.xlu0 %v3708_v20 }
0x11bc   :  { %v3705_v16 = vsel %vm1392_vm12, %v12316_v3, 0.0 }
0x11bd   :  { %v12318_v17 = vpop.eup %12317  ;;  %3706 = vadd.xlane.f32.xlu1 %v3705_v16 }
0x11be   :  { %v3714_v22 = vsel %vm1392_vm12, %v12318_v17, 0.0 }
0x11bf   :  { %v12320_v33 = vpop.eup %12319  ;;  %3715 = vadd.xlane.f32.xlu0 %v3714_v22  ;;  %v14675_v22 = vld [vmem:[%s16411_s4 + $0x70] sm:$0xff] }
0x11c0   :  { %v3711_v45 = vsel %vm1392_vm12, %v12320_v33, 0.0 }
0x11c1   :  { %v12322_v29 = vpop.eup %12321  ;;  %3712 = vadd.xlane.f32.xlu1 %v3711_v45 }
0x11c2   :  { %v3720_v42 = vsel %vm1392_vm12, %v12322_v29, 0.0 }
0x11c3   :  { %v12324_v14 = vpop.eup %12323  ;;  %3721 = vadd.xlane.f32.xlu0 %v3720_v42 }
0x11c4   :  { %v3717_v48 = vsel %vm1392_vm12, %v12324_v14, 0.0 }
0x11c5   :  { %3718 = vadd.xlane.f32.xlu1 %v3717_v48 }
0x1244   :  { %v3710_v44 = vpop.xlane.xlu0 %3709 }
0x1245   :  { %12325 = vrcp.f32 %v3710_v44 }
0x1246   :  { %v3707_v47 = vpop.xlane.xlu1 %3706 }
0x1247   :  { %12327 = vrcp.f32 %v3707_v47 }
0x1248   :  { %v3716_v2 = vpop.xlane.xlu0 %3715 }
0x1249   :  { %12329 = vrcp.f32 %v3716_v2 }
0x124a   :  { %v3713_v46 = vpop.xlane.xlu1 %3712 }
0x124b   :  { %12331 = vrcp.f32 %v3713_v46  ;;  %v14689_v46 = vld [vmem:[%s16411_s4 + $0x80] sm:$0xff] }
0x124c   :  { %v3722_v38 = vpop.xlane.xlu0 %3721 }
0x124d   :  { %12333 = vrcp.f32 %v3722_v38 }
0x124e   :  { %v3719_v40 = vpop.xlane.xlu1 %3718 }
0x124f   :  { %12335 = vrcp.f32 %v3719_v40 }
0x1252   :  { %v12326_v30 = vpop.eup %12325 }
0x1253   :  { %v3726_v26 = vmul.f32 %v12326_v30, %v12314_v13 }
0x1254   :  { %v12328_v31 = vpop.eup %12327 }
0x1255   :  { %v3724_v55 = vmul.f32 %v12328_v31, %v12316_v3 }
0x1256   :  { %v12330_v61 = vpop.eup %12329 }
0x1257   :  { %11392 = vmatprep.mubr.msk.f32.mxu0 %vm1392_vm12, %v3724_v55  ;;  %v3730_v15 = vmul.f32 %v12330_v61, %v12318_v17 }
0x1258   :  { %v12332_v34 = vpop.eup %12331  ;;  %11393 = vmatmul.mubr.msk.f32.vlgmr.msra.gmra.mxu0 %vm1392_vm12, %v3726_v26 }
0x1259   :  { %11402 = vmatpush3.xpose.msk.msra.mxu0 %vm1248_vm11, %v13357_v10  ;;  %v3728_v25 = vmul.f32 %v12332_v34, %v12320_v33 }
0x125a   :  { %11403 = vmatprep.subr.msk.mxu0 %vm1248_vm11, %v13377_v4  ;;  %v12334_v58 = vpop.eup %12333 }
0x125b   :  { %11395 = vmatprep.mubr.msk.f32.mxu0 %vm1392_vm12, %v3728_v25  ;;  %v3734_v54 = vmul.f32 %v12334_v58, %v12322_v29 }
0x125c   :  { %v12336_v36 = vpop.eup %12335  ;;  %11396 = vmatmul.mubr.msk.f32.gmra.mxu0 %vm1392_vm12, %v3730_v15 }
0x125d   :  { %11404 = vmatpush3.xpose.msk.msra.mxu0 %vm1248_vm11, %v13377_v4  ;;  %v3732_v59 = vmul.f32 %v12336_v36, %v12324_v14  ;;  %v14682_v14 = vld [vmem:[%s16411_s4 + $0x88] sm:$0xff] }
0x125e   :  { %11405 = vmatprep.subr.msk.mxu0 %vm1248_vm11, %v13399_v0 }
0x125f   :  { %11398 = vmatprep.mubr.msk.f32.mxu0 %vm1392_vm12, %v3732_v59 }
0x1260   :  { %11399 = vmatmul.mubr.msk.f32.gmra.mxu0 %vm1392_vm12, %v3734_v54 }
0x1261   :  { %11406 = vmatpush3.xpose.msk.msra.mxu0 %vm1248_vm11, %v13399_v0  ;;  %11413 = vmatprep.mubr.msk.f32.mxu0 %vm1248_vm11, %v16626_v24 }
0x1262   :  { %11407 = vmatprep.subr.msk.mxu0 %vm1248_vm11, %v13427_v63 }
0x1265   :  { %11408 = vmatpush3.xpose.msk.msra.mxu0 %vm1248_vm11, %v13427_v63 }
0x1266   :  { %11409 = vmatprep.subr.msk.mxu0 %vm1248_vm11, %v13367_v7 }
0x1269   :  { %11410 = vmatpush3.xpose.msk.msra.mxu0 %vm1248_vm11, %v13367_v7 }
0x126a   :  { %11411 = vmatprep.subr.msk.mxu0 %vm1248_vm11, %v13372_v52 }
0x126d   :  { %11412 = vmatpush3.xpose.msk.msra.mxu0 %vm1248_vm11, %v13372_v52 }
0x126e   :  { %11464 = vmatprep.subr.mxu0 %v13710_v37 }
0x1270   :  { %11414 = vmatmul.mubr.msk.f32.vlgmr.msra.gmra.mxu0 %vm1248_vm11, %v16627_v57 }
0x1271   :  { %11416 = vmatprep.mubr.msk.f32.mxu0 %vm1248_vm11, %v16628_v35  ;;  %11465 = vmatpush3.msra.mxu0 %v13710_v37  ;;  %v16633_v37 = vld [vmem:[#allocation79_spill] sm:$0xff] }
0x1272   :  { %11466 = vmatprep.subr.mxu0 %v16629_v49 }
0x1273   :  { %11467 = vmatpush3.msra.mxu0 %v16629_v49 }
0x1274   :  { %11417 = vmatmul.mubr.msk.f32.gmra.mxu0 %vm1248_vm11, %v16630_v6  ;;  %11468 = vmatprep.subr.mxu0 %v16631_v8 }
0x1275   :  { %11419 = vmatprep.mubr.msk.f32.mxu0 %vm1248_vm11, %v16632_v53  ;;  %11469 = vmatpush3.msra.mxu0 %v16631_v8 }
0x1276   :  { %11470 = vmatprep.subr.mxu0 %v13726_v41 }
0x1277   :  { %11471 = vmatpush3.msra.mxu0 %v13726_v41 }
0x1278   :  { %11420 = vmatmul.mubr.msk.f32.gmra.mxu0 %vm1248_vm11, %v13734_v19  ;;  %11472 = vmatprep.subr.mxu0 %v16633_v37 }
0x1279   :  { %11473 = vmatpush3.msra.mxu0 %v16633_v37 }
0x127a   :  { %11474 = vmatprep.subr.mxu0 %v16634_v28 }
0x127b   :  { %11475 = vmatpush3.msra.mxu0 %v16634_v28 }
0x127c   :  { %11485 = vmatprep.subr.msk.mxu0 %vm1248_vm11, %v13357_v10 }
0x1318   :  { %v11394_v43 = vpop.f32.mrf.mxu0 }
0x1319   :  { %v14637_v21 = vadd.f32 %v11394_v43, %v14544_v50 }
0x131a   :  { %v3825_v5 = vpop.f32.mrf.mxu0 }
0x131b   :  { %v14640_v41 = vadd.f32 %v3825_v5, %v14548_v39  ;;  %v14657_v39 = vld [vmem:[%s16411_s4 + $0x68] sm:$0xff] }
0x131c   :  { %v11397_v19 = vpop.f32.mrf.mxu0 }
0x131d   :  { %v14643_v9 = vadd.f32 %v11397_v19, %v14553_v12 }
0x131e   :  { %v3835_v51 = vpop.f32.mrf.mxu0 }
0x131f   :  { %v14646_v32 = vadd.f32 %v3835_v51, %v14556_v62  ;;  %v14662_v62 = vld [vmem:[%s16411_s4 + $0x60] sm:$0xff] }
0x1320   :  { %v11400_v23 = vpop.f32.mrf.mxu0 }
0x1321   :  { %v14649_v27 = vadd.f32 %v11400_v23, %v14560_v11 }
0x1322   :  { %v3845_v18 = vpop.f32.mrf.mxu0 }
0x1323   :  { %v14652_v50 = vadd.f32 %v3845_v18, %v14562_v1  ;;  %v14668_v1 = vld [vmem:[%s16411_s4 + $0x78] sm:$0xff] }
0x1330   :  { %v11415_v56 = vpop.f32.mrf.mxu0 }
0x1331   :  { %v3990_v12 = vmul.f32 0.35355338, %v11415_v56 }
0x1332   :  { %v3960_v60 = vpop.f32.mrf.mxu0 }
0x1333   :  { %v3996_v11 = vadd.f32 %v3990_v12, %v14657_v39  ;;  %v3989_v13 = vmul.f32 0.35355338, %v3960_v60 }
0x1334   :  { %v11418_v20 = vpop.f32.mrf.mxu0 }
0x1335   :  { %v3995_v3 = vadd.f32 %v3989_v13, %v14662_v62  ;;  %v3992_v16 = vmul.f32 0.35355338, %v11418_v20  ;;  %v4004_v17 = vsel %vm1392_vm12, %v3996_v11, -inf }
0x1336   :  { %4005 = vmax.xlane.f32.xlu0 %v4004_v17  ;;  %v3970_v33 = vpop.f32.mrf.mxu0 }
0x1337   :  { %v3998_v45 = vadd.f32 %v3992_v16, %v14668_v1  ;;  %v3991_v29 = vmul.f32 0.35355338, %v3970_v33  ;;  %v4001_v42 = vsel %vm1392_vm12, %v3995_v3, -inf }
0x1338   :  { %4002 = vmax.xlane.f32.xlu1 %v4001_v42  ;;  %v11421_v48 = vpop.f32.mrf.mxu0 }
0x1339   :  { %v3997_v44 = vadd.f32 %v3991_v29, %v14675_v22  ;;  %v3994_v47 = vmul.f32 0.35355338, %v11421_v48  ;;  %v4010_v2 = vsel %vm1392_vm12, %v3998_v45, -inf }
0x133a   :  { %4011 = vmax.xlane.f32.xlu0 %v4010_v2  ;;  %v3980_v38 = vpop.f32.mrf.mxu0 }
0x133b   :  { %v4000_v40 = vadd.f32 %v3994_v47, %v14682_v14  ;;  %v3993_v30 = vmul.f32 0.35355338, %v3980_v38  ;;  %v4007_v31 = vsel %vm1392_vm12, %v3997_v44, -inf }
0x133c   :  { %4008 = vmax.xlane.f32.xlu1 %v4007_v31 }
0x133d   :  { %v3999_v55 = vadd.f32 %v3993_v30, %v14689_v46  ;;  %v4016_v26 = vsel %vm1392_vm12, %v4000_v40, -inf }
0x133e   :  { %4017 = vmax.xlane.f32.xlu0 %v4016_v26 }
0x133f   :  { %v4013_v61 = vsel %vm1392_vm12, %v3999_v55, -inf }
0x1340   :  { %4014 = vmax.xlane.f32.xlu1 %v4013_v61 }
0x13bf   :  { %v4006_v34 = vpop.xlane.xlu0 %4005 }
0x13c0   :  { %v4020_v25 = vsub.f32 %v3996_v11, %v4006_v34 }
0x13c1   :  { %v4003_v15 = vpop.xlane.xlu1 %4002 }
0x13c2   :  { %v4027_v58 = vmul.f32 1.442695, %v4020_v25  ;;  %v4019_v36 = vsub.f32 %v3995_v3, %v4003_v15  ;;  %v16635_v15 = vld [vmem:[#allocation17_spill] sm:$0xff] }
0x13c3   :  { %v4012_v59 = vpop.xlane.xlu0 %4011 }
0x13c4   :  { %12337 = vpow2.f32 %v4027_v58  ;;  %v4025_v54 = vmul.f32 1.442695, %v4019_v36  ;;  %v4022_v24 = vsub.f32 %v3998_v45, %v4012_v59  ;;  %v16636_v58 = vld [vmem:[#allocation81_spill] sm:$0xff]  ;;  %v16637_v36 = vld [vmem:[#allocation18_spill] sm:$0xff]  ;;  %v16638_v59 = vld [vmem:[#allocation35_spill] sm:$0xff] }
0x13c5   :  { %v4009_v57 = vpop.xlane.xlu1 %4008 }
0x13c6   :  { %12339 = vpow2.f32 %v4025_v54  ;;  %v4031_v35 = vmul.f32 1.442695, %v4022_v24  ;;  %v4021_v49 = vsub.f32 %v3997_v44, %v4009_v57  ;;  %v16639_v54 = vld [vmem:[#allocation82_spill] sm:$0xff]  ;;  %v16640_v24 = vld [vmem:[#allocation36_spill] sm:$0xff]  ;;  %v16641_v57 = vld [vmem:[#allocation83_spill] sm:$0xff] }
0x13c7   :  { %v4018_v6 = vpop.xlane.xlu0 %4017 }
0x13c8   :  { %12341 = vpow2.f32 %v4031_v35  ;;  %v4029_v8 = vmul.f32 1.442695, %v4021_v49  ;;  %v4024_v53 = vsub.f32 %v4000_v40, %v4018_v6  ;;  %v16642_v35 = vld [vmem:[#allocation84_spill] sm:$0xff]  ;;  %v16643_v49 = vld [vmem:[#allocation85_spill] sm:$0xff]  ;;  %v16644_v6 = vld [vmem:[#allocation86_spill] sm:$0xff] }
0x13c9   :  { %v4015_v37 = vpop.xlane.xlu1 %4014 }
0x13ca   :  { %12343 = vpow2.f32 %v4029_v8  ;;  %v4035_v28 = vmul.f32 1.442695, %v4024_v53  ;;  %v4023_v43 = vsub.f32 %v3999_v55, %v4015_v37  ;;  %v16645_v8 = vld [vmem:[#allocation87_spill] sm:$0xff]  ;;  %v16646_v53 = vld [vmem:[#allocation88_spill] sm:$0xff] }
0x13cc   :  { %12345 = vpow2.f32 %v4035_v28  ;;  %v4033_v5 = vmul.f32 1.442695, %v4023_v43 }
0x13ce   :  { %12347 = vpow2.f32 %v4033_v5 }
0x13d1   :  { %v12338_v19 = vpop.eup %12337 }
0x13d2   :  { %v4040_v51 = vsel %vm1392_vm12, %v12338_v19, 0.0 }
0x13d3   :  { %v12340_v23 = vpop.eup %12339  ;;  %4041 = vadd.xlane.f32.xlu0 %v4040_v51 }
0x13d4   :  { %v4037_v18 = vsel %vm1392_vm12, %v12340_v23, 0.0 }
0x13d5   :  { %v12342_v56 = vpop.eup %12341  ;;  %4038 = vadd.xlane.f32.xlu1 %v4037_v18 }
0x13d6   :  { %v4046_v12 = vsel %vm1392_vm12, %v12342_v56, 0.0 }
0x13d7   :  { %v12344_v60 = vpop.eup %12343  ;;  %4047 = vadd.xlane.f32.xlu0 %v4046_v12 }
0x13d8   :  { %v4043_v11 = vsel %vm1392_vm12, %v12344_v60, 0.0 }
0x13d9   :  { %v12346_v13 = vpop.eup %12345  ;;  %4044 = vadd.xlane.f32.xlu1 %v4043_v11 }
0x13da   :  { %v4052_v20 = vsel %vm1392_vm12, %v12346_v13, 0.0 }
0x13db   :  { %v12348_v3 = vpop.eup %12347  ;;  %4053 = vadd.xlane.f32.xlu0 %v4052_v20 }
0x13dc   :  { %v4049_v16 = vsel %vm1392_vm12, %v12348_v3, 0.0 }
0x13dd   :  { %4050 = vadd.xlane.f32.xlu1 %v4049_v16 }
0x145c   :  { %v4042_v17 = vpop.xlane.xlu0 %4041 }
0x145d   :  { %12349 = vrcp.f32 %v4042_v17 }
0x145e   :  { %v4039_v33 = vpop.xlane.xlu1 %4038 }
0x145f   :  { %12351 = vrcp.f32 %v4039_v33 }
0x1460   :  { %v4048_v45 = vpop.xlane.xlu0 %4047 }
0x1461   :  { %12353 = vrcp.f32 %v4048_v45 }
0x1462   :  { %v4045_v29 = vpop.xlane.xlu1 %4044 }
0x1463   :  { %12355 = vrcp.f32 %v4045_v29 }
0x1464   :  { %v4054_v42 = vpop.xlane.xlu0 %4053 }
0x1465   :  { %12357 = vrcp.f32 %v4054_v42 }
0x1466   :  { %v4051_v48 = vpop.xlane.xlu1 %4050 }
0x1467   :  { %12359 = vrcp.f32 %v4051_v48 }
0x146a   :  { %v12350_v44 = vpop.eup %12349 }
0x146b   :  { %v4058_v38 = vmul.f32 %v12350_v44, %v12338_v19 }
0x146c   :  { %v12352_v47 = vpop.eup %12351 }
0x146d   :  { %v4056_v2 = vmul.f32 %v12352_v47, %v12340_v23 }
0x146e   :  { %v12354_v40 = vpop.eup %12353 }
0x146f   :  { %11434 = vmatprep.mubr.msk.f32.mxu1 %vm1392_vm12, %v4056_v2  ;;  %v4062_v55 = vmul.f32 %v12354_v40, %v12342_v56 }
0x1470   :  { %v12356_v30 = vpop.eup %12355  ;;  %11435 = vmatmul.mubr.msk.f32.vlgmr.msra.gmra.mxu1 %vm1392_vm12, %v4058_v38 }
0x1471   :  { %11444 = vmatpush3.xpose.msk.msra.mxu1 %vm1248_vm11, %v13357_v10  ;;  %v4060_v31 = vmul.f32 %v12356_v30, %v12344_v60 }
0x1472   :  { %11445 = vmatprep.subr.msk.mxu1 %vm1248_vm11, %v13377_v4  ;;  %v12358_v26 = vpop.eup %12357 }
0x1473   :  { %11437 = vmatprep.mubr.msk.f32.mxu1 %vm1392_vm12, %v4060_v31  ;;  %v4066_v25 = vmul.f32 %v12358_v26, %v12346_v13 }
0x1474   :  { %v12360_v61 = vpop.eup %12359  ;;  %11438 = vmatmul.mubr.msk.f32.gmra.mxu1 %vm1392_vm12, %v4062_v55 }
0x1475   :  { %11446 = vmatpush3.xpose.msk.msra.mxu1 %vm1248_vm11, %v13377_v4  ;;  %v4064_v34 = vmul.f32 %v12360_v61, %v12348_v3 }
0x1476   :  { %11447 = vmatprep.subr.msk.mxu1 %vm1248_vm11, %v13399_v0 }
0x1477   :  { %11440 = vmatprep.mubr.msk.f32.mxu1 %vm1392_vm12, %v4064_v34 }
0x1478   :  { %11441 = vmatmul.mubr.msk.f32.gmra.mxu1 %vm1392_vm12, %v4066_v25 }
0x1479   :  { %11448 = vmatpush3.xpose.msk.msra.mxu1 %vm1248_vm11, %v13399_v0  ;;  %11455 = vmatprep.mubr.msk.f32.mxu1 %vm1248_vm11, %v16635_v15 }
0x147a   :  { %11449 = vmatprep.subr.msk.mxu1 %vm1248_vm11, %v13427_v63 }
0x147d   :  { %11450 = vmatpush3.xpose.msk.msra.mxu1 %vm1248_vm11, %v13427_v63 }
0x147e   :  { %11451 = vmatprep.subr.msk.mxu1 %vm1248_vm11, %v13367_v7 }
0x1481   :  { %11452 = vmatpush3.xpose.msk.msra.mxu1 %vm1248_vm11, %v13367_v7 }
0x1482   :  { %11453 = vmatprep.subr.msk.mxu1 %vm1248_vm11, %v13372_v52 }
0x1485   :  { %11454 = vmatpush3.xpose.msk.msra.mxu1 %vm1248_vm11, %v13372_v52 }
0x1486   :  { %11506 = vmatprep.subr.mxu1 %v16636_v58 }
0x1488   :  { %11456 = vmatmul.mubr.msk.f32.vlgmr.msra.gmra.mxu1 %vm1248_vm11, %v16637_v36 }
0x1489   :  { %11458 = vmatprep.mubr.msk.f32.mxu1 %vm1248_vm11, %v16638_v59  ;;  %11507 = vmatpush3.msra.mxu1 %v16636_v58 }
0x148a   :  { %11508 = vmatprep.subr.mxu1 %v16639_v54 }
0x148b   :  { %11509 = vmatpush3.msra.mxu1 %v16639_v54 }
0x148c   :  { %11459 = vmatmul.mubr.msk.f32.gmra.mxu1 %vm1248_vm11, %v16640_v24  ;;  %11510 = vmatprep.subr.mxu1 %v16641_v57 }
0x148d   :  { %11461 = vmatprep.mubr.msk.f32.mxu1 %vm1248_vm11, %v16642_v35  ;;  %11511 = vmatpush3.msra.mxu1 %v16641_v57 }
0x148e   :  { %11512 = vmatprep.subr.mxu1 %v16643_v49 }
0x148f   :  { %11513 = vmatpush3.msra.mxu1 %v16643_v49 }
0x1490   :  { %11462 = vmatmul.mubr.msk.f32.gmra.mxu1 %vm1248_vm11, %v16644_v6  ;;  %11514 = vmatprep.subr.mxu1 %v16645_v8 }
0x1491   :  { %11515 = vmatpush3.msra.mxu1 %v16645_v8 }
0x1492   :  { %11516 = vmatprep.subr.mxu1 %v16646_v53 }
0x1493   :  { %11517 = vmatpush3.msra.mxu1 %v16646_v53 }
0x1494   :  { %11527 = vmatprep.subr.msk.mxu1 %vm1248_vm11, %v13357_v10 }
0x1530   :  { %v11436_v37 = vpop.f32.mrf.mxu1 }
0x1531   :  { %v14757_v28 = vadd.f32 %v11436_v37, %v14637_v21 }
0x1532   :  { %v4157_v43 = vpop.f32.mrf.mxu1 }
0x1533   :  { %v14760_v5 = vadd.f32 %v4157_v43, %v14640_v41 }
0x1534   :  { %v11439_v19 = vpop.f32.mrf.mxu1 }
0x1535   :  { %v14763_v51 = vadd.f32 %v11439_v19, %v14643_v9 }
0x1536   :  { %v4167_v23 = vpop.f32.mrf.mxu1 }
0x1537   :  { %v14766_v18 = vadd.f32 %v4167_v23, %v14646_v32 }
0x1538   :  { %v11442_v56 = vpop.f32.mrf.mxu1 }
0x1539   :  { %v14769_v12 = vadd.f32 %v11442_v56, %v14649_v27 }
0x153a   :  { %v4177_v60 = vpop.f32.mrf.mxu1 }
0x153b   :  { %v14772_v21 = vadd.f32 %v4177_v60, %v14652_v50 }
0x1548   :  { %v11457_v11 = vpop.f32.mrf.mxu1 }
0x1549   :  { %v4316_v13 = vmul.f32 0.35355338, %v11457_v11 }
0x154a   :  { %v4286_v41 = vpop.f32.mrf.mxu1 }
0x154b   :  { %v4322_v20 = vadd.f32 %v4316_v13, %v14657_v39  ;;  %v4315_v3 = vmul.f32 0.35355338, %v4286_v41 }
0x154c   :  { %v11460_v9 = vpop.f32.mrf.mxu1 }
0x154d   :  { %v4321_v16 = vadd.f32 %v4315_v3, %v14662_v62  ;;  %v4318_v17 = vmul.f32 0.35355338, %v11460_v9  ;;  %v4330_v32 = vsel %vm1392_vm12, %v4322_v20, -inf }
0x154e   :  { %4331 = vmax.xlane.f32.xlu0 %v4330_v32  ;;  %v4296_v33 = vpop.f32.mrf.mxu1 }
0x154f   :  { %v4324_v27 = vadd.f32 %v4318_v17, %v14668_v1  ;;  %v4317_v45 = vmul.f32 0.35355338, %v4296_v33  ;;  %v4327_v50 = vsel %vm1392_vm12, %v4321_v16, -inf }
0x1550   :  { %4328 = vmax.xlane.f32.xlu1 %v4327_v50  ;;  %v11463_v29 = vpop.f32.mrf.mxu1 }
0x1551   :  { %v4323_v42 = vadd.f32 %v4317_v45, %v14675_v22  ;;  %v4320_v48 = vmul.f32 0.35355338, %v11463_v29  ;;  %v4336_v44 = vsel %vm1392_vm12, %v4324_v27, -inf }
0x1552   :  { %4337 = vmax.xlane.f32.xlu0 %v4336_v44  ;;  %v4306_v47 = vpop.f32.mrf.mxu1 }
0x1553   :  { %v4326_v2 = vadd.f32 %v4320_v48, %v14682_v14  ;;  %v4319_v38 = vmul.f32 0.35355338, %v4306_v47  ;;  %v4333_v40 = vsel %vm1392_vm12, %v4323_v42, -inf }
0x1554   :  { %4334 = vmax.xlane.f32.xlu1 %v4333_v40 }
0x1555   :  { %v4325_v30 = vadd.f32 %v4319_v38, %v14689_v46  ;;  %v4342_v31 = vsel %vm1392_vm12, %v4326_v2, -inf }
0x1556   :  { %4343 = vmax.xlane.f32.xlu0 %v4342_v31 }
0x1557   :  { %v4339_v55 = vsel %vm1392_vm12, %v4325_v30, -inf }
0x1558   :  { %4340 = vmax.xlane.f32.xlu1 %v4339_v55 }
0x15d7   :  { %v4332_v26 = vpop.xlane.xlu0 %4331 }
0x15d8   :  { %v4346_v61 = vsub.f32 %v4322_v20, %v4332_v26 }
0x15d9   :  { %v4329_v34 = vpop.xlane.xlu1 %4328 }
0x15da   :  { %v4353_v25 = vmul.f32 1.442695, %v4346_v61  ;;  %v4345_v15 = vsub.f32 %v4321_v16, %v4329_v34  ;;  %v16647_v34 = vld [vmem:[#allocation19_spill] sm:$0xff] }
0x15db   :  { %v4338_v58 = vpop.xlane.xlu0 %4337 }
0x15dc   :  { %12361 = vpow2.f32 %v4353_v25  ;;  %v4351_v36 = vmul.f32 1.442695, %v4345_v15  ;;  %v4348_v59 = vsub.f32 %v4324_v27, %v4338_v58  ;;  %v16648_v25 = vld [vmem:[#allocation89_spill] sm:$0xff]  ;;  %v16649_v15 = vld [vmem:[#allocation20_spill] sm:$0xff] }
0x15dd   :  { %v4335_v54 = vpop.xlane.xlu1 %4334  ;;  %v16650_v58 = vld [vmem:[#allocation37_spill] sm:$0xff] }
0x15de   :  { %12363 = vpow2.f32 %v4351_v36  ;;  %v4357_v24 = vmul.f32 1.442695, %v4348_v59  ;;  %v4347_v57 = vsub.f32 %v4323_v42, %v4335_v54  ;;  %v16651_v36 = vld [vmem:[#allocation90_spill] sm:$0xff]  ;;  %v16653_v54 = vld [vmem:[#allocation91_spill] sm:$0xff] }
0x15df   :  { %v4344_v35 = vpop.xlane.xlu0 %4343  ;;  %v16652_v59 = vld [vmem:[#allocation38_spill] sm:$0xff] }
0x15e0   :  { %12365 = vpow2.f32 %v4357_v24  ;;  %v4355_v49 = vmul.f32 1.442695, %v4347_v57  ;;  %v4350_v6 = vsub.f32 %v4326_v2, %v4344_v35  ;;  %v16654_v24 = vld [vmem:[#allocation92_spill] sm:$0xff]  ;;  %v16655_v57 = vld [vmem:[#allocation93_spill] sm:$0xff]  ;;  %v16656_v35 = vld [vmem:[#allocation94_spill] sm:$0xff] }
0x15e1   :  { %v4341_v8 = vpop.xlane.xlu1 %4340 }
0x15e2   :  { %12367 = vpow2.f32 %v4355_v49  ;;  %v4361_v53 = vmul.f32 1.442695, %v4350_v6  ;;  %v4349_v37 = vsub.f32 %v4325_v30, %v4341_v8  ;;  %v16657_v49 = vld [vmem:[#allocation95_spill] sm:$0xff]  ;;  %v16658_v6 = vld [vmem:[#allocation96_spill] sm:$0xff] }
0x15e4   :  { %12369 = vpow2.f32 %v4361_v53  ;;  %v4359_v43 = vmul.f32 1.442695, %v4349_v37 }
0x15e6   :  { %12371 = vpow2.f32 %v4359_v43 }
0x15e9   :  { %v12362_v19 = vpop.eup %12361 }
0x15ea   :  { %v4366_v23 = vsel %vm1392_vm12, %v12362_v19, 0.0 }
0x15eb   :  { %v12364_v56 = vpop.eup %12363  ;;  %4367 = vadd.xlane.f32.xlu0 %v4366_v23 }
0x15ec   :  { %v4363_v60 = vsel %vm1392_vm12, %v12364_v56, 0.0 }
0x15ed   :  { %v12366_v11 = vpop.eup %12365  ;;  %4364 = vadd.xlane.f32.xlu1 %v4363_v60 }
0x15ee   :  { %v4372_v13 = vsel %vm1392_vm12, %v12366_v11, 0.0 }
0x15ef   :  { %v12368_v41 = vpop.eup %12367  ;;  %4373 = vadd.xlane.f32.xlu0 %v4372_v13 }
0x15f0   :  { %v4369_v20 = vsel %vm1392_vm12, %v12368_v41, 0.0 }
0x15f1   :  { %v12370_v3 = vpop.eup %12369  ;;  %4370 = vadd.xlane.f32.xlu1 %v4369_v20 }
0x15f2   :  { %v4378_v9 = vsel %vm1392_vm12, %v12370_v3, 0.0 }
0x15f3   :  { %v12372_v16 = vpop.eup %12371  ;;  %4379 = vadd.xlane.f32.xlu0 %v4378_v9 }
0x15f4   :  { %v4375_v17 = vsel %vm1392_vm12, %v12372_v16, 0.0 }
0x15f5   :  { %4376 = vadd.xlane.f32.xlu1 %v4375_v17 }
0x1674   :  { %v4368_v32 = vpop.xlane.xlu0 %4367 }
0x1675   :  { %12373 = vrcp.f32 %v4368_v32 }
0x1676   :  { %v4365_v33 = vpop.xlane.xlu1 %4364 }
0x1677   :  { %12375 = vrcp.f32 %v4365_v33 }
0x1678   :  { %v4374_v27 = vpop.xlane.xlu0 %4373 }
0x1679   :  { %12377 = vrcp.f32 %v4374_v27 }
0x167a   :  { %v4371_v45 = vpop.xlane.xlu1 %4370 }
0x167b   :  { %12379 = vrcp.f32 %v4371_v45 }
0x167c   :  { %v4380_v50 = vpop.xlane.xlu0 %4379 }
0x167d   :  { %12381 = vrcp.f32 %v4380_v50 }
0x167e   :  { %v4377_v29 = vpop.xlane.xlu1 %4376 }
0x167f   :  { %12383 = vrcp.f32 %v4377_v29 }
0x1682   :  { %v12374_v42 = vpop.eup %12373 }
0x1683   :  { %v4384_v47 = vmul.f32 %v12374_v42, %v12362_v19 }
0x1684   :  { %v12376_v48 = vpop.eup %12375 }
0x1685   :  { %v4382_v44 = vmul.f32 %v12376_v48, %v12364_v56 }
0x1686   :  { %v12378_v2 = vpop.eup %12377 }
0x1687   :  { %11476 = vmatprep.mubr.msk.f32.mxu0 %vm1392_vm12, %v4382_v44  ;;  %v4388_v30 = vmul.f32 %v12378_v2, %v12366_v11 }
0x1688   :  { %v12380_v38 = vpop.eup %12379  ;;  %11477 = vmatmul.mubr.msk.f32.vlgmr.msra.gmra.mxu0 %vm1392_vm12, %v4384_v47 }
0x1689   :  { %11486 = vmatpush3.xpose.msk.msra.mxu0 %vm1248_vm11, %v13357_v10  ;;  %v4386_v40 = vmul.f32 %v12380_v38, %v12368_v41 }
0x168a   :  { %11487 = vmatprep.subr.msk.mxu0 %vm1248_vm11, %v13377_v4  ;;  %v12382_v31 = vpop.eup %12381 }
0x168b   :  { %11479 = vmatprep.mubr.msk.f32.mxu0 %vm1392_vm12, %v4386_v40  ;;  %v4392_v61 = vmul.f32 %v12382_v31, %v12370_v3 }
0x168c   :  { %v12384_v55 = vpop.eup %12383  ;;  %11480 = vmatmul.mubr.msk.f32.gmra.mxu0 %vm1392_vm12, %v4388_v30 }
0x168d   :  { %11488 = vmatpush3.xpose.msk.msra.mxu0 %vm1248_vm11, %v13377_v4  ;;  %v4390_v26 = vmul.f32 %v12384_v55, %v12372_v16 }
0x168e   :  { %11489 = vmatprep.subr.msk.mxu0 %vm1248_vm11, %v13399_v0 }
0x168f   :  { %11482 = vmatprep.mubr.msk.f32.mxu0 %vm1392_vm12, %v4390_v26 }
0x1690   :  { %11483 = vmatmul.mubr.msk.f32.gmra.mxu0 %vm1392_vm12, %v4392_v61 }
0x1691   :  { %11490 = vmatpush3.xpose.msk.msra.mxu0 %vm1248_vm11, %v13399_v0  ;;  %11497 = vmatprep.mubr.msk.f32.mxu0 %vm1248_vm11, %v16647_v34 }
0x1692   :  { %11491 = vmatprep.subr.msk.mxu0 %vm1248_vm11, %v13427_v63 }
0x1695   :  { %11492 = vmatpush3.xpose.msk.msra.mxu0 %vm1248_vm11, %v13427_v63 }
0x1696   :  { %11493 = vmatprep.subr.msk.mxu0 %vm1248_vm11, %v13367_v7 }
0x1699   :  { %11494 = vmatpush3.xpose.msk.msra.mxu0 %vm1248_vm11, %v13367_v7 }
0x169a   :  { %11495 = vmatprep.subr.msk.mxu0 %vm1248_vm11, %v13372_v52 }
0x169d   :  { %11496 = vmatpush3.xpose.msk.msra.mxu0 %vm1248_vm11, %v13372_v52 }
0x169e   :  { %11548 = vmatprep.subr.mxu0 %v16648_v25 }
0x16a0   :  { %11498 = vmatmul.mubr.msk.f32.vlgmr.msra.gmra.mxu0 %vm1248_vm11, %v16649_v15 }
0x16a1   :  { %11500 = vmatprep.mubr.msk.f32.mxu0 %vm1248_vm11, %v16650_v58  ;;  %11549 = vmatpush3.msra.mxu0 %v16648_v25 }
0x16a2   :  { %11550 = vmatprep.subr.mxu0 %v16651_v36 }
0x16a3   :  { %11551 = vmatpush3.msra.mxu0 %v16651_v36 }
0x16a4   :  { %11501 = vmatmul.mubr.msk.f32.gmra.mxu0 %vm1248_vm11, %v16652_v59  ;;  %11552 = vmatprep.subr.mxu0 %v16653_v54 }
0x16a5   :  { %11503 = vmatprep.mubr.msk.f32.mxu0 %vm1248_vm11, %v16654_v24  ;;  %11553 = vmatpush3.msra.mxu0 %v16653_v54 }
0x16a6   :  { %11554 = vmatprep.subr.mxu0 %v16655_v57 }
0x16a7   :  { %11555 = vmatpush3.msra.mxu0 %v16655_v57 }
0x16a8   :  { %11504 = vmatmul.mubr.msk.f32.gmra.mxu0 %vm1248_vm11, %v16656_v35  ;;  %11556 = vmatprep.subr.mxu0 %v16657_v49 }
0x16a9   :  { %11557 = vmatpush3.msra.mxu0 %v16657_v49 }
0x16aa   :  { %11558 = vmatprep.subr.mxu0 %v16658_v6 }
0x16ab   :  { %11559 = vmatpush3.msra.mxu0 %v16658_v6 }
0x1748   :  { %v11478_v8 = vpop.f32.mrf.mxu0 }
0x1749   :  { %v14845_v53 = vadd.f32 %v11478_v8, %v14757_v28 }
0x174a   :  { %v4483_v37 = vpop.f32.mrf.mxu0 }
0x174b   :  { %v14848_v43 = vadd.f32 %v4483_v37, %v14760_v5 }
0x174c   :  { %v11481_v19 = vpop.f32.mrf.mxu0 }
0x174d   :  { %v14851_v23 = vadd.f32 %v11481_v19, %v14763_v51 }
0x174e   :  { %v4493_v56 = vpop.f32.mrf.mxu0 }
0x174f   :  { %v14854_v60 = vadd.f32 %v4493_v56, %v14766_v18 }
0x1750   :  { %v11484_v11 = vpop.f32.mrf.mxu0 }
0x1751   :  { %v14857_v13 = vadd.f32 %v11484_v11, %v14769_v12 }
0x1752   :  { %v4503_v41 = vpop.f32.mrf.mxu0 }
0x1753   :  { %v14860_v28 = vadd.f32 %v4503_v41, %v14772_v21 }
0x1760   :  { %v11499_v20 = vpop.f32.mrf.mxu0 }
0x1761   :  { %v4642_v3 = vmul.f32 0.35355338, %v11499_v20 }
0x1762   :  { %v4612_v5 = vpop.f32.mrf.mxu0 }
0x1763   :  { %v4648_v9 = vadd.f32 %v4642_v3, %v14657_v39  ;;  %v4641_v16 = vmul.f32 0.35355338, %v4612_v5 }
0x1764   :  { %v11502_v51 = vpop.f32.mrf.mxu0 }
0x1765   :  { %v4647_v17 = vadd.f32 %v4641_v16, %v14662_v62  ;;  %v4644_v32 = vmul.f32 0.35355338, %v11502_v51  ;;  %v4656_v18 = vsel %vm1392_vm12, %v4648_v9, -inf }
0x1766   :  { %4657 = vmax.xlane.f32.xlu0 %v4656_v18  ;;  %v4622_v33 = vpop.f32.mrf.mxu0 }
0x1767   :  { %v4650_v12 = vadd.f32 %v4644_v32, %v14668_v1  ;;  %v4643_v27 = vmul.f32 0.35355338, %v4622_v33  ;;  %v4653_v21 = vsel %vm1392_vm12, %v4647_v17, -inf }
0x1768   :  { %4654 = vmax.xlane.f32.xlu1 %v4653_v21  ;;  %v11505_v45 = vpop.f32.mrf.mxu0 }
0x1769   :  { %v4649_v50 = vadd.f32 %v4643_v27, %v14675_v22  ;;  %v4646_v29 = vmul.f32 0.35355338, %v11505_v45  ;;  %v4662_v42 = vsel %vm1392_vm12, %v4650_v12, -inf }
0x176a   :  { %4663 = vmax.xlane.f32.xlu0 %v4662_v42  ;;  %v4632_v48 = vpop.f32.mrf.mxu0 }
0x176b   :  { %v4652_v44 = vadd.f32 %v4646_v29, %v14682_v14  ;;  %v4645_v47 = vmul.f32 0.35355338, %v4632_v48  ;;  %v4659_v2 = vsel %vm1392_vm12, %v4649_v50, -inf }
0x176c   :  { %4660 = vmax.xlane.f32.xlu1 %v4659_v2 }
0x176d   :  { %v4651_v38 = vadd.f32 %v4645_v47, %v14689_v46  ;;  %v4668_v40 = vsel %vm1392_vm12, %v4652_v44, -inf }
0x176e   :  { %4669 = vmax.xlane.f32.xlu0 %v4668_v40 }
0x176f   :  { %v4665_v30 = vsel %vm1392_vm12, %v4651_v38, -inf }
0x1770   :  { %4666 = vmax.xlane.f32.xlu1 %v4665_v30 }
0x17ef   :  { %v4658_v31 = vpop.xlane.xlu0 %4657 }
0x17f0   :  { %v4672_v55 = vsub.f32 %v4648_v9, %v4658_v31 }
0x17f1   :  { %v4655_v26 = vpop.xlane.xlu1 %4654 }
0x17f2   :  { %v4679_v61 = vmul.f32 1.442695, %v4672_v55  ;;  %v4671_v34 = vsub.f32 %v4647_v17, %v4655_v26  ;;  %v16662_v26 = vld [vmem:[#allocation40_spill] sm:$0xff] }
0x17f3   :  { %v4664_v25 = vpop.xlane.xlu0 %4663 }
0x17f4   :  { %12385 = vpow2.f32 %v4679_v61  ;;  %v4677_v15 = vmul.f32 1.442695, %v4671_v34  ;;  %v4674_v58 = vsub.f32 %v4650_v12, %v4664_v25  ;;  %v16664_v61 = vld [vmem:[#allocation98_spill] sm:$0xff] }
0x17f5   :  { %v4661_v36 = vpop.xlane.xlu1 %4660 }
0x17f6   :  { %12387 = vpow2.f32 %v4677_v15  ;;  %v4683_v59 = vmul.f32 1.442695, %v4674_v58  ;;  %v4673_v54 = vsub.f32 %v4649_v50, %v4661_v36 }
0x17f7   :  { %v4670_v24 = vpop.xlane.xlu0 %4669 }
0x17f8   :  { %12389 = vpow2.f32 %v4683_v59  ;;  %v4681_v57 = vmul.f32 1.442695, %v4673_v54  ;;  %v4676_v35 = vsub.f32 %v4652_v44, %v4670_v24 }
0x17f9   :  { %v4667_v49 = vpop.xlane.xlu1 %4666 }
0x17fa   :  { %12391 = vpow2.f32 %v4681_v57  ;;  %v4687_v6 = vmul.f32 1.442695, %v4676_v35  ;;  %v4675_v8 = vsub.f32 %v4651_v38, %v4667_v49 }
0x17fc   :  { %12393 = vpow2.f32 %v4687_v6  ;;  %v4685_v37 = vmul.f32 1.442695, %v4675_v8 }
0x17fe   :  { %12395 = vpow2.f32 %v4685_v37 }
0x1801   :  { %v12386_v19 = vpop.eup %12385 }
0x1802   :  { %v4692_v56 = vsel %vm1392_vm12, %v12386_v19, 0.0 }
0x1803   :  { %v12388_v11 = vpop.eup %12387  ;;  %4693 = vadd.xlane.f32.xlu0 %v4692_v56 }
0x1804   :  { %v4689_v41 = vsel %vm1392_vm12, %v12388_v11, 0.0 }
0x1805   :  { %v12390_v20 = vpop.eup %12389  ;;  %4690 = vadd.xlane.f32.xlu1 %v4689_v41 }
0x1806   :  { %v4698_v3 = vsel %vm1392_vm12, %v12390_v20, 0.0 }
0x1807   :  { %v12392_v5 = vpop.eup %12391  ;;  %4699 = vadd.xlane.f32.xlu0 %v4698_v3 }
0x1808   :  { %v4695_v9 = vsel %vm1392_vm12, %v12392_v5, 0.0 }
0x1809   :  { %v12394_v16 = vpop.eup %12393  ;;  %4696 = vadd.xlane.f32.xlu1 %v4695_v9 }
0x180a   :  { %v4704_v51 = vsel %vm1392_vm12, %v12394_v16, 0.0 }
0x180b   :  { %v12396_v17 = vpop.eup %12395  ;;  %4705 = vadd.xlane.f32.xlu0 %v4704_v51 }
0x180c   :  { %v4701_v32 = vsel %vm1392_vm12, %v12396_v17, 0.0 }
0x180d   :  { %4702 = vadd.xlane.f32.xlu1 %v4701_v32 }
0x188c   :  { %v4694_v18 = vpop.xlane.xlu0 %4693 }
0x188d   :  { %12397 = vrcp.f32 %v4694_v18 }
0x188e   :  { %v4691_v33 = vpop.xlane.xlu1 %4690 }
0x188f   :  { %12399 = vrcp.f32 %v4691_v33 }
0x1890   :  { %v4700_v12 = vpop.xlane.xlu0 %4699 }
0x1891   :  { %12401 = vrcp.f32 %v4700_v12 }
0x1892   :  { %v4697_v27 = vpop.xlane.xlu1 %4696 }
0x1893   :  { %12403 = vrcp.f32 %v4697_v27 }
0x1894   :  { %v4706_v21 = vpop.xlane.xlu0 %4705 }
0x1895   :  { %12405 = vrcp.f32 %v4706_v21 }
0x1896   :  { %v4703_v45 = vpop.xlane.xlu1 %4702 }
0x1897   :  { %12407 = vrcp.f32 %v4703_v45 }
0x189a   :  { %v12398_v50 = vpop.eup %12397 }
0x189b   :  { %v4710_v48 = vmul.f32 %v12398_v50, %v12386_v19 }
0x189c   :  { %v12400_v29 = vpop.eup %12399 }
0x189d   :  { %v4708_v42 = vmul.f32 %v12400_v29, %v12388_v11 }
0x189e   :  { %v12402_v44 = vpop.eup %12401 }
0x189f   :  { %11518 = vmatprep.mubr.msk.f32.mxu1 %vm1392_vm12, %v4708_v42  ;;  %v4714_v38 = vmul.f32 %v12402_v44, %v12390_v20 }
0x18a0   :  { %v12404_v47 = vpop.eup %12403  ;;  %11519 = vmatmul.mubr.msk.f32.vlgmr.msra.gmra.mxu1 %vm1392_vm12, %v4710_v48 }
0x18a1   :  { %11528 = vmatpush3.xpose.msk.msra.mxu1 %vm1248_vm11, %v13357_v10  ;;  %v4712_v2 = vmul.f32 %v12404_v47, %v12392_v5  ;;  %v16659_v10 = vld [vmem:[#allocation21_spill] sm:$0xff] }
0x18a2   :  { %11529 = vmatprep.subr.msk.mxu1 %vm1248_vm11, %v13377_v4  ;;  %v12406_v40 = vpop.eup %12405 }
0x18a3   :  { %11521 = vmatprep.mubr.msk.f32.mxu1 %vm1392_vm12, %v4712_v2  ;;  %v4718_v55 = vmul.f32 %v12406_v40, %v12394_v16 }
0x18a4   :  { %v12408_v30 = vpop.eup %12407  ;;  %11522 = vmatmul.mubr.msk.f32.gmra.mxu1 %vm1392_vm12, %v4714_v38 }
0x18a5   :  { %11530 = vmatpush3.xpose.msk.msra.mxu1 %vm1248_vm11, %v13377_v4  ;;  %v4716_v31 = vmul.f32 %v12408_v30, %v12396_v17  ;;  %v16660_v4 = vld [vmem:[#allocation22_spill] sm:$0xff] }
0x18a6   :  { %11531 = vmatprep.subr.msk.mxu1 %vm1248_vm11, %v13399_v0 }
0x18a7   :  { %11524 = vmatprep.mubr.msk.f32.mxu1 %vm1392_vm12, %v4716_v31 }
0x18a8   :  { %11525 = vmatmul.mubr.msk.f32.gmra.mxu1 %vm1392_vm12, %v4718_v55 }
0x18a9   :  { %11532 = vmatpush3.xpose.msk.msra.mxu1 %vm1248_vm11, %v13399_v0  ;;  %11539 = vmatprep.mubr.msk.f32.mxu1 %vm1248_vm11, %v16659_v10  ;;  %v16661_v0 = vld [vmem:[#allocation39_spill] sm:$0xff] }
0x18aa   :  { %11533 = vmatprep.subr.msk.mxu1 %vm1248_vm11, %v13427_v63 }
0x18ad   :  { %11534 = vmatpush3.xpose.msk.msra.mxu1 %vm1248_vm11, %v13427_v63  ;;  %v16663_v63 = vld [vmem:[#allocation97_spill] sm:$0xff] }
0x18ae   :  { %11535 = vmatprep.subr.msk.mxu1 %vm1248_vm11, %v13367_v7 }
0x18b1   :  { %11536 = vmatpush3.xpose.msk.msra.mxu1 %vm1248_vm11, %v13367_v7 }
0x18b2   :  { %11537 = vmatprep.subr.msk.mxu1 %vm1248_vm11, %v13372_v52 }
0x18b5   :  { %11538 = vmatpush3.xpose.msk.msra.mxu1 %vm1248_vm11, %v13372_v52 }
0x18b8   :  { %11540 = vmatmul.mubr.msk.f32.vlgmr.msra.gmra.mxu1 %vm1248_vm11, %v16660_v4 }
0x18b9   :  { %11542 = vmatprep.mubr.msk.f32.mxu1 %vm1248_vm11, %v16661_v0 }
0x18bc   :  { %11543 = vmatmul.mubr.msk.f32.gmra.mxu1 %vm1248_vm11, %v16662_v26 }
0x18bd   :  { %11545 = vmatprep.mubr.msk.f32.mxu1 %vm1248_vm11, %v16663_v63 }
0x18c0   :  { %11546 = vmatmul.mubr.msk.f32.gmra.mxu1 %vm1248_vm11, %v16664_v61 }
0x1960   :  { %v11520_v7 = vpop.f32.mrf.mxu1 }
0x1961   :  { %v14921_v34 = vadd.f32 %v11520_v7, %v14845_v53 }
0x1962   :  { %v4809_v52 = vpop.f32.mrf.mxu1 }
0x1963   :  { %v14924_v25 = vadd.f32 %v4809_v52, %v14848_v43 }
0x1964   :  { %v11523_v15 = vpop.f32.mrf.mxu1 }
0x1965   :  { %v14927_v58 = vadd.f32 %v11523_v15, %v14851_v23  ;;  %v5187_v15 = vld [vmem:[%s16412_s5 + $0x2c0] sm:$0xff] }
0x1966   :  { %v4819_v36 = vpop.f32.mrf.mxu1  ;;  %11569 = vmatprep.subr.mxu0 %v5187_v15 }
0x1967   :  { %v14930_v59 = vadd.f32 %v4819_v36, %v14854_v60 }
0x1968   :  { %v11526_v54 = vpop.f32.mrf.mxu1 }
0x1969   :  { %v14933_v24 = vadd.f32 %v11526_v54, %v14857_v13 }
0x196a   :  { %v4829_v57 = vpop.f32.mrf.mxu1 }
0x196b   :  { %v14936_v53 = vadd.f32 %v4829_v57, %v14860_v28 }
0x1978   :  { %v11541_v35 = vpop.f32.mrf.mxu1 }
0x1979   :  { %v4968_v49 = vmul.f32 0.35355338, %v11541_v35 }
0x197a   :  { %v4938_v43 = vpop.f32.mrf.mxu1 }
0x197b   :  { %v4974_v6 = vadd.f32 %v4968_v49, %v14657_v39  ;;  %v4967_v8 = vmul.f32 0.35355338, %v4938_v43 }
0x197c   :  { %v11544_v23 = vpop.f32.mrf.mxu1 }
0x197d   :  { %v4973_v37 = vadd.f32 %v4967_v8, %v14662_v62  ;;  %v4970_v19 = vmul.f32 0.35355338, %v11544_v23  ;;  %v4982_v60 = vsel %vm1392_vm12, %v4974_v6, -inf }
0x197e   :  { %4983 = vmax.xlane.f32.xlu0 %v4982_v60  ;;  %v4948_v56 = vpop.f32.mrf.mxu1  ;;  %v5186_v60 = vld [vmem:[%s16412_s5 + $0x2b8] sm:$0xff] }
0x197f   :  { %v4976_v13 = vadd.f32 %v4970_v19, %v14668_v1  ;;  %v4969_v11 = vmul.f32 0.35355338, %v4948_v56  ;;  %v4979_v28 = vsel %vm1392_vm12, %v4973_v37, -inf }
0x1980   :  { %4980 = vmax.xlane.f32.xlu1 %v4979_v28  ;;  %v11547_v41 = vpop.f32.mrf.mxu1 }
0x1981   :  { %v4975_v20 = vadd.f32 %v4969_v11, %v14675_v22  ;;  %v4972_v3 = vmul.f32 0.35355338, %v11547_v41  ;;  %v4988_v39 = vsel %vm1392_vm12, %v4976_v13, -inf  ;;  %v5185_v11 = vld [vmem:[%s16412_s5 + $0x2b0] sm:$0xff] }
0x1982   :  { %4989 = vmax.xlane.f32.xlu0 %v4988_v39  ;;  %v4958_v5 = vpop.f32.mrf.mxu1 }
0x1983   :  { %v4978_v62 = vadd.f32 %v4972_v3, %v14682_v14  ;;  %v4971_v9 = vmul.f32 0.35355338, %v4958_v5  ;;  %v4985_v16 = vsel %vm1392_vm12, %v4975_v20, -inf  ;;  %v5183_v5 = vld [vmem:[%s16412_s5 + $0x2a0] sm:$0xff] }
0x1984   :  { %4986 = vmax.xlane.f32.xlu1 %v4985_v16  ;;  %v5181_v16 = vld [vmem:[%s16412_s5 + $0x290] sm:$0xff] }
0x1985   :  { %v4977_v1 = vadd.f32 %v4971_v9, %v14689_v46  ;;  %v4994_v51 = vsel %vm1392_vm12, %v4978_v62, -inf  ;;  %v5182_v9 = vld [vmem:[%s16412_s5 + $0x298] sm:$0xff] }
0x1986   :  { %4995 = vmax.xlane.f32.xlu0 %v4994_v51  ;;  %v5179_v51 = vld [vmem:[%s16412_s5 + $0x280] sm:$0xff] }
0x1987   :  { %v4991_v17 = vsel %vm1392_vm12, %v4977_v1, -inf }
0x1988   :  { %4992 = vmax.xlane.f32.xlu1 %v4991_v17  ;;  %v5178_v17 = vld [vmem:[%s16412_s5 + $0x278] sm:$0xff] }
0x1a07   :  { %v4984_v22 = vpop.xlane.xlu0 %4983 }
0x1a08   :  { %v4998_v32 = vsub.f32 %v4974_v6, %v4984_v22  ;;  %v5177_v22 = vld [vmem:[%s16412_s5 + $0x270] sm:$0xff] }
0x1a09   :  { %v4981_v18 = vpop.xlane.xlu1 %4980 }
0x1a0a   :  { %v5005_v33 = vmul.f32 1.442695, %v4998_v32  ;;  %v4997_v12 = vsub.f32 %v4973_v37, %v4981_v18  ;;  %v5176_v32 = vld [vmem:[%s16412_s5 + $0x268] sm:$0xff]  ;;  %v5310_v18 = vld [vmem:[%s16412_s5 + $0x310] sm:$0xff] }
0x1a0b   :  { %v4990_v27 = vpop.xlane.xlu0 %4989  ;;  %11602 = vmatprep.subr.mxu1 %v5310_v18 }
0x1a0c   :  { %12409 = vpow2.f32 %v5005_v33  ;;  %v5003_v14 = vmul.f32 1.442695, %v4997_v12  ;;  %v5000_v21 = vsub.f32 %v4976_v13, %v4990_v27  ;;  %v5309_v33 = vld [vmem:[%s16412_s5 + $0x308] sm:$0xff]  ;;  %v5320_v12 = vld [vmem:[%s16412_s5 + $0x360] sm:$0xff]  ;;  %11603 = vmatpush3.msra.mxu1 %v5310_v18 }
0x1a0d   :  { %v4987_v45 = vpop.xlane.xlu1 %4986  ;;  %11604 = vmatprep.subr.mxu1 %v5309_v33 }
0x1a0e   :  { %12411 = vpow2.f32 %v5003_v14  ;;  %v5009_v50 = vmul.f32 1.442695, %v5000_v21  ;;  %v4999_v29 = vsub.f32 %v4975_v20, %v4987_v45  ;;  %v5184_v20 = vld [vmem:[%s16412_s5 + $0x2a8] sm:$0xff]  ;;  %11605 = vmatpush3.msra.mxu1 %v5309_v33  ;;  %v890_v21 = vld [vmem:[%s16411_s4 + $0xd8] sm:$0xff] }
0x1a0f   :  { %v4996_v46 = vpop.xlane.xlu0 %4995 }
0x1a10   :  { %12413 = vpow2.f32 %v5009_v50  ;;  %v5007_v42 = vmul.f32 1.442695, %v4999_v29  ;;  %v5002_v48 = vsub.f32 %v4978_v62, %v4996_v46  ;;  %v891_v50 = vld [vmem:[%s16411_s4 + $0xe0] sm:$0xff] }
0x1a11   :  { %v4993_v44 = vpop.xlane.xlu1 %4992 }
0x1a12   :  { %12415 = vpow2.f32 %v5007_v42  ;;  %v5013_v47 = vmul.f32 1.442695, %v5002_v48  ;;  %v5001_v2 = vsub.f32 %v4977_v1, %v4993_v44  ;;  %v5180_v1 = vld [vmem:[%s16412_s5 + $0x288] sm:$0xff] }
0x1a14   :  { %12417 = vpow2.f32 %v5013_v47  ;;  %v5011_v38 = vmul.f32 1.442695, %v5001_v2  ;;  %v893_v2 = vld [vmem:[%s16411_s4 + $0xf0] sm:$0xff] }
0x1a16   :  { %12419 = vpow2.f32 %v5011_v38 }
0x1a19   :  { %v12410_v40 = vpop.eup %12409 }
0x1a1a   :  { %v5018_v30 = vsel %vm1392_vm12, %v12410_v40, 0.0 }
0x1a1b   :  { %v12412_v31 = vpop.eup %12411  ;;  %5019 = vadd.xlane.f32.xlu0 %v5018_v30 }
0x1a1c   :  { %v5015_v55 = vsel %vm1392_vm12, %v12412_v31, 0.0 }
0x1a1d   :  { %v12414_v10 = vpop.eup %12413  ;;  %5016 = vadd.xlane.f32.xlu1 %v5015_v55 }
0x1a1e   :  { %v5024_v4 = vsel %vm1392_vm12, %v12414_v10, 0.0 }
0x1a1f   :  { %v12416_v0 = vpop.eup %12415  ;;  %5025 = vadd.xlane.f32.xlu0 %v5024_v4 }
0x1a20   :  { %v5021_v26 = vsel %vm1392_vm12, %v12416_v0, 0.0 }
0x1a21   :  { %v12418_v63 = vpop.eup %12417  ;;  %5022 = vadd.xlane.f32.xlu1 %v5021_v26  ;;  %v5319_v26 = vld [vmem:[%s16412_s5 + $0x358] sm:$0xff] }
0x1a22   :  { %v5030_v61 = vsel %vm1392_vm12, %v12418_v63, 0.0 }
0x1a23   :  { %v12420_v7 = vpop.eup %12419  ;;  %5031 = vadd.xlane.f32.xlu0 %v5030_v61  ;;  %v5317_v61 = vld [vmem:[%s16412_s5 + $0x348] sm:$0xff] }
0x1a24   :  { %v5027_v52 = vsel %vm1392_vm12, %v12420_v7, 0.0 }
0x1a25   :  { %5028 = vadd.xlane.f32.xlu1 %v5027_v52 }
0x1aa4   :  { %v5020_v36 = vpop.xlane.xlu0 %5019 }
0x1aa5   :  { %12421 = vrcp.f32 %v5020_v36  ;;  %v5189_v36 = vld [vmem:[%s16412_s5 + $0x2d0] sm:$0xff] }
0x1aa6   :  { %v5017_v54 = vpop.xlane.xlu1 %5016 }
0x1aa7   :  { %12423 = vrcp.f32 %v5017_v54 }
0x1aa8   :  { %v5026_v57 = vpop.xlane.xlu0 %5025 }
0x1aa9   :  { %12425 = vrcp.f32 %v5026_v57 }
0x1aaa   :  { %v5023_v35 = vpop.xlane.xlu1 %5022 }
0x1aab   :  { %12427 = vrcp.f32 %v5023_v35 }
0x1aac   :  { %v5032_v49 = vpop.xlane.xlu0 %5031 }
0x1aad   :  { %12429 = vrcp.f32 %v5032_v49 }
0x1aae   :  { %v5029_v43 = vpop.xlane.xlu1 %5028 }
0x1aaf   :  { %12431 = vrcp.f32 %v5029_v43  ;;  %v5190_v43 = vld [vmem:[%s16412_s5 + $0x2d8] sm:$0xff] }
0x1ab2   :  { %v12422_v6 = vpop.eup %12421 }
0x1ab3   :  { %v5036_v37 = vmul.f32 %v12422_v6, %v12410_v40  ;;  %v5191_v6 = vld [vmem:[%s16412_s5 + $0x2e0] sm:$0xff] }
0x1ab4   :  { %v12424_v8 = vpop.eup %12423 }
0x1ab5   :  { %v5034_v23 = vmul.f32 %v12424_v8, %v12412_v31  ;;  %v894_v31 = vld [vmem:[%s16411_s4 + $0xf8] sm:$0xff]  ;;  %v5314_v8 = vld [vmem:[%s16412_s5 + $0x330] sm:$0xff] }
0x1ab6   :  { %v12426_v19 = vpop.eup %12425 }
0x1ab7   :  { %11560 = vmatprep.mubr.msk.f32.mxu0 %vm1392_vm12, %v5034_v23  ;;  %v5040_v28 = vmul.f32 %v12426_v19, %v12414_v10  ;;  %v895_v10 = vld [vmem:[%s16411_s4 + $0x100] sm:$0xff] }
0x1ab8   :  { %v12428_v56 = vpop.eup %12427  ;;  %11561 = vmatmul.mubr.msk.f32.vlgmr.msra.gmra.mxu0 %vm1392_vm12, %v5036_v37 }
0x1ab9   :  { %v5038_v13 = vmul.f32 %v12428_v56, %v12416_v0  ;;  %11570 = vmatpush3.msra.mxu0 %v5187_v15  ;;  %v5188_v15 = vld [vmem:[%s16412_s5 + $0x2c8] sm:$0xff] }
0x1aba   :  { %11571 = vmatprep.subr.mxu0 %v5186_v60  ;;  %v12430_v41 = vpop.eup %12429  ;;  %v5192_v56 = vld [vmem:[%s16412_s5 + $0x2e8] sm:$0xff] }
0x1abb   :  { %11563 = vmatprep.mubr.msk.f32.mxu0 %vm1392_vm12, %v5038_v13  ;;  %11572 = vmatpush3.msra.mxu0 %v5186_v60  ;;  %v5044_v62 = vmul.f32 %v12430_v41, %v12418_v63  ;;  %v5307_v63 = vld [vmem:[%s16412_s5 + $0x2f8] sm:$0xff]  ;;  %v5193_v13 = vld [vmem:[%s16412_s5 + $0x2f0] sm:$0xff] }
0x1abc   :  { %v12432_v3 = vpop.eup %12431  ;;  %11564 = vmatmul.mubr.msk.f32.gmra.mxu0 %vm1392_vm12, %v5040_v28  ;;  %11573 = vmatprep.subr.mxu0 %v5185_v11 }
0x1abd   :  { %v5042_v39 = vmul.f32 %v12432_v3, %v12420_v7  ;;  %11574 = vmatpush3.msra.mxu0 %v5185_v11  ;;  %v5315_v7 = vld [vmem:[%s16412_s5 + $0x338] sm:$0xff]  ;;  %v5313_v11 = vld [vmem:[%s16412_s5 + $0x328] sm:$0xff]  ;;  %v5312_v3 = vld [vmem:[%s16412_s5 + $0x320] sm:$0xff] }
0x1abe   :  { %11575 = vmatprep.subr.mxu0 %v5184_v20 }
0x1abf   :  { %11566 = vmatprep.mubr.msk.f32.mxu0 %vm1392_vm12, %v5042_v39  ;;  %11576 = vmatpush3.msra.mxu0 %v5184_v20 }
0x1ac0   :  { %11567 = vmatmul.mubr.msk.f32.gmra.mxu0 %vm1392_vm12, %v5044_v62  ;;  %11577 = vmatprep.subr.mxu0 %v5183_v5 }
0x1ac1   :  { %11578 = vmatpush3.msra.mxu0 %v5183_v5  ;;  %v15133_v5 = vld [vmem:[%s16411_s4 + $0xd0] sm:$0xf] }
0x1ac2   :  { %11579 = vmatprep.subr.mxu0 %v5182_v9 }
0x1ac3   :  { %11580 = vmatpush3.msra.mxu0 %v5182_v9  ;;  %v15138_v9 = vld [vmem:[%s16412_s5 + $0x318] ss:$0 sm:$0xff] }
0x1ac4   :  { %11581 = vmatprep.subr.mxu0 %v5181_v16 }
0x1ac5   :  { %11582 = vmatpush3.msra.mxu0 %v5181_v16  ;;  %v16668_v16 = vld [vmem:[#allocation6_spill] sm:$0xff] }
0x1ac6   :  { %11583 = vmatprep.subr.mxu0 %v5180_v1 }
0x1ac7   :  { %11584 = vmatpush3.msra.mxu0 %v5180_v1  ;;  %v15142_v1 = vrot.slane %v15133_v5, %v16668_v16 }
0x1ac8   :  { %11585 = vmatprep.subr.mxu0 %v5179_v51 }
0x1ac9   :  { %11586 = vmatpush3.msra.mxu0 %v5179_v51  ;;  %16669 = vst [vmem:[#allocation49_spill] sm:$0xff] %v15142_v1  ;;  %v16670_v51 = vld [vmem:[#allocation3_spill] sm:$0xff] }
0x1aca   :  { %11587 = vmatprep.subr.mxu0 %v5178_v17 }
0x1acb   :  { %11588 = vmatpush3.msra.mxu0 %v5178_v17  ;;  %v15146_v17 = vrot.slane %v15133_v5, %v16670_v51 }
0x1acc   :  { %11589 = vmatprep.subr.mxu0 %v5177_v22 }
0x1acd   :  { %11590 = vmatpush3.msra.mxu0 %v5177_v22  ;;  %16671 = vst [vmem:[#allocation42_spill] sm:$0xff] %v15146_v17 }
0x1ace   :  { %11591 = vmatprep.subr.mxu0 %v5176_v32 }
0x1acf   :  { %11592 = vmatpush3.msra.mxu0 %v5176_v32 }
0x1ad0   :  { %11636 = vmatprep.subr.mxu0 %v5320_v12 }
0x1b78   :  { %v11562_v27 = vpop.f32.mrf.mxu0 }
0x1b79   :  { %v5165_v14 = vadd.f32 %v11562_v27, %v14921_v34  ;;  %v892_v34 = vld [vmem:[%s16411_s4 + $0xe8] sm:$0xff] }
0x1b7a   :  { %v5135_v45 = vpop.f32.mrf.mxu0 }
0x1b7b   :  { %v5164_v29 = vadd.f32 %v5135_v45, %v14924_v25  ;;  %v5171_v48 = vmul.f32 %v5165_v14, %v891_v50 }
0x1b7c   :  { %v11565_v46 = vpop.f32.mrf.mxu0 }
0x1b7d   :  { %v5170_v42 = vmul.f32 %v5164_v29, %v890_v21  ;;  %v5167_v44 = vadd.f32 %v11565_v46, %v14927_v58 }
0x1b7e   :  { %v5145_v47 = vpop.f32.mrf.mxu0 }
0x1b7f   :  { %v5166_v38 = vadd.f32 %v5145_v47, %v14930_v59  ;;  %11593 = vmatprep.mubr.msk.f32.mxu0 %vm1248_vm11, %v5170_v42  ;;  %v5173_v30 = vmul.f32 %v5167_v44, %v893_v2  ;;  %v10061_v42 = vld [vmem:[%s16412_s5 + $0x340] ss:$0 sm:$0xff] }
0x1b80   :  { %v11568_v40 = vpop.f32.mrf.mxu0  ;;  %11594 = vmatmul.mubr.msk.f32.vlgmr.msra.gmra.mxu0 %vm1248_vm11, %v5171_v48 }
0x1b81   :  { %v5172_v25 = vmul.f32 %v5166_v38, %v892_v34  ;;  %11637 = vmatpush3.msra.mxu0 %v5320_v12  ;;  %v5169_v58 = vadd.f32 %v11568_v40, %v14933_v24  ;;  %v5308_v24 = vld [vmem:[%s16412_s5 + $0x300] sm:$0xff] }
0x1b82   :  { %v5155_v55 = vpop.f32.mrf.mxu0  ;;  %11606 = vmatprep.subr.mxu1 %v5308_v24  ;;  %11638 = vmatprep.subr.mxu0 %v5319_v26 }
0x1b83   :  { %v5168_v59 = vadd.f32 %v5155_v55, %v14936_v53  ;;  %11596 = vmatprep.mubr.msk.f32.mxu0 %vm1248_vm11, %v5172_v25  ;;  %v5175_v0 = vmul.f32 %v5169_v58, %v895_v10  ;;  %11607 = vmatpush3.msra.mxu1 %v5308_v24  ;;  %v5318_v53 = vld [vmem:[%s16412_s5 + $0x350] sm:$0xff]  ;;  %v10068_v55 = vld [vmem:[%s16412_s5 + $0x368] ss:$0 sm:$0xff] }
0x1b84   :  { %11597 = vmatmul.mubr.msk.f32.gmra.mxu0 %vm1248_vm11, %v5173_v30  ;;  %11608 = vmatprep.subr.mxu1 %v5307_v63 }
0x1b85   :  { %v5174_v4 = vmul.f32 %v5168_v59, %v894_v31  ;;  %11639 = vmatpush3.msra.mxu0 %v5319_v26  ;;  %11609 = vmatpush3.msra.mxu1 %v5307_v63 }
0x1b86   :  { %11640 = vmatprep.subr.mxu0 %v5318_v53  ;;  %11619 = vmatprep.subr.mxu1 %v5315_v7 }
0x1b87   :  { %11599 = vmatprep.mubr.msk.f32.mxu0 %vm1248_vm11, %v5174_v4  ;;  %11641 = vmatpush3.msra.mxu0 %v5318_v53 }
0x1b88   :  { %11600 = vmatmul.mubr.msk.f32.gmra.mxu0 %vm1248_vm11, %v5175_v0  ;;  %11642 = vmatprep.subr.mxu0 %v5317_v61 }
0x1b89   :  { %11643 = vmatpush3.msra.mxu0 %v5317_v61 }
0x1c40   :  { %v11595_v52 = vpop.f32.mrf.mxu0 }
0x1c41   :  { %v15063_v35 = vadd.f32 %v11595_v52, %v5189_v36 }
0x1c42   :  { %v5278_v54 = vpop.f32.mrf.mxu0 }
0x1c43   :  { %v15061_v57 = vadd.f32 %v5278_v54, %v5188_v15 }
0x1c44   :  { %v11598_v49 = vpop.f32.mrf.mxu0 }
0x1c45   :  { %11610 = vmatprep.mubr.msk.f32.mxu1 %vm579_vm10, %v15061_v57  ;;  %11644 = vmatprep.mubr.msk.f32.mxu0 %vm579_vm10, %v15061_v57  ;;  %v15084_v19 = vadd.f32 %v11598_v49, %v5191_v6 }
0x1c46   :  { %v5288_v23 = vpop.f32.mrf.mxu0  ;;  %11611 = vmatmul.mubr.msk.f32.vlgmr.msra.gmra.mxu1 %vm579_vm10, %v15063_v35  ;;  %11645 = vmatmul.mubr.msk.f32.vlgmr.msra.gmra.mxu0 %vm579_vm10, %v15063_v35 }
0x1c47   :  { %v15082_v37 = vadd.f32 %v5288_v23, %v5190_v43  ;;  %11620 = vmatpush3.msra.mxu1 %v5315_v7  ;;  %16665 = vst [vmem:[#allocation26_spill] sm:$0xff] %v15084_v19 }
0x1c48   :  { %v11601_v60 = vpop.f32.mrf.mxu0  ;;  %11621 = vmatprep.subr.mxu1 %v5314_v8 }
0x1c49   :  { %11613 = vmatprep.mubr.msk.f32.mxu1 %vm579_vm10, %v15082_v37  ;;  %11647 = vmatprep.mubr.msk.f32.mxu0 %vm579_vm10, %v15082_v37  ;;  %v15105_v20 = vadd.f32 %v11601_v60, %v5193_v13 }
0x1c4a   :  { %v5298_v28 = vpop.f32.mrf.mxu0  ;;  %11614 = vmatmul.mubr.msk.f32.gmra.mxu1 %vm579_vm10, %v15084_v19  ;;  %11648 = vmatmul.mubr.msk.f32.gmra.mxu0 %vm579_vm10, %v15084_v19 }
0x1c4b   :  { %v15103_v41 = vadd.f32 %v5298_v28, %v5192_v56  ;;  %11622 = vmatpush3.msra.mxu1 %v5314_v8  ;;  %16667 = vst [vmem:[#allocation23_spill] sm:$0xff] %v15105_v20 }
0x1c4c   :  { %11623 = vmatprep.subr.mxu1 %v5313_v11 }
0x1c4d   :  { %16666 = vst [vmem:[#allocation54_spill] sm:$0xff] %v15103_v41  ;;  %11616 = vmatprep.mubr.msk.f32.mxu1 %vm579_vm10, %v15103_v41  ;;  %11624 = vmatpush3.msra.mxu1 %v5313_v11 }
0x1c4e   :  { %11650 = vmatprep.mubr.msk.f32.mxu0 %vm579_vm10, %v15103_v41  ;;  %11617 = vmatmul.mubr.msk.f32.gmra.mxu1 %vm579_vm10, %v15105_v20 }
0x1c4f   :  { %11651 = vmatmul.mubr.msk.f32.gmra.mxu0 %vm579_vm10, %v15105_v20  ;;  %11625 = vmatprep.subr.mxu1 %v5312_v3 }
0x1c50   :  { %11627 = vmatprep.mubr.msk.f32.mxu1 %vm579_vm10, %v15061_v57  ;;  %11626 = vmatpush3.msra.mxu1 %v5312_v3 }
0x1c52   :  { %11628 = vmatmul.mubr.msk.f32.vlgmr.msra.gmra.mxu1 %vm579_vm10, %v15063_v35 }
0x1c53   :  { %11630 = vmatprep.mubr.msk.f32.mxu1 %vm579_vm10, %v15082_v37 }
0x1c56   :  { %11631 = vmatmul.mubr.msk.f32.gmra.mxu1 %vm579_vm10, %v15084_v19 }
0x1c57   :  { %11633 = vmatprep.mubr.msk.f32.mxu1 %vm579_vm10, %v15103_v41 }
0x1c5a   :  { %11634 = vmatmul.mubr.msk.f32.gmra.mxu1 %vm579_vm10, %v15105_v20 }
0x1d06   :  { %v11612_v39 = vpop.f32.mrf.mxu1  ;;  %v15159_v46 = vpop.f32.mrf.mxu0 }
0x1d07   :  { %v15224_v4 = vadd.f32 %v11612_v39, %v15138_v9  ;;  %v15288_v39 = vadd.f32 %v15159_v46, %v10068_v55 }
0x1d08   :  { %v5421_v62 = vpop.f32.mrf.mxu1  ;;  %v15172_v2 = vpop.f32.mrf.mxu0 }
0x1d09   :  { %v15149_v22 = vadd.f32 %v15138_v9, %v5421_v62  ;;  %v5653_v61 = vmul.f32 %v15142_v1, %v15224_v4  ;;  %v5878_v7 = vmul.f32 %v15146_v17, %v15224_v4  ;;  %v15297_v16 = vadd.f32 %v10068_v55, %v15172_v2 }
0x1d0a   :  { %v11615_v32 = vpop.f32.mrf.mxu1  ;;  %v11649_v40 = vpop.f32.mrf.mxu0 }
0x1d0b   :  { %v5652_v33 = vmul.f32 %v15142_v1, %v15149_v22  ;;  %v5877_v12 = vmul.f32 %v15146_v17, %v15149_v22  ;;  %v15248_v52 = vadd.f32 %v11615_v32, %v15138_v9  ;;  %v15254_v54 = vadd.f32 %v11649_v40, %v10068_v55 }
0x1d0c   :  { %v5431_v18 = vpop.f32.mrf.mxu1  ;;  %v5629_v30 = vpop.f32.mrf.mxu0 }
0x1d0d   :  { %11665 = vmatprep.mubr.msk.f32.mxu1 %vm579_vm10, %v5652_v33  ;;  %11686 = vmatprep.mubr.msk.f32.mxu0 %vm579_vm10, %v5877_v12  ;;  %v15231_v24 = vadd.f32 %v15138_v9, %v5431_v18  ;;  %v5655_v8 = vmul.f32 %v15142_v1, %v15248_v52  ;;  %v5880_v23 = vmul.f32 %v15146_v17, %v15248_v52  ;;  %v16672_v12 = vld [vmem:[#allocation4_spill] sm:$0xff] }
0x1d0e   :  { %v15157_v27 = vpop.f32.mrf.mxu1  ;;  %v15271_v60 = vadd.f32 %v10068_v55, %v5629_v30  ;;  %v6077_v56 = vmul.f32 %v15146_v17, %v15254_v54  ;;  %v5870_v13 = vmul.f32 %v15142_v1, %v15254_v54  ;;  %v6075_v18 = vmul.f32 %v15146_v17, %v15288_v39  ;;  %v15339_v30 = vld [vmem:[%s16411_s4 + $0xa8] sm:$0xff] }
0x1d0f   :  { %v11652_v31 = vpop.f32.mrf.mxu0  ;;  %v5654_v15 = vmul.f32 %v15142_v1, %v15231_v24  ;;  %v5879_v36 = vmul.f32 %v15146_v17, %v15231_v24  ;;  %v15279_v11 = vadd.f32 %v15157_v27, %v15138_v9  ;;  %v5868_v33 = vmul.f32 %v15142_v1, %v15288_v39 }
0x1d10   :  { %v5441_v14 = vpop.f32.mrf.mxu1  ;;  %v15215_v10 = vadd.f32 %v11652_v31, %v10068_v55  ;;  %v6076_v62 = vmul.f32 %v15146_v17, %v15271_v60  ;;  %v15311_v27 = vrot.slane %v15133_v5, %v16672_v12 }
0x1d11   :  { %v5639_v0 = vpop.f32.mrf.mxu0  ;;  %v15259_v49 = vadd.f32 %v15138_v9, %v5441_v14  ;;  %v5869_v9 = vmul.f32 %v15142_v1, %v15271_v60  ;;  %v5657_v51 = vmul.f32 %v15142_v1, %v15279_v11  ;;  %v5882_v32 = vmul.f32 %v15146_v17, %v15279_v11 }
0x1d12   :  { %v11629_v21 = vpop.f32.mrf.mxu1  ;;  %v6079_v26 = vmul.f32 %v15146_v17, %v15215_v10  ;;  %v5872_v53 = vmul.f32 %v15142_v1, %v15215_v10  ;;  %v15237_v63 = vadd.f32 %v10068_v55, %v5639_v0  ;;  %v6074_v14 = vmul.f32 %v15146_v17, %v15297_v16 }
0x1d13   :  { %v15202_v58 = vadd.f32 %v11629_v21, %v10061_v42  ;;  %v5656_v28 = vmul.f32 %v15142_v1, %v15259_v49  ;;  %v5881_v3 = vmul.f32 %v15146_v17, %v15259_v49  ;;  %v5867_v21 = vmul.f32 %v15142_v1, %v15297_v16 }
0x1d14   :  { %v5520_v45 = vpop.f32.mrf.mxu1  ;;  %v6078_v43 = vmul.f32 %v15146_v17, %v15237_v63  ;;  %v5871_v6 = vmul.f32 %v15142_v1, %v15237_v63 }
0x1d15   :  { %v15217_v59 = vadd.f32 %v10061_v42, %v5520_v45  ;;  %v15319_v45 = vmul.f32 %v15311_v27, %v15215_v10 }
0x1d16   :  { %v11632_v50 = vpop.f32.mrf.mxu1 }
0x1d17   :  { %v15182_v38 = vadd.f32 %v11632_v50, %v10061_v42  ;;  %v15327_v50 = vld [vmem:[%s16411_s4 + $0x98] sm:$0xff] }
0x1d18   :  { %v5530_v29 = vpop.f32.mrf.mxu1 }
0x1d19   :  { %v15192_v25 = vadd.f32 %v10061_v42, %v5530_v29 }
0x1d1a   :  { %v11635_v48 = vpop.f32.mrf.mxu1 }
0x1d1b   :  { %v15164_v44 = vadd.f32 %v11635_v48, %v10061_v42 }
0x1d1c   :  { %v5540_v34 = vpop.f32.mrf.mxu1 }
0x1d1d   :  { %v15166_v47 = vadd.f32 %v10061_v42, %v5540_v34  ;;  %11653 = vmatprep.subr.msk.mxu1 %vm579_vm10, %v15164_v44  ;;  %11674 = vmatprep.subr.msk.mxu0 %vm579_vm10, %v15164_v44  ;;  %v15332_v42 = vld [vmem:[%s16411_s4 + $0x90] sm:$0xff] }
0x1d1e   :  { %11654 = vmatpush3.xpose.msk.msra.mxu1 %vm579_vm10, %v15164_v44  ;;  %11675 = vmatpush3.xpose.msk.msra.mxu0 %vm579_vm10, %v15164_v44 }
0x1d1f   :  { %11655 = vmatprep.subr.msk.mxu1 %vm579_vm10, %v15166_v47  ;;  %11676 = vmatprep.subr.msk.mxu0 %vm579_vm10, %v15166_v47 }
0x1d22   :  { %11656 = vmatpush3.xpose.msk.msra.mxu1 %vm579_vm10, %v15166_v47  ;;  %11677 = vmatpush3.xpose.msk.msra.mxu0 %vm579_vm10, %v15166_v47 }
0x1d23   :  { %11657 = vmatprep.subr.msk.mxu1 %vm579_vm10, %v15182_v38  ;;  %11678 = vmatprep.subr.msk.mxu0 %vm579_vm10, %v15182_v38 }
0x1d26   :  { %11658 = vmatpush3.xpose.msk.msra.mxu1 %vm579_vm10, %v15182_v38  ;;  %11679 = vmatpush3.xpose.msk.msra.mxu0 %vm579_vm10, %v15182_v38 }
0x1d27   :  { %11659 = vmatprep.subr.msk.mxu1 %vm579_vm10, %v15192_v25  ;;  %11680 = vmatprep.subr.msk.mxu0 %vm579_vm10, %v15192_v25 }
0x1d2a   :  { %11660 = vmatpush3.xpose.msk.msra.mxu1 %vm579_vm10, %v15192_v25  ;;  %11681 = vmatpush3.xpose.msk.msra.mxu0 %vm579_vm10, %v15192_v25 }
0x1d2b   :  { %11661 = vmatprep.subr.msk.mxu1 %vm579_vm10, %v15202_v58  ;;  %11682 = vmatprep.subr.msk.mxu0 %vm579_vm10, %v15202_v58 }
0x1d2e   :  { %11662 = vmatpush3.xpose.msk.msra.mxu1 %vm579_vm10, %v15202_v58  ;;  %11683 = vmatpush3.xpose.msk.msra.mxu0 %vm579_vm10, %v15202_v58 }
0x1d2f   :  { %11663 = vmatprep.subr.msk.mxu1 %vm579_vm10, %v15217_v59  ;;  %11684 = vmatprep.subr.msk.mxu0 %vm579_vm10, %v15217_v59 }
0x1d32   :  { %11664 = vmatpush3.xpose.msk.msra.mxu1 %vm579_vm10, %v15217_v59  ;;  %11685 = vmatpush3.xpose.msk.msra.mxu0 %vm579_vm10, %v15217_v59 }
0x1d33   :  { %11695 = vmatprep.subr.mxu1 %v6079_v26  ;;  %11716 = vmatprep.subr.mxu0 %v5872_v53 }
0x1d35   :  { %11666 = vmatmul.mubr.msk.f32.vlgmr.msra.gmra.mxu1 %vm579_vm10, %v5653_v61  ;;  %11687 = vmatmul.mubr.msk.f32.vlgmr.msra.gmra.mxu0 %vm579_vm10, %v5878_v7 }
0x1d36   :  { %11668 = vmatprep.mubr.msk.f32.mxu1 %vm579_vm10, %v5654_v15  ;;  %11689 = vmatprep.mubr.msk.f32.mxu0 %vm579_vm10, %v5879_v36 }
0x1d37   :  { %11696 = vmatpush3.msra.mxu1 %v6079_v26  ;;  %11717 = vmatpush3.msra.mxu0 %v5872_v53  ;;  %v15345_v26 = vld [vmem:[%s16411_s4 + $0xa0] sm:$0xff] }
0x1d38   :  { %11697 = vmatprep.subr.mxu1 %v6078_v43  ;;  %11718 = vmatprep.subr.mxu0 %v5871_v6 }
0x1d39   :  { %11698 = vmatpush3.msra.mxu1 %v6078_v43  ;;  %11719 = vmatpush3.msra.mxu0 %v5871_v6  ;;  %v15354_v6 = vld [vmem:[%s16411_s4 + $0xb8] sm:$0xff] }
0x1d3a   :  { %11669 = vmatmul.mubr.msk.f32.gmra.mxu1 %vm579_vm10, %v5655_v8  ;;  %11690 = vmatmul.mubr.msk.f32.gmra.mxu0 %vm579_vm10, %v5880_v23 }
0x1d3b   :  { %11699 = vmatprep.subr.mxu1 %v6077_v56  ;;  %11720 = vmatprep.subr.mxu0 %v5870_v13 }
0x1d3c   :  { %11671 = vmatprep.mubr.msk.f32.mxu1 %vm579_vm10, %v5656_v28  ;;  %11692 = vmatprep.mubr.msk.f32.mxu0 %vm579_vm10, %v5881_v3 }
0x1d3d   :  { %11700 = vmatpush3.msra.mxu1 %v6077_v56  ;;  %11721 = vmatpush3.msra.mxu0 %v5870_v13  ;;  %v15360_v13 = vld [vmem:[%s16411_s4 + $0xb0] sm:$0xff] }
0x1d3e   :  { %11701 = vmatprep.subr.mxu1 %v6076_v62  ;;  %11722 = vmatprep.subr.mxu0 %v5869_v9 }
0x1d3f   :  { %11702 = vmatpush3.msra.mxu1 %v6076_v62  ;;  %11723 = vmatpush3.msra.mxu0 %v5869_v9 }
0x1d40   :  { %11672 = vmatmul.mubr.msk.f32.gmra.mxu1 %vm579_vm10, %v5657_v51  ;;  %11693 = vmatmul.mubr.msk.f32.gmra.mxu0 %vm579_vm10, %v5882_v32 }
0x1d41   :  { %11703 = vmatprep.subr.mxu1 %v6075_v18  ;;  %11724 = vmatprep.subr.mxu0 %v5868_v33 }
0x1d42   :  { %11704 = vmatpush3.msra.mxu1 %v6075_v18  ;;  %11725 = vmatpush3.msra.mxu0 %v5868_v33 }
0x1d43   :  { %11705 = vmatprep.subr.mxu1 %v6074_v14  ;;  %11726 = vmatprep.subr.mxu0 %v5867_v21 }
0x1d44   :  { %11706 = vmatpush3.msra.mxu1 %v6074_v14  ;;  %11727 = vmatpush3.msra.mxu0 %v5867_v21 }
0x1d45   :  { %11737 = vmatprep.subr.msk.mxu1 %vm579_vm10, %v15164_v44  ;;  %11758 = vmatprep.subr.mxu0 %v15319_v45 }
0x1df5   :  { %v11688_v29 = vpop.f32.mrf.mxu0 }
0x1df6   :  { %v5997_v46 = vmul.f32 0.35355338, %v11688_v29 }
0x1df7   :  { %v5967_v48 = vpop.f32.mrf.mxu0 }
0x1df8   :  { %v6003_v34 = vadd.f32 %v5997_v46, %v15327_v50  ;;  %v5996_v2 = vmul.f32 0.35355338, %v5967_v48 }
0x1dfa   :  { %v6002_v40 = vadd.f32 %v5996_v2, %v15332_v42  ;;  %v11691_v31 = vpop.f32.mrf.mxu0  ;;  %v6011_v55 = vsel %vm1392_vm12, %v6003_v34, -inf }
0x1dfb   :  { %v5999_v0 = vmul.f32 0.35355338, %v11691_v31  ;;  %6012 = vmax.xlane.f32.xlu0 %v6011_v55 }
0x1dfc   :  { %v5977_v53 = vpop.f32.mrf.mxu0  ;;  %v6008_v61 = vsel %vm1392_vm12, %v6002_v40, -inf }
0x1dfd   :  { %v6005_v7 = vadd.f32 %v5999_v0, %v15339_v30  ;;  %v5998_v15 = vmul.f32 0.35355338, %v5977_v53  ;;  %6009 = vmax.xlane.f32.xlu1 %v6008_v61 }
0x1dff   :  { %v6004_v36 = vadd.f32 %v5998_v15, %v15345_v26  ;;  %v6017_v43 = vsel %vm1392_vm12, %v6005_v7, -inf  ;;  %v11667_v15 = vpop.f32.mrf.mxu1 }
0x1e00   :  { %v11694_v8 = vpop.f32.mrf.mxu0  ;;  %6018 = vmax.xlane.f32.xlu0 %v6017_v43 }
0x1e01   :  { %v6001_v23 = vmul.f32 0.35355338, %v11694_v8  ;;  %v6014_v56 = vsel %vm1392_vm12, %v6004_v36, -inf }
0x1e02   :  { %v5987_v28 = vpop.f32.mrf.mxu0  ;;  %6015 = vmax.xlane.f32.xlu1 %v6014_v56 }
0x1e03   :  { %v6007_v3 = vadd.f32 %v6001_v23, %v15354_v6  ;;  %v6000_v62 = vmul.f32 0.35355338, %v5987_v28 }
0x1e05   :  { %v6006_v9 = vadd.f32 %v6000_v62, %v15360_v13  ;;  %v6023_v51 = vsel %vm1392_vm12, %v6007_v3, -inf }
0x1e06   :  { %6024 = vmax.xlane.f32.xlu0 %v6023_v51 }
0x1e07   :  { %v6020_v32 = vsel %vm1392_vm12, %v6006_v9, -inf }
0x1e08   :  { %6021 = vmax.xlane.f32.xlu1 %v6020_v32 }
0x1e84   :  { %v6013_v18 = vpop.xlane.xlu0 %6012 }
0x1e85   :  { %v6027_v33 = vsub.f32 %v6003_v34, %v6013_v18 }
0x1e86   :  { %v6010_v12 = vpop.xlane.xlu1 %6009 }
0x1e87   :  { %v6034_v14 = vmul.f32 1.442695, %v6027_v33  ;;  %v6026_v21 = vsub.f32 %v6002_v40, %v6010_v12  ;;  %v5760_v40 = vpop.f32.mrf.mxu1 }
0x1e88   :  { %v5789_v12 = vmul.f32 0.35355338, %v5760_v40 }
0x1e89   :  { %12433 = vpow2.f32 %v6034_v14  ;;  %v6032_v29 = vmul.f32 1.442695, %v6026_v21  ;;  %v6019_v46 = vpop.xlane.xlu0 %6018  ;;  %v11670_v62 = vpop.f32.mrf.mxu1 }
0x1e8a   :  { %v6029_v48 = vsub.f32 %v6005_v7, %v6019_v46  ;;  %v5792_v46 = vmul.f32 0.35355338, %v11670_v62 }
0x1e8b   :  { %12435 = vpow2.f32 %v6032_v29  ;;  %v6016_v2 = vpop.xlane.xlu1 %6015  ;;  %v5770_v18 = vpop.f32.mrf.mxu1 }
0x1e8c   :  { %v6038_v31 = vmul.f32 1.442695, %v6029_v48  ;;  %v6028_v55 = vsub.f32 %v6004_v36, %v6016_v2 }
0x1e8d   :  { %v11673_v21 = vpop.f32.mrf.mxu1 }
0x1e8e   :  { %12437 = vpow2.f32 %v6038_v31  ;;  %v6036_v0 = vmul.f32 1.442695, %v6028_v55  ;;  %v15375_v31 = vadd.f32 %v5789_v12, %v15332_v42  ;;  %v5791_v55 = vmul.f32 0.35355338, %v5770_v18 }
0x1e8f   :  { %v6025_v53 = vpop.xlane.xlu0 %6024 }
0x1e90   :  { %12439 = vpow2.f32 %v6036_v0  ;;  %v6031_v61 = vsub.f32 %v6007_v3, %v6025_v53  ;;  %v5780_v53 = vpop.f32.mrf.mxu1 }
0x1e91   :  { %v6022_v43 = vpop.xlane.xlu1 %6021 }
0x1e92   :  { %v6042_v8 = vmul.f32 1.442695, %v6031_v61  ;;  %v6030_v34 = vsub.f32 %v6006_v9, %v6022_v43  ;;  %v5790_v9 = vmul.f32 0.35355338, %v11667_v15  ;;  %v15379_v61 = vadd.f32 %v5792_v46, %v15339_v30 }
0x1e93   :  { %v5794_v15 = vmul.f32 0.35355338, %v11673_v21 }
0x1e94   :  { %12441 = vpow2.f32 %v6042_v8  ;;  %v6040_v23 = vmul.f32 1.442695, %v6030_v34  ;;  %v15371_v29 = vadd.f32 %v5790_v9, %v15327_v50  ;;  %v15384_v8 = vadd.f32 %v5791_v55, %v15345_v26 }
0x1e95   :  { %v5793_v34 = vmul.f32 0.35355338, %v5780_v53  ;;  %v15389_v40 = vadd.f32 %v5794_v15, %v15354_v6 }
0x1e96   :  { %v12434_v56 = vpop.eup %12433  ;;  %12443 = vpow2.f32 %v6040_v23  ;;  %v5804_v43 = vsel %vm1392_vm12, %v15371_v29, -inf  ;;  %v5801_v23 = vsel %vm1392_vm12, %v15375_v31, -inf }
0x1e97   :  { %v6047_v7 = vsel %vm1392_vm12, %v12434_v56, 0.0  ;;  %v15394_v62 = vadd.f32 %v5793_v34, %v15360_v13 }
0x1e98   :  { %v12436_v28 = vpop.eup %12435  ;;  %6048 = vadd.xlane.f32.xlu0 %v6047_v7  ;;  %v5810_v7 = vsel %vm1392_vm12, %v15379_v61, -inf }
0x1e99   :  { %v6044_v36 = vsel %vm1392_vm12, %v12436_v28, 0.0  ;;  %v5813_v18 = vsel %vm1392_vm12, %v15394_v62, -inf }
0x1e9a   :  { %6045 = vadd.xlane.f32.xlu1 %v6044_v36  ;;  %v5807_v36 = vsel %vm1392_vm12, %v15384_v8, -inf }
0x1e9b   :  { %v12438_v51 = vpop.eup %12437 }
0x1e9c   :  { %v6053_v3 = vsel %vm1392_vm12, %v12438_v51, 0.0 }
0x1e9d   :  { %v12440_v32 = vpop.eup %12439  ;;  %6054 = vadd.xlane.f32.xlu0 %v6053_v3  ;;  %v5816_v3 = vsel %vm1392_vm12, %v15389_v40, -inf }
0x1e9e   :  { %v6050_v33 = vsel %vm1392_vm12, %v12440_v32, 0.0 }
0x1e9f   :  { %6051 = vadd.xlane.f32.xlu1 %v6050_v33 }
0x1ea1   :  { %v12442_v14 = vpop.eup %12441 }
0x1ea2   :  { %v6059_v48 = vsel %vm1392_vm12, %v12442_v14, 0.0 }
0x1ea3   :  { %v12444_v2 = vpop.eup %12443  ;;  %6060 = vadd.xlane.f32.xlu0 %v6059_v48 }
0x1ea4   :  { %v6056_v0 = vsel %vm1392_vm12, %v12444_v2, 0.0 }
0x1ea5   :  { %6057 = vadd.xlane.f32.xlu1 %v6056_v0 }
0x1ea7   :  { %5805 = vmax.xlane.f32.xlu0 %v5804_v43 }
0x1ea9   :  { %5802 = vmax.xlane.f32.xlu1 %v5801_v23 }
0x1eab   :  { %5811 = vmax.xlane.f32.xlu0 %v5810_v7 }
0x1ead   :  { %5808 = vmax.xlane.f32.xlu1 %v5807_v36 }
0x1eaf   :  { %5817 = vmax.xlane.f32.xlu0 %v5816_v3 }
0x1eb1   :  { %5814 = vmax.xlane.f32.xlu1 %v5813_v18  ;;  %v6311_v18 = vmul.f32 %v15311_v27, %v15224_v4 }
0x1f21   :  { %v6049_v9 = vpop.xlane.xlu0 %6048 }
0x1f22   :  { %12445 = vrcp.f32 %v6049_v9  ;;  %v6312_v9 = vmul.f32 %v15311_v27, %v15231_v24 }
0x1f23   :  { %v6046_v33 = vpop.xlane.xlu1 %6045 }
0x1f24   :  { %12447 = vrcp.f32 %v6046_v33 }
0x1f26   :  { %v6055_v12 = vpop.xlane.xlu0 %6054 }
0x1f27   :  { %12449 = vrcp.f32 %v6055_v12  ;;  %v6314_v12 = vmul.f32 %v15311_v27, %v15259_v49 }
0x1f28   :  { %v6052_v21 = vpop.xlane.xlu1 %6051 }
0x1f29   :  { %12451 = vrcp.f32 %v6052_v21 }
0x1f2c   :  { %v6061_v46 = vpop.xlane.xlu0 %6060 }
0x1f2d   :  { %12453 = vrcp.f32 %v6061_v46  ;;  %v6315_v46 = vmul.f32 %v15311_v27, %v15279_v11 }
0x1f2e   :  { %v6058_v48 = vpop.xlane.xlu1 %6057 }
0x1f2f   :  { %12455 = vrcp.f32 %v6058_v48  ;;  %v12446_v55 = vpop.eup %12445 }
0x1f30   :  { %v6065_v15 = vmul.f32 %v12446_v55, %v12434_v56 }
0x1f31   :  { %v12448_v0 = vpop.eup %12447 }
0x1f32   :  { %v6063_v53 = vmul.f32 %v12448_v0, %v12436_v28 }
0x1f34   :  { %11707 = vmatprep.mubr.msk.f32.mxu1 %vm1392_vm12, %v6063_v53  ;;  %v12450_v43 = vpop.eup %12449 }
0x1f35   :  { %11708 = vmatmul.mubr.msk.f32.vlgmr.msra.gmra.mxu1 %vm1392_vm12, %v6065_v15  ;;  %v6069_v7 = vmul.f32 %v12450_v43, %v12438_v51  ;;  %v6310_v51 = vmul.f32 %v15311_v27, %v15149_v22  ;;  %v5806_v15 = vpop.xlane.xlu0 %5805 }
0x1f36   :  { %v12452_v34 = vpop.eup %12451  ;;  %11738 = vmatpush3.xpose.msk.msra.mxu1 %vm579_vm10, %v15164_v44 }
0x1f37   :  { %11739 = vmatprep.subr.msk.mxu1 %vm579_vm10, %v15166_v47  ;;  %v6067_v23 = vmul.f32 %v12452_v34, %v12440_v32  ;;  %v16673_v32 = vld [vmem:[#allocation5_spill] sm:$0xff]  ;;  %v5803_v34 = vpop.xlane.xlu1 %5802 }
0x1f39   :  { %11710 = vmatprep.mubr.msk.f32.mxu1 %vm1392_vm12, %v6067_v23 }
0x1f3a   :  { %11711 = vmatmul.mubr.msk.f32.gmra.mxu1 %vm1392_vm12, %v6069_v7  ;;  %v12454_v28 = vpop.eup %12453  ;;  %v5812_v7 = vpop.xlane.xlu0 %5811 }
0x1f3b   :  { %11740 = vmatpush3.xpose.msk.msra.mxu1 %vm579_vm10, %v15166_v47  ;;  %v6073_v3 = vmul.f32 %v12454_v28, %v12442_v14  ;;  %v15431_v14 = vrot.slane %v15133_v5, %v16673_v32  ;;  %v5820_v28 = vsub.f32 %v15371_v29, %v5806_v15 }
0x1f3c   :  { %v12456_v56 = vpop.eup %12455  ;;  %11741 = vmatprep.subr.msk.mxu1 %vm579_vm10, %v15182_v38 }
0x1f3d   :  { %v6071_v36 = vmul.f32 %v12456_v56, %v12444_v2  ;;  %v6838_v2 = vmul.f32 %v15431_v14, %v15215_v10  ;;  %v6837_v5 = vmul.f32 %v15431_v14, %v15237_v63  ;;  %v6313_v10 = vmul.f32 %v15311_v27, %v15248_v52  ;;  %v5809_v56 = vpop.xlane.xlu1 %5808 }
0x1f3e   :  { %v6836_v33 = vmul.f32 %v15431_v14, %v15254_v54  ;;  %v6835_v21 = vmul.f32 %v15431_v14, %v15271_v60  ;;  %v6834_v48 = vmul.f32 %v15431_v14, %v15288_v39  ;;  %v6833_v55 = vmul.f32 %v15431_v14, %v15297_v16 }
0x1f3f   :  { %11713 = vmatprep.mubr.msk.f32.mxu1 %vm1392_vm12, %v6071_v36  ;;  %11742 = vmatpush3.xpose.msk.msra.mxu1 %vm579_vm10, %v15182_v38  ;;  %v5827_v32 = vmul.f32 1.442695, %v5820_v28 }
0x1f40   :  { %11714 = vmatmul.mubr.msk.f32.gmra.mxu1 %vm1392_vm12, %v6073_v3  ;;  %11743 = vmatprep.subr.msk.mxu1 %vm579_vm10, %v15192_v25  ;;  %v5819_v3 = vsub.f32 %v15375_v31, %v5803_v34 }
0x1f41   :  { %11749 = vmatprep.mubr.msk.f32.mxu1 %vm579_vm10, %v6310_v51  ;;  %v5822_v51 = vsub.f32 %v15379_v61, %v5812_v7  ;;  %12457 = vpow2.f32 %v5827_v32 }
0x1f43   :  { %11744 = vmatpush3.xpose.msk.msra.mxu1 %vm579_vm10, %v15192_v25 }
0x1f44   :  { %11745 = vmatprep.subr.msk.mxu1 %vm579_vm10, %v15202_v58 }
0x1f47   :  { %11746 = vmatpush3.xpose.msk.msra.mxu1 %vm579_vm10, %v15202_v58 }
0x1f48   :  { %11747 = vmatprep.subr.msk.mxu1 %vm579_vm10, %v15217_v59 }
0x1f4b   :  { %11748 = vmatpush3.xpose.msk.msra.mxu1 %vm579_vm10, %v15217_v59 }
0x1f4c   :  { %11800 = vmatprep.subr.mxu1 %v6838_v2 }
0x1f4e   :  { %11750 = vmatmul.mubr.msk.f32.vlgmr.msra.gmra.mxu1 %vm579_vm10, %v6311_v18  ;;  %v5818_v18 = vpop.xlane.xlu0 %5817 }
0x1f4f   :  { %11752 = vmatprep.mubr.msk.f32.mxu1 %vm579_vm10, %v6312_v9  ;;  %11801 = vmatpush3.msra.mxu1 %v6838_v2  ;;  %v5821_v2 = vsub.f32 %v15384_v8, %v5809_v56  ;;  %v5824_v29 = vsub.f32 %v15389_v40, %v5818_v18 }
0x1f50   :  { %11802 = vmatprep.subr.mxu1 %v6837_v5 }
0x1f51   :  { %11803 = vmatpush3.msra.mxu1 %v6837_v5  ;;  %v5825_v5 = vmul.f32 1.442695, %v5819_v3  ;;  %v5835_v15 = vmul.f32 1.442695, %v5824_v29 }
0x1f52   :  { %11753 = vmatmul.mubr.msk.f32.gmra.mxu1 %vm579_vm10, %v6313_v10  ;;  %11804 = vmatprep.subr.mxu1 %v6836_v33  ;;  %v5831_v10 = vmul.f32 1.442695, %v5822_v51 }
0x1f53   :  { %11755 = vmatprep.mubr.msk.f32.mxu1 %vm579_vm10, %v6314_v12  ;;  %11805 = vmatpush3.msra.mxu1 %v6836_v33  ;;  %v5815_v33 = vpop.xlane.xlu1 %5814  ;;  %12459 = vpow2.f32 %v5825_v5 }
0x1f54   :  { %11806 = vmatprep.subr.mxu1 %v6835_v21  ;;  %v5823_v31 = vsub.f32 %v15394_v62, %v5815_v33  ;;  %12461 = vpow2.f32 %v5831_v10 }
0x1f55   :  { %11807 = vmatpush3.msra.mxu1 %v6835_v21 }
0x1f56   :  { %11756 = vmatmul.mubr.msk.f32.gmra.mxu1 %vm579_vm10, %v6315_v46  ;;  %11808 = vmatprep.subr.mxu1 %v6834_v48  ;;  %v5829_v46 = vmul.f32 1.442695, %v5821_v2  ;;  %v5833_v56 = vmul.f32 1.442695, %v5823_v31 }
0x1f57   :  { %11809 = vmatpush3.msra.mxu1 %v6834_v48 }
0x1f58   :  { %11810 = vmatprep.subr.mxu1 %v6833_v55  ;;  %12463 = vpow2.f32 %v5829_v46 }
0x1f59   :  { %11811 = vmatpush3.msra.mxu1 %v6833_v55  ;;  %12465 = vpow2.f32 %v5835_v15 }
0x1f5a   :  { %12467 = vpow2.f32 %v5833_v56 }
0x1ff5   :  { %v15464_v0 = vpop.f32.mrf.mxu1 }
0x1ff7   :  { %v15466_v53 = vpop.f32.mrf.mxu1 }
0x1ffa   :  { %v15468_v43 = vpop.f32.mrf.mxu1 }
0x1ffc   :  { %v15470_v23 = vpop.f32.mrf.mxu1 }
0x2000   :  { %v15473_v36 = vpop.f32.mrf.mxu1 }
0x2002   :  { %v15478_v9 = vpop.f32.mrf.mxu1 }
0x200e   :  { %v11751_v12 = vpop.f32.mrf.mxu1 }
0x200f   :  { %v6430_v21 = vmul.f32 0.35355338, %v11751_v12 }
0x2010   :  { %v6400_v48 = vpop.f32.mrf.mxu1 }
0x2011   :  { %v6436_v61 = vadd.f32 %v6430_v21, %v15327_v50  ;;  %v6429_v55 = vmul.f32 0.35355338, %v6400_v48  ;;  %v15493_v48 = vpop.eup %12457 }
0x2012   :  { %v11754_v8 = vpop.f32.mrf.mxu1  ;;  %v5840_v15 = vsel %vm1392_vm12, %v15493_v48, 0.0 }
0x2013   :  { %v6435_v34 = vadd.f32 %v6429_v55, %v15332_v42  ;;  %v6432_v7 = vmul.f32 0.35355338, %v11754_v8  ;;  %v6444_v28 = vsel %vm1392_vm12, %v6436_v61, -inf  ;;  %v15496_v55 = vpop.eup %12459 }
0x2014   :  { %6445 = vmax.xlane.f32.xlu0 %v6444_v28  ;;  %v6410_v40 = vpop.f32.mrf.mxu1  ;;  %v15498_v8 = vpop.eup %12461  ;;  %v5837_v28 = vsel %vm1392_vm12, %v15496_v55, 0.0 }
0x2015   :  { %v6438_v3 = vadd.f32 %v6432_v7, %v15339_v30  ;;  %v6431_v51 = vmul.f32 0.35355338, %v6410_v40  ;;  %v6441_v62 = vsel %vm1392_vm12, %v6435_v34, -inf  ;;  %v15502_v7 = vpop.eup %12463  ;;  %v5846_v40 = vsel %vm1392_vm12, %v15498_v8, 0.0 }
0x2016   :  { %v11757_v32 = vpop.f32.mrf.mxu1  ;;  %6442 = vmax.xlane.f32.xlu1 %v6441_v62  ;;  %v15508_v56 = vpop.eup %12465 }
0x2017   :  { %v6437_v2 = vadd.f32 %v6431_v51, %v15345_v26  ;;  %v6434_v18 = vmul.f32 0.35355338, %v11757_v32  ;;  %v6450_v5 = vsel %vm1392_vm12, %v6438_v3, -inf  ;;  %v5843_v51 = vsel %vm1392_vm12, %v15502_v7, 0.0  ;;  %v15512_v62 = vpop.eup %12467 }
0x2018   :  { %6451 = vmax.xlane.f32.xlu0 %v6450_v5  ;;  %v6420_v10 = vpop.f32.mrf.mxu1  ;;  %v5852_v32 = vsel %vm1392_vm12, %v15508_v56, 0.0 }
0x2019   :  { %v6440_v33 = vadd.f32 %v6434_v18, %v15354_v6  ;;  %v6433_v12 = vmul.f32 0.35355338, %v6420_v10  ;;  %v6447_v29 = vsel %vm1392_vm12, %v6437_v2, -inf  ;;  %v5849_v18 = vsel %vm1392_vm12, %v15512_v62, 0.0 }
0x201a   :  { %6448 = vmax.xlane.f32.xlu1 %v6447_v29 }
0x201b   :  { %v6439_v21 = vadd.f32 %v6433_v12, %v15360_v13  ;;  %v6456_v46 = vsel %vm1392_vm12, %v6440_v33, -inf }
0x201c   :  { %6457 = vmax.xlane.f32.xlu0 %v6456_v46 }
0x201d   :  { %v6453_v31 = vsel %vm1392_vm12, %v6439_v21, -inf }
0x201e   :  { %6454 = vmax.xlane.f32.xlu1 %v6453_v31 }
0x2020   :  { %5841 = vadd.xlane.f32.xlu0 %v5840_v15 }
0x2022   :  { %5838 = vadd.xlane.f32.xlu1 %v5837_v28 }
0x2024   :  { %5847 = vadd.xlane.f32.xlu0 %v5846_v40 }
0x2026   :  { %5844 = vadd.xlane.f32.xlu1 %v5843_v51 }
0x2028   :  { %5853 = vadd.xlane.f32.xlu0 %v5852_v32 }
0x202a   :  { %5850 = vadd.xlane.f32.xlu1 %v5849_v18 }
0x209d   :  { %v6446_v5 = vpop.xlane.xlu0 %6445 }
0x209e   :  { %v6460_v10 = vsub.f32 %v6436_v61, %v6446_v5 }
0x209f   :  { %v6443_v12 = vpop.xlane.xlu1 %6442 }
0x20a0   :  { %v6467_v29 = vmul.f32 1.442695, %v6460_v10  ;;  %v6459_v46 = vsub.f32 %v6435_v34, %v6443_v12 }
0x20a1   :  { %v6452_v31 = vpop.xlane.xlu0 %6451 }
0x20a2   :  { %12469 = vpow2.f32 %v6467_v29  ;;  %v6465_v15 = vmul.f32 1.442695, %v6459_v46  ;;  %v6462_v28 = vsub.f32 %v6438_v3, %v6452_v31 }
0x20a3   :  { %v6449_v40 = vpop.xlane.xlu1 %6448 }
0x20a4   :  { %12471 = vpow2.f32 %v6465_v15  ;;  %v6471_v51 = vmul.f32 1.442695, %v6462_v28  ;;  %v6461_v17 = vsub.f32 %v6437_v2, %v6449_v40 }
0x20a5   :  { %v6458_v1 = vpop.xlane.xlu0 %6457 }
0x20a6   :  { %12473 = vpow2.f32 %v6471_v51  ;;  %v6469_v32 = vmul.f32 1.442695, %v6461_v17  ;;  %v6464_v20 = vsub.f32 %v6440_v33, %v6458_v1 }
0x20a7   :  { %v6455_v41 = vpop.xlane.xlu1 %6454 }
0x20a8   :  { %12475 = vpow2.f32 %v6469_v32  ;;  %v6475_v18 = vmul.f32 1.442695, %v6464_v20  ;;  %v6463_v19 = vsub.f32 %v6439_v21, %v6455_v41 }
0x20a9   :  { %v5842_v61 = vpop.xlane.xlu0 %5841 }
0x20aa   :  { %12477 = vpow2.f32 %v6475_v18  ;;  %v6473_v5 = vmul.f32 1.442695, %v6463_v19 }
0x20ab   :  { %12479 = vrcp.f32 %v5842_v61  ;;  %v5839_v34 = vpop.xlane.xlu1 %5838 }
0x20ac   :  { %12481 = vpow2.f32 %v6473_v5 }
0x20ad   :  { %12483 = vrcp.f32 %v5839_v34  ;;  %v5848_v3 = vpop.xlane.xlu0 %5847  ;;  %v6511_v34 = vmul.f32 %v15311_v27, %v15237_v63  ;;  %v6509_v63 = vmul.f32 %v15311_v27, %v15271_v60 }
0x20ae   :  { %12485 = vrcp.f32 %v5848_v3 }
0x20af   :  { %v15518_v10 = vpop.eup %12469  ;;  %v5845_v2 = vpop.xlane.xlu1 %5844 }
0x20b0   :  { %12487 = vrcp.f32 %v5845_v2  ;;  %v6480_v1 = vsel %vm1392_vm12, %v15518_v10, 0.0 }
0x20b1   :  { %v15522_v17 = vpop.eup %12471  ;;  %6481 = vadd.xlane.f32.xlu0 %v6480_v1  ;;  %v5854_v41 = vpop.xlane.xlu0 %5853 }
0x20b2   :  { %v6477_v19 = vsel %vm1392_vm12, %v15522_v17, 0.0  ;;  %12489 = vrcp.f32 %v5854_v41 }
0x20b3   :  { %v15526_v20 = vpop.eup %12473  ;;  %6478 = vadd.xlane.f32.xlu1 %v6477_v19  ;;  %v5851_v33 = vpop.xlane.xlu1 %5850 }
0x20b4   :  { %12491 = vrcp.f32 %v5851_v33  ;;  %v6486_v21 = vsel %vm1392_vm12, %v15526_v20, 0.0 }
0x20b5   :  { %v15530_v12 = vpop.eup %12475  ;;  %6487 = vadd.xlane.f32.xlu0 %v6486_v21 }
0x20b6   :  { %v6483_v29 = vsel %vm1392_vm12, %v15530_v12, 0.0 }
0x20b7   :  { %v15534_v46 = vpop.eup %12477  ;;  %6484 = vadd.xlane.f32.xlu1 %v6483_v29 }
0x20b8   :  { %v12480_v31 = vpop.eup %12479  ;;  %v6492_v15 = vsel %vm1392_vm12, %v15534_v46, 0.0 }
0x20b9   :  { %v15538_v28 = vpop.eup %12481  ;;  %6493 = vadd.xlane.f32.xlu0 %v6492_v15  ;;  %v5858_v61 = vmul.f32 %v12480_v31, %v15493_v48 }
0x20ba   :  { %v12484_v40 = vpop.eup %12483  ;;  %v6489_v51 = vsel %vm1392_vm12, %v15538_v28, 0.0 }
0x20bb   :  { %6490 = vadd.xlane.f32.xlu1 %v6489_v51  ;;  %v5856_v32 = vmul.f32 %v12484_v40, %v15496_v55  ;;  %v12486_v18 = vpop.eup %12485  ;;  %v6510_v55 = vmul.f32 %v15311_v27, %v15254_v54 }
0x20bc   :  { %v5862_v48 = vmul.f32 %v12486_v18, %v15498_v8  ;;  %v6507_v8 = vmul.f32 %v15311_v27, %v15297_v16 }
0x20bd   :  { %v12488_v5 = vpop.eup %12487  ;;  %11728 = vmatprep.mubr.msk.f32.mxu0 %vm1392_vm12, %v5856_v32 }
0x20be   :  { %11729 = vmatmul.mubr.msk.f32.vlgmr.msra.gmra.mxu0 %vm1392_vm12, %v5858_v61  ;;  %v5860_v3 = vmul.f32 %v12488_v5, %v15502_v7 }
0x20bf   :  { %11759 = vmatpush3.msra.mxu0 %v15319_v45  ;;  %v12490_v2 = vpop.eup %12489  ;;  %v6508_v45 = vmul.f32 %v15311_v27, %v15288_v39 }
0x20c0   :  { %11760 = vmatprep.subr.mxu0 %v6511_v34  ;;  %11731 = vmatprep.mubr.msk.f32.mxu0 %vm1392_vm12, %v5860_v3  ;;  %v5866_v54 = vmul.f32 %v12490_v2, %v15508_v56 }
0x20c1   :  { %v12492_v1 = vpop.eup %12491  ;;  %11761 = vmatpush3.msra.mxu0 %v6511_v34 }
0x20c2   :  { %11762 = vmatprep.subr.mxu0 %v6510_v55  ;;  %11732 = vmatmul.mubr.msk.f32.gmra.mxu0 %vm1392_vm12, %v5862_v48  ;;  %v5864_v7 = vmul.f32 %v12492_v1, %v15512_v62 }
0x20c3   :  { %11763 = vmatpush3.msra.mxu0 %v6510_v55 }
0x20c4   :  { %11764 = vmatprep.subr.mxu0 %v6509_v63  ;;  %11734 = vmatprep.mubr.msk.f32.mxu0 %vm1392_vm12, %v5864_v7 }
0x20c5   :  { %11765 = vmatpush3.msra.mxu0 %v6509_v63 }
0x20c6   :  { %11766 = vmatprep.subr.mxu0 %v6508_v45  ;;  %11735 = vmatmul.mubr.msk.f32.gmra.mxu0 %vm1392_vm12, %v5866_v54 }
0x20c7   :  { %11767 = vmatpush3.msra.mxu0 %v6508_v45 }
0x20c8   :  { %11768 = vmatprep.subr.mxu0 %v6507_v8 }
0x20c9   :  { %11769 = vmatpush3.msra.mxu0 %v6507_v8 }
0x20ca   :  { %11779 = vmatprep.subr.msk.mxu0 %vm579_vm10, %v15164_v44 }
0x213a   :  { %v6482_v60 = vpop.xlane.xlu0 %6481 }
0x213b   :  { %12493 = vrcp.f32 %v6482_v60 }
0x213c   :  { %v6479_v62 = vpop.xlane.xlu1 %6478 }
0x213d   :  { %12495 = vrcp.f32 %v6479_v62 }
0x213e   :  { %v6488_v39 = vpop.xlane.xlu0 %6487 }
0x213f   :  { %12497 = vrcp.f32 %v6488_v39 }
0x2140   :  { %v6485_v56 = vpop.xlane.xlu1 %6484 }
0x2141   :  { %12499 = vrcp.f32 %v6485_v56 }
0x2142   :  { %v6494_v41 = vpop.xlane.xlu0 %6493 }
0x2143   :  { %12501 = vrcp.f32 %v6494_v41 }
0x2144   :  { %v6491_v19 = vpop.xlane.xlu1 %6490 }
0x2145   :  { %12503 = vrcp.f32 %v6491_v19 }
0x2148   :  { %v12494_v33 = vpop.eup %12493 }
0x2149   :  { %v6498_v29 = vmul.f32 %v12494_v33, %v15518_v10 }
0x214a   :  { %v12496_v16 = vpop.eup %12495 }
0x214b   :  { %v6496_v21 = vmul.f32 %v12496_v16, %v15522_v17 }
0x214c   :  { %v12498_v31 = vpop.eup %12497 }
0x214d   :  { %11770 = vmatprep.mubr.msk.f32.mxu0 %vm1392_vm12, %v6496_v21  ;;  %v6502_v51 = vmul.f32 %v12498_v31, %v15526_v20  ;;  %v6636_v20 = vmul.f32 %v15431_v14, %v15149_v22  ;;  %v6637_v22 = vmul.f32 %v15431_v14, %v15224_v4 }
0x214e   :  { %v12500_v15 = vpop.eup %12499  ;;  %11771 = vmatmul.mubr.msk.f32.vlgmr.msra.gmra.mxu0 %vm1392_vm12, %v6498_v29 }
0x214f   :  { %11780 = vmatpush3.xpose.msk.msra.mxu0 %vm579_vm10, %v15164_v44  ;;  %v6500_v40 = vmul.f32 %v12500_v15, %v15530_v12 }
0x2150   :  { %11781 = vmatprep.subr.msk.mxu0 %vm579_vm10, %v15166_v47  ;;  %v12502_v32 = vpop.eup %12501 }
0x2151   :  { %11773 = vmatprep.mubr.msk.f32.mxu0 %vm1392_vm12, %v6500_v40  ;;  %v6506_v44 = vmul.f32 %v12502_v32, %v15534_v46 }
0x2152   :  { %v12504_v10 = vpop.eup %12503  ;;  %11774 = vmatmul.mubr.msk.f32.gmra.mxu0 %vm1392_vm12, %v6502_v51 }
0x2153   :  { %11782 = vmatpush3.xpose.msk.msra.mxu0 %vm579_vm10, %v15166_v47  ;;  %v6504_v17 = vmul.f32 %v12504_v10, %v15538_v28  ;;  %v6638_v47 = vmul.f32 %v15431_v14, %v15231_v24 }
0x2154   :  { %11783 = vmatprep.subr.msk.mxu0 %vm579_vm10, %v15182_v38 }
0x2155   :  { %11776 = vmatprep.mubr.msk.f32.mxu0 %vm1392_vm12, %v6504_v17 }
0x2156   :  { %11777 = vmatmul.mubr.msk.f32.gmra.mxu0 %vm1392_vm12, %v6506_v44 }
0x2157   :  { %11784 = vmatpush3.xpose.msk.msra.mxu0 %vm579_vm10, %v15182_v38  ;;  %11791 = vmatprep.mubr.msk.f32.mxu0 %vm579_vm10, %v6636_v20  ;;  %v6639_v38 = vmul.f32 %v15431_v14, %v15248_v52 }
0x2158   :  { %11785 = vmatprep.subr.msk.mxu0 %vm579_vm10, %v15192_v25 }
0x215b   :  { %11786 = vmatpush3.xpose.msk.msra.mxu0 %vm579_vm10, %v15192_v25  ;;  %v6640_v25 = vmul.f32 %v15431_v14, %v15259_v49 }
0x215c   :  { %11787 = vmatprep.subr.msk.mxu0 %vm579_vm10, %v15202_v58 }
0x215f   :  { %11788 = vmatpush3.xpose.msk.msra.mxu0 %vm579_vm10, %v15202_v58  ;;  %v6641_v58 = vmul.f32 %v15431_v14, %v15279_v11 }
0x2160   :  { %11789 = vmatprep.subr.msk.mxu0 %vm579_vm10, %v15217_v59 }
0x2163   :  { %11790 = vmatpush3.xpose.msk.msra.mxu0 %vm579_vm10, %v15217_v59 }
0x2166   :  { %11792 = vmatmul.mubr.msk.f32.vlgmr.msra.gmra.mxu0 %vm579_vm10, %v6637_v22 }
0x2167   :  { %11794 = vmatprep.mubr.msk.f32.mxu0 %vm579_vm10, %v6638_v47 }
0x216a   :  { %11795 = vmatmul.mubr.msk.f32.gmra.mxu0 %vm579_vm10, %v6639_v38 }
0x216b   :  { %11797 = vmatprep.mubr.msk.f32.mxu0 %vm579_vm10, %v6640_v25 }
0x216e   :  { %11798 = vmatmul.mubr.msk.f32.gmra.mxu0 %vm579_vm10, %v6641_v58 }
0x217e   :  { %v11730_v59 = vpop.f32.mrf.mxu0 }
0x217f   :  { %v6283_v52 = vadd.f32 %v11730_v59, %v15464_v0 }
0x2180   :  { %v6277_v4 = vpop.f32.mrf.mxu0 }
0x2181   :  { %v6278_v49 = vadd.f32 %v6277_v4, %v15466_v53 }
0x2182   :  { %v11733_v24 = vpop.f32.mrf.mxu0 }
0x2183   :  { %v6293_v34 = vadd.f32 %v11733_v24, %v15468_v43 }
0x2184   :  { %v6287_v12 = vpop.f32.mrf.mxu0 }
0x2185   :  { %v6288_v2 = vadd.f32 %v6287_v12, %v15470_v23 }
0x2186   :  { %v11736_v46 = vpop.f32.mrf.mxu0 }
0x2187   :  { %v6303_v1 = vadd.f32 %v11736_v46, %v15473_v36 }
0x2188   :  { %v15619_v28 = vpop.f32.mrf.mxu0 }
0x220e   :  { %v11772_v18 = vpop.f32.mrf.mxu0 }
0x220f   :  { %v15623_v61 = vadd.f32 %v11772_v18, %v6283_v52 }
0x2210   :  { %v6597_v5 = vpop.f32.mrf.mxu0 }
0x2211   :  { %v15626_v11 = vadd.f32 %v6597_v5, %v6278_v49 }
0x2212   :  { %v11775_v3 = vpop.f32.mrf.mxu0 }
0x2213   :  { %v15629_v55 = vadd.f32 %v11775_v3, %v6293_v34 }
0x2214   :  { %v6607_v48 = vpop.f32.mrf.mxu0 }
0x2215   :  { %v15632_v63 = vadd.f32 %v6607_v48, %v6288_v2 }
0x2216   :  { %v11778_v0 = vpop.f32.mrf.mxu0 }
0x2217   :  { %v15634_v7 = vadd.f32 %v11778_v0, %v6303_v1 }
0x2218   :  { %v15636_v53 = vpop.f32.mrf.mxu0 }
0x2226   :  { %v11793_v45 = vpop.f32.mrf.mxu0 }
0x2227   :  { %v6756_v54 = vmul.f32 0.35355338, %v11793_v45 }
0x2228   :  { %v6726_v43 = vpop.f32.mrf.mxu0 }
0x2229   :  { %v6762_v8 = vadd.f32 %v6756_v54, %v15327_v50  ;;  %v6755_v60 = vmul.f32 0.35355338, %v6726_v43 }
0x222a   :  { %v11796_v62 = vpop.f32.mrf.mxu0 }
0x222b   :  { %v6761_v23 = vadd.f32 %v6755_v60, %v15332_v42  ;;  %v6758_v39 = vmul.f32 0.35355338, %v11796_v62  ;;  %v6770_v56 = vsel %vm1392_vm12, %v6762_v8, -inf  ;;  %v897_v62 = vld [vmem:[%s16411_s4 + $0x140] sm:$0xff] }
0x222c   :  { %6771 = vmax.xlane.f32.xlu0 %v6770_v56  ;;  %v6736_v36 = vpop.f32.mrf.mxu0 }
0x222d   :  { %v6764_v41 = vadd.f32 %v6758_v39, %v15339_v30  ;;  %v6757_v19 = vmul.f32 0.35355338, %v6736_v36  ;;  %v6767_v33 = vsel %vm1392_vm12, %v6761_v23, -inf  ;;  %v898_v39 = vld [vmem:[%s16411_s4 + $0x148] sm:$0xff]  ;;  %v899_v36 = vld [vmem:[%s16411_s4 + $0x150] sm:$0xff] }
0x222e   :  { %6768 = vmax.xlane.f32.xlu1 %v6767_v33  ;;  %v11799_v16 = vpop.f32.mrf.mxu0  ;;  %v7113_v56 = vsub.f32 1.0, %v898_v39 }
0x222f   :  { %v6763_v21 = vadd.f32 %v6757_v19, %v15345_v26  ;;  %v6760_v29 = vmul.f32 0.35355338, %v11799_v16  ;;  %v6776_v50 = vsel %vm1392_vm12, %v6764_v41, -inf  ;;  %v900_v19 = vld [vmem:[%s16411_s4 + $0x158] sm:$0xff]  ;;  %v901_v16 = vld [vmem:[%s16411_s4 + $0x160] sm:$0xff] }
0x2230   :  { %6777 = vmax.xlane.f32.xlu0 %v6776_v50  ;;  %v6746_v31 = vpop.f32.mrf.mxu0  ;;  %v7115_v33 = vsub.f32 1.0, %v900_v19 }
0x2231   :  { %v6766_v42 = vadd.f32 %v6760_v29, %v15354_v6  ;;  %v6759_v15 = vmul.f32 0.35355338, %v6746_v31  ;;  %v6773_v40 = vsel %vm1392_vm12, %v6763_v21, -inf  ;;  %v5325_v29 = vld [vmem:[%s16412_s5 + $0x388] sm:$0xff] }
0x2232   :  { %6774 = vmax.xlane.f32.xlu1 %v6773_v40  ;;  %11821 = vmatprep.subr.mxu1 %v5325_v29 }
0x2233   :  { %v6765_v30 = vadd.f32 %v6759_v15, %v15360_v13  ;;  %v6782_v51 = vsel %vm1392_vm12, %v6766_v42, -inf }
0x2234   :  { %6783 = vmax.xlane.f32.xlu0 %v6782_v51 }
0x2235   :  { %v6779_v32 = vsel %vm1392_vm12, %v6765_v30, -inf }
0x2236   :  { %6780 = vmax.xlane.f32.xlu1 %v6779_v32 }
0x22b5   :  { %v6772_v26 = vpop.xlane.xlu0 %6771 }
0x22b6   :  { %v6786_v10 = vsub.f32 %v6762_v8, %v6772_v26  ;;  %v896_v8 = vld [vmem:[%s16411_s4 + $0x138] sm:$0xff] }
0x22b7   :  { %v6769_v17 = vpop.xlane.xlu1 %6768  ;;  %v7111_v60 = vsub.f32 1.0, %v896_v8 }
0x22b8   :  { %v6793_v44 = vmul.f32 1.442695, %v6786_v10  ;;  %v6785_v20 = vsub.f32 %v6761_v23, %v6769_v17  ;;  %v7112_v23 = vsub.f32 1.0, %v897_v62 }
0x22b9   :  { %v6778_v22 = vpop.xlane.xlu0 %6777 }
0x22ba   :  { %12505 = vpow2.f32 %v6793_v44  ;;  %v6791_v6 = vmul.f32 1.442695, %v6785_v20  ;;  %v6788_v47 = vsub.f32 %v6764_v41, %v6778_v22  ;;  %v7114_v41 = vsub.f32 1.0, %v899_v36  ;;  %v5324_v44 = vld [vmem:[%s16412_s5 + $0x380] sm:$0xff] }
0x22bb   :  { %v6775_v38 = vpop.xlane.xlu1 %6774 }
0x22bc   :  { %12507 = vpow2.f32 %v6791_v6  ;;  %v6797_v25 = vmul.f32 1.442695, %v6788_v47  ;;  %v6787_v58 = vsub.f32 %v6763_v21, %v6775_v38  ;;  %v7116_v21 = vsub.f32 1.0, %v901_v16 }
0x22bd   :  { %v6784_v13 = vpop.xlane.xlu0 %6783 }
0x22be   :  { %12509 = vpow2.f32 %v6797_v25  ;;  %v6795_v59 = vmul.f32 1.442695, %v6787_v58  ;;  %v6790_v4 = vsub.f32 %v6766_v42, %v6784_v13  ;;  %v5323_v13 = vld [vmem:[%s16412_s5 + $0x378] sm:$0xff] }
0x22bf   :  { %v6781_v24 = vpop.xlane.xlu1 %6780 }
0x22c0   :  { %12511 = vpow2.f32 %v6795_v59  ;;  %v6801_v12 = vmul.f32 1.442695, %v6790_v4  ;;  %v6789_v46 = vsub.f32 %v6765_v30, %v6781_v24  ;;  %v5322_v59 = vld [vmem:[%s16412_s5 + $0x370] sm:$0xff] }
0x22c2   :  { %12513 = vpow2.f32 %v6801_v12  ;;  %v6799_v52 = vmul.f32 1.442695, %v6789_v46 }
0x22c4   :  { %12515 = vpow2.f32 %v6799_v52 }
0x22c7   :  { %v12506_v18 = vpop.eup %12505 }
0x22c8   :  { %v6806_v49 = vsel %vm1392_vm12, %v12506_v18, 0.0 }
0x22c9   :  { %v12508_v5 = vpop.eup %12507  ;;  %6807 = vadd.xlane.f32.xlu0 %v6806_v49  ;;  %v6298_v49 = vadd.f32 %v15619_v28, %v15478_v9 }
0x22ca   :  { %v6803_v34 = vsel %vm1392_vm12, %v12508_v5, 0.0 }
0x22cb   :  { %v12510_v3 = vpop.eup %12509  ;;  %6804 = vadd.xlane.f32.xlu1 %v6803_v34 }
0x22cc   :  { %v6812_v2 = vsel %vm1392_vm12, %v12510_v3, 0.0 }
0x22cd   :  { %v12512_v48 = vpop.eup %12511  ;;  %6813 = vadd.xlane.f32.xlu0 %v6812_v2  ;;  %v6630_v2 = vadd.f32 %v15636_v53, %v6298_v49 }
0x22ce   :  { %v6809_v1 = vsel %vm1392_vm12, %v12512_v48, 0.0 }
0x22cf   :  { %v15654_v0 = vpop.eup %12513  ;;  %6810 = vadd.xlane.f32.xlu1 %v6809_v1 }
0x22d0   :  { %v6818_v45 = vsel %vm1392_vm12, %v15654_v0, 0.0 }
0x22d1   :  { %v12516_v54 = vpop.eup %12515  ;;  %6819 = vadd.xlane.f32.xlu0 %v6818_v45 }
0x22d2   :  { %v6815_v43 = vsel %vm1392_vm12, %v12516_v54, 0.0 }
0x22d3   :  { %6816 = vadd.xlane.f32.xlu1 %v6815_v43 }
0x22e4   :  { %7077 = vperm.xlu1 %12131, %v896_v8  }
0x22e7   :  { %7119 = vperm.xlu0 %12130, %v7111_v60  }
0x22e8   :  { %7082 = vperm.xlu1 %12131, %v897_v62  }
0x22eb   :  { %7087 = vperm.xlu0 %12130, %v898_v39  }
0x22ec   :  { %7124 = vperm.xlu1 %12131, %v7112_v23  }
0x22ef   :  { %7092 = vperm.xlu0 %12130, %v899_v36  }
0x22f0   :  { %7129 = vperm.xlu1 %12131, %v7113_v56  }
0x22f3   :  { %7097 = vperm.xlu0 %12130, %v900_v19  }
0x22f4   :  { %7134 = vperm.xlu1 %12131, %v7114_v41  }
0x22f7   :  { %7102 = vperm.xlu0 %12130, %v901_v16  }
0x22f8   :  { %7139 = vperm.xlu1 %12131, %v7115_v33  }
0x22fc   :  { %7144 = vperm.xlu1 %12131, %v7116_v21  }
0x2352   :  { %v6808_v50 = vpop.xlane.xlu0 %6807 }
0x2353   :  { %12517 = vrcp.f32 %v6808_v50 }
0x2354   :  { %v6805_v31 = vpop.xlane.xlu1 %6804 }
0x2355   :  { %12519 = vrcp.f32 %v6805_v31 }
0x2356   :  { %v6814_v42 = vpop.xlane.xlu0 %6813 }
0x2357   :  { %12521 = vrcp.f32 %v6814_v42 }
0x2358   :  { %v6811_v15 = vpop.xlane.xlu1 %6810 }
0x2359   :  { %12523 = vrcp.f32 %v6811_v15 }
0x235a   :  { %v6820_v40 = vpop.xlane.xlu0 %6819 }
0x235b   :  { %12525 = vrcp.f32 %v6820_v40  ;;  %v16674_v40 = vld [vmem:[#allocation26_spill] sm:$0xff] }
0x235c   :  { %v6817_v30 = vpop.xlane.xlu1 %6816 }
0x235d   :  { %12527 = vrcp.f32 %v6817_v30 }
0x2360   :  { %v12518_v51 = vpop.eup %12517  ;;  %v7078_v9 = vpop.permute.xlu1 %7077 }
0x2361   :  { %v6824_v10 = vmul.f32 %v12518_v51, %v12506_v18 }
0x2362   :  { %v12520_v32 = vpop.eup %12519 }
0x2363   :  { %v6822_v26 = vmul.f32 %v12520_v32, %v12508_v5 }
0x2364   :  { %v12522_v17 = vpop.eup %12521  ;;  %v7083_v28 = vpop.permute.xlu1 %7082 }
0x2365   :  { %11812 = vmatprep.mubr.msk.f32.mxu1 %vm1392_vm12, %v6822_v26  ;;  %v6828_v6 = vmul.f32 %v12522_v17, %v12510_v3 }
0x2366   :  { %v12524_v20 = vpop.eup %12523  ;;  %11813 = vmatmul.mubr.msk.f32.vlgmr.msra.gmra.mxu1 %vm1392_vm12, %v6824_v10 }
0x2367   :  { %v6826_v22 = vmul.f32 %v12524_v20, %v12512_v48  ;;  %11822 = vmatpush3.msra.mxu1 %v5325_v29 }
0x2368   :  { %11823 = vmatprep.subr.mxu1 %v5324_v44  ;;  %v12526_v47 = vpop.eup %12525  ;;  %v7125_v1 = vpop.permute.xlu1 %7124 }
0x2369   :  { %11815 = vmatprep.mubr.msk.f32.mxu1 %vm1392_vm12, %v6826_v22  ;;  %11824 = vmatpush3.msra.mxu1 %v5324_v44  ;;  %v6832_v58 = vmul.f32 %v12526_v47, %v15654_v0 }
0x236a   :  { %v12528_v38 = vpop.eup %12527  ;;  %11816 = vmatmul.mubr.msk.f32.gmra.mxu1 %vm1392_vm12, %v6828_v6  ;;  %11825 = vmatprep.subr.mxu1 %v5323_v13 }
0x236b   :  { %v6830_v25 = vmul.f32 %v12528_v38, %v12516_v54  ;;  %11826 = vmatpush3.msra.mxu1 %v5323_v13  ;;  %v10147_v54 = vld [vmem:[%s16412_s5 + $0x390] ss:$0 sm:$0xff] }
0x236c   :  { %11827 = vmatprep.subr.mxu1 %v5322_v59  ;;  %v7130_v0 = vpop.permute.xlu1 %7129 }
0x236d   :  { %11818 = vmatprep.mubr.msk.f32.mxu1 %vm1392_vm12, %v6830_v25  ;;  %11828 = vmatpush3.msra.mxu1 %v5322_v59  ;;  %v7149_v15 = vmul.f32 %v7130_v0, %v15082_v37  ;;  %v16675_v37 = vld [vmem:[#allocation54_spill] sm:$0xff] }
0x236e   :  { %11819 = vmatmul.mubr.msk.f32.gmra.mxu1 %vm1392_vm12, %v6832_v58  ;;  %v16676_v58 = vld [vmem:[#allocation23_spill] sm:$0xff] }
0x2370   :  { %v7135_v53 = vpop.permute.xlu1 %7134 }
0x2371   :  { %v7150_v30 = vmul.f32 %v7135_v53, %v16674_v40  ;;  %v7266_v40 = vld [vmem:[%s16415_s6 + $0x80] sm:$0xff] }
0x2374   :  { %v7140_v56 = vpop.permute.xlu1 %7139 }
0x2375   :  { %v7151_v25 = vmul.f32 %v7140_v56, %v16675_v37 }
0x2426   :  { %v11814_v4 = vpop.f32.mrf.mxu1 }
0x2427   :  { %v6953_v46 = vadd.f32 %v11814_v4, %v15623_v61 }
0x2428   :  { %v6923_v24 = vpop.f32.mrf.mxu1 }
0x2429   :  { %v6952_v12 = vadd.f32 %v6923_v24, %v15626_v11 }
0x242a   :  { %v11817_v52 = vpop.f32.mrf.mxu1 }
0x242b   :  { %11829 = vmatprep.mubr.msk.f32.mxu1 %vm579_vm10, %v6952_v12  ;;  %v6955_v34 = vadd.f32 %v11817_v52, %v15629_v55 }
0x242c   :  { %v6933_v18 = vpop.f32.mrf.mxu1  ;;  %11830 = vmatmul.mubr.msk.f32.vlgmr.msra.gmra.mxu1 %vm579_vm10, %v6953_v46 }
0x242d   :  { %v6954_v5 = vadd.f32 %v6933_v18, %v15632_v63  ;;  %v7120_v63 = vpop.permute.xlu0 %7119 }
0x242e   :  { %v11820_v3 = vpop.f32.mrf.mxu1  ;;  %v7147_v41 = vmul.f32 %v7120_v63, %v15061_v57  ;;  %v7145_v57 = vpop.permute.xlu1 %7144 }
0x242f   :  { %11832 = vmatprep.mubr.msk.f32.mxu1 %vm579_vm10, %v6954_v5  ;;  %v6957_v48 = vadd.f32 %v11820_v3, %v15634_v7  ;;  %v7148_v7 = vmul.f32 %v7125_v1, %v15063_v35  ;;  %v7152_v13 = vmul.f32 %v7145_v57, %v16676_v58 }
0x2430   :  { %v6943_v11 = vpop.f32.mrf.mxu1  ;;  %11833 = vmatmul.mubr.msk.f32.gmra.mxu1 %vm579_vm10, %v6955_v34 }
0x2431   :  { %v6956_v61 = vadd.f32 %v6943_v11, %v6630_v2  ;;  %v7088_v55 = vpop.permute.xlu0 %7087 }
0x2433   :  { %11835 = vmatprep.mubr.msk.f32.mxu1 %vm579_vm10, %v6956_v61 }
0x2434   :  { %11836 = vmatmul.mubr.msk.f32.gmra.mxu1 %vm579_vm10, %v6957_v48 }
0x2435   :  { %v7093_v45 = vpop.permute.xlu0 %7092 }
0x2439   :  { %v7098_v62 = vpop.permute.xlu0 %7097 }
0x243d   :  { %v7103_v51 = vpop.permute.xlu0 %7102 }
0x24ec   :  { %v11831_v43 = vpop.f32.mrf.mxu1 }
0x24ed   :  { %v7052_v8 = vadd.f32 %v11831_v43, %v10147_v54 }
0x24ee   :  { %v7046_v60 = vpop.f32.mrf.mxu1 }
0x24ef   :  { %v7106_v23 = vmul.f32 %v7083_v28, %v7052_v8  ;;  %v7047_v39 = vadd.f32 %v10147_v54, %v7046_v60 }
0x24f0   :  { %v11834_v36 = vpop.f32.mrf.mxu1 }
0x24f1   :  { %v7105_v19 = vmul.f32 %v7078_v9, %v7047_v39  ;;  %v7062_v33 = vadd.f32 %v11834_v36, %v10147_v54  ;;  %v7154_v16 = vadd.f32 %v7148_v7, %v7106_v23 }
0x24f2   :  { %v7056_v21 = vpop.f32.mrf.mxu1 }
0x24f3   :  { %v7108_v29 = vmul.f32 %v7093_v45, %v7062_v33  ;;  %v7057_v50 = vadd.f32 %v10147_v54, %v7056_v21  ;;  %v7160_v31 = vmul.f32 2.0, %v7154_v16  ;;  %v7153_v42 = vadd.f32 %v7147_v41, %v7105_v19 }
0x24f4   :  { %v11837_v35 = vpop.f32.mrf.mxu1 }
0x24f5   :  { %v7107_v32 = vmul.f32 %v7088_v55, %v7057_v50  ;;  %v7072_v26 = vadd.f32 %v11837_v35, %v10147_v54  ;;  %v7170_v10 = vsel %vm579_vm10, %v7160_v31, 0.0  ;;  %v7159_v17 = vmul.f32 2.0, %v7153_v42  ;;  %v7268_v42 = vld [vmem:[%s16415_s6 + $0x90] sm:$0xff] }
0x24f6   :  { %7171 = vadd.xlane.f32.xlu1 %v7170_v10  ;;  %v7066_v44 = vpop.f32.mrf.mxu1  ;;  %v7156_v20 = vadd.f32 %v7150_v30, %v7108_v29  ;;  %11838 = vmatprep.subr.mxu0 %v7268_v42  ;;  %v7265_v30 = vld [vmem:[%s16415_s6 + $0x78] sm:$0xff]  ;;  %v7400_v35 = vld [vmem:[%s16412_s5 + $0x3d0] sm:$0xff] }
0x24f7   :  { %v7110_v22 = vmul.f32 %v7103_v51, %v7072_v26  ;;  %v7067_v6 = vadd.f32 %v10147_v54, %v7066_v44  ;;  %v7167_v47 = vsel %vm579_vm10, %v7159_v17, 0.0  ;;  %v7155_v38 = vadd.f32 %v7149_v15, %v7107_v32  ;;  %v7267_v15 = vld [vmem:[%s16415_s6 + $0x88] sm:$0xff]  ;;  %11839 = vmatpush3.msra.mxu0 %v7268_v42  ;;  %11855 = vmatprep.subr.mxu1 %v7400_v35  ;;  %v7398_v32 = vld [vmem:[%s16412_s5 + $0x3c0] sm:$0xff]  ;;  %v7397_v10 = vld [vmem:[%s16412_s5 + $0x3b8] sm:$0xff] }
0x24f8   :  { %7168 = vadd.xlane.f32.xlu0 %v7167_v47  ;;  %v7162_v12 = vmul.f32 2.0, %v7156_v20  ;;  %11840 = vmatprep.subr.mxu0 %v7267_v15  ;;  %v7399_v51 = vld [vmem:[%s16412_s5 + $0x3c8] sm:$0xff]  ;;  %v16677_v26 = vmov 0.0  }
0x24f9   :  { %v7109_v59 = vmul.f32 %v7098_v62, %v7067_v6  ;;  %v7161_v4 = vmul.f32 2.0, %v7155_v38  ;;  %v7158_v52 = vadd.f32 %v7152_v13, %v7110_v22  ;;  %11841 = vmatpush3.msra.mxu0 %v7267_v15  ;;  %11856 = vmatpush3.msra.mxu1 %v7400_v35 }
0x24fa   :  { %v7176_v49 = vsel %vm579_vm10, %v7162_v12, 0.0  ;;  %11842 = vmatprep.subr.mxu0 %v7266_v40  ;;  %11857 = vmatprep.subr.mxu1 %v7399_v51 }
0x24fb   :  { %v7173_v24 = vsel %vm579_vm10, %v7161_v4, 0.0  ;;  %v7157_v46 = vadd.f32 %v7151_v25, %v7109_v59  ;;  %v7164_v34 = vmul.f32 2.0, %v7158_v52  ;;  %11843 = vmatpush3.msra.mxu0 %v7266_v40  ;;  %11858 = vmatpush3.msra.mxu1 %v7399_v51 }
0x24fc   :  { %7174 = vadd.xlane.f32.xlu0 %v7173_v24  ;;  %11844 = vmatprep.subr.mxu0 %v7265_v30 }
0x24fd   :  { %v7163_v18 = vmul.f32 2.0, %v7157_v46  ;;  %v7182_v3 = vsel %vm579_vm10, %v7164_v34, 0.0  ;;  %11845 = vmatpush3.msra.mxu0 %v7265_v30  ;;  %11859 = vmatprep.subr.mxu1 %v7398_v32 }
0x24fe   :  { %11880 = vmatprep.subr.mxu0 %v16677_v26  ;;  %11860 = vmatpush3.msra.mxu1 %v7398_v32 }
0x24ff   :  { %v7179_v5 = vsel %vm579_vm10, %v7163_v18, 0.0  ;;  %11861 = vmatprep.subr.mxu1 %v7397_v10 }
0x2500   :  { %7177 = vadd.xlane.f32.xlu0 %v7176_v49  ;;  %7180 = vadd.xlane.f32.xlu1 %v7179_v5  ;;  %v10154_v49 = vld [vmem:[%s16412_s5 + $0x3e0] ss:$0 sm:$0xff] }
0x2501   :  { %11862 = vmatpush3.msra.mxu1 %v7397_v10 }
0x2504   :  { %7183 = vadd.xlane.f32.xlu0 %v7182_v3 }
0x257f   :  { %v7172_v2 = vpop.xlane.xlu1 %7171 }
0x2580   :  { %v7186_v11 = vmul.f32 0.03125, %v7172_v2 }
0x2581   :  { %v7169_v61 = vpop.xlane.xlu0 %7168 }
0x2582   :  { %v15725_v48 = vsub.f32 %v7160_v31, %v7186_v11  ;;  %v7185_v9 = vmul.f32 0.03125, %v7169_v61  ;;  %v10155_v11 = vld [vmem:[%s16412_s5 + $0x3e8] ss:$0 sm:$0xff] }
0x2584   :  { %v15727_v28 = vsub.f32 %v7159_v17, %v7185_v9  ;;  %v7198_v63 = vmul.f32 %v15725_v48, %v15725_v48 }
0x2585   :  { %v7175_v1 = vpop.xlane.xlu0 %7174 }
0x2586   :  { %v7187_v55 = vmul.f32 0.03125, %v7175_v1  ;;  %v7206_v0 = vsel %vm579_vm10, %v7198_v63, 0.0  ;;  %v7197_v45 = vmul.f32 %v15727_v28, %v15727_v28 }
0x2587   :  { %7207 = vadd.xlane.f32.xlu0 %v7206_v0 }
0x2588   :  { %v15734_v53 = vsub.f32 %v7161_v4, %v7187_v55  ;;  %v7203_v54 = vsel %vm579_vm10, %v7197_v45, 0.0 }
0x2589   :  { %v7178_v43 = vpop.xlane.xlu0 %7177  ;;  %7204 = vadd.xlane.f32.xlu1 %v7203_v54  ;;  %v7181_v8 = vpop.xlane.xlu1 %7180 }
0x258a   :  { %v7188_v60 = vmul.f32 0.03125, %v7178_v43  ;;  %v7189_v7 = vmul.f32 0.03125, %v7181_v8  ;;  %v7199_v62 = vmul.f32 %v15734_v53, %v15734_v53 }
0x258c   :  { %v15739_v23 = vsub.f32 %v7162_v12, %v7188_v60  ;;  %v15741_v39 = vsub.f32 %v7163_v18, %v7189_v7  ;;  %v7209_v56 = vsel %vm579_vm10, %v7199_v62, 0.0 }
0x258d   :  { %v7184_v36 = vpop.xlane.xlu0 %7183  ;;  %7210 = vadd.xlane.f32.xlu1 %v7209_v56 }
0x258e   :  { %v7190_v41 = vmul.f32 0.03125, %v7184_v36  ;;  %v7200_v19 = vmul.f32 %v15739_v23, %v15739_v23  ;;  %v7201_v33 = vmul.f32 %v15741_v39, %v15741_v39 }
0x2590   :  { %v15748_v16 = vsub.f32 %v7164_v34, %v7190_v41  ;;  %v7212_v21 = vsel %vm579_vm10, %v7200_v19, 0.0  ;;  %v7215_v29 = vsel %vm579_vm10, %v7201_v33, 0.0  ;;  %v7395_v41 = vld [vmem:[%s16412_s5 + $0x3a8] sm:$0xff]  ;;  %v7394_v19 = vld [vmem:[%s16412_s5 + $0x3a0] sm:$0xff]  ;;  %v7393_v33 = vld [vmem:[%s16412_s5 + $0x398] sm:$0xff] }
0x2591   :  { %7213 = vadd.xlane.f32.xlu0 %v7212_v21  ;;  %7216 = vadd.xlane.f32.xlu1 %v7215_v29 }
0x2592   :  { %v7202_v50 = vmul.f32 %v15748_v16, %v15748_v16 }
0x2594   :  { %v7218_v31 = vsel %vm579_vm10, %v7202_v50, 0.0 }
0x2595   :  { %7219 = vadd.xlane.f32.xlu0 %v7218_v31 }
0x2610   :  { %v7208_v17 = vpop.xlane.xlu0 %7207 }
0x2611   :  { %v7222_v57 = vmul.f32 0.03125, %v7208_v17 }
0x2612   :  { %v7205_v44 = vpop.xlane.xlu1 %7204 }
0x2613   :  { %v7228_v20 = vadd.f32 1e-05, %v7222_v57  ;;  %v7221_v22 = vmul.f32 0.03125, %v7205_v44 }
0x2615   :  { %12529 = vrsqrt.f32 %v7228_v20  ;;  %v7227_v6 = vadd.f32 1e-05, %v7221_v22 }
0x2616   :  { %v7211_v47 = vpop.xlane.xlu1 %7210 }
0x2617   :  { %12531 = vrsqrt.f32 %v7227_v6  ;;  %v7223_v38 = vmul.f32 0.03125, %v7211_v47 }
0x2619   :  { %v7229_v37 = vadd.f32 1e-05, %v7223_v38 }
0x261a   :  { %v7214_v25 = vpop.xlane.xlu0 %7213  ;;  %v7217_v58 = vpop.xlane.xlu1 %7216 }
0x261b   :  { %12533 = vrsqrt.f32 %v7229_v37  ;;  %v7224_v13 = vmul.f32 0.03125, %v7214_v25  ;;  %v7225_v59 = vmul.f32 0.03125, %v7217_v58  ;;  %v10163_v58 = vld [vmem:[%s16412_s5 + $0x3d8] ss:$0 sm:$0xff] }
0x261d   :  { %v7230_v4 = vadd.f32 1e-05, %v7224_v13  ;;  %v7231_v24 = vadd.f32 1e-05, %v7225_v59 }
0x261e   :  { %v7220_v12 = vpop.xlane.xlu0 %7219 }
0x261f   :  { %12535 = vrsqrt.f32 %v7230_v4  ;;  %v7226_v46 = vmul.f32 0.03125, %v7220_v12 }
0x2620   :  { %12537 = vrsqrt.f32 %v7231_v24 }
0x2621   :  { %v7232_v52 = vadd.f32 1e-05, %v7226_v46 }
0x2622   :  { %v12530_v18 = vpop.eup %12529 }
0x2623   :  { %v7240_v5 = vmul.f32 %v12530_v18, %v15725_v48  ;;  %12539 = vrsqrt.f32 %v7232_v52 }
0x2624   :  { %v12532_v34 = vpop.eup %12531 }
0x2625   :  { %v7239_v3 = vmul.f32 %v12532_v34, %v15727_v28  ;;  %v7250_v2 = vmul.f32 %v10154_v49, %v7240_v5 }
0x2627   :  { %v7249_v61 = vmul.f32 %v10154_v49, %v7239_v3  ;;  %v15791_v55 = vadd.f32 %v10155_v11, %v7250_v2 }
0x2628   :  { %v12534_v9 = vpop.eup %12533 }
0x2629   :  { %v15788_v63 = vadd.f32 %v10155_v11, %v7249_v61  ;;  %v7241_v1 = vmul.f32 %v12534_v9, %v15734_v53 }
0x262b   :  { %11846 = vmatprep.mubr.msk.f32.mxu0 %vm579_vm10, %v15788_v63  ;;  %v7251_v48 = vmul.f32 %v10154_v49, %v7241_v1 }
0x262c   :  { %v12536_v0 = vpop.eup %12535  ;;  %11847 = vmatmul.mubr.msk.f32.vlgmr.msra.gmra.mxu0 %vm579_vm10, %v15791_v55 }
0x262d   :  { %v12538_v28 = vpop.eup %12537  ;;  %v7242_v45 = vmul.f32 %v12536_v0, %v15739_v23  ;;  %v15798_v54 = vadd.f32 %v10155_v11, %v7251_v48 }
0x262e   :  { %v7243_v43 = vmul.f32 %v12538_v28, %v15741_v39  ;;  %v7396_v39 = vld [vmem:[%s16412_s5 + $0x3b0] sm:$0xff] }
0x262f   :  { %11849 = vmatprep.mubr.msk.f32.mxu0 %vm579_vm10, %v15798_v54  ;;  %v7252_v53 = vmul.f32 %v10154_v49, %v7242_v45  ;;  %11863 = vmatprep.subr.mxu1 %v7396_v39 }
0x2630   :  { %v12540_v8 = vpop.eup %12539  ;;  %v7253_v60 = vmul.f32 %v10154_v49, %v7243_v43  ;;  %11864 = vmatpush3.msra.mxu1 %v7396_v39 }
0x2631   :  { %v7244_v7 = vmul.f32 %v12540_v8, %v15748_v16  ;;  %v7262_v62 = vadd.f32 %v10155_v11, %v7252_v53  ;;  %11865 = vmatprep.subr.mxu1 %v7395_v41  ;;  %v10156_v16 = vld [vmem:[%s16415_s6 + $0x98] ss:$0 sm:$0xff] }
0x2632   :  { %v7263_v56 = vadd.f32 %v10155_v11, %v7253_v60  ;;  %11866 = vmatpush3.msra.mxu1 %v7395_v41 }
0x2633   :  { %11850 = vmatmul.mubr.msk.f32.gmra.mxu0 %vm579_vm10, %v7262_v62  ;;  %v7254_v36 = vmul.f32 %v10154_v49, %v7244_v7  ;;  %11867 = vmatprep.subr.mxu1 %v7394_v19 }
0x2634   :  { %11852 = vmatprep.mubr.msk.f32.mxu0 %vm579_vm10, %v7263_v56  ;;  %11868 = vmatpush3.msra.mxu1 %v7394_v19 }
0x2635   :  { %v7264_v23 = vadd.f32 %v10155_v11, %v7254_v36  ;;  %11869 = vmatprep.subr.mxu1 %v7393_v33 }
0x2636   :  { %11870 = vmatpush3.msra.mxu1 %v7393_v33 }
0x2637   :  { %11853 = vmatmul.mubr.msk.f32.gmra.mxu0 %vm579_vm10, %v7264_v23  ;;  %11895 = vmatprep.subr.mxu1 %v16677_v26 }
0x2638   :  { %11892 = vmatprep.mubr.msk.f32.mxu0 %vm12607_vm14, %v16677_v26 }
0x26ec   :  { %v11848_v21 = vpop.f32.mrf.mxu0 }
0x26ed   :  { %v7364_v29 = vadd.f32 %v11848_v21, %v10156_v16 }
0x26ee   :  { %v7358_v50 = vpop.f32.mrf.mxu0 }
0x26ef   :  { %v7359_v31 = vadd.f32 %v10156_v16, %v7358_v50  ;;  %v7388_v15 = vmax.f32 %v7364_v29, 0.0 }
0x26f1   :  { %v7387_v42 = vmax.f32 %v7359_v31, 0.0 }
0x26f3   :  { %v11851_v40 = vpop.f32.mrf.mxu0  ;;  %11871 = vmatprep.mubr.msk.f32.mxu1 %vm7406_vm13, %v7387_v42 }
0x26f4   :  { %11872 = vmatmul.mubr.msk.f32.vlgmr.msra.gmra.mxu1 %vm7406_vm13, %v7388_v15  ;;  %v7374_v30 = vadd.f32 %v11851_v40, %v10156_v16 }
0x26f5   :  { %v7368_v35 = vpop.f32.mrf.mxu0 }
0x26f6   :  { %v7369_v51 = vadd.f32 %v10156_v16, %v7368_v35  ;;  %v7390_v17 = vmax.f32 %v7374_v30, 0.0 }
0x26f7   :  { %v11854_v32 = vpop.f32.mrf.mxu0 }
0x26f8   :  { %v7389_v10 = vmax.f32 %v7369_v51, 0.0  ;;  %v7384_v57 = vadd.f32 %v11854_v32, %v10156_v16 }
0x26f9   :  { %v7378_v44 = vpop.f32.mrf.mxu0 }
0x26fa   :  { %v7379_v20 = vadd.f32 %v10156_v16, %v7378_v44  ;;  %11874 = vmatprep.mubr.msk.f32.mxu1 %vm7406_vm13, %v7389_v10  ;;  %v7392_v6 = vmax.f32 %v7384_v57, 0.0  ;;  %v7877_v57 = vld [vmem:[%s16413_s1 + $0x38] sm:$0xff]  ;;  %v7703_v44 = vld [vmem:[%s16415_s6 + $0xe0] sm:$0xff] }
0x26fb   :  { %11875 = vmatmul.mubr.msk.f32.gmra.mxu1 %vm7406_vm13, %v7390_v17  ;;  %v7876_v17 = vld [vmem:[%s16413_s1 + $0x30] sm:$0xff] }
0x26fc   :  { %v7391_v22 = vmax.f32 %v7379_v20, 0.0  ;;  %v7702_v20 = vld [vmem:[%s16415_s6 + $0xd8] sm:$0xff]  ;;  %11896 = vmatpush3.msra.mxu1 %v7703_v44  ;;  %v7787_v44 = vld [vmem:[%s16412_s5 + $0x588] sm:$0xff] }
0x26fd   :  { %11897 = vmatprep.subr.mxu1 %v16677_v26 }
0x26fe   :  { %11877 = vmatprep.mubr.msk.f32.mxu1 %vm7406_vm13, %v7391_v22  ;;  %v7701_v22 = vld [vmem:[%s16415_s6 + $0xd0] sm:$0xff]  ;;  %11898 = vmatpush3.msra.mxu1 %v7702_v20  ;;  %v7786_v20 = vld [vmem:[%s16412_s5 + $0x580] sm:$0xff] }
0x26ff   :  { %11878 = vmatmul.mubr.msk.f32.gmra.mxu1 %vm7406_vm13, %v7392_v6  ;;  %11899 = vmatprep.subr.mxu1 %v16677_v26  ;;  %v7700_v6 = vld [vmem:[%s16415_s6 + $0xc8] sm:$0xff] }
0x2700   :  { %11903 = vmatprep.mubr.msk.f32.mxu1 %vm12607_vm14, %v16677_v26  ;;  %11900 = vmatpush3.msra.mxu1 %v7701_v22 }
0x2701   :  { %11901 = vmatprep.subr.mxu1 %v16677_v26 }
0x2702   :  { %11902 = vmatpush3.msra.mxu1 %v7700_v6  ;;  %v16678_v6 = vld [vmem:[#allocation2_spill] sm:$0xff] }
0x27b4   :  { %v11873_v47 = vpop.f32.mrf.mxu1 }
0x27b5   :  { %v7497_v18 = vadd.f32 %v11873_v47, %v10163_v58  ;;  %v15899_v47 = vld [vmem:[%s16412_s5 + $0x260] sm:$0x3] }
0x27b6   :  { %v7491_v38 = vpop.f32.mrf.mxu1  ;;  %11941 = vmatprep.subr.msk.mxu1 %vm71_vm1, %v15899_v47 }
0x27b7   :  { %v7492_v3 = vadd.f32 %v10163_v58, %v7491_v38  ;;  %v7521_v61 = vadd.f32 %v7497_v18, %v15791_v55 }
0x27b9   :  { %v7520_v1 = vadd.f32 %v7492_v3, %v15788_v63  ;;  %v7531_v0 = vsel %vm579_vm10, %v7521_v61, 0.0 }
0x27bb   :  { %v11876_v37 = vpop.f32.mrf.mxu1  ;;  %v7528_v28 = vsel %vm579_vm10, %v7520_v1, 0.0 }
0x27bc   :  { %v7507_v59 = vadd.f32 %v11876_v37, %v10163_v58 }
0x27bd   :  { %v7501_v25 = vpop.f32.mrf.mxu1 }
0x27be   :  { %v7502_v12 = vadd.f32 %v10163_v58, %v7501_v25  ;;  %v7523_v49 = vadd.f32 %v7507_v59, %v7262_v62 }
0x27bf   :  { %v11879_v13 = vpop.f32.mrf.mxu1 }
0x27c0   :  { %v7517_v4 = vadd.f32 %v11879_v13, %v10163_v58  ;;  %v7522_v2 = vadd.f32 %v7502_v12, %v15798_v54  ;;  %v7537_v9 = vsel %vm579_vm10, %v7523_v49, 0.0 }
0x27c1   :  { %v7511_v24 = vpop.f32.mrf.mxu1 }
0x27c2   :  { %v7525_v46 = vadd.f32 %v7517_v4, %v7264_v23  ;;  %v7512_v52 = vadd.f32 %v10163_v58, %v7511_v24  ;;  %v7534_v48 = vsel %vm579_vm10, %v7522_v2, 0.0 }
0x27c4   :  { %v7524_v5 = vadd.f32 %v7512_v52, %v7263_v56  ;;  %v7543_v34 = vsel %vm579_vm10, %v7525_v46, 0.0 }
0x27c5   :  { %7544 = vadd.xlane.f32.xlu1 %v7543_v34 }
0x27c6   :  { %v7540_v11 = vsel %vm579_vm10, %v7524_v5, 0.0 }
0x27c7   :  { %7541 = vadd.xlane.f32.xlu0 %v7540_v11 }
0x27c9   :  { %7538 = vadd.xlane.f32.xlu1 %v7537_v9  ;;  %v10170_v9 = vld [vmem:[%s16412_s5 + $0x3f0] ss:$0 sm:$0xff] }
0x27cb   :  { %7535 = vadd.xlane.f32.xlu0 %v7534_v48 }
0x27cd   :  { %7532 = vadd.xlane.f32.xlu1 %v7531_v0  ;;  %v10171_v0 = vld [vmem:[%s16412_s5 + $0x3f8] ss:$0 sm:$0xff] }
0x27cf   :  { %7529 = vadd.xlane.f32.xlu0 %v7528_v28 }
0x284e   :  { %v7545_v45 = vpop.xlane.xlu1 %7544 }
0x284f   :  { %v7551_v54 = vmul.f32 0.03125, %v7545_v45 }
0x2850   :  { %v7542_v43 = vpop.xlane.xlu0 %7541 }
0x2851   :  { %v15841_v53 = vsub.f32 %v7525_v46, %v7551_v54  ;;  %v7550_v55 = vmul.f32 0.03125, %v7542_v43 }
0x2852   :  { %v7539_v8 = vpop.xlane.xlu1 %7538 }
0x2853   :  { %v15843_v60 = vsub.f32 %v7524_v5, %v7550_v55  ;;  %v7549_v7 = vmul.f32 0.03125, %v7539_v8  ;;  %v7563_v63 = vmul.f32 %v15841_v53, %v15841_v53 }
0x2854   :  { %v7536_v62 = vpop.xlane.xlu0 %7535 }
0x2855   :  { %v15847_v56 = vsub.f32 %v7523_v49, %v7549_v7  ;;  %v7548_v36 = vmul.f32 0.03125, %v7536_v62  ;;  %v7579_v23 = vsel %vm579_vm10, %v7563_v63, 0.0  ;;  %v7562_v39 = vmul.f32 %v15843_v60, %v15843_v60 }
0x2856   :  { %7580 = vadd.xlane.f32.xlu1 %v7579_v23  ;;  %v7533_v41 = vpop.xlane.xlu1 %7532 }
0x2857   :  { %v15852_v19 = vsub.f32 %v7522_v2, %v7548_v36  ;;  %v7547_v33 = vmul.f32 0.03125, %v7533_v41  ;;  %v7576_v16 = vsel %vm579_vm10, %v7562_v39, 0.0  ;;  %v7561_v21 = vmul.f32 %v15847_v56, %v15847_v56 }
0x2858   :  { %7577 = vadd.xlane.f32.xlu0 %v7576_v16  ;;  %v7530_v29 = vpop.xlane.xlu0 %7529 }
0x2859   :  { %v15857_v50 = vsub.f32 %v7521_v61, %v7547_v33  ;;  %v7546_v31 = vmul.f32 0.03125, %v7530_v29  ;;  %v7573_v42 = vsel %vm579_vm10, %v7561_v21, 0.0  ;;  %v7560_v15 = vmul.f32 %v15852_v19, %v15852_v19 }
0x285a   :  { %7574 = vadd.xlane.f32.xlu1 %v7573_v42  ;;  %v7797_v42 = vld [vmem:[%s16412_s5 + $0x5d8] sm:$0xff] }
0x285b   :  { %v15862_v40 = vsub.f32 %v7520_v1, %v7546_v31  ;;  %v7570_v30 = vsel %vm579_vm10, %v7560_v15, 0.0  ;;  %v7559_v35 = vmul.f32 %v15857_v50, %v15857_v50  ;;  %v7798_v31 = vld [vmem:[%s16412_s5 + $0x5e0] sm:$0xff]  ;;  %v7796_v15 = vld [vmem:[%s16412_s5 + $0x5d0] sm:$0xff] }
0x285c   :  { %7571 = vadd.xlane.f32.xlu0 %v7570_v30  ;;  %v7794_v30 = vld [vmem:[%s16412_s5 + $0x5c0] sm:$0xff] }
0x285d   :  { %v7567_v51 = vsel %vm579_vm10, %v7559_v35, 0.0  ;;  %v7558_v32 = vmul.f32 %v15862_v40, %v15862_v40  ;;  %v7793_v35 = vld [vmem:[%s16412_s5 + $0x5b8] sm:$0xff] }
0x285e   :  { %7568 = vadd.xlane.f32.xlu1 %v7567_v51  ;;  %v7792_v51 = vld [vmem:[%s16412_s5 + $0x5b0] sm:$0xff] }
0x285f   :  { %v7564_v10 = vsel %vm579_vm10, %v7558_v32, 0.0  ;;  %v7791_v32 = vld [vmem:[%s16412_s5 + $0x5a8] sm:$0xff] }
0x2860   :  { %7565 = vadd.xlane.f32.xlu0 %v7564_v10  ;;  %v7790_v10 = vld [vmem:[%s16412_s5 + $0x5a0] sm:$0xff] }
0x286f   :  { %7880 = vperm.xlu1 %12131, %v7876_v17   ;;  %v7789_v17 = vld [vmem:[%s16412_s5 + $0x598] sm:$0xff] }
0x2876   :  { %7885 = vperm.xlu0 %12130, %v7877_v57   ;;  %v7788_v57 = vld [vmem:[%s16412_s5 + $0x590] sm:$0xff] }
0x28df   :  { %v7581_v38 = vpop.xlane.xlu1 %7580 }
0x28e0   :  { %v7587_v37 = vmul.f32 0.03125, %v7581_v38 }
0x28e1   :  { %v7578_v25 = vpop.xlane.xlu0 %7577 }
0x28e2   :  { %v7593_v58 = vadd.f32 1e-05, %v7587_v37  ;;  %v7586_v13 = vmul.f32 0.03125, %v7578_v25 }
0x28e3   :  { %v7575_v59 = vpop.xlane.xlu1 %7574 }
0x28e4   :  { %12541 = vrsqrt.f32 %v7593_v58  ;;  %v7592_v4 = vadd.f32 1e-05, %v7586_v13  ;;  %v7585_v24 = vmul.f32 0.03125, %v7575_v59  ;;  %v12598_v58 = vld [vmem:[%s16412_s5 + $0x258] sm:$0xff]  ;;  %v12599_v13 = vld [vmem:[%s16412_s5 + $0x250] sm:$0xff]  ;;  %v12600_v59 = vld [vmem:[%s16412_s5 + $0x248] sm:$0xff] }
0x28e5   :  { %v7572_v12 = vpop.xlane.xlu0 %7571 }
0x28e6   :  { %12543 = vrsqrt.f32 %v7592_v4  ;;  %v7591_v46 = vadd.f32 1e-05, %v7585_v24  ;;  %v7584_v52 = vmul.f32 0.03125, %v7572_v12  ;;  %v12601_v4 = vld [vmem:[%s16412_s5 + $0x240] sm:$0xff]  ;;  %v12602_v24 = vld [vmem:[%s16412_s5 + $0x238] sm:$0xff]  ;;  %v12603_v12 = vld [vmem:[%s16412_s5 + $0x230] sm:$0xff] }
0x28e7   :  { %v7569_v18 = vpop.xlane.xlu1 %7568 }
0x28e8   :  { %12545 = vrsqrt.f32 %v7591_v46  ;;  %v7590_v49 = vadd.f32 1e-05, %v7584_v52  ;;  %v7583_v5 = vmul.f32 0.03125, %v7569_v18  ;;  %v7785_v52 = vld [vmem:[%s16412_s5 + $0x578] sm:$0xff]  ;;  %v7784_v18 = vld [vmem:[%s16412_s5 + $0x570] sm:$0xff] }
0x28e9   :  { %v7566_v34 = vpop.xlane.xlu0 %7565 }
0x28ea   :  { %12547 = vrsqrt.f32 %v7590_v49  ;;  %v7589_v3 = vadd.f32 1e-05, %v7583_v5  ;;  %v7582_v2 = vmul.f32 0.03125, %v7566_v34  ;;  %v7783_v49 = vld [vmem:[%s16412_s5 + $0x568] sm:$0xff]  ;;  %v7993_v5 = vld [vmem:[%s16412_s5 + $0x418] sm:$0xff] }
0x28eb   :  { %v7881_v22 = vpop.permute.xlu1 %7880  ;;  %v8003_v34 = vld [vmem:[%s16412_s5 + $0x468] sm:$0xff] }
0x28ec   :  { %12549 = vrsqrt.f32 %v7589_v3  ;;  %v7588_v11 = vadd.f32 1e-05, %v7582_v2  ;;  %vm7888_vm15 = vcmp.eq.f32.partialorder %v16678_v6, %v7881_v22  ;;  %v7992_v3 = vld [vmem:[%s16412_s5 + $0x410] sm:$0xff]  ;;  %v7991_v2 = vld [vmem:[%s16412_s5 + $0x408] sm:$0xff] }
0x28ed   :  { %v10176_v37 = vsel %vm7888_vm15, 1.0, %v16677_v26 }
0x28ee   :  { %12551 = vrsqrt.f32 %v7588_v11  ;;  %v7990_v11 = vld [vmem:[%s16412_s5 + $0x400] sm:$0xff] }
0x28f1   :  { %v12542_v61 = vpop.eup %12541 }
0x28f2   :  { %v7605_v1 = vmul.f32 %v12542_v61, %v15841_v53  ;;  %v7998_v61 = vld [vmem:[%s16412_s5 + $0x440] sm:$0xff] }
0x28f3   :  { %v12544_v48 = vpop.eup %12543 }
0x28f4   :  { %v7615_v28 = vmul.f32 %v10170_v9, %v7605_v1  ;;  %v7604_v45 = vmul.f32 %v12544_v48, %v15843_v60 }
0x28f5   :  { %v12546_v54 = vpop.eup %12545 }
0x28f6   :  { %v7625_v43 = vadd.f32 %v10171_v0, %v7615_v28  ;;  %v7614_v55 = vmul.f32 %v10170_v9, %v7604_v45  ;;  %v7603_v8 = vmul.f32 %v12546_v54, %v15847_v56  ;;  %v8002_v45 = vld [vmem:[%s16412_s5 + $0x460] sm:$0xff]  ;;  %v8001_v54 = vld [vmem:[%s16412_s5 + $0x458] sm:$0xff] }
0x28f7   :  { %v12548_v7 = vpop.eup %12547 }
0x28f8   :  { %11881 = vmatpush3.msra.mxu0 %v7625_v43  ;;  %v7624_v63 = vadd.f32 %v10171_v0, %v7614_v55  ;;  %v7613_v62 = vmul.f32 %v10170_v9, %v7603_v8  ;;  %v7602_v36 = vmul.f32 %v12548_v7, %v15852_v19  ;;  %v8000_v43 = vld [vmem:[%s16412_s5 + $0x450] sm:$0xff]  ;;  %v10181_v8 = vld [vmem:[%s16412_s5 + $0x228] ss:$0 sm:$0xff]  ;;  %v7979_v7 = vld [vmem:[%s16412_s5 + $0x218] sm:$0xff] }
0x28f9   :  { %v12550_v53 = vpop.eup %12549  ;;  %11882 = vmatprep.subr.mxu0 %v16677_v26  ;;  %v7978_v55 = vld [vmem:[%s16412_s5 + $0x210] sm:$0xff] }
0x28fa   :  { %11883 = vmatpush3.msra.mxu0 %v7624_v63  ;;  %v7623_v23 = vadd.f32 %v10171_v0, %v7613_v62  ;;  %v7612_v39 = vmul.f32 %v10170_v9, %v7602_v36  ;;  %v7601_v41 = vmul.f32 %v12550_v53, %v15857_v50  ;;  %v7626_v50 = vld [vmem:[%s16411_s4 + $0x168] sm:$0x3]  ;;  %v7984_v62 = vmul.f32 %v10181_v8, %v7978_v55 }
0x28fb   :  { %v12552_v60 = vpop.eup %12551  ;;  %11884 = vmatprep.subr.mxu0 %v16677_v26  ;;  %v7985_v53 = vmul.f32 %v10181_v8, %v7979_v7 }
0x28fc   :  { %11885 = vmatpush3.msra.mxu0 %v7623_v23  ;;  %v7622_v33 = vadd.f32 %v10171_v0, %v7612_v39  ;;  %v7611_v56 = vmul.f32 %v10170_v9, %v7601_v41  ;;  %v7600_v16 = vmul.f32 %v12552_v60, %v15862_v40  ;;  %v7795_v40 = vld [vmem:[%s16412_s5 + $0x5c8] sm:$0xff] }
0x28fd   :  { %11886 = vmatprep.subr.mxu0 %v16677_v26 }
0x28fe   :  { %11887 = vmatpush3.msra.mxu0 %v7622_v33  ;;  %v7621_v19 = vadd.f32 %v10171_v0, %v7611_v56  ;;  %v7610_v21 = vmul.f32 %v10170_v9, %v7600_v16  ;;  %v10173_v9 = vld [vmem:[%s16415_s6 + $0xe8] ss:$0 sm:$0xff]  ;;  %v7997_v33 = vld [vmem:[%s16412_s5 + $0x438] sm:$0xff]  ;;  %v7996_v56 = vld [vmem:[%s16412_s5 + $0x430] sm:$0xff] }
0x28ff   :  { %11888 = vmatprep.subr.mxu0 %v16677_v26  ;;  %v7995_v16 = vld [vmem:[%s16412_s5 + $0x428] sm:$0xff] }
0x2900   :  { %11889 = vmatpush3.msra.mxu0 %v7621_v19  ;;  %v7620_v29 = vadd.f32 %v10171_v0, %v7610_v21  ;;  %v10175_v19 = vld [vmem:[%s16412_s5 + $0x5e8] ss:$0 sm:$0xff] }
0x2901   :  { %11890 = vmatprep.subr.mxu0 %v16677_v26 }
0x2902   :  { %11891 = vmatpush3.msra.mxu0 %v7620_v29 }
0x2903   :  { %11893 = vmatmul.mubr.msk.f32.vlgmr.msra.gmra.mxu0 %vm1392_vm12, %v7626_v50  ;;  %11906 = vmatprep.subr.mxu0 %v16677_v26 }
0x2904   :  { %11938 = vmatprep.mubr.msk.f32.mxu0 %vm12607_vm14, %v16677_v26  ;;  %11907 = vmatpush3.msra.mxu0 %v7798_v31 }
0x2905   :  { %11908 = vmatprep.subr.mxu0 %v16677_v26 }
0x2906   :  { %11909 = vmatpush3.msra.mxu0 %v7797_v42 }
0x2907   :  { %11910 = vmatprep.subr.mxu0 %v16677_v26 }
0x2908   :  { %11911 = vmatpush3.msra.mxu0 %v7796_v15  ;;  %v10182_v15 = vld [vmem:[%s16412_s5 + $0x420] ss:$0 sm:$0xff] }
0x2909   :  { %11912 = vmatprep.subr.mxu0 %v16677_v26 }
0x290a   :  { %11913 = vmatpush3.msra.mxu0 %v7795_v40 }
0x290b   :  { %11914 = vmatprep.subr.mxu0 %v16677_v26 }
0x290c   :  { %11915 = vmatpush3.msra.mxu0 %v7794_v30  ;;  %v10185_v30 = vld [vmem:[%s16412_s5 + $0x448] ss:$0 sm:$0xff] }
0x290d   :  { %11916 = vmatprep.subr.mxu0 %v16677_v26 }
0x290e   :  { %11917 = vmatpush3.msra.mxu0 %v7793_v35  ;;  %v16679_v35 = vld [vmem:[#allocation49_spill] sm:$0xff] }
0x290f   :  { %11918 = vmatprep.subr.mxu0 %v16677_v26 }
0x2910   :  { %11919 = vmatpush3.msra.mxu0 %v7792_v51 }
0x2911   :  { %11920 = vmatprep.subr.mxu0 %v16677_v26 }
0x2912   :  { %11921 = vmatpush3.msra.mxu0 %v7791_v32  ;;  %v16680_v32 = vld [vmem:[#allocation42_spill] sm:$0xff] }
0x2913   :  { %11922 = vmatprep.subr.mxu0 %v16677_v26 }
0x2914   :  { %11923 = vmatpush3.msra.mxu0 %v7790_v10 }
0x2915   :  { %11924 = vmatprep.subr.mxu0 %v16677_v26 }
0x2916   :  { %11925 = vmatpush3.msra.mxu0 %v7789_v17 }
0x2917   :  { %11926 = vmatprep.subr.mxu0 %v16677_v26 }
0x2918   :  { %11927 = vmatpush3.msra.mxu0 %v7788_v57  ;;  %v10188_v57 = vld [vmem:[%s16412_s5 + $0x470] ss:$0 sm:$0xff] }
0x2919   :  { %11928 = vmatprep.subr.mxu0 %v16677_v26 }
0x291a   :  { %11929 = vmatpush3.msra.mxu0 %v7787_v44 }
0x291b   :  { %11930 = vmatprep.subr.mxu0 %v16677_v26 }
0x291c   :  { %11931 = vmatpush3.msra.mxu0 %v7786_v20 }
0x291d   :  { %11932 = vmatprep.subr.mxu0 %v16677_v26 }
0x291e   :  { %11933 = vmatpush3.msra.mxu0 %v7785_v52 }
0x291f   :  { %11934 = vmatprep.subr.mxu0 %v16677_v26 }
0x2920   :  { %11935 = vmatpush3.msra.mxu0 %v7784_v18  ;;  %v16157_v18 = vld [vmem:[%s16417_s2 + $0x8] sm:$0xff] }
0x2921   :  { %11936 = vmatprep.subr.mxu0 %v16677_v26 }
0x2922   :  { %11937 = vmatpush3.msra.mxu0 %v7783_v49 }
0x2923   :  { %11980 = vmatprep.subr.mxu0 %v8003_v34 }
0x29c3   :  { %v15980_v38 = vpop.f32.mrf.mxu0 }
0x29c4   :  { %11904 = vmatmul.mubr.msk.f32.vlgmr.msra.gmra.mxu1 %vm579_vm10, %v15980_v38 }
0x29c5   :  { %11942 = vmatpush3.msk.msra.mxu1 %vm71_vm1, %v15899_v47  ;;  %v11894_v25 = vpop.f32.mrf.mxu0  ;;  %11955 = vmatprep.mubr.msk.f32.mxu1 %vm735_vm3, %v10176_v37  ;;  %v7886_v47 = vpop.permute.xlu0 %7885 }
0x29c6   :  { %11943 = vmatprep.subr.mxu1 %v12598_v58  ;;  %vm7889_vm2 = vcmp.eq.f32.partialorder %v16678_v6, %v7886_v47 }
0x29c7   :  { %11944 = vmatpush3.msra.mxu1 %v12598_v58  ;;  %v10177_v46 = vsel %vm7889_vm2, 1.0, %v16677_v26 }
0x29c8   :  { %11945 = vmatprep.subr.mxu1 %v12599_v13 }
0x29c9   :  { %11946 = vmatpush3.msra.mxu1 %v12599_v13 }
0x29ca   :  { %11947 = vmatprep.subr.mxu1 %v12600_v59 }
0x29cb   :  { %11948 = vmatpush3.msra.mxu1 %v12600_v59 }
0x29cc   :  { %11949 = vmatprep.subr.mxu1 %v12601_v4 }
0x29cd   :  { %11950 = vmatpush3.msra.mxu1 %v12601_v4 }
0x29ce   :  { %11951 = vmatprep.subr.mxu1 %v12602_v24 }
0x29cf   :  { %11952 = vmatpush3.msra.mxu1 %v12602_v24 }
0x29d0   :  { %11953 = vmatprep.subr.mxu1 %v12603_v12 }
0x29d1   :  { %11954 = vmatpush3.msra.mxu1 %v12603_v12 }
0x29d2   :  { %11956 = vmatmul.mubr.msk.f32.vlgmr.msra.gmra.mxu1 %vm735_vm3, %v10177_v46  ;;  %11958 = vmatprep.subr.mxu1 %v7993_v5 }
0x29d3   :  { %11959 = vmatpush3.msra.mxu1 %v7993_v5 }
0x29d4   :  { %11960 = vmatprep.subr.mxu1 %v7992_v3 }
0x29d5   :  { %11961 = vmatpush3.msra.mxu1 %v7992_v3 }
0x29d6   :  { %11962 = vmatprep.subr.mxu1 %v7991_v2 }
0x29d7   :  { %11963 = vmatpush3.msra.mxu1 %v7991_v2 }
0x29d8   :  { %11964 = vmatprep.subr.mxu1 %v7990_v11 }
0x29d9   :  { %11965 = vmatpush3.msra.mxu1 %v7990_v11 }
0x29da   :  { %11969 = vmatprep.subr.mxu1 %v7998_v61 }
0x2a84   :  { %v7778_v1 = vpop.f32.mrf.mxu1 }
0x2a85   :  { %v7779_v48 = vadd.f32 %v10173_v9, %v7778_v1 }
0x2a86   :  { %v11905_v0 = vpop.f32.mrf.mxu1 }
0x2a87   :  { %v7782_v28 = vmax.f32 %v7779_v48, 0.0 }
0x2a89   :  { %11939 = vmatmul.mubr.f32.vlgmr.msra.gmra.mxu0 %v7782_v28 }
0x2a8a   :  { %11981 = vmatpush3.msra.mxu0 %v8003_v34  ;;  %v16162_v34 = vld [vmem:[%s16417_s2] sm:$0xff] }
0x2a8b   :  { %11982 = vmatprep.subr.mxu0 %v8002_v45 }
0x2a8c   :  { %11983 = vmatpush3.msra.mxu0 %v8002_v45 }
0x2a8d   :  { %11984 = vmatprep.subr.mxu0 %v8001_v54 }
0x2a8e   :  { %11985 = vmatpush3.msra.mxu0 %v8001_v54 }
0x2a8f   :  { %11986 = vmatprep.subr.mxu0 %v8000_v43 }
0x2a90   :  { %11987 = vmatpush3.msra.mxu0 %v8000_v43 }
0x2a92   :  { %v11957_v63 = vpop.f32.mrf.mxu1 }
0x2a93   :  { %v7976_v36 = vmul.f32 5.656854, %v11957_v63 }
0x2a94   :  { %v7966_v23 = vpop.f32.mrf.mxu1 }
0x2a95   :  { %v7975_v39 = vmul.f32 5.656854, %v7966_v23  ;;  %v16061_v60 = vadd.f32 %v7985_v53, %v7976_v36 }
0x2a97   :  { %v16059_v41 = vadd.f32 %v7984_v62, %v7975_v39 }
0x2a99   :  { %11966 = vmatprep.mubr.msk.f32.mxu1 %vm579_vm10, %v16059_v41  ;;  %11988 = vmatprep.mubr.msk.f32.mxu0 %vm579_vm10, %v16059_v41 }
0x2a9a   :  { %11967 = vmatmul.mubr.msk.f32.vlgmr.msra.gmra.mxu1 %vm579_vm10, %v16061_v60  ;;  %11989 = vmatmul.mubr.msk.f32.vlgmr.msra.gmra.mxu0 %vm579_vm10, %v16061_v60 }
0x2a9b   :  { %11970 = vmatpush3.msra.mxu1 %v7998_v61  ;;  %11977 = vmatprep.mubr.msk.f32.mxu1 %vm579_vm10, %v16059_v41 }
0x2a9c   :  { %11971 = vmatprep.subr.mxu1 %v7997_v33 }
0x2a9d   :  { %11972 = vmatpush3.msra.mxu1 %v7997_v33 }
0x2a9e   :  { %11973 = vmatprep.subr.mxu1 %v7996_v56 }
0x2a9f   :  { %11974 = vmatpush3.msra.mxu1 %v7996_v56 }
0x2aa0   :  { %11975 = vmatprep.subr.mxu1 %v7995_v16 }
0x2aa1   :  { %11976 = vmatpush3.msra.mxu1 %v7995_v16 }
0x2aa2   :  { %11978 = vmatmul.mubr.msk.f32.vlgmr.msra.gmra.mxu1 %vm579_vm10, %v16061_v60 }
0x2b49   :  { %v7870_v21 = vpop.f32.mrf.mxu0 }
0x2b4a   :  { %v7871_v29 = vadd.f32 %v10175_v19, %v7870_v21 }
0x2b4b   :  { %v11940_v50 = vpop.f32.mrf.mxu0 }
0x2b4c   :  { %7875 = vst.msk [vmem:[%s16416_s7] sm:$0x3] %vm7874_vm4, %v7871_v29 }
0x2b5a   :  { %v11968_v31 = vpop.f32.mrf.mxu1  ;;  %v11990_v17 = vpop.f32.mrf.mxu0 }
0x2b5b   :  { %v16109_v6 = vadd.f32 %v11990_v17, %v10188_v57  ;;  %v16121_v58 = vadd.f32 %v11968_v31, %v10182_v15 }
0x2b5c   :  { %v8086_v42 = vpop.f32.mrf.mxu1  ;;  %v8244_v25 = vpop.f32.mrf.mxu0 }
0x2b5d   :  { %v16093_v40 = vadd.f32 %v10182_v15, %v8086_v42  ;;  %v16127_v13 = vadd.f32 %v10188_v57, %v8244_v25  ;;  %v8481_v59 = vmul.f32 %v16109_v6, %v16680_v32  ;;  %v8370_v47 = vmul.f32 %v16109_v6, %v16679_v35 }
0x2b5e   :  { %v8254_v4 = vmul.f32 %v16121_v58, %v16679_v35  ;;  %v8372_v24 = vmul.f32 %v16121_v58, %v16680_v32  ;;  %v16149_v52 = vmul.f32 %v16109_v6, %v15311_v27 }
0x2b5f   :  { %v8253_v51 = vmul.f32 %v16093_v40, %v16679_v35  ;;  %v8371_v10 = vmul.f32 %v16093_v40, %v16680_v32  ;;  %v8480_v12 = vmul.f32 %v16127_v13, %v16680_v32  ;;  %v8369_v46 = vmul.f32 %v16127_v13, %v16679_v35 }
0x2b60   :  { %v8644_v15 = vmul.f32 %v16093_v40, %v15311_v27  ;;  %v8645_v35 = vmul.f32 %v16121_v58, %v15311_v27 }
0x2b61   :  { %11995 = vmatprep.mubr.msk.f32.mxu1 %vm579_vm10, %v8253_v51  ;;  %12002 = vmatprep.mubr.msk.f32.mxu0 %vm579_vm10, %v8371_v10  ;;  %v8947_v51 = vmul.f32 %v16127_v13, %v15431_v14 }
0x2b62   :  { %v11979_v44 = vpop.f32.mrf.mxu1 }
0x2b63   :  { %v16107_v20 = vadd.f32 %v11979_v44, %v10185_v30 }
0x2b64   :  { %v8165_v22 = vpop.f32.mrf.mxu1 }
0x2b65   :  { %v16111_v37 = vadd.f32 %v10185_v30, %v8165_v22  ;;  %11991 = vmatprep.subr.msk.mxu1 %vm579_vm10, %v16107_v20  ;;  %11998 = vmatprep.subr.msk.mxu0 %vm579_vm10, %v16107_v20  ;;  %v8948_v30 = vmul.f32 %v16109_v6, %v15431_v14 }
0x2b66   :  { %11992 = vmatpush3.xpose.msk.msra.mxu1 %vm579_vm10, %v16107_v20  ;;  %11999 = vmatpush3.xpose.msk.msra.mxu0 %vm579_vm10, %v16107_v20 }
0x2b67   :  { %11993 = vmatprep.subr.msk.mxu1 %vm579_vm10, %v16111_v37  ;;  %12000 = vmatprep.subr.msk.mxu0 %vm579_vm10, %v16111_v37 }
0x2b6a   :  { %11994 = vmatpush3.xpose.msk.msra.mxu1 %vm579_vm10, %v16111_v37  ;;  %12001 = vmatpush3.xpose.msk.msra.mxu0 %vm579_vm10, %v16111_v37 }
0x2b6b   :  { %12005 = vmatprep.subr.mxu1 %v8481_v59  ;;  %12012 = vmatprep.subr.mxu0 %v8370_v47 }
0x2b6d   :  { %11996 = vmatmul.mubr.msk.f32.vlgmr.msra.gmra.mxu1 %vm579_vm10, %v8254_v4  ;;  %12003 = vmatmul.mubr.msk.f32.vlgmr.msra.gmra.mxu0 %vm579_vm10, %v8372_v24 }
0x2b6e   :  { %12006 = vmatpush3.msra.mxu1 %v8481_v59  ;;  %12013 = vmatpush3.msra.mxu0 %v8370_v47 }
0x2b6f   :  { %12007 = vmatprep.subr.mxu1 %v8480_v12  ;;  %12014 = vmatprep.subr.mxu0 %v8369_v46 }
0x2b70   :  { %12008 = vmatpush3.msra.mxu1 %v8480_v12  ;;  %12015 = vmatpush3.msra.mxu0 %v8369_v46 }
0x2b71   :  { %12019 = vmatprep.subr.msk.mxu1 %vm579_vm10, %v16107_v20  ;;  %12026 = vmatprep.subr.mxu0 %v16149_v52 }
0x2c2d   :  { %v12004_v49 = vpop.f32.mrf.mxu0  ;;  %v11997_v55 = vpop.f32.mrf.mxu1 }
0x2c2e   :  { %v8455_v5 = vmul.f32 0.35355338, %v12004_v49  ;;  %v8343_v7 = vmul.f32 0.35355338, %v11997_v55 }
0x2c2f   :  { %v8445_v3 = vpop.f32.mrf.mxu0  ;;  %v8333_v8 = vpop.f32.mrf.mxu1 }
0x2c30   :  { %v8457_v2 = vadd.f32 %v8455_v5, %v16157_v18  ;;  %v8454_v11 = vmul.f32 0.35355338, %v8445_v3  ;;  %v8342_v63 = vmul.f32 0.35355338, %v8333_v8  ;;  %v8345_v36 = vadd.f32 %v8343_v7, %v16157_v18 }
0x2c32   :  { %v8456_v61 = vadd.f32 %v8454_v11, %v16162_v34  ;;  %v8461_v9 = vsel %vm8346_vm5, %v8457_v2, -inf  ;;  %v8344_v39 = vadd.f32 %v8342_v63, %v16162_v34  ;;  %v8350_v56 = vsel %vm8346_vm5, %v8345_v36, -inf }
0x2c33   :  { %8462 = vmax.xlane.f32.xlu0 %v8461_v9 }
0x2c34   :  { %v8458_v1 = vsel %vm8346_vm5, %v8456_v61, -inf  ;;  %v8347_v16 = vsel %vm8346_vm5, %v8344_v39, -inf }
0x2c35   :  { %8459 = vmax.xlane.f32.xlu1 %v8458_v1 }
0x2cbc   :  { %v8463_v48 = vpop.xlane.xlu0 %8462 }
0x2cbd   :  { %v8465_v0 = vsub.f32 %v8457_v2, %v8463_v48 }
0x2cbe   :  { %v8460_v28 = vpop.xlane.xlu1 %8459 }
0x2cbf   :  { %v8468_v45 = vmul.f32 1.442695, %v8465_v0  ;;  %v8464_v54 = vsub.f32 %v8456_v61, %v8460_v28 }
0x2cc1   :  { %12553 = vpow2.f32 %v8468_v45  ;;  %v8466_v43 = vmul.f32 1.442695, %v8464_v54 }
0x2cc3   :  { %12555 = vpow2.f32 %v8466_v43 }
0x2cce   :  { %v12554_v62 = vpop.eup %12553 }
0x2ccf   :  { %v8473_v53 = vsel %vm8346_vm5, %v12554_v62, 0.0 }
0x2cd0   :  { %v12556_v23 = vpop.eup %12555  ;;  %8474 = vadd.xlane.f32.xlu0 %v8473_v53 }
0x2cd1   :  { %v8470_v33 = vsel %vm8346_vm5, %v12556_v23, 0.0 }
0x2cd2   :  { %8471 = vadd.xlane.f32.xlu1 %v8470_v33 }
0x2cd4   :  { %8351 = vmax.xlane.f32.xlu0 %v8350_v56 }
0x2cd6   :  { %8348 = vmax.xlane.f32.xlu1 %v8347_v16 }
0x2d59   :  { %v8475_v19 = vpop.xlane.xlu0 %8474 }
0x2d5a   :  { %12557 = vrcp.f32 %v8475_v19 }
0x2d5b   :  { %v8472_v21 = vpop.xlane.xlu1 %8471 }
0x2d5c   :  { %12559 = vrcp.f32 %v8472_v21 }
0x2d5d   :  { %v8352_v32 = vpop.xlane.xlu0 %8351 }
0x2d5e   :  { %v8354_v17 = vsub.f32 %v8345_v36, %v8352_v32 }
0x2d5f   :  { %v8349_v10 = vpop.xlane.xlu1 %8348 }
0x2d60   :  { %v8353_v57 = vsub.f32 %v8344_v39, %v8349_v10  ;;  %v8357_v44 = vmul.f32 1.442695, %v8354_v17  ;;  %v8753_v39 = vmul.f32 %v16127_v13, %v15311_v27  ;;  %v8838_v27 = vmul.f32 %v16093_v40, %v15431_v14  ;;  %v9162_v40 = vld [vmem:[%s16412_s5 + $0x4b8] sm:$0xff] }
0x2d61   :  { %v8839_v13 = vmul.f32 %v16121_v58, %v15431_v14  ;;  %v9160_v14 = vld [vmem:[%s16412_s5 + $0x4a8] sm:$0xff] }
0x2d62   :  { %v8355_v22 = vmul.f32 1.442695, %v8353_v57  ;;  %12561 = vpow2.f32 %v8357_v44 }
0x2d64   :  { %12563 = vpow2.f32 %v8355_v22 }
0x2d67   :  { %v12558_v29 = vpop.eup %12557 }
0x2d68   :  { %v8479_v42 = vmul.f32 %v12558_v29, %v12554_v62 }
0x2d69   :  { %v12560_v50 = vpop.eup %12559 }
0x2d6a   :  { %v8477_v31 = vmul.f32 %v12560_v50, %v12556_v23 }
0x2d6c   :  { %12009 = vmatprep.mubr.msk.f32.mxu1 %vm8346_vm5, %v8477_v31 }
0x2d6d   :  { %12010 = vmatmul.mubr.msk.f32.vlgmr.msra.gmra.mxu1 %vm8346_vm5, %v8479_v42 }
0x2d6e   :  { %12020 = vmatpush3.xpose.msk.msra.mxu1 %vm579_vm10, %v16107_v20  ;;  %12023 = vmatprep.mubr.msk.f32.mxu1 %vm579_vm10, %v8644_v15 }
0x2d6f   :  { %12021 = vmatprep.subr.msk.mxu1 %vm579_vm10, %v16111_v37  ;;  %v12562_v5 = vpop.eup %12561 }
0x2d70   :  { %v8362_v11 = vsel %vm8346_vm5, %v12562_v5, 0.0 }
0x2d71   :  { %v12564_v2 = vpop.eup %12563 }
0x2d72   :  { %12022 = vmatpush3.xpose.msk.msra.mxu1 %vm579_vm10, %v16111_v37  ;;  %v8359_v61 = vsel %vm8346_vm5, %v12564_v2, 0.0 }
0x2d73   :  { %12040 = vmatprep.subr.mxu1 %v8948_v30 }
0x2d75   :  { %12024 = vmatmul.mubr.msk.f32.vlgmr.msra.gmra.mxu1 %vm579_vm10, %v8645_v35 }
0x2d76   :  { %12041 = vmatpush3.msra.mxu1 %v8948_v30 }
0x2d77   :  { %12042 = vmatprep.subr.mxu1 %v8947_v51 }
0x2d78   :  { %12043 = vmatpush3.msra.mxu1 %v8947_v51 }
0x2e2d   :  { %v16192_v6 = vpop.f32.mrf.mxu1 }
0x2e2f   :  { %v16194_v25 = vpop.f32.mrf.mxu1 }
0x2e35   :  { %v12025_v59 = vpop.f32.mrf.mxu1 }
0x2e36   :  { %v8728_v47 = vmul.f32 0.35355338, %v12025_v59 }
0x2e37   :  { %v8718_v4 = vpop.f32.mrf.mxu1 }
0x2e38   :  { %v8730_v24 = vadd.f32 %v8728_v47, %v16157_v18  ;;  %v8727_v12 = vmul.f32 0.35355338, %v8718_v4 }
0x2e3a   :  { %v8729_v46 = vadd.f32 %v8727_v12, %v16162_v34  ;;  %v8734_v49 = vsel %vm8346_vm5, %v8730_v24, -inf }
0x2e3b   :  { %8735 = vmax.xlane.f32.xlu0 %v8734_v49 }
0x2e3c   :  { %v8731_v3 = vsel %vm8346_vm5, %v8729_v46, -inf }
0x2e3d   :  { %8732 = vmax.xlane.f32.xlu1 %v8731_v3 }
0x2e3f   :  { %8363 = vadd.xlane.f32.xlu0 %v8362_v11 }
0x2e41   :  { %8360 = vadd.xlane.f32.xlu1 %v8359_v61 }
0x2ec4   :  { %v8736_v9 = vpop.xlane.xlu0 %8735 }
0x2ec5   :  { %v8738_v1 = vsub.f32 %v8730_v24, %v8736_v9 }
0x2ec6   :  { %v8733_v48 = vpop.xlane.xlu1 %8732 }
0x2ec7   :  { %v8741_v0 = vmul.f32 1.442695, %v8738_v1  ;;  %v8737_v28 = vsub.f32 %v8729_v46, %v8733_v48  ;;  %v8007_v48 = vld [vmem:[%s16412_s5 + $0x488] sm:$0xff] }
0x2ec8   :  { %v8364_v45 = vpop.xlane.xlu0 %8363 }
0x2ec9   :  { %12565 = vpow2.f32 %v8741_v0  ;;  %v8739_v54 = vmul.f32 1.442695, %v8737_v28  ;;  %v8006_v0 = vld [vmem:[%s16412_s5 + $0x480] sm:$0xff]  ;;  %v8005_v28 = vld [vmem:[%s16412_s5 + $0x478] sm:$0xff] }
0x2eca   :  { %12567 = vrcp.f32 %v8364_v45  ;;  %v8361_v43 = vpop.xlane.xlu1 %8360 }
0x2ecb   :  { %12569 = vpow2.f32 %v8739_v54 }
0x2ecc   :  { %12571 = vrcp.f32 %v8361_v43 }
0x2ed6   :  { %v12566_v55 = vpop.eup %12565 }
0x2ed7   :  { %v12568_v8 = vpop.eup %12567  ;;  %v8746_v7 = vsel %vm8346_vm5, %v12566_v55, 0.0 }
0x2ed8   :  { %v12570_v63 = vpop.eup %12569  ;;  %8747 = vadd.xlane.f32.xlu0 %v8746_v7  ;;  %v8368_v23 = vmul.f32 %v12568_v8, %v12562_v5  ;;  %v8008_v5 = vld [vmem:[%s16412_s5 + $0x490] sm:$0xff] }
0x2ed9   :  { %v12572_v62 = vpop.eup %12571  ;;  %v8743_v36 = vsel %vm8346_vm5, %v12570_v63, 0.0  ;;  %12047 = vmatprep.subr.mxu1 %v8008_v5 }
0x2eda   :  { %8744 = vadd.xlane.f32.xlu1 %v8743_v36  ;;  %v8366_v53 = vmul.f32 %v12572_v62, %v12564_v2  ;;  %v9240_v62 = vld [vmem:[%s16412_s5 + $0x4d8] sm:$0xff]  ;;  %v10220_v36 = vld [vmem:[%s16412_s5 + $0x4c0] ss:$0 sm:$0xff] }
0x2edc   :  { %12016 = vmatprep.mubr.msk.f32.mxu0 %vm8346_vm5, %v8366_v53  ;;  %v9238_v53 = vld [vmem:[%s16412_s5 + $0x4c8] sm:$0xff] }
0x2edd   :  { %12017 = vmatmul.mubr.msk.f32.vlgmr.msra.gmra.mxu0 %vm8346_vm5, %v8368_v23 }
0x2ede   :  { %12027 = vmatpush3.msra.mxu0 %v16149_v52 }
0x2edf   :  { %12028 = vmatprep.subr.mxu0 %v8753_v39 }
0x2ee0   :  { %12029 = vmatpush3.msra.mxu0 %v8753_v39  ;;  %v9320_v39 = vld [vmem:[%s16411_s4 + $0x170] sm:$0xff] }
0x2ee1   :  { %12033 = vmatprep.subr.msk.mxu0 %vm579_vm10, %v16107_v20 }
0x2f61   :  { %v8748_v33 = vpop.xlane.xlu0 %8747 }
0x2f62   :  { %12573 = vrcp.f32 %v8748_v33  ;;  %v10215_v33 = vld [vmem:[%s16412_s5 + $0x498] ss:$0 sm:$0xff] }
0x2f63   :  { %v8745_v56 = vpop.xlane.xlu1 %8744 }
0x2f64   :  { %12575 = vrcp.f32 %v8745_v56 }
0x2f6f   :  { %v12574_v16 = vpop.eup %12573 }
0x2f70   :  { %v8752_v29 = vmul.f32 %v12574_v16, %v12566_v55 }
0x2f71   :  { %v12576_v19 = vpop.eup %12575 }
0x2f72   :  { %v8750_v21 = vmul.f32 %v12576_v19, %v12570_v63  ;;  %v9241_v63 = vld [vmem:[%s16412_s5 + $0x4e0] sm:$0xff] }
0x2f74   :  { %12030 = vmatprep.mubr.msk.f32.mxu0 %vm8346_vm5, %v8750_v21 }
0x2f75   :  { %12031 = vmatmul.mubr.msk.f32.vlgmr.msra.gmra.mxu0 %vm8346_vm5, %v8752_v29 }
0x2f76   :  { %12034 = vmatpush3.xpose.msk.msra.mxu0 %vm579_vm10, %v16107_v20  ;;  %12037 = vmatprep.mubr.msk.f32.mxu0 %vm579_vm10, %v8838_v27  ;;  %v9161_v20 = vld [vmem:[%s16412_s5 + $0x4b0] sm:$0xff] }
0x2f77   :  { %12035 = vmatprep.subr.msk.mxu0 %vm579_vm10, %v16111_v37 }
0x2f7a   :  { %12036 = vmatpush3.xpose.msk.msra.mxu0 %vm579_vm10, %v16111_v37  ;;  %v9159_v37 = vld [vmem:[%s16412_s5 + $0x4a0] sm:$0xff] }
0x2f7b   :  { %12058 = vmatprep.subr.mxu0 %v16677_v26 }
0x2f7d   :  { %12038 = vmatmul.mubr.msk.f32.vlgmr.msra.gmra.mxu0 %vm579_vm10, %v8839_v13  ;;  %v10222_v13 = vld [vmem:[%s16412_s5 + $0x4e8] ss:$0 sm:$0xff] }
0x2f7e   :  { %12059 = vmatpush3.msra.mxu0 %v9162_v40  ;;  %12066 = vmatprep.mubr.msk.f32.mxu0 %vm12607_vm14, %v16677_v26 }
0x2f7f   :  { %12060 = vmatprep.subr.mxu0 %v16677_v26 }
0x2f80   :  { %12061 = vmatpush3.msra.mxu0 %v9161_v20 }
0x2f81   :  { %12062 = vmatprep.subr.mxu0 %v16677_v26 }
0x2f82   :  { %12063 = vmatpush3.msra.mxu0 %v9160_v14 }
0x2f83   :  { %12064 = vmatprep.subr.mxu0 %v16677_v26 }
0x2f84   :  { %12065 = vmatpush3.msra.mxu0 %v9159_v37 }
0x2f85   :  { %12067 = vmatmul.mubr.msk.f32.vlgmr.msra.gmra.mxu0 %vm579_vm10, %v15980_v38 }
0x2f86   :  { %12082 = vmatprep.mubr.msk.f32.mxu0 %vm52_vm0, %v9320_v39  ;;  %v9544_v39 = vld [vmem:[%s16412_s5 + $0x510] sm:$0xff] }
0x2f9d   :  { %v12018_v58 = vpop.f32.mrf.mxu0 }
0x2f9e   :  { %v8641_v50 = vadd.f32 %v12018_v58, %v16192_v6 }
0x2f9f   :  { %v8635_v52 = vpop.f32.mrf.mxu0 }
0x2fa0   :  { %v8636_v45 = vadd.f32 %v8635_v52, %v16194_v25  ;;  %v9239_v25 = vld [vmem:[%s16412_s5 + $0x4d0] sm:$0xff] }
0x3035   :  { %v12032_v31 = vpop.f32.mrf.mxu0 }
0x3036   :  { %v8837_v42 = vadd.f32 %v12032_v31, %v8641_v50 }
0x3037   :  { %v8827_v15 = vpop.f32.mrf.mxu0 }
0x3038   :  { %v8836_v43 = vadd.f32 %v8827_v15, %v8636_v45 }
0x303d   :  { %v12039_v30 = vpop.f32.mrf.mxu0 }
0x303e   :  { %v8922_v35 = vmul.f32 0.35355338, %v12039_v30 }
0x303f   :  { %v8912_v51 = vpop.f32.mrf.mxu0 }
0x3040   :  { %v8924_v32 = vadd.f32 %v8922_v35, %v16157_v18  ;;  %v8921_v10 = vmul.f32 0.35355338, %v8912_v51 }
0x3042   :  { %v8923_v17 = vadd.f32 %v8921_v10, %v16162_v34  ;;  %v8928_v57 = vsel %vm8346_vm5, %v8924_v32, -inf }
0x3043   :  { %8929 = vmax.xlane.f32.xlu0 %v8928_v57 }
0x3044   :  { %v8925_v38 = vsel %vm8346_vm5, %v8923_v17, -inf }
0x3045   :  { %v9234_v44 = vpop.f32.mrf.mxu0  ;;  %8926 = vmax.xlane.f32.xlu1 %v8925_v38 }
0x3046   :  { %v9235_v23 = vadd.f32 %v10220_v36, %v9234_v44  ;;  %v9547_v36 = vld [vmem:[%s16412_s5 + $0x528] sm:$0xff] }
0x3047   :  { %v12068_v22 = vpop.f32.mrf.mxu0 }
0x30cc   :  { %v8930_v6 = vpop.xlane.xlu0 %8929 }
0x30cd   :  { %v8932_v59 = vsub.f32 %v8924_v32, %v8930_v6  ;;  %v10218_v6 = vld [vmem:[%s16412_s5 + $0x538] ss:$0 sm:$0xff] }
0x30ce   :  { %v8927_v47 = vpop.xlane.xlu1 %8926 }
0x30cf   :  { %v8935_v4 = vmul.f32 1.442695, %v8932_v59  ;;  %v8931_v24 = vsub.f32 %v8923_v17, %v8927_v47 }
0x30d1   :  { %12577 = vpow2.f32 %v8935_v4  ;;  %v8933_v12 = vmul.f32 1.442695, %v8931_v24  ;;  %v10219_v4 = vld [vmem:[%s16412_s5 + $0x540] ss:$0 sm:$0xff] }
0x30d3   :  { %12579 = vpow2.f32 %v8933_v12 }
0x30de   :  { %v12578_v18 = vpop.eup %12577 }
0x30df   :  { %v8940_v46 = vsel %vm8346_vm5, %v12578_v18, 0.0 }
0x30e0   :  { %v12580_v34 = vpop.eup %12579  ;;  %8941 = vadd.xlane.f32.xlu0 %v8940_v46 }
0x30e1   :  { %v8937_v49 = vsel %vm8346_vm5, %v12580_v34, 0.0 }
0x30e2   :  { %8938 = vadd.xlane.f32.xlu1 %v8937_v49 }
0x3169   :  { %v8942_v3 = vpop.xlane.xlu0 %8941 }
0x316a   :  { %12581 = vrcp.f32 %v8942_v3 }
0x316b   :  { %v8939_v2 = vpop.xlane.xlu1 %8938 }
0x316c   :  { %12583 = vrcp.f32 %v8939_v2 }
0x3177   :  { %v12582_v11 = vpop.eup %12581 }
0x3178   :  { %v8946_v1 = vmul.f32 %v12582_v11, %v12578_v18 }
0x3179   :  { %v12584_v61 = vpop.eup %12583 }
0x317a   :  { %v8944_v9 = vmul.f32 %v12584_v61, %v12580_v34 }
0x317c   :  { %12044 = vmatprep.mubr.msk.f32.mxu1 %vm8346_vm5, %v8944_v9 }
0x317d   :  { %12045 = vmatmul.mubr.msk.f32.vlgmr.msra.gmra.mxu1 %vm8346_vm5, %v8946_v1 }
0x317e   :  { %12048 = vmatpush3.msra.mxu1 %v8008_v5 }
0x317f   :  { %12049 = vmatprep.subr.mxu1 %v8007_v48 }
0x3180   :  { %12050 = vmatpush3.msra.mxu1 %v8007_v48 }
0x3181   :  { %12051 = vmatprep.subr.mxu1 %v8006_v0 }
0x3182   :  { %12052 = vmatpush3.msra.mxu1 %v8006_v0 }
0x3183   :  { %12053 = vmatprep.subr.mxu1 %v8005_v28 }
0x3184   :  { %12054 = vmatpush3.msra.mxu1 %v8005_v28 }
0x3185   :  { %12069 = vmatprep.subr.mxu1 %v16677_v26 }
0x323d   :  { %v12046_v54 = vpop.f32.mrf.mxu1 }
0x323e   :  { %v9031_v7 = vadd.f32 %v12046_v54, %v8837_v42 }
0x323f   :  { %v9021_v55 = vpop.f32.mrf.mxu1 }
0x3240   :  { %v9030_v8 = vadd.f32 %v9021_v55, %v8836_v43 }
0x3242   :  { %12055 = vmatprep.mubr.msk.f32.mxu1 %vm579_vm10, %v9030_v8 }
0x3243   :  { %12056 = vmatmul.mubr.msk.f32.vlgmr.msra.gmra.mxu1 %vm579_vm10, %v9031_v7  ;;  %v9451_v7 = vld [vmem:[%s16415_s6 + $0xb8] sm:$0xff] }
0x3244   :  { %12070 = vmatpush3.msra.mxu1 %v9241_v63  ;;  %12077 = vmatprep.mubr.msk.f32.mxu1 %vm12607_vm14, %v16677_v26  ;;  %v9450_v63 = vld [vmem:[%s16415_s6 + $0xb0] sm:$0xff] }
0x3245   :  { %12071 = vmatprep.subr.mxu1 %v16677_v26 }
0x3246   :  { %12072 = vmatpush3.msra.mxu1 %v9240_v62  ;;  %v9449_v62 = vld [vmem:[%s16415_s6 + $0xa8] sm:$0xff] }
0x3247   :  { %12073 = vmatprep.subr.mxu1 %v16677_v26 }
0x3248   :  { %12074 = vmatpush3.msra.mxu1 %v9239_v25  ;;  %v9448_v25 = vld [vmem:[%s16415_s6 + $0xa0] sm:$0xff] }
0x3249   :  { %12075 = vmatprep.subr.mxu1 %v16677_v26 }
0x324a   :  { %12076 = vmatpush3.msra.mxu1 %v9238_v53  ;;  %v9546_v53 = vld [vmem:[%s16412_s5 + $0x520] sm:$0xff] }
0x324b   :  { %12078 = vmatmul.mubr.msk.f32.vlgmr.msra.gmra.mxu1 %vm579_vm10, %v9235_v23  ;;  %12096 = vmatprep.subr.mxu1 %v9547_v36  ;;  %v9545_v23 = vld [vmem:[%s16412_s5 + $0x518] sm:$0xff] }
0x324c   :  { %12097 = vmatpush3.msra.mxu1 %v9547_v36 }
0x324d   :  { %12098 = vmatprep.subr.mxu1 %v9546_v53 }
0x324e   :  { %12099 = vmatpush3.msra.mxu1 %v9546_v53 }
0x324f   :  { %12100 = vmatprep.subr.mxu1 %v9545_v23 }
0x3250   :  { %12101 = vmatpush3.msra.mxu1 %v9545_v23  ;;  %v10236_v23 = vld [vmem:[%s16412_s5 + $0x560] ss:$0 sm:$0xff] }
0x3251   :  { %12102 = vmatprep.subr.mxu1 %v9544_v39 }
0x3252   :  { %12103 = vmatpush3.msra.mxu1 %v9544_v39 }
0x3303   :  { %v12057_v56 = vpop.f32.mrf.mxu1 }
0x3304   :  { %v9114_v16 = vadd.f32 %v12057_v56, %v10215_v33 }
0x3305   :  { %v9108_v19 = vpop.f32.mrf.mxu1 }
0x3306   :  { %v9118_v21 = vadd.f32 %v9114_v16, %v16061_v60  ;;  %v9109_v29 = vadd.f32 %v10215_v33, %v9108_v19  ;;  %v9321_v60 = vld [vmem:[%s16411_s4 + $0x178] sm:$0xff] }
0x3308   :  { %v9117_v26 = vadd.f32 %v9109_v29, %v16059_v41  ;;  %v9124_v27 = vsel %vm579_vm10, %v9118_v21, 0.0 }
0x3309   :  { %9125 = vadd.xlane.f32.xlu0 %v9124_v27  ;;  %v10227_v27 = vld [vmem:[%s16412_s5 + $0x548] ss:$0 sm:$0xff] }
0x330a   :  { %v9121_v40 = vsel %vm579_vm10, %v9117_v26, 0.0 }
0x330b   :  { %v9316_v20 = vpop.f32.mrf.mxu1  ;;  %9122 = vadd.xlane.f32.xlu1 %v9121_v40 }
0x330c   :  { %v9317_v14 = vadd.f32 %v10222_v13, %v9316_v20 }
0x330d   :  { %v12079_v37 = vpop.f32.mrf.mxu1 }
0x330e   :  { %12080 = vmatprep.subr.msk.mxu0 %vm71_vm1, %v9317_v14  ;;  %v10228_v37 = vld [vmem:[%s16412_s5 + $0x550] ss:$0 sm:$0xff] }
0x330f   :  { %12081 = vmatpush3.msk.msra.mxu0 %vm71_vm1, %v9317_v14 }
0x3310   :  { %12083 = vmatmul.mubr.msk.f32.vlgmr.msra.gmra.mxu0 %vm52_vm0, %v9321_v60  ;;  %12085 = vmatprep.subr.mxu0 %v9451_v7 }
0x3311   :  { %12086 = vmatpush3.msra.mxu0 %v9451_v7 }
0x3312   :  { %12087 = vmatprep.subr.mxu0 %v9450_v63 }
0x3313   :  { %12088 = vmatpush3.msra.mxu0 %v9450_v63  ;;  %v10235_v63 = vld [vmem:[%s16412_s5 + $0x558] ss:$0 sm:$0xff] }
0x3314   :  { %12089 = vmatprep.subr.mxu0 %v9449_v62 }
0x3315   :  { %12090 = vmatpush3.msra.mxu0 %v9449_v62 }
0x3316   :  { %12091 = vmatprep.subr.mxu0 %v9448_v25 }
0x3317   :  { %12092 = vmatpush3.msra.mxu0 %v9448_v25 }
0x3392   :  { %v9126_v41 = vpop.xlane.xlu0 %9125 }
0x3393   :  { %v9128_v58 = vmul.f32 0.03125, %v9126_v41 }
0x3394   :  { %v9123_v52 = vpop.xlane.xlu1 %9122 }
0x3395   :  { %v9130_v50 = vsub.f32 %v9118_v21, %v9128_v58  ;;  %v9127_v31 = vmul.f32 0.03125, %v9123_v52  ;;  %v9543_v52 = vld [vmem:[%s16412_s5 + $0x508] sm:$0xff] }
0x3396   :  { %12104 = vmatprep.subr.mxu1 %v9543_v52 }
0x3397   :  { %v9129_v42 = vsub.f32 %v9117_v26, %v9127_v31  ;;  %v9132_v15 = vmul.f32 %v9130_v50, %v9130_v50  ;;  %12105 = vmatpush3.msra.mxu1 %v9543_v52  ;;  %v9541_v31 = vld [vmem:[%s16412_s5 + $0x4f8] sm:$0xff] }
0x3399   :  { %v9136_v30 = vsel %vm579_vm10, %v9132_v15, 0.0  ;;  %v9131_v35 = vmul.f32 %v9129_v42, %v9129_v42  ;;  %v10229_v15 = vld [vmem:[%s16415_s6 + $0xc0] ss:$0 sm:$0xff] }
0x339a   :  { %9137 = vadd.xlane.f32.xlu0 %v9136_v30 }
0x339b   :  { %v9133_v51 = vsel %vm579_vm10, %v9131_v35, 0.0 }
0x339c   :  { %9134 = vadd.xlane.f32.xlu1 %v9133_v51 }
0x33d0   :  { %v12084_v18 = vpop.f32.mrf.mxu0 }
0x33d2   :  { %v9397_v3 = vpop.f32.mrf.mxu0 }
0x3423   :  { %v9138_v32 = vpop.xlane.xlu0 %9137 }
0x3424   :  { %v9140_v10 = vmul.f32 0.03125, %v9138_v32 }
0x3425   :  { %v9135_v17 = vpop.xlane.xlu1 %9134 }
0x3426   :  { %v9142_v57 = vadd.f32 1e-05, %v9140_v10  ;;  %v9139_v38 = vmul.f32 0.03125, %v9135_v17 }
0x3428   :  { %12585 = vrsqrt.f32 %v9142_v57  ;;  %v9141_v44 = vadd.f32 1e-05, %v9139_v38  ;;  %v10232_v57 = vld [vmem:[%s16412_s5 + $0x530] ss:$0 sm:$0xff] }
0x342a   :  { %12587 = vrsqrt.f32 %v9141_v44 }
0x3435   :  { %v12586_v22 = vpop.eup %12585 }
0x3436   :  { %v9146_v59 = vmul.f32 %v12586_v22, %v9130_v50  ;;  %v9542_v50 = vld [vmem:[%s16412_s5 + $0x500] sm:$0xff] }
0x3437   :  { %v12588_v47 = vpop.eup %12587  ;;  %12106 = vmatprep.subr.mxu1 %v9542_v50 }
0x3438   :  { %v9152_v24 = vmul.f32 %v10218_v6, %v9146_v59  ;;  %v9145_v12 = vmul.f32 %v12588_v47, %v9129_v42  ;;  %12107 = vmatpush3.msra.mxu1 %v9542_v50  ;;  %v9540_v42 = vld [vmem:[%s16412_s5 + $0x4f0] sm:$0xff] }
0x3439   :  { %12108 = vmatprep.subr.mxu1 %v9541_v31 }
0x343a   :  { %v9158_v46 = vadd.f32 %v10219_v4, %v9152_v24  ;;  %v9151_v34 = vmul.f32 %v10218_v6, %v9145_v12  ;;  %12109 = vmatpush3.msra.mxu1 %v9541_v31 }
0x343b   :  { %12110 = vmatprep.subr.mxu1 %v9540_v42 }
0x343c   :  { %v9407_v49 = vadd.f32 %v12084_v18, %v9158_v46  ;;  %v9157_v5 = vadd.f32 %v10219_v4, %v9151_v34  ;;  %12111 = vmatpush3.msra.mxu1 %v9540_v42 }
0x343e   :  { %v9406_v2 = vadd.f32 %v9397_v3, %v9157_v5  ;;  %v9413_v11 = vsel %vm579_vm10, %v9407_v49, 0.0 }
0x343f   :  { %9414 = vadd.xlane.f32.xlu0 %v9413_v11 }
0x3440   :  { %v9410_v61 = vsel %vm579_vm10, %v9406_v2, 0.0 }
0x3441   :  { %9411 = vadd.xlane.f32.xlu1 %v9410_v61 }
0x34c8   :  { %v9415_v9 = vpop.xlane.xlu0 %9414 }
0x34c9   :  { %v9417_v1 = vmul.f32 0.03125, %v9415_v9  ;;  %v9679_v9 = vld [vmem:[%s16415_s6 + $0x108] sm:$0xff] }
0x34ca   :  { %v9412_v48 = vpop.xlane.xlu1 %9411  ;;  %12115 = vmatprep.subr.mxu0 %v9679_v9 }
0x34cb   :  { %v9419_v0 = vsub.f32 %v9407_v49, %v9417_v1  ;;  %v9416_v28 = vmul.f32 0.03125, %v9412_v48  ;;  %v9678_v1 = vld [vmem:[%s16415_s6 + $0x100] sm:$0xff]  ;;  %v9677_v48 = vld [vmem:[%s16415_s6 + $0xf8] sm:$0xff] }
0x34cd   :  { %v9418_v45 = vsub.f32 %v9406_v2, %v9416_v28  ;;  %v9421_v54 = vmul.f32 %v9419_v0, %v9419_v0 }
0x34cf   :  { %v9425_v43 = vsel %vm579_vm10, %v9421_v54, 0.0  ;;  %v9420_v55 = vmul.f32 %v9418_v45, %v9418_v45 }
0x34d0   :  { %9426 = vadd.xlane.f32.xlu0 %v9425_v43 }
0x34d1   :  { %v9422_v8 = vsel %vm579_vm10, %v9420_v55, 0.0 }
0x34d2   :  { %9423 = vadd.xlane.f32.xlu1 %v9422_v8 }
0x3559   :  { %v9427_v33 = vpop.xlane.xlu0 %9426 }
0x355a   :  { %v9429_v56 = vmul.f32 0.03125, %v9427_v33 }
0x355b   :  { %v9424_v16 = vpop.xlane.xlu1 %9423 }
0x355c   :  { %v9431_v19 = vadd.f32 1e-05, %v9429_v56  ;;  %v9428_v21 = vmul.f32 0.03125, %v9424_v16  ;;  %v10237_v16 = vld [vmem:[%s16415_s6 + $0x110] ss:$0 sm:$0xff] }
0x355e   :  { %12589 = vrsqrt.f32 %v9431_v19  ;;  %v9430_v29 = vadd.f32 1e-05, %v9428_v21 }
0x3560   :  { %12591 = vrsqrt.f32 %v9430_v29 }
0x356b   :  { %v12590_v26 = vpop.eup %12589 }
0x356c   :  { %v9435_v13 = vmul.f32 %v12590_v26, %v9419_v0  ;;  %v9676_v0 = vld [vmem:[%s16415_s6 + $0xf0] sm:$0xff] }
0x356d   :  { %v12592_v40 = vpop.eup %12591 }
0x356e   :  { %v9434_v20 = vmul.f32 %v12592_v40, %v9418_v45  ;;  %v9441_v14 = vmul.f32 %v10227_v27, %v9435_v13 }
0x3570   :  { %v9440_v60 = vmul.f32 %v10227_v27, %v9434_v20  ;;  %v9447_v58 = vadd.f32 %v10228_v37, %v9441_v14 }
0x3572   :  { %v9446_v41 = vadd.f32 %v10228_v37, %v9440_v60 }
0x3574   :  { %12093 = vmatprep.mubr.msk.f32.mxu0 %vm579_vm10, %v9446_v41 }
0x3575   :  { %12094 = vmatmul.mubr.msk.f32.vlgmr.msra.gmra.mxu0 %vm579_vm10, %v9447_v58 }
0x3576   :  { %12116 = vmatpush3.msra.mxu0 %v9679_v9 }
0x3577   :  { %12117 = vmatprep.subr.mxu0 %v9678_v1 }
0x3578   :  { %12118 = vmatpush3.msra.mxu0 %v9678_v1 }
0x3579   :  { %12119 = vmatprep.subr.mxu0 %v9677_v48 }
0x357a   :  { %12120 = vmatpush3.msra.mxu0 %v9677_v48 }
0x357b   :  { %12121 = vmatprep.subr.mxu0 %v9676_v0 }
0x357c   :  { %12122 = vmatpush3.msra.mxu0 %v9676_v0 }
0x3635   :  { %v12095_v30 = vpop.f32.mrf.mxu0 }
0x3636   :  { %v9535_v35 = vadd.f32 %v12095_v30, %v10229_v15 }
0x3637   :  { %v9529_v51 = vpop.f32.mrf.mxu0 }
0x3638   :  { %v9530_v32 = vadd.f32 %v10229_v15, %v9529_v51  ;;  %v9539_v17 = vmax.f32 %v9535_v35, 0.0 }
0x363a   :  { %v9538_v10 = vmax.f32 %v9530_v32, 0.0 }
0x363c   :  { %12112 = vmatprep.mubr.msk.f32.mxu1 %vm7406_vm13, %v9538_v10 }
0x363d   :  { %12113 = vmatmul.mubr.msk.f32.vlgmr.msra.gmra.mxu1 %vm7406_vm13, %v9539_v17 }
0x36fd   :  { %v12114_v38 = vpop.f32.mrf.mxu1 }
0x36fe   :  { %v9631_v44 = vadd.f32 %v12114_v38, %v10232_v57 }
0x36ff   :  { %v9625_v22 = vpop.f32.mrf.mxu1 }
0x3700   :  { %v9635_v6 = vadd.f32 %v9631_v44, %v9447_v58  ;;  %v9626_v59 = vadd.f32 %v10232_v57, %v9625_v22 }
0x3702   :  { %v9634_v47 = vadd.f32 %v9626_v59, %v9446_v41  ;;  %v9641_v4 = vsel %vm579_vm10, %v9635_v6, 0.0 }
0x3703   :  { %9642 = vadd.xlane.f32.xlu0 %v9641_v4 }
0x3704   :  { %v9638_v24 = vsel %vm579_vm10, %v9634_v47, 0.0 }
0x3705   :  { %9639 = vadd.xlane.f32.xlu1 %v9638_v24 }
0x378c   :  { %v9643_v12 = vpop.xlane.xlu0 %9642 }
0x378d   :  { %v9645_v18 = vmul.f32 0.03125, %v9643_v12 }
0x378e   :  { %v9640_v46 = vpop.xlane.xlu1 %9639 }
0x378f   :  { %v9647_v34 = vsub.f32 %v9635_v6, %v9645_v18  ;;  %v9644_v49 = vmul.f32 0.03125, %v9640_v46 }
0x3791   :  { %v9646_v5 = vsub.f32 %v9634_v47, %v9644_v49  ;;  %v9649_v3 = vmul.f32 %v9647_v34, %v9647_v34 }
0x3793   :  { %v9653_v2 = vsel %vm579_vm10, %v9649_v3, 0.0  ;;  %v9648_v11 = vmul.f32 %v9646_v5, %v9646_v5 }
0x3794   :  { %9654 = vadd.xlane.f32.xlu0 %v9653_v2 }
0x3795   :  { %v9650_v61 = vsel %vm579_vm10, %v9648_v11, 0.0 }
0x3796   :  { %9651 = vadd.xlane.f32.xlu1 %v9650_v61 }
0x381d   :  { %v9655_v28 = vpop.xlane.xlu0 %9654 }
0x381e   :  { %v9657_v45 = vmul.f32 0.03125, %v9655_v28 }
0x381f   :  { %v9652_v54 = vpop.xlane.xlu1 %9651 }
0x3820   :  { %v9659_v43 = vadd.f32 1e-05, %v9657_v45  ;;  %v9656_v55 = vmul.f32 0.03125, %v9652_v54 }
0x3822   :  { %12593 = vrsqrt.f32 %v9659_v43  ;;  %v9658_v8 = vadd.f32 1e-05, %v9656_v55 }
0x3824   :  { %12595 = vrsqrt.f32 %v9658_v8 }
0x382f   :  { %v12594_v7 = vpop.eup %12593 }
0x3830   :  { %v9663_v62 = vmul.f32 %v12594_v7, %v9647_v34 }
0x3831   :  { %v12596_v25 = vpop.eup %12595 }
0x3832   :  { %v9662_v36 = vmul.f32 %v12596_v25, %v9646_v5  ;;  %v9669_v53 = vmul.f32 %v10235_v63, %v9663_v62 }
0x3834   :  { %v9668_v39 = vmul.f32 %v10235_v63, %v9662_v36  ;;  %v9675_v56 = vadd.f32 %v10236_v23, %v9669_v53 }
0x3836   :  { %v9674_v33 = vadd.f32 %v10236_v23, %v9668_v39 }
0x3838   :  { %12123 = vmatprep.mubr.msk.f32.mxu0 %vm579_vm10, %v9674_v33 }
0x3839   :  { %12124 = vmatmul.mubr.msk.f32.vlgmr.msra.gmra.mxu0 %vm579_vm10, %v9675_v56 }
0x38f9   :  { %v12125_v19 = vpop.f32.mrf.mxu0 }
0x38fa   :  { %v9763_v21 = vadd.f32 %v12125_v19, %v10237_v16 }
0x38fb   :  { %v9757_v29 = vpop.f32.mrf.mxu0 }
0x38fc   :  { %9767 = vst.msk [vmem:[%s16418_s8 + $0x8] sm:$0xff] %vm735_vm3, %v9763_v21  ;;  %v9758_v26 = vadd.f32 %v10237_v16, %v9757_v29 }
0x38fe   :  { %9766 = vst.msk [vmem:[%s16418_s8] sm:$0xff] %vm735_vm3, %v9758_v26 }

</bundles_post_ra>
